<compile_context>
chip_gen: v7x
topology: tpu7x:2x2x1
jax: 0.10.0
libtpu: 0.0.40
codegen_flags: <defaults>
</compile_context>

<pallas_src>
import numpy as np
import jax
import jax.numpy as jnp
from jax.experimental import pallas as pl
from jax.experimental.pallas import tpu as pltpu

FOURIER_ORDER = 4
HIDDEN = 100                                    # hidden_size of SkipConn
NUM_HIDDEN_LAYERS = 7
INIT_SIZE = FOURIER_ORDER * FOURIER_ORDER * 4 + 2   # 66 fourier features
PAD = 128                                       # lane padding
SLAB = 3 * PAD                                  # [cur | prev | feat] fused K
NEG_SLOPE = 0.01                                # nn.LeakyReLU default


def _leaky(v):
    return jnp.where(v > 0, v, NEG_SLOPE * v)


# ----------------------------- Pallas kernel --------------------------------
def fourier2d_kernel(x_ref, fc_ref, w_in_ref, b_in_ref, w_h_ref, b_h_ref,
                     w_out_ref, b_out_ref, o_ref, slab_ref):
    x = x_ref[...].astype(jnp.float32)               # (TB, 2)
    tb = x.shape[0]
    x0 = x[:, 0:1]                                   # (TB, 1)
    x1 = x[:, 1:2]

    # Host-precomputed per-lane constants (no iota / div / mod in-kernel).
    fc = fc_ref[...]                                 # (8, 128) f32
    n_lane, m_lane = fc[0:1, :], fc[1:2, :]          # harmonic order per lane
    pa, pb = fc[2:3, :], fc[3:4, :]                  # 0 (cos lane) or -pi/2 (sin lane)
    fmask, sel0, sel1 = fc[4:5, :], fc[5:6, :], fc[6:7, :]

    # Fourier features in PyTorch lane order: lane 0 = x0, lane 1 = x1,
    # lanes 2..65 = trig(n*x0)*trig(m*x1), lanes >= 66 = 0.   Only 2 EUP cos() calls.
    fa = jnp.cos(x0 * n_lane + pa)                   # (TB, 128)
    fb = jnp.cos(x1 * m_lane + pb)
    feat = fa * fb * fmask + x0 * sel0 + x1 * sel1   # f32

    feat_bf = feat.astype(jnp.bfloat16)
    slab_ref[:, 2 * PAD:3 * PAD] = feat_bf           # feat slot, written once

    # inLayer + LeakyReLU  (bf16 MXU, f32 accumulation)
    cur = _leaky(jnp.dot(feat_bf, w_in_ref[...],
                         preferred_element_type=jnp.float32) + b_in_ref[...])
    slab_ref[:, 0:PAD] = cur.astype(jnp.bfloat16)                    # cur slot
    slab_ref[:, PAD:2 * PAD] = jnp.zeros((tb, PAD), jnp.bfloat16)    # prev = []

    # Hidden skip-connected layers: cat([cur, prev, feat]) @ W as ONE K=384 dot.
    for i in range(NUM_HIDDEN_LAYERS):
        pre = jnp.dot(slab_ref[...], w_h_ref[i],
                      preferred_element_type=jnp.float32) + b_h_ref[i]
        slab_ref[:, PAD:2 * PAD] = slab_ref[:, 0:PAD]                # prev <- cur
        slab_ref[:, 0:PAD] = _leaky(pre).astype(jnp.bfloat16)        # cur  <- new

    # Output layer (only column 0 of w_out / b_out is non-zero).
    y = jnp.dot(slab_ref[...], w_out_ref[...],
                preferred_element_type=jnp.float32) + b_out_ref[...]
    o_ref[...] = (jnp.tanh(y[:, 0:1]) + 1.0) * 0.5   # (TB, 1) lane-narrow writeback


def _pick_tile_b(B):
    # Biggest tile (amortizes MXU weight pushes / per-step overhead) that still
    # leaves >= 2 grid steps so a v7x megacore can shard the batch axis.
    for t in (512, 256, 128):
        if B >= 2 * t:
            return t
    return 128


def fourier2d_pallas(x, padded_params, tile_b=None):
    fc, w_in, b_in, w_h, b_h, w_out, b_out = padded_params
    B = x.shape[0]
    if tile_b is None:
        tile_b = _pick_tile_b(B)
    n_tiles = pl.cdiv(B, tile_b)
    Bp = n_tiles * tile_b
    if Bp != B:
        x = jnp.pad(x, ((0, Bp - B), (0, 0)))        # zero-pad the remainder tile

    def cspec(shape):
        return pl.BlockSpec(shape, lambda i, _nd=len(shape): (0,) * _nd)

    out = pl.pallas_call(
        fourier2d_kernel,
        out_shape=jax.ShapeDtypeStruct((Bp, 1), jnp.float32),
        grid=(n_tiles,),
        in_specs=[
            pl.BlockSpec((tile_b, 2), lambda i: (i, 0)),       # x tile
            cspec((8, PAD)),                                   # fourier lane consts
            cspec((PAD, PAD)),                                 # w_in  (bf16)
            cspec((1, PAD)),                                   # b_in  (f32)
            cspec((NUM_HIDDEN_LAYERS, SLAB, PAD)),             # w_h   (bf16, K=384)
            cspec((NUM_HIDDEN_LAYERS, 1, PAD)),                # b_h   (f32)
            cspec((SLAB, PAD)),                                # w_out (bf16)
            cspec((1, PAD)),                                   # b_out (f32)
        ],
        out_specs=pl.BlockSpec((tile_b, 1), lambda i: (i, 0)),
        scratch_shapes=[pltpu.VMEM((tile_b, SLAB), jnp.bfloat16)],
        compiler_params=pltpu.CompilerParams(
            dimension_semantics=("parallel",)),
    )(x, fc, w_in, b_in, w_h, b_h, w_out, b_out)
    return out[:B]                                   # (B, 1), matches PyTorch


# -------------------------- parameter construction --------------------------
def torch_linear_init(key, fan_in, fan_out):
    # mimics torch.nn.Linear default init: U(-1/sqrt(fan_in), 1/sqrt(fan_in))
    kw, kb = jax.random.split(key)
    bound = 1.0 / np.sqrt(fan_in)
    W = jax.random.uniform(kw, (fan_in, fan_out), jnp.float32, -bound, bound)
    b = jax.random.uniform(kb, (fan_out,), jnp.float32, -bound, bound)
    return W, b


def init_dense_params(key):
    keys = jax.random.split(key, NUM_HIDDEN_LAYERS + 2)
    W_in, b_in = torch_linear_init(keys[0], INIT_SIZE, HIDDEN)
    W_hs, b_hs = [], []
    for i in range(NUM_HIDDEN_LAYERS):
        in_size = HIDDEN * 2 + INIT_SIZE if i > 0 else HIDDEN + INIT_SIZE
        W, b = torch_linear_init(keys[1 + i], in_size, HIDDEN)
        W_hs.append(W)
        b_hs.append(b)
    W_out, b_out = torch_linear_init(keys[-1], HIDDEN * 2 + INIT_SIZE, 1)
    return W_in, b_in, W_hs, b_hs, W_out, b_out


def build_feature_consts():
    """(8,128) per-lane f32 constants: [n, m, phase_a, phase_b, fmask, sel_x0, sel_x1, 0]."""
    fc = np.zeros((8, PAD), np.float32)
    fc[5, 0] = 1.0                       # lane 0 <- x0
    fc[6, 1] = 1.0                       # lane 1 <- x1
    half_pi = np.pi / 2
    for j in range(2, INIT_SIZE):
        jj = j - 2
        n = jj // (FOURIER_ORDER * 4)
        m = (jj // 4) % FOURIER_ORDER
        t = jj % 4
        fc[0, j] = float(n)
        fc[1, j] = float(m)
        fc[2, j] = 0.0 if t < 2 else -half_pi        # cos vs sin of n*x0
        fc[3, j] = 0.0 if t % 2 == 0 else -half_pi   # cos vs sin of m*x1
        fc[4, j] = 1.0
    return jnp.asarray(fc)


def pad_params(dense):
    """Pack dense params into lane-padded slabs; weights stored bf16 (K=384 fused layout)."""
    W_in, b_in, W_hs, b_hs, W_out, b_out = dense

    w_in_p = np.zeros((PAD, PAD), np.float32)
    w_in_p[:INIT_SIZE, :HIDDEN] = np.asarray(W_in)
    b_in_p = np.zeros((1, PAD), np.float32)
    b_in_p[0, :HIDDEN] = np.asarray(b_in)

    # hidden: rows [0:128)=cur slot, [128:256)=prev slot, [256:384)=feat slot
    w_h_p = np.zeros((NUM_HIDDEN_LAYERS, SLAB, PAD), np.float32)
    b_h_p = np.zeros((NUM_HIDDEN_LAYERS, 1, PAD), np.float32)
    for i, (W, b) in enumerate(zip(W_hs, b_hs)):
        W = np.asarray(W)
        w_h_p[i, :HIDDEN, :HIDDEN] = W[:HIDDEN]                         # cur slot
        if i == 0:
            # layer 0 input is cat([cur, x]); prev slot stays zero
            w_h_p[i, 2 * PAD:2 * PAD + INIT_SIZE, :HIDDEN] = W[HIDDEN:HIDDEN + INIT_SIZE]
        else:
            w_h_p[i, PAD:PAD + HIDDEN, :HIDDEN] = W[HIDDEN:2 * HIDDEN]  # prev slot
            w_h_p[i, 2 * PAD:2 * PAD + INIT_SIZE, :HIDDEN] = W[2 * HIDDEN:]   # x slot
        b_h_p[i, 0, :HIDDEN] = np.asarray(b)

    W_out = np.asarray(W_out)
    w_out_p = np.zeros((SLAB, PAD), np.float32)
    w_out_p[:HIDDEN, 0:1] = W_out[:HIDDEN]
    w_out_p[PAD:PAD + HIDDEN, 0:1] = W_out[HIDDEN:2 * HIDDEN]
    w_out_p[2 * PAD:2 * PAD + INIT_SIZE, 0:1] = W_out[2 * HIDDEN:]
    b_out_p = np.zeros((1, PAD), np.float32)
    b_out_p[0, 0] = float(np.asarray(b_out)[0])

    return (build_feature_consts(),
            jnp.asarray(w_in_p, jnp.bfloat16), jnp.asarray(b_in_p),
            jnp.asarray(w_h_p, jnp.bfloat16), jnp.asarray(b_h_p),
            jnp.asarray(w_out_p, jnp.bfloat16), jnp.asarray(b_out_p))


# ---------------------------- pure-JAX reference -----------------------------
def ref_forward(x, dense):
    W_in, b_in, W_hs, b_hs, W_out, b_out = dense
    B = x.shape[0]
    x0, x1 = x[:, 0], x[:, 1]
    feats = [x]
    for n in range(FOURIER_ORDER):
        for m in range(FOURIER_ORDER):
            cn, sn = jnp.cos(n * x0), jnp.sin(n * x0)
            cm, sm = jnp.cos(m * x1), jnp.sin(m * x1)
            feats += [(cn * cm)[:, None], (cn * sm)[:, None],
                      (sn * cm)[:, None], (sn * sm)[:, None]]
    f = jnp.concatenate(feats, axis=1)            # (B, 66)
    cur = _leaky(f @ W_in + b_in)
    prev = jnp.zeros((B, 0), jnp.float32)
    for i in range(NUM_HIDDEN_LAYERS):
        comb = jnp.concatenate([cur, prev, f], axis=1)
        nxt = _leaky(comb @ W_hs[i] + b_hs[i])
        prev, cur = cur, nxt
    comb = jnp.concatenate([cur, prev, f], axis=1)
    y = comb @ W_out + b_out
    return (jnp.tanh(y) + 1.0) / 2.0


# ----------------------------------- main ------------------------------------
if __name__ == "__main__":
    key = jax.random.PRNGKey(0)
    kx, kp = jax.random.split(key)

    dense = init_dense_params(kp)
    padded = pad_params(dense)

    # aligned batch + a ragged one (exercises the cdiv / zero-padding remainder path)
    for B in (256, 200):
        x = jax.random.uniform(jax.random.fold_in(kx, B), (B, 2),
                               jnp.float32, -2.0, 2.0)
        y = jax.block_until_ready(fourier2d_pallas(x, padded))
        y_ref = ref_forward(x, dense)
        np.testing.assert_allclose(np.asarray(y), np.asarray(y_ref),
                                   rtol=2e-2, atol=2e-2)
    print("KERNEL_OK")
</pallas_src>

<mosaic_0001>
module attributes {stable_mosaic.version = 11 : i64} {
  func.func @fourier2d_kernel(%arg0: i32, %arg1: memref<128x2xf32, #tpu.memory_space<vmem>>, %arg2: memref<8x128xf32, #tpu.memory_space<vmem>>, %arg3: memref<128x128xbf16, #tpu.memory_space<vmem>>, %arg4: memref<1x128xf32, #tpu.memory_space<vmem>>, %arg5: memref<7x384x128xbf16, #tpu.memory_space<vmem>>, %arg6: memref<7x1x128xf32, #tpu.memory_space<vmem>>, %arg7: memref<384x128xbf16, #tpu.memory_space<vmem>>, %arg8: memref<1x128xf32, #tpu.memory_space<vmem>>, %arg9: memref<128x1xf32, #tpu.memory_space<vmem>>, %arg10: memref<128x384xbf16, #tpu.memory_space<vmem>>) attributes {dimension_semantics = [#tpu.dimension_semantics<parallel>], iteration_bounds = array<i64: 2>, scalar_prefetch = 0 : i64, scratch_operands = 1 : i64, tpu.core_type = #tpu.core_type<tc>, window_params = [{transform_indices = @transform_0, window_bounds = array<i64: 128, 2>}, {pipeline_mode = #tpu.pipeline_mode<synchronous>, transform_indices = @transform_1, window_bounds = array<i64: 8, 128>}, {pipeline_mode = #tpu.pipeline_mode<synchronous>, transform_indices = @transform_2, window_bounds = array<i64: 128, 128>}, {pipeline_mode = #tpu.pipeline_mode<synchronous>, transform_indices = @transform_3, window_bounds = array<i64: 1, 128>}, {pipeline_mode = #tpu.pipeline_mode<synchronous>, transform_indices = @transform_4, window_bounds = array<i64: 7, 384, 128>}, {pipeline_mode = #tpu.pipeline_mode<synchronous>, transform_indices = @transform_5, window_bounds = array<i64: 7, 1, 128>}, {pipeline_mode = #tpu.pipeline_mode<synchronous>, transform_indices = @transform_6, window_bounds = array<i64: 384, 128>}, {pipeline_mode = #tpu.pipeline_mode<synchronous>, transform_indices = @transform_7, window_bounds = array<i64: 1, 128>}, {transform_indices = @transform_8, window_bounds = array<i64: 128, 1>}]} {
    %c0 = arith.constant 0 : index
    %c0_0 = arith.constant 0 : index
    %0 = vector.load %arg1[%c0, %c0_0] : memref<128x2xf32, #tpu.memory_space<vmem>>, vector<128x2xf32>
    %1 = vector.extract_strided_slice %0 {offsets = [0, 0], sizes = [128, 1], strides = [1, 1]} : vector<128x2xf32> to vector<128x1xf32>
    %2 = vector.extract_strided_slice %0 {offsets = [0, 1], sizes = [128, 1], strides = [1, 1]} : vector<128x2xf32> to vector<128x1xf32>
    %c0_1 = arith.constant 0 : index
    %c0_2 = arith.constant 0 : index
    %3 = vector.load %arg2[%c0_1, %c0_2] : memref<8x128xf32, #tpu.memory_space<vmem>>, vector<8x128xf32>
    %4 = vector.extract_strided_slice %3 {offsets = [0, 0], sizes = [1, 128], strides = [1, 1]} : vector<8x128xf32> to vector<1x128xf32>
    %5 = vector.extract_strided_slice %3 {offsets = [1, 0], sizes = [1, 128], strides = [1, 1]} : vector<8x128xf32> to vector<1x128xf32>
    %6 = vector.extract_strided_slice %3 {offsets = [2, 0], sizes = [1, 128], strides = [1, 1]} : vector<8x128xf32> to vector<1x128xf32>
    %7 = vector.extract_strided_slice %3 {offsets = [3, 0], sizes = [1, 128], strides = [1, 1]} : vector<8x128xf32> to vector<1x128xf32>
    %8 = vector.extract_strided_slice %3 {offsets = [4, 0], sizes = [1, 128], strides = [1, 1]} : vector<8x128xf32> to vector<1x128xf32>
    %9 = vector.extract_strided_slice %3 {offsets = [5, 0], sizes = [1, 128], strides = [1, 1]} : vector<8x128xf32> to vector<1x128xf32>
    %10 = vector.extract_strided_slice %3 {offsets = [6, 0], sizes = [1, 128], strides = [1, 1]} : vector<8x128xf32> to vector<1x128xf32>
    %11 = vector.broadcast %1 : vector<128x1xf32> to vector<128x128xf32>
    %12 = vector.broadcast %4 : vector<1x128xf32> to vector<128x128xf32>
    %13 = arith.mulf %11, %12 : vector<128x128xf32>
    %14 = vector.broadcast %6 : vector<1x128xf32> to vector<128x128xf32>
    %15 = arith.addf %13, %14 : vector<128x128xf32>
    %16 = math.cos %15 : vector<128x128xf32>
    %17 = vector.broadcast %2 : vector<128x1xf32> to vector<128x128xf32>
    %18 = vector.broadcast %5 : vector<1x128xf32> to vector<128x128xf32>
    %19 = arith.mulf %17, %18 : vector<128x128xf32>
    %20 = vector.broadcast %7 : vector<1x128xf32> to vector<128x128xf32>
    %21 = arith.addf %19, %20 : vector<128x128xf32>
    %22 = math.cos %21 : vector<128x128xf32>
    %23 = arith.mulf %16, %22 : vector<128x128xf32>
    %24 = vector.broadcast %8 : vector<1x128xf32> to vector<128x128xf32>
    %25 = arith.mulf %23, %24 : vector<128x128xf32>
    %26 = vector.broadcast %1 : vector<128x1xf32> to vector<128x128xf32>
    %27 = vector.broadcast %9 : vector<1x128xf32> to vector<128x128xf32>
    %28 = arith.mulf %26, %27 : vector<128x128xf32>
    %29 = arith.addf %25, %28 : vector<128x128xf32>
    %30 = vector.broadcast %2 : vector<128x1xf32> to vector<128x128xf32>
    %31 = vector.broadcast %10 : vector<1x128xf32> to vector<128x128xf32>
    %32 = arith.mulf %30, %31 : vector<128x128xf32>
    %33 = arith.addf %29, %32 : vector<128x128xf32>
    %34 = arith.truncf %33 : vector<128x128xf32> to vector<128x128xbf16>
    %c0_3 = arith.constant 0 : index
    %c256 = arith.constant 256 : index
    %35 = vector.load %arg10[%c0_3, %c256] : memref<128x384xbf16, #tpu.memory_space<vmem>>, vector<128x128xbf16>
    tpu.vector_store %arg10[%c0_3, %c256], %34 {strides = array<i32>} : memref<128x384xbf16, #tpu.memory_space<vmem>>, vector<128x128xbf16>,
    %c0_4 = arith.constant 0 : index
    %c0_5 = arith.constant 0 : index
    %36 = vector.load %arg3[%c0_4, %c0_5] : memref<128x128xbf16, #tpu.memory_space<vmem>>, vector<128x128xbf16>
    %cst = arith.constant dense<0.000000e+00> : vector<128x128xf32>
    %37 = tpu.matmul %34, %36, %cst {dimension_numbers = #tpu.dot_dimension_numbers<[1], [0], [0], [1], [0, 0, 1, 1], [], []>} : vector<128x128xbf16>, vector<128x128xbf16>, vector<128x128xf32> -> vector<128x128xf32>
    %c0_6 = arith.constant 0 : index
    %c0_7 = arith.constant 0 : index
    %38 = vector.load %arg4[%c0_6, %c0_7] : memref<1x128xf32, #tpu.memory_space<vmem>>, vector<1x128xf32>
    %39 = vector.broadcast %38 : vector<1x128xf32> to vector<128x128xf32>
    %40 = arith.addf %37, %39 : vector<128x128xf32>
    %cst_8 = arith.constant 0.000000e+00 : f32
    %41 = vector.broadcast %cst_8 : f32 to vector<128x128xf32>
    %42 = arith.cmpf ogt, %40, %41 : vector<128x128xf32>
    %cst_9 = arith.constant 0.00999999977 : f32
    %43 = vector.broadcast %cst_9 : f32 to vector<128x128xf32>
    %44 = arith.mulf %43, %40 : vector<128x128xf32>
    %45 = arith.select %42, %40, %44 : vector<128x128xi1>, vector<128x128xf32>
    %46 = arith.truncf %45 : vector<128x128xf32> to vector<128x128xbf16>
    %c0_10 = arith.constant 0 : index
    %c0_11 = arith.constant 0 : index
    %47 = vector.load %arg10[%c0_10, %c0_11] : memref<128x384xbf16, #tpu.memory_space<vmem>>, vector<128x128xbf16>
    tpu.vector_store %arg10[%c0_10, %c0_11], %46 {strides = array<i32>} : memref<128x384xbf16, #tpu.memory_space<vmem>>, vector<128x128xbf16>,
    %cst_12 = arith.constant 0.000000e+00 : bf16
    %48 = vector.broadcast %cst_12 : bf16 to vector<128x128xbf16>
    %c0_13 = arith.constant 0 : index
    %c128 = arith.constant 128 : index
    %49 = vector.load %arg10[%c0_13, %c128] : memref<128x384xbf16, #tpu.memory_space<vmem>>, vector<128x128xbf16>
    tpu.vector_store %arg10[%c0_13, %c128], %48 {strides = array<i32>} : memref<128x384xbf16, #tpu.memory_space<vmem>>, vector<128x128xbf16>,
    %c0_14 = arith.constant 0 : index
    %c0_15 = arith.constant 0 : index
    %50 = vector.load %arg10[%c0_14, %c0_15] : memref<128x384xbf16, #tpu.memory_space<vmem>>, vector<128x384xbf16>
    %c0_16 = arith.constant 0 : index
    %c0_17 = arith.constant 0 : index
    %c0_18 = arith.constant 0 : index
    %51 = vector.load %arg5[%c0_16, %c0_17, %c0_18] : memref<7x384x128xbf16, #tpu.memory_space<vmem>>, vector<1x384x128xbf16>
    %52 = vector.shape_cast %51 : vector<1x384x128xbf16> to vector<384x128xbf16>
    %cst_19 = arith.constant dense<0.000000e+00> : vector<128x128xf32>
    %53 = tpu.matmul %50, %52, %cst_19 {dimension_numbers = #tpu.dot_dimension_numbers<[1], [0], [0], [1], [0, 0, 1, 1], [], []>} : vector<128x384xbf16>, vector<384x128xbf16>, vector<128x128xf32> -> vector<128x128xf32>
    %c0_20 = arith.constant 0 : index
    %c0_21 = arith.constant 0 : index
    %c0_22 = arith.constant 0 : index
    %54 = vector.load %arg6[%c0_20, %c0_21, %c0_22] : memref<7x1x128xf32, #tpu.memory_space<vmem>>, vector<1x1x128xf32>
    %55 = vector.shape_cast %54 : vector<1x1x128xf32> to vector<1x128xf32>
    %56 = vector.broadcast %55 : vector<1x128xf32> to vector<128x128xf32>
    %57 = arith.addf %53, %56 : vector<128x128xf32>
    %c0_23 = arith.constant 0 : index
    %c0_24 = arith.constant 0 : index
    %58 = vector.load %arg10[%c0_23, %c0_24] : memref<128x384xbf16, #tpu.memory_space<vmem>>, vector<128x128xbf16>
    %c0_25 = arith.constant 0 : index
    %c128_26 = arith.constant 128 : index
    %59 = vector.load %arg10[%c0_25, %c128_26] : memref<128x384xbf16, #tpu.memory_space<vmem>>, vector<128x128xbf16>
    tpu.vector_store %arg10[%c0_25, %c128_26], %58 {strides = array<i32>} : memref<128x384xbf16, #tpu.memory_space<vmem>>, vector<128x128xbf16>,
    %cst_27 = arith.constant 0.000000e+00 : f32
    %60 = vector.broadcast %cst_27 : f32 to vector<128x128xf32>
    %61 = arith.cmpf ogt, %57, %60 : vector<128x128xf32>
    %cst_28 = arith.constant 0.00999999977 : f32
    %62 = vector.broadcast %cst_28 : f32 to vector<128x128xf32>
    %63 = arith.mulf %62, %57 : vector<128x128xf32>
    %64 = arith.select %61, %57, %63 : vector<128x128xi1>, vector<128x128xf32>
    %65 = arith.truncf %64 : vector<128x128xf32> to vector<128x128xbf16>
    %c0_29 = arith.constant 0 : index
    %c0_30 = arith.constant 0 : index
    %66 = vector.load %arg10[%c0_29, %c0_30] : memref<128x384xbf16, #tpu.memory_space<vmem>>, vector<128x128xbf16>
    tpu.vector_store %arg10[%c0_29, %c0_30], %65 {strides = array<i32>} : memref<128x384xbf16, #tpu.memory_space<vmem>>, vector<128x128xbf16>,
    %c0_31 = arith.constant 0 : index
    %c0_32 = arith.constant 0 : index
    %67 = vector.load %arg10[%c0_31, %c0_32] : memref<128x384xbf16, #tpu.memory_space<vmem>>, vector<128x384xbf16>
    %c1 = arith.constant 1 : index
    %c0_33 = arith.constant 0 : index
    %c0_34 = arith.constant 0 : index
    %68 = vector.load %arg5[%c1, %c0_33, %c0_34] : memref<7x384x128xbf16, #tpu.memory_space<vmem>>, vector<1x384x128xbf16>
    %69 = vector.shape_cast %68 : vector<1x384x128xbf16> to vector<384x128xbf16>
    %cst_35 = arith.constant dense<0.000000e+00> : vector<128x128xf32>
    %70 = tpu.matmul %67, %69, %cst_35 {dimension_numbers = #tpu.dot_dimension_numbers<[1], [0], [0], [1], [0, 0, 1, 1], [], []>} : vector<128x384xbf16>, vector<384x128xbf16>, vector<128x128xf32> -> vector<128x128xf32>
    %c1_36 = arith.constant 1 : index
    %c0_37 = arith.constant 0 : index
    %c0_38 = arith.constant 0 : index
    %71 = vector.load %arg6[%c1_36, %c0_37, %c0_38] : memref<7x1x128xf32, #tpu.memory_space<vmem>>, vector<1x1x128xf32>
    %72 = vector.shape_cast %71 : vector<1x1x128xf32> to vector<1x128xf32>
    %73 = vector.broadcast %72 : vector<1x128xf32> to vector<128x128xf32>
    %74 = arith.addf %70, %73 : vector<128x128xf32>
    %c0_39 = arith.constant 0 : index
    %c0_40 = arith.constant 0 : index
    %75 = vector.load %arg10[%c0_39, %c0_40] : memref<128x384xbf16, #tpu.memory_space<vmem>>, vector<128x128xbf16>
    %c0_41 = arith.constant 0 : index
    %c128_42 = arith.constant 128 : index
    %76 = vector.load %arg10[%c0_41, %c128_42] : memref<128x384xbf16, #tpu.memory_space<vmem>>, vector<128x128xbf16>
    tpu.vector_store %arg10[%c0_41, %c128_42], %75 {strides = array<i32>} : memref<128x384xbf16, #tpu.memory_space<vmem>>, vector<128x128xbf16>,
    %cst_43 = arith.constant 0.000000e+00 : f32
    %77 = vector.broadcast %cst_43 : f32 to vector<128x128xf32>
    %78 = arith.cmpf ogt, %74, %77 : vector<128x128xf32>
    %cst_44 = arith.constant 0.00999999977 : f32
    %79 = vector.broadcast %cst_44 : f32 to vector<128x128xf32>
    %80 = arith.mulf %79, %74 : vector<128x128xf32>
    %81 = arith.select %78, %74, %80 : vector<128x128xi1>, vector<128x128xf32>
    %82 = arith.truncf %81 : vector<128x128xf32> to vector<128x128xbf16>
    %c0_45 = arith.constant 0 : index
    %c0_46 = arith.constant 0 : index
    %83 = vector.load %arg10[%c0_45, %c0_46] : memref<128x384xbf16, #tpu.memory_space<vmem>>, vector<128x128xbf16>
    tpu.vector_store %arg10[%c0_45, %c0_46], %82 {strides = array<i32>} : memref<128x384xbf16, #tpu.memory_space<vmem>>, vector<128x128xbf16>,
    %c0_47 = arith.constant 0 : index
    %c0_48 = arith.constant 0 : index
    %84 = vector.load %arg10[%c0_47, %c0_48] : memref<128x384xbf16, #tpu.memory_space<vmem>>, vector<128x384xbf16>
    %c2 = arith.constant 2 : index
    %c0_49 = arith.constant 0 : index
    %c0_50 = arith.constant 0 : index
    %85 = vector.load %arg5[%c2, %c0_49, %c0_50] : memref<7x384x128xbf16, #tpu.memory_space<vmem>>, vector<1x384x128xbf16>
    %86 = vector.shape_cast %85 : vector<1x384x128xbf16> to vector<384x128xbf16>
    %cst_51 = arith.constant dense<0.000000e+00> : vector<128x128xf32>
    %87 = tpu.matmul %84, %86, %cst_51 {dimension_numbers = #tpu.dot_dimension_numbers<[1], [0], [0], [1], [0, 0, 1, 1], [], []>} : vector<128x384xbf16>, vector<384x128xbf16>, vector<128x128xf32> -> vector<128x128xf32>
    %c2_52 = arith.constant 2 : index
    %c0_53 = arith.constant 0 : index
    %c0_54 = arith.constant 0 : index
    %88 = vector.load %arg6[%c2_52, %c0_53, %c0_54] : memref<7x1x128xf32, #tpu.memory_space<vmem>>, vector<1x1x128xf32>
    %89 = vector.shape_cast %88 : vector<1x1x128xf32> to vector<1x128xf32>
    %90 = vector.broadcast %89 : vector<1x128xf32> to vector<128x128xf32>
    %91 = arith.addf %87, %90 : vector<128x128xf32>
    %c0_55 = arith.constant 0 : index
    %c0_56 = arith.constant 0 : index
    %92 = vector.load %arg10[%c0_55, %c0_56] : memref<128x384xbf16, #tpu.memory_space<vmem>>, vector<128x128xbf16>
    %c0_57 = arith.constant 0 : index
    %c128_58 = arith.constant 128 : index
    %93 = vector.load %arg10[%c0_57, %c128_58] : memref<128x384xbf16, #tpu.memory_space<vmem>>, vector<128x128xbf16>
    tpu.vector_store %arg10[%c0_57, %c128_58], %92 {strides = array<i32>} : memref<128x384xbf16, #tpu.memory_space<vmem>>, vector<128x128xbf16>,
    %cst_59 = arith.constant 0.000000e+00 : f32
    %94 = vector.broadcast %cst_59 : f32 to vector<128x128xf32>
    %95 = arith.cmpf ogt, %91, %94 : vector<128x128xf32>
    %cst_60 = arith.constant 0.00999999977 : f32
    %96 = vector.broadcast %cst_60 : f32 to vector<128x128xf32>
    %97 = arith.mulf %96, %91 : vector<128x128xf32>
    %98 = arith.select %95, %91, %97 : vector<128x128xi1>, vector<128x128xf32>
    %99 = arith.truncf %98 : vector<128x128xf32> to vector<128x128xbf16>
    %c0_61 = arith.constant 0 : index
    %c0_62 = arith.constant 0 : index
    %100 = vector.load %arg10[%c0_61, %c0_62] : memref<128x384xbf16, #tpu.memory_space<vmem>>, vector<128x128xbf16>
    tpu.vector_store %arg10[%c0_61, %c0_62], %99 {strides = array<i32>} : memref<128x384xbf16, #tpu.memory_space<vmem>>, vector<128x128xbf16>,
    %c0_63 = arith.constant 0 : index
    %c0_64 = arith.constant 0 : index
    %101 = vector.load %arg10[%c0_63, %c0_64] : memref<128x384xbf16, #tpu.memory_space<vmem>>, vector<128x384xbf16>
    %c3 = arith.constant 3 : index
    %c0_65 = arith.constant 0 : index
    %c0_66 = arith.constant 0 : index
    %102 = vector.load %arg5[%c3, %c0_65, %c0_66] : memref<7x384x128xbf16, #tpu.memory_space<vmem>>, vector<1x384x128xbf16>
    %103 = vector.shape_cast %102 : vector<1x384x128xbf16> to vector<384x128xbf16>
    %cst_67 = arith.constant dense<0.000000e+00> : vector<128x128xf32>
    %104 = tpu.matmul %101, %103, %cst_67 {dimension_numbers = #tpu.dot_dimension_numbers<[1], [0], [0], [1], [0, 0, 1, 1], [], []>} : vector<128x384xbf16>, vector<384x128xbf16>, vector<128x128xf32> -> vector<128x128xf32>
    %c3_68 = arith.constant 3 : index
    %c0_69 = arith.constant 0 : index
    %c0_70 = arith.constant 0 : index
    %105 = vector.load %arg6[%c3_68, %c0_69, %c0_70] : memref<7x1x128xf32, #tpu.memory_space<vmem>>, vector<1x1x128xf32>
    %106 = vector.shape_cast %105 : vector<1x1x128xf32> to vector<1x128xf32>
    %107 = vector.broadcast %106 : vector<1x128xf32> to vector<128x128xf32>
    %108 = arith.addf %104, %107 : vector<128x128xf32>
    %c0_71 = arith.constant 0 : index
    %c0_72 = arith.constant 0 : index
    %109 = vector.load %arg10[%c0_71, %c0_72] : memref<128x384xbf16, #tpu.memory_space<vmem>>, vector<128x128xbf16>
    %c0_73 = arith.constant 0 : index
    %c128_74 = arith.constant 128 : index
    %110 = vector.load %arg10[%c0_73, %c128_74] : memref<128x384xbf16, #tpu.memory_space<vmem>>, vector<128x128xbf16>
    tpu.vector_store %arg10[%c0_73, %c128_74], %109 {strides = array<i32>} : memref<128x384xbf16, #tpu.memory_space<vmem>>, vector<128x128xbf16>,
    %cst_75 = arith.constant 0.000000e+00 : f32
    %111 = vector.broadcast %cst_75 : f32 to vector<128x128xf32>
    %112 = arith.cmpf ogt, %108, %111 : vector<128x128xf32>
    %cst_76 = arith.constant 0.00999999977 : f32
    %113 = vector.broadcast %cst_76 : f32 to vector<128x128xf32>
    %114 = arith.mulf %113, %108 : vector<128x128xf32>
    %115 = arith.select %112, %108, %114 : vector<128x128xi1>, vector<128x128xf32>
    %116 = arith.truncf %115 : vector<128x128xf32> to vector<128x128xbf16>
    %c0_77 = arith.constant 0 : index
    %c0_78 = arith.constant 0 : index
    %117 = vector.load %arg10[%c0_77, %c0_78] : memref<128x384xbf16, #tpu.memory_space<vmem>>, vector<128x128xbf16>
    tpu.vector_store %arg10[%c0_77, %c0_78], %116 {strides = array<i32>} : memref<128x384xbf16, #tpu.memory_space<vmem>>, vector<128x128xbf16>,
    %c0_79 = arith.constant 0 : index
    %c0_80 = arith.constant 0 : index
    %118 = vector.load %arg10[%c0_79, %c0_80] : memref<128x384xbf16, #tpu.memory_space<vmem>>, vector<128x384xbf16>
    %c4 = arith.constant 4 : index
    %c0_81 = arith.constant 0 : index
    %c0_82 = arith.constant 0 : index
    %119 = vector.load %arg5[%c4, %c0_81, %c0_82] : memref<7x384x128xbf16, #tpu.memory_space<vmem>>, vector<1x384x128xbf16>
    %120 = vector.shape_cast %119 : vector<1x384x128xbf16> to vector<384x128xbf16>
    %cst_83 = arith.constant dense<0.000000e+00> : vector<128x128xf32>
    %121 = tpu.matmul %118, %120, %cst_83 {dimension_numbers = #tpu.dot_dimension_numbers<[1], [0], [0], [1], [0, 0, 1, 1], [], []>} : vector<128x384xbf16>, vector<384x128xbf16>, vector<128x128xf32> -> vector<128x128xf32>
    %c4_84 = arith.constant 4 : index
    %c0_85 = arith.constant 0 : index
    %c0_86 = arith.constant 0 : index
    %122 = vector.load %arg6[%c4_84, %c0_85, %c0_86] : memref<7x1x128xf32, #tpu.memory_space<vmem>>, vector<1x1x128xf32>
    %123 = vector.shape_cast %122 : vector<1x1x128xf32> to vector<1x128xf32>
    %124 = vector.broadcast %123 : vector<1x128xf32> to vector<128x128xf32>
    %125 = arith.addf %121, %124 : vector<128x128xf32>
    %c0_87 = arith.constant 0 : index
    %c0_88 = arith.constant 0 : index
    %126 = vector.load %arg10[%c0_87, %c0_88] : memref<128x384xbf16, #tpu.memory_space<vmem>>, vector<128x128xbf16>
    %c0_89 = arith.constant 0 : index
    %c128_90 = arith.constant 128 : index
    %127 = vector.load %arg10[%c0_89, %c128_90] : memref<128x384xbf16, #tpu.memory_space<vmem>>, vector<128x128xbf16>
    tpu.vector_store %arg10[%c0_89, %c128_90], %126 {strides = array<i32>} : memref<128x384xbf16, #tpu.memory_space<vmem>>, vector<128x128xbf16>,
    %cst_91 = arith.constant 0.000000e+00 : f32
    %128 = vector.broadcast %cst_91 : f32 to vector<128x128xf32>
    %129 = arith.cmpf ogt, %125, %128 : vector<128x128xf32>
    %cst_92 = arith.constant 0.00999999977 : f32
    %130 = vector.broadcast %cst_92 : f32 to vector<128x128xf32>
    %131 = arith.mulf %130, %125 : vector<128x128xf32>
    %132 = arith.select %129, %125, %131 : vector<128x128xi1>, vector<128x128xf32>
    %133 = arith.truncf %132 : vector<128x128xf32> to vector<128x128xbf16>
    %c0_93 = arith.constant 0 : index
    %c0_94 = arith.constant 0 : index
    %134 = vector.load %arg10[%c0_93, %c0_94] : memref<128x384xbf16, #tpu.memory_space<vmem>>, vector<128x128xbf16>
    tpu.vector_store %arg10[%c0_93, %c0_94], %133 {strides = array<i32>} : memref<128x384xbf16, #tpu.memory_space<vmem>>, vector<128x128xbf16>,
    %c0_95 = arith.constant 0 : index
    %c0_96 = arith.constant 0 : index
    %135 = vector.load %arg10[%c0_95, %c0_96] : memref<128x384xbf16, #tpu.memory_space<vmem>>, vector<128x384xbf16>
    %c5 = arith.constant 5 : index
    %c0_97 = arith.constant 0 : index
    %c0_98 = arith.constant 0 : index
    %136 = vector.load %arg5[%c5, %c0_97, %c0_98] : memref<7x384x128xbf16, #tpu.memory_space<vmem>>, vector<1x384x128xbf16>
    %137 = vector.shape_cast %136 : vector<1x384x128xbf16> to vector<384x128xbf16>
    %cst_99 = arith.constant dense<0.000000e+00> : vector<128x128xf32>
    %138 = tpu.matmul %135, %137, %cst_99 {dimension_numbers = #tpu.dot_dimension_numbers<[1], [0], [0], [1], [0, 0, 1, 1], [], []>} : vector<128x384xbf16>, vector<384x128xbf16>, vector<128x128xf32> -> vector<128x128xf32>
    %c5_100 = arith.constant 5 : index
    %c0_101 = arith.constant 0 : index
    %c0_102 = arith.constant 0 : index
    %139 = vector.load %arg6[%c5_100, %c0_101, %c0_102] : memref<7x1x128xf32, #tpu.memory_space<vmem>>, vector<1x1x128xf32>
    %140 = vector.shape_cast %139 : vector<1x1x128xf32> to vector<1x128xf32>
    %141 = vector.broadcast %140 : vector<1x128xf32> to vector<128x128xf32>
    %142 = arith.addf %138, %141 : vector<128x128xf32>
    %c0_103 = arith.constant 0 : index
    %c0_104 = arith.constant 0 : index
    %143 = vector.load %arg10[%c0_103, %c0_104] : memref<128x384xbf16, #tpu.memory_space<vmem>>, vector<128x128xbf16>
    %c0_105 = arith.constant 0 : index
    %c128_106 = arith.constant 128 : index
    %144 = vector.load %arg10[%c0_105, %c128_106] : memref<128x384xbf16, #tpu.memory_space<vmem>>, vector<128x128xbf16>
    tpu.vector_store %arg10[%c0_105, %c128_106], %143 {strides = array<i32>} : memref<128x384xbf16, #tpu.memory_space<vmem>>, vector<128x128xbf16>,
    %cst_107 = arith.constant 0.000000e+00 : f32
    %145 = vector.broadcast %cst_107 : f32 to vector<128x128xf32>
    %146 = arith.cmpf ogt, %142, %145 : vector<128x128xf32>
    %cst_108 = arith.constant 0.00999999977 : f32
    %147 = vector.broadcast %cst_108 : f32 to vector<128x128xf32>
    %148 = arith.mulf %147, %142 : vector<128x128xf32>
    %149 = arith.select %146, %142, %148 : vector<128x128xi1>, vector<128x128xf32>
    %150 = arith.truncf %149 : vector<128x128xf32> to vector<128x128xbf16>
    %c0_109 = arith.constant 0 : index
    %c0_110 = arith.constant 0 : index
    %151 = vector.load %arg10[%c0_109, %c0_110] : memref<128x384xbf16, #tpu.memory_space<vmem>>, vector<128x128xbf16>
    tpu.vector_store %arg10[%c0_109, %c0_110], %150 {strides = array<i32>} : memref<128x384xbf16, #tpu.memory_space<vmem>>, vector<128x128xbf16>,
    %c0_111 = arith.constant 0 : index
    %c0_112 = arith.constant 0 : index
    %152 = vector.load %arg10[%c0_111, %c0_112] : memref<128x384xbf16, #tpu.memory_space<vmem>>, vector<128x384xbf16>
    %c6 = arith.constant 6 : index
    %c0_113 = arith.constant 0 : index
    %c0_114 = arith.constant 0 : index
    %153 = vector.load %arg5[%c6, %c0_113, %c0_114] : memref<7x384x128xbf16, #tpu.memory_space<vmem>>, vector<1x384x128xbf16>
    %154 = vector.shape_cast %153 : vector<1x384x128xbf16> to vector<384x128xbf16>
    %cst_115 = arith.constant dense<0.000000e+00> : vector<128x128xf32>
    %155 = tpu.matmul %152, %154, %cst_115 {dimension_numbers = #tpu.dot_dimension_numbers<[1], [0], [0], [1], [0, 0, 1, 1], [], []>} : vector<128x384xbf16>, vector<384x128xbf16>, vector<128x128xf32> -> vector<128x128xf32>
    %c6_116 = arith.constant 6 : index
    %c0_117 = arith.constant 0 : index
    %c0_118 = arith.constant 0 : index
    %156 = vector.load %arg6[%c6_116, %c0_117, %c0_118] : memref<7x1x128xf32, #tpu.memory_space<vmem>>, vector<1x1x128xf32>
    %157 = vector.shape_cast %156 : vector<1x1x128xf32> to vector<1x128xf32>
    %158 = vector.broadcast %157 : vector<1x128xf32> to vector<128x128xf32>
    %159 = arith.addf %155, %158 : vector<128x128xf32>
    %c0_119 = arith.constant 0 : index
    %c0_120 = arith.constant 0 : index
    %160 = vector.load %arg10[%c0_119, %c0_120] : memref<128x384xbf16, #tpu.memory_space<vmem>>, vector<128x128xbf16>
    %c0_121 = arith.constant 0 : index
    %c128_122 = arith.constant 128 : index
    %161 = vector.load %arg10[%c0_121, %c128_122] : memref<128x384xbf16, #tpu.memory_space<vmem>>, vector<128x128xbf16>
    tpu.vector_store %arg10[%c0_121, %c128_122], %160 {strides = array<i32>} : memref<128x384xbf16, #tpu.memory_space<vmem>>, vector<128x128xbf16>,
    %cst_123 = arith.constant 0.000000e+00 : f32
    %162 = vector.broadcast %cst_123 : f32 to vector<128x128xf32>
    %163 = arith.cmpf ogt, %159, %162 : vector<128x128xf32>
    %cst_124 = arith.constant 0.00999999977 : f32
    %164 = vector.broadcast %cst_124 : f32 to vector<128x128xf32>
    %165 = arith.mulf %164, %159 : vector<128x128xf32>
    %166 = arith.select %163, %159, %165 : vector<128x128xi1>, vector<128x128xf32>
    %167 = arith.truncf %166 : vector<128x128xf32> to vector<128x128xbf16>
    %c0_125 = arith.constant 0 : index
    %c0_126 = arith.constant 0 : index
    %168 = vector.load %arg10[%c0_125, %c0_126] : memref<128x384xbf16, #tpu.memory_space<vmem>>, vector<128x128xbf16>
    tpu.vector_store %arg10[%c0_125, %c0_126], %167 {strides = array<i32>} : memref<128x384xbf16, #tpu.memory_space<vmem>>, vector<128x128xbf16>,
    %c0_127 = arith.constant 0 : index
    %c0_128 = arith.constant 0 : index
    %169 = vector.load %arg10[%c0_127, %c0_128] : memref<128x384xbf16, #tpu.memory_space<vmem>>, vector<128x384xbf16>
    %c0_129 = arith.constant 0 : index
    %c0_130 = arith.constant 0 : index
    %170 = vector.load %arg7[%c0_129, %c0_130] : memref<384x128xbf16, #tpu.memory_space<vmem>>, vector<384x128xbf16>
    %cst_131 = arith.constant dense<0.000000e+00> : vector<128x128xf32>
    %171 = tpu.matmul %169, %170, %cst_131 {dimension_numbers = #tpu.dot_dimension_numbers<[1], [0], [0], [1], [0, 0, 1, 1], [], []>} : vector<128x384xbf16>, vector<384x128xbf16>, vector<128x128xf32> -> vector<128x128xf32>
    %c0_132 = arith.constant 0 : index
    %c0_133 = arith.constant 0 : index
    %172 = vector.load %arg8[%c0_132, %c0_133] : memref<1x128xf32, #tpu.memory_space<vmem>>, vector<1x128xf32>
    %173 = vector.broadcast %172 : vector<1x128xf32> to vector<128x128xf32>
    %174 = arith.addf %171, %173 : vector<128x128xf32>
    %175 = vector.extract_strided_slice %174 {offsets = [0, 0], sizes = [128, 1], strides = [1, 1]} : vector<128x128xf32> to vector<128x1xf32>
    %176 = math.tanh %175 : vector<128x1xf32>
    %cst_134 = arith.constant 1.000000e+00 : f32
    %177 = vector.broadcast %cst_134 : f32 to vector<128x1xf32>
    %178 = arith.addf %176, %177 : vector<128x1xf32>
    %cst_135 = arith.constant 5.000000e-01 : f32
    %179 = vector.broadcast %cst_135 : f32 to vector<128x1xf32>
    %180 = arith.mulf %178, %179 : vector<128x1xf32>
    %c0_136 = arith.constant 0 : index
    %c0_137 = arith.constant 0 : index
    %181 = vector.load %arg9[%c0_136, %c0_137] : memref<128x1xf32, #tpu.memory_space<vmem>>, vector<128x1xf32>
    tpu.vector_store %arg9[%c0_136, %c0_137], %180 {strides = array<i32>} : memref<128x1xf32, #tpu.memory_space<vmem>>, vector<128x1xf32>,
    return
  }
  func.func @transform_0(%arg0: i32) -> (i32, i32) {
    %c0_i32 = arith.constant 0 : i32
    %c0_i32_0 = arith.constant 0 : i32
    return %arg0, %c0_i32 : i32, i32
  }
  func.func @transform_1(%arg0: i32) -> (i32, i32) {
    %c0_i32 = arith.constant 0 : i32
    %c0_i32_0 = arith.constant 0 : i32
    %c0_i32_1 = arith.constant 0 : i32
    return %c0_i32, %c0_i32_0 : i32, i32
  }
  func.func @transform_2(%arg0: i32) -> (i32, i32) {
    %c0_i32 = arith.constant 0 : i32
    %c0_i32_0 = arith.constant 0 : i32
    %c0_i32_1 = arith.constant 0 : i32
    return %c0_i32, %c0_i32_0 : i32, i32
  }
  func.func @transform_3(%arg0: i32) -> (i32, i32) {
    %c0_i32 = arith.constant 0 : i32
    %c0_i32_0 = arith.constant 0 : i32
    %c0_i32_1 = arith.constant 0 : i32
    return %c0_i32, %c0_i32_0 : i32, i32
  }
  func.func @transform_4(%arg0: i32) -> (i32, i32, i32) {
    %c0_i32 = arith.constant 0 : i32
    %c0_i32_0 = arith.constant 0 : i32
    %c0_i32_1 = arith.constant 0 : i32
    %c0_i32_2 = arith.constant 0 : i32
    return %c0_i32, %c0_i32_0, %c0_i32_1 : i32, i32, i32
  }
  func.func @transform_5(%arg0: i32) -> (i32, i32, i32) {
    %c0_i32 = arith.constant 0 : i32
    %c0_i32_0 = arith.constant 0 : i32
    %c0_i32_1 = arith.constant 0 : i32
    %c0_i32_2 = arith.constant 0 : i32
    return %c0_i32, %c0_i32_0, %c0_i32_1 : i32, i32, i32
  }
  func.func @transform_6(%arg0: i32) -> (i32, i32) {
    %c0_i32 = arith.constant 0 : i32
    %c0_i32_0 = arith.constant 0 : i32
    %c0_i32_1 = arith.constant 0 : i32
    return %c0_i32, %c0_i32_0 : i32, i32
  }
  func.func @transform_7(%arg0: i32) -> (i32, i32) {
    %c0_i32 = arith.constant 0 : i32
    %c0_i32_0 = arith.constant 0 : i32
    %c0_i32_1 = arith.constant 0 : i32
    return %c0_i32, %c0_i32_0 : i32, i32
  }
  func.func @transform_8(%arg0: i32) -> (i32, i32) {
    %c0_i32 = arith.constant 0 : i32
    %c0_i32_0 = arith.constant 0 : i32
    return %arg0, %c0_i32 : i32, i32
  }
}

</mosaic_0001>

<bundles_post_ra>
// kernel: tpu_custom_call.1
= control target key start
LH: loop header
LB: loop body
LE: loop exit
PB: predicated region body
PF: predicated region fallthrough
CT: control target
= control target key end

     0   :  { %13 = vsyncpa [#allocation4], 0  ;;  %s10201_s27 = smov 0   ;;  %s14888_s0 = inlined_call_operand.vmem [shape: f32[256,2], index: 0, kind: input, shape index: {}]   ;;  %s14889_s1 = inlined_call_operand.vmem [shape: f32[8,128], index: 1, kind: input, shape index: {}]   ;;  %s14890_s2 = inlined_call_operand.vmem [shape: bf16[128,128], index: 2, kind: input, shape index: {}]   ;;  %s14891_s3 = inlined_call_operand.vmem [shape: f32[1,128], index: 3, kind: input, shape index: {}]   ;;  %s14892_s4 = inlined_call_operand.hbm [shape: bf16[7,384,128], index: 4, kind: input, shape index: {}]   ;;  %s14893_s5 = inlined_call_operand.vmem [shape: f32[7,1,128], index: 5, kind: input, shape index: {}]   ;;  %s14894_s6 = inlined_call_operand.vmem [shape: bf16[384,128], index: 6, kind: input, shape index: {}]   ;;  %s14895_s7 = inlined_call_operand.vmem [shape: f32[1,128], index: 7, kind: input, shape index: {}]   ;;  %s14896_s8 = inlined_call_operand.vmem [shape: f32[256,1], index: 8, kind: output, shape index: {}]  }
   0x1 LB: > { %s8267_s28 = sadd.s32 4294967295, %s10143_s27   ;;  %p8269_p0 = scmp.ge.s32.totalorder %s10143_s27, 1  ;;  %s10143_s27 = sphi %s10201_s27, %s19_s27  }
   0x2   : > { %p223_p1 = scmp.lt.s32.totalorder %s10143_s27, 3  ;;  %s10145_s29 = smov [#allocation3]  }
   0x3   : > { %s244_s30 = sshll.u32 %s10145_s29, 4  ;;  %p10215_p3 = scmp.eq.s32.totalorder %s8267_s28, 0  ;;  %s245_s30 = int_to_ptr.vmem [resolvable:$true] %s244_s30 }
   0x4   : > { %p10209_p2 = pnand %p8269_p0, %p223_p1  ;;  %s10105_s14 = scalar_lea.hbm %s14892_s4, 21504 }
   0x5   : > { %s15021_s10 = scalar_select %p10215_p3, 1, 0 }
   0x6   : > { %s15020_s9 = scalar_select %p10209_p2, 1, 0 }
   0x7   : > { %p9699_p4 = pneg %p10209_p2  ;;  %p10106_p6 = scmp.ne.s32.totalorder %s14892_s4, %s10105_s14 }
   0x8   : > { %p10112_p10 = scmp.lt.u32.totalorder %s10105_s14, %s14892_s4 }
   0x9   : > { %p10223_p5 = pnand %p10215_p3, %p9699_p4 }
   0xb   : > { %p10107_p7 = pneg %p10223_p5 }
   0xd   : > { %p10108_p8 = pnand %p10107_p7, %p10106_p6 }
   0xf   : > { %p10109_p9 = pneg %p10108_p8 }
  0x11   : > { %p10114_p11 = pnand %p10112_p10, %p10109_p9 }
  0x13   : > { %10117 = shalt.err (!%p10114_p11)
}
  0x14   : > { %s10118_s19 = scalar_lea.vmem %s245_s30, 21504  ;;  %p10126_p1 = scmp.lt.s32.totalorder %s245_s30, %s245_s30 }
  0x15   : > { %p10119_p12 = scmp.ne.s32.totalorder %s245_s30, %s10118_s19  ;;  %p10127_p4 = scmp.lt.s32.totalorder %s10118_s19, %s10118_s19 }
  0x17   : > { %p10121_p13 = pnand %p10119_p12, %p10107_p7  ;;  %p10128_p3 = por %p10127_p4, %p10126_p1 }
  0x19   : > { %p10122_p0 = pneg %p10121_p13 }
  0x1b   : > { %p10129_p2 = pnand %p10128_p3, %p10122_p0 }
  0x1d   : > { %10132 = shalt.err (!%p10129_p2)
}
  0x1e   : > { %s10146_s20 = smov 64   ;;  %s10147_s21 = smov 4  }
  0x1f   : > { %9702 = dma.hbm_to_vmem [thread:$0]  (!%p10223_p5), %s14892_s4, 21504, %s245_s30, [#allocation4], %s10146_s20, %s10146_s20, %s10147_s21  }
  0x20   : > { %p15023_p6 = scmp.ne.s32.totalorder %s15020_s9, 0 }
  0x22   : > { %278 = sbr.rel (%p15023_p6) target bundleno = 3088 (0xc10), region = 52 }
  0x29   : > { %p15024_p8 = scmp.ne.s32.totalorder %s15021_s10, 0 }
  0x2b   : > { %10138 = dma.done.wait (%p15024_p8), [#allocation4], 21504  }
  0x2c   : > { %10140 = vsyncadd (%p15024_p8), [#allocation4], 4294945792  ;;  %s8274_s24 = sshll.u32 %s8267_s28, 4  ;;  %v10148_v0 = vmov 1   ;;  %v14900_v1 = vmov 0   ;;  %v422_v3 = vlaneseq  ;;  %v10308_v24 = vld [vmem:[%s14889_s1] sm:$0xff] }
  0x2d   : > { %9725 = vset.pattern.permute.xlu1 %v10148_v0  ;;  %9724 = vset.pattern.permute.xlu0 %v14900_v1  ;;  %p313_p2 = scmp.lt.s32.totalorder %s8274_s24, 31 }
  0x2e   : > { %4481 = vmatprep.mubr.bf16.mxu1 %v14900_v1  ;;  %v10269_v7 = vshrl.u32 %v422_v3, 7  ;;  %v14925_v3 = vmov 2475754826  }
  0x2f   : > { %s15277_s24 = smov (!%p313_p2, %s8274_s24), 31 }
  0x30   : > { %s8275_s25 = sshll.u32 %s15277_s24, 3  ;;  %v2176_v8 = vsub.s32 1, %v10269_v7  ;;  %v2196_v9 = vsub.s32 3, %v10269_v7  ;;  %v424_v22 = vsub.s32 0, %v10269_v7  ;;  %v444_v23 = vsub.s32 2, %v10269_v7 }
  0x31   : > { %s10262_s30 = scalar_lea.vmem %s14888_s0, %s8275_s25  ;;  %s14829_s18 = scalar_lea.vmem %s14896_s8, %s8275_s25 }
  0x32   : > { %v325_v2 = vld [vmem:[%s10262_s30] sm:$0xff]  ;;  %v326_v4 = vld [vmem:[%s10262_s30 + $0x8] sm:$0xff]  ;;  %v327_v5 = vld [vmem:[%s10262_s30 + $0x10] sm:$0xff]  ;;  %v10311_v25 = vrot.slane %v10308_v24, %v2176_v8  ;;  %v10314_v26 = vrot.slane %v10308_v24, %v424_v22  ;;  %v10319_v27 = vrot.slane %v10308_v24, %v2196_v9  ;;  %v10322_v28 = vrot.slane %v10308_v24, %v444_v23 }
  0x33   : > { %2111 = vperm.xlu1 %9725, %v325_v2   ;;  %344 = vperm.xlu0 %9724, %v325_v2   ;;  %v328_v6 = vld [vmem:[%s10262_s30 + $0x18] sm:$0xff]  ;;  %v330_v10 = vld [vmem:[%s10262_s30 + $0x28] sm:$0xff]  ;;  %v329_v11 = vld [vmem:[%s10262_s30 + $0x20] sm:$0xff]  ;;  %v14910_v9 = vmov 2102212464  }
  0x34   : > { %v331_v12 = vld [vmem:[%s10262_s30 + $0x30] sm:$0xff]  ;;  %v332_v14 = vld [vmem:[%s10262_s30 + $0x38] sm:$0xff]  ;;  %v334_v15 = vld [vmem:[%s10262_s30 + $0x48] sm:$0xff]  ;;  %15025 = vst [vmem:[#allocation6_spill] sm:$0xff] %v10311_v25 }
  0x35   : > { %v335_v13 = vld [vmem:[%s10262_s30 + $0x50] sm:$0xff]  ;;  %v333_v16 = vld [vmem:[%s10262_s30 + $0x40] sm:$0xff]  ;;  %v338_v17 = vld [vmem:[%s10262_s30 + $0x68] sm:$0xff]  ;;  %15026 = vst [vmem:[#allocation7_spill] sm:$0xff] %v10314_v26 }
  0x36   : > { %v339_v18 = vld [vmem:[%s10262_s30 + $0x70] sm:$0xff]  ;;  %v336_v19 = vld [vmem:[%s10262_s30 + $0x58] sm:$0xff]  ;;  %v337_v20 = vld [vmem:[%s10262_s30 + $0x60] sm:$0xff]  ;;  %15027 = vst [vmem:[#allocation8_spill] sm:$0xff] %v10319_v27 }
  0x37   : > { %2115 = vperm.xlu1 %9725, %v326_v4   ;;  %9727 = vset.pattern.permute.xlu0 %v10148_v0  ;;  %v340_v21 = vld [vmem:[%s10262_s30 + $0x78] sm:$0xff]  ;;  %15028 = vst [vmem:[#allocation9_spill] sm:$0xff] %v10322_v28 }
  0x38   : > { %2119 = vperm.xlu0 %9727, %v327_v5  }
  0x3b   : > { %9726 = vset.pattern.permute.xlu1 %v14900_v1 }
  0x3c   : > { %359 = vperm.xlu1 %9726, %v328_v6   ;;  %9728 = vset.pattern.permute.xlu0 %v14900_v1 }
  0x3d   : > { %349 = vperm.xlu0 %9728, %v326_v4  }
  0x40   : > { %9729 = vset.pattern.permute.xlu1 %v10148_v0 }
  0x41   : > { %2123 = vperm.xlu1 %9729, %v328_v6   ;;  %354 = vperm.xlu0 %9728, %v327_v5   ;;  %v14922_v6 = vmov 2131351028  }
  0x45   : > { %9730 = vset.pattern.permute.xlu1 %v14900_v1  ;;  %369 = vperm.xlu0 %9728, %v330_v10  }
  0x46   : > { %364 = vperm.xlu1 %9730, %v329_v11  }
  0x49   : > { %374 = vperm.xlu0 %9728, %v331_v12  }
  0x4a   : > { %9731 = vset.pattern.permute.xlu1 %v10148_v0 }
  0x4b   : > { %2127 = vperm.xlu1 %9731, %v329_v11  }
  0x4d   : > { %9733 = vset.pattern.permute.xlu0 %v10148_v0 }
  0x4e   : > { %2135 = vperm.xlu0 %9733, %v331_v12  }
  0x4f   : > { %2131 = vperm.xlu1 %9731, %v330_v10  }
  0x52   : > { %2151 = vperm.xlu0 %9733, %v335_v13  }
  0x53   : > { %9732 = vset.pattern.permute.xlu1 %v14900_v1 }
  0x54   : > { %379 = vperm.xlu1 %9732, %v332_v14  }
  0x56   : > { %9738 = vset.pattern.permute.xlu0 %v14900_v1 }
  0x57   : > { %389 = vperm.xlu0 %9738, %v334_v15  }
  0x58   : > { %9734 = vset.pattern.permute.xlu1 %v10148_v0 }
  0x59   : > { %2139 = vperm.xlu1 %9734, %v332_v14   ;;  %v14905_v14 = vmov 920167782  }
  0x5b   : > { %394 = vperm.xlu0 %9738, %v335_v13  }
  0x5d   : > { %9735 = vset.pattern.permute.xlu1 %v14900_v1 }
  0x5e   : > { %384 = vperm.xlu1 %9735, %v333_v16  }
  0x5f   : > { %409 = vperm.xlu0 %9738, %v338_v17  }
  0x62   : > { %9736 = vset.pattern.permute.xlu1 %v10148_v0 }
  0x63   : > { %2143 = vperm.xlu1 %9736, %v333_v16   ;;  %414 = vperm.xlu0 %9738, %v339_v18  }
  0x67   : > { %2147 = vperm.xlu1 %9736, %v334_v15   ;;  %9743 = vset.pattern.permute.xlu0 %v10148_v0 }
  0x68   : > { %2167 = vperm.xlu0 %9743, %v339_v18   ;;  %v14908_v18 = vmov 1326507024  }
  0x6b   : > { %9737 = vset.pattern.permute.xlu1 %v14900_v1 }
  0x6c   : > { %399 = vperm.xlu1 %9737, %v336_v19  }
  0x70   : > { %9739 = vset.pattern.permute.xlu1 %v10148_v0 }
  0x71   : > { %2155 = vperm.xlu1 %9739, %v336_v19  }
  0x75   : > { %9740 = vset.pattern.permute.xlu1 %v14900_v1 }
  0x76   : > { %404 = vperm.xlu1 %9740, %v337_v20  }
  0x7a   : > { %9741 = vset.pattern.permute.xlu1 %v10148_v0 }
  0x7b   : > { %2159 = vperm.xlu1 %9741, %v337_v20  }
  0x7f   : > { %2163 = vperm.xlu1 %9741, %v338_v17  }
  0x83   : > { %9742 = vset.pattern.permute.xlu1 %v14900_v1 }
  0x84   : > { %419 = vperm.xlu1 %9742, %v340_v21  }
  0x88   : > { %9744 = vset.pattern.permute.xlu1 %v10148_v0  ;;  %v14927_v0 = vmov 683565275  }
  0x89   : > { %2171 = vperm.xlu1 %9744, %v340_v21  }
  0xb2   : > { %v10324_v29 = vpop.permute.xlu1 %2111  ;;  %v10326_v30 = vpop.permute.xlu0 %344 }
  0xb3   : > { %v2178_v31 = vmul.f32 %v10311_v25, %v10324_v29  ;;  %v426_v32 = vmul.f32 %v10314_v26, %v10326_v30 }
  0xb5   : > { %v10333_v33 = vadd.f32 %v10319_v27, %v2178_v31  ;;  %v10336_v34 = vadd.f32 %v10322_v28, %v426_v32 }
  0xb6   : > { %v10338_v35 = vpop.permute.xlu1 %2115 }
  0xb7   : > { %v2214_v36 = vand.u32 2147483647, %v10333_v33  ;;  %v2217_v37 = vand.u32 2139095040, %v10333_v33  ;;  %v462_v38 = vand.u32 2147483647, %v10336_v34  ;;  %v465_v39 = vand.u32 2139095040, %v10336_v34 }
  0xb8   : > { %v2179_v42 = vmul.f32 %v10311_v25, %v10338_v35  ;;  %vm2216_vm13 = vcmp.lt.s32.totalorder %v10333_v33, 0 }
  0xb9   : > { %v2218_v40 = vshrl.u32 %v2217_v37, 23  ;;  %v2221_v41 = vand.u32 8388607, %v2214_v36  ;;  %v466_v43 = vshrl.u32 %v465_v39, 23  ;;  %v469_v44 = vand.u32 8388607, %v462_v38 }
  0xba   : > { %v10351_v46 = vadd.f32 %v10319_v27, %v2179_v42 }
  0xbb   : > { %v8342_v45 = vadd.s32 4294967169, %v2218_v40  ;;  %v8278_v47 = vadd.s32 4294967169, %v466_v43  ;;  %v2222_v48 = vor.u32 8388608, %v2221_v41  ;;  %v470_v50 = vor.u32 8388608, %v469_v44 }
  0xbc   : > { %v2320_v52 = vand.u32 2139095040, %v10351_v46  ;;  %v2317_v62 = vand.u32 2147483647, %v10351_v46 }
  0xbd   : > { %v2224_v49 = vadd.s32 1, %v8342_v45  ;;  %v472_v51 = vadd.s32 1, %v8278_v47  ;;  %v10354_v57 = vshll.u32 %v2222_v48, 8  ;;  %v10358_v61 = vshll.u32 %v470_v50, 8 }
  0xbe   : > { %v2321_v54 = vshrl.u32 %v2320_v52, 23 }
  0xbf   : > { %vm2225_vm0 = vcmp.gt.s32.totalorder %v2224_v49, 0  ;;  %vm473_vm1 = vcmp.gt.s32.totalorder %v472_v51, 0 }
  0xc0   : > { %v2226_v53 = vsel %vm2225_vm0, %v2224_v49, 0  ;;  %v474_v58 = vsel %vm473_vm1, %v472_v51, 0  ;;  %v10363_v5 = vadd.s32 4294967169, %v2321_v54 }
  0xc1   : > { %v2227_v55 = vshrl.u32 %v2226_v53, 5  ;;  %v2228_v56 = vand.u32 31, %v2226_v53  ;;  %v10356_v59 = vshrl.u32 %v474_v58, 5  ;;  %v476_v60 = vand.u32 31, %v474_v58 }
  0xc3   : > { %v2229_v63 = vsub.s32 32, %v2228_v56  ;;  %v2231_v2 = vshll.u32 %v14927_v0, %v2228_v56  ;;  %v2234_v4 = vshll.u32 %v14925_v3, %v2228_v56  ;;  %v2237_v8 = vshll.u32 %v14922_v6, %v2228_v56 }
  0xc4   : > { %v2240_v10 = vshll.u32 %v14910_v9, %v2228_v56  ;;  %vm2246_vm2 = vcmp.lt.s32.totalorder %v2227_v55, 1  ;;  %vm2247_vm3 = vcmp.lt.s32.totalorder %v2227_v55, 2  ;;  %v2243_v15 = vshll.u32 %v14905_v14, %v2228_v56 }
  0xc5   : > { %v2232_v11 = vshrl.u32 %v14925_v3, %v2229_v63  ;;  %v2235_v12 = vshrl.u32 %v14922_v6, %v2229_v63  ;;  %v2238_v13 = vshrl.u32 %v14910_v9, %v2229_v63  ;;  %v2230_v16 = vshrl.u32 %v14927_v0, %v2229_v63 }
  0xc6   : > { %v2241_v17 = vshrl.u32 %v14905_v14, %v2229_v63  ;;  %v2244_v19 = vshrl.u32 %v14908_v18, %v2229_v63  ;;  %vm2248_vm4 = vcmp.lt.s32.totalorder %v2227_v55, 3  ;;  %v477_v23 = vsub.s32 32, %v476_v60 }
  0xc7   : > { %v2233_v20 = vor.u32 %v2232_v11, %v2231_v2  ;;  %v2236_v21 = vor.u32 %v2235_v12, %v2234_v4  ;;  %v2239_v22 = vor.u32 %v2238_v13, %v2237_v8  ;;  %vm2249_vm5 = vcmp.lt.s32.totalorder %v2227_v55, 4 }
  0xc8   : > { %v2242_v31 = vor.u32 %v2241_v17, %v2240_v10  ;;  %v2245_v32 = vor.u32 %v2244_v19, %v2243_v15  ;;  %v479_v37 = vshll.u32 %v14927_v0, %v476_v60  ;;  %v482_v47 = vshll.u32 %v14925_v3, %v476_v60 }
  0xc9   : > { %v2250_v39 = vsel %vm2246_vm2, %v2230_v16, %v2233_v20  ;;  %v2251_v40 = vsel %vm2249_vm5, %v2239_v22, 2102212464  ;;  %v2254_v41 = vsel %vm2246_vm2, %v2233_v20, %v2236_v21  ;;  %v2258_v42 = vsel %vm2246_vm2, %v2236_v21, %v2239_v22 }
  0xca   : > { %v2252_v43 = vsel %vm2248_vm4, %v2236_v21, %v2251_v40  ;;  %v2255_v44 = vsel %vm2249_vm5, %v2242_v31, 920167782  ;;  %v2259_v45 = vsel %vm2249_vm5, %v2245_v32, 1326507024  ;;  %v478_v50 = vshrl.u32 %v14927_v0, %v477_v23 }
  0xcb   : > { %v2256_v48 = vsel %vm2248_vm4, %v2239_v22, %v2255_v44  ;;  %v2260_v49 = vsel %vm2248_vm4, %v2242_v31, %v2259_v45  ;;  %v480_v51 = vshrl.u32 %v14925_v3, %v477_v23  ;;  %v2253_v52 = vsel %vm2247_vm3, %v2250_v39, %v2252_v43 }
  0xcc   : > { %v2257_v53 = vsel %vm2247_vm3, %v2254_v41, %v2256_v48  ;;  %v2261_v54 = vsel %vm2247_vm3, %v2258_v42, %v2260_v49  ;;  %v483_v56 = vshrl.u32 %v14922_v6, %v477_v23  ;;  %v485_v11 = vshll.u32 %v14922_v6, %v476_v60  ;;  %v10417_v48 = vpop.permute.xlu0 %2119 }
  0xcd   : > { %v10389_v58 = vmul.u32.u64.low %v10354_v57, %v2261_v54  ;;  %v10390_v63 = vmul.u32.u64.high %v10354_v57, %v2261_v54, %v10389_v58  ;;  %v10393_v2 = vmul.u32.u64.low %v10354_v57, %v2257_v53  ;;  %v10394_v4 = vmul.u32.u64.high %v10354_v57, %v2257_v53, %v10393_v2 }
  0xce   : > { %v481_v8 = vor.u32 %v480_v51, %v479_v37  ;;  %v484_v10 = vor.u32 %v483_v56, %v482_v47  ;;  %v486_v12 = vshrl.u32 %v14910_v9, %v477_v23  ;;  %v488_v55 = vshll.u32 %v14910_v9, %v476_v60 }
  0xcf   : > { %v489_v13 = vshrl.u32 %v14905_v14, %v477_v23  ;;  %v491_v15 = vshll.u32 %v14905_v14, %v476_v60  ;;  %v492_v16 = vshrl.u32 %v14908_v18, %v477_v23  ;;  %v2269_v17 = vmul.u32 %v10354_v57, %v2253_v52 }
  0xd0   : > { %v487_v19 = vor.u32 %v486_v12, %v485_v11  ;;  %vm494_vm6 = vcmp.lt.s32.totalorder %v10356_v59, 1  ;;  %vm495_vm7 = vcmp.lt.s32.totalorder %v10356_v59, 2  ;;  %vm2271_vm8 = vc.u32 %v10390_v63, %v10393_v2 }
  0xd1   : > { %v2272_v20 = vadd.s32 1, %v10394_v4  ;;  %v490_v21 = vor.u32 %v489_v13, %v488_v55  ;;  %vm496_vm9 = vcmp.lt.s32.totalorder %v10356_v59, 3  ;;  %v493_v22 = vor.u32 %v492_v16, %v491_v15 }
  0xd2   : > { %vm497_vm10 = vcmp.lt.s32.totalorder %v10356_v59, 4  ;;  %v498_v60 = vsel %vm494_vm6, %v478_v50, %v481_v8  ;;  %v502_v23 = vsel %vm494_vm6, %v481_v8, %v484_v10  ;;  %v506_v37 = vsel %vm494_vm6, %v484_v10, %v487_v19 }
  0xd3   : > { %v2273_v57 = vsel %vm2271_vm8, %v2272_v20, %v10394_v4  ;;  %v499_v31 = vsel %vm497_vm10, %v487_v19, 2102212464  ;;  %v503_v32 = vsel %vm497_vm10, %v490_v21, 920167782  ;;  %v507_v42 = vsel %vm497_vm10, %v493_v22, 1326507024 }
  0xd4   : > { %v2274_v39 = vadd.s32 %v2273_v57, %v2269_v17  ;;  %v500_v40 = vsel %vm496_vm9, %v484_v10, %v499_v31  ;;  %v504_v41 = vsel %vm496_vm9, %v487_v19, %v503_v32  ;;  %v508_v45 = vsel %vm496_vm9, %v490_v21, %v507_v42 }
  0xd5   : > { %v501_v43 = vsel %vm495_vm7, %v498_v60, %v500_v40  ;;  %v505_v44 = vsel %vm495_vm7, %v502_v23, %v504_v41  ;;  %v2327_v47 = vadd.s32 1, %v10363_v5  ;;  %v509_v50 = vsel %vm495_vm7, %v506_v37, %v508_v45  ;;  %v10432_v5 = vpop.permute.xlu1 %359 }
  0xd6   : > { %v2275_v49 = vadd.s32 536870912, %v2274_v39  ;;  %v10422_v51 = vmul.u32.u64.low %v10358_v61, %v505_v44  ;;  %v10423_v52 = vmul.u32.u64.high %v10358_v61, %v505_v44, %v10422_v51  ;;  %v2324_v56 = vand.u32 8388607, %v2317_v62 }
  0xd7   : > { %v10427_v53 = vmul.u32.u64.low %v10358_v61, %v509_v50  ;;  %v10428_v54 = vmul.u32.u64.high %v10358_v61, %v509_v50, %v10427_v53  ;;  %vm2328_vm11 = vcmp.gt.s32.totalorder %v2327_v47, 0  ;;  %v2180_v59 = vmul.f32 %v10311_v25, %v10417_v48 }
  0xd8   : > { %v2276_v58 = vshrl.u32 %v2275_v49, 30  ;;  %v2329_v4 = vsel %vm2328_vm11, %v2327_v47, 0  ;;  %v517_v8 = vmul.u32 %v10358_v61, %v501_v43  ;;  %v520_v12 = vadd.s32 1, %v10423_v52 }
  0xd9   : > { %v2331_v10 = vand.u32 31, %v2329_v4  ;;  %v429_v55 = vmul.f32 %v10314_v26, %v10432_v5  ;;  %vm519_vm12 = vc.u32 %v10428_v54, %v10422_v51  ;;  %v2325_v13 = vor.u32 8388608, %v2324_v56 }
  0xda   : > { %v2277_v11 = vshll.u32 %v2276_v58, 30  ;;  %v521_v17 = vsel %vm519_vm12, %v520_v12, %v10423_v52  ;;  %v10446_v19 = vadd.f32 %v10319_v27, %v2180_v59  ;;  %v3936_v61 = vsub.s32 6, %v10269_v7 }
  0xdb   : > { %v2332_v15 = vsub.s32 32, %v2331_v10  ;;  %v522_v20 = vadd.s32 %v521_v17, %v517_v8  ;;  %v10453_v60 = vadd.f32 %v10322_v28, %v429_v55  ;;  %v2270_v23 = vadd.s32 %v10393_v2, %v10390_v63 }
  0xdc   : > { %v10442_v16 = vsub.s32 %v2274_v39, %v2277_v11  ;;  %v14903_v22 = vand.u32 2147483647, %v10446_v19  ;;  %v10458_v32 = vshll.u32 %v2325_v13, 8  ;;  %v10461_v39 = vshrl.u32 %v2329_v4, 5 }
  0xdd   : > { %v523_v57 = vadd.s32 536870912, %v522_v20  ;;  %v2341_v31 = vshrl.u32 %v14910_v9, %v2332_v15  ;;  %v2335_v40 = vshrl.u32 %v14925_v3, %v2332_v15  ;;  %v2338_v41 = vshrl.u32 %v14922_v6, %v2332_v15 }
  0xde   : > { %v2280_v21 = vsub.s32 0, %v10442_v16  ;;  %v2300_v42 = vsub.s32 4, %v2276_v58  ;;  %v2340_v44 = vshll.u32 %v14922_v6, %v2331_v10  ;;  %v2344_v63 = vshrl.u32 %v14905_v14, %v2332_v15 }
  0xdf   : > { %v10465_v43 = vshrl.u32 %v523_v57, 30  ;;  %v2334_v45 = vshll.u32 %v14927_v0, %v2331_v10  ;;  %v2337_v47 = vshll.u32 %v14925_v3, %v2331_v10  ;;  %v2343_v49 = vshll.u32 %v14910_v9, %v2331_v10 }
  0xe0   : > { %v8343_v37 = vmin.u32 %v2280_v21, %v10442_v16  ;;  %v2342_v52 = vor.u32 %v2341_v31, %v2340_v44  ;;  %v2347_v53 = vshrl.u32 %v14908_v18, %v2332_v15  ;;  %v2423_v56 = vand.u32 2139095040, %v10446_v19 }
  0xe1   : > { %v525_v50 = vshll.u32 %v10465_v43, 30  ;;  %v2336_v59 = vor.u32 %v2335_v40, %v2334_v45  ;;  %v2339_v8 = vor.u32 %v2338_v41, %v2337_v47  ;;  %v2345_v11 = vor.u32 %v2344_v63, %v2343_v49 }
  0xe2   : > { %v2282_v2 = vclz %v8343_v37  ;;  %v10477_v12 = vsel %vm2216_vm13, %v2300_v42, %v2276_v58  ;;  %v2333_v13 = vshrl.u32 %v14927_v0, %v2332_v15  ;;  %v2346_v17 = vshll.u32 %v14905_v14, %v2331_v10 }
  0xe3   : > { %v10479_v55 = vsub.s32 %v522_v20, %v525_v50  ;;  %vm2349_vm15 = vcmp.lt.s32.totalorder %v10461_v39, 1  ;;  %vm2350_vm0 = vcmp.lt.s32.totalorder %v10461_v39, 2  ;;  %vm2352_vm1 = vcmp.lt.s32.totalorder %v10461_v39, 4 }
  0xe4   : > { %v8344_v4 = vadd.s32 4294967294, %v2282_v2  ;;  %vm10488_vm2 = vcmp.le.f32.partialorder %v2214_v36, 0.7853982  ;;  %v2348_v57 = vor.u32 %v2347_v53, %v2346_v17  ;;  %v2354_v10 = vsel %vm2352_vm1, %v2342_v52, 2102212464 }
  0xe5   : > { %v528_v20 = vsub.s32 0, %v10479_v55  ;;  %v2357_v37 = vsel %vm2349_vm15, %v2336_v59, %v2339_v8  ;;  %v2358_v40 = vsel %vm2352_vm1, %v2345_v11, 920167782  ;;  %vm2351_vm3 = vcmp.lt.s32.totalorder %v10461_v39, 3 }
  0xe6   : > { %vm8345_vm14 = vcmp.lt.s32.totalorder %v8344_v4, 0  ;;  %v2353_v42 = vsel %vm2349_vm15, %v2333_v13, %v2336_v59  ;;  %v2359_v2 = vsel %vm2351_vm3, %v2342_v52, %v2358_v40  ;;  %v2361_v45 = vsel %vm2349_vm15, %v2339_v8, %v2342_v52 }
  0xe7   : > { %v2285_v58 = vsel %vm8345_vm14, 0, %v8344_v4  ;;  %v8279_v41 = vmin.u32 %v528_v20, %v10479_v55  ;;  %v2355_v49 = vsel %vm2351_vm3, %v2339_v8, %v2354_v10  ;;  %v2360_v50 = vsel %vm2350_vm0, %v2357_v37, %v2359_v2 }
  0xe8   : > { %v2286_v15 = vsub.s32 32, %v2285_v58  ;;  %v2290_v31 = vsub.s32 4294967266, %v2285_v58  ;;  %v2287_v36 = vshll.u32 %v10442_v16, %v2285_v58  ;;  %v2362_v16 = vsel %vm2352_vm1, %v2348_v57, 1326507024 }
  0xe9   : > { %v530_v47 = vclz %v8279_v41  ;;  %vm464_vm4 = vcmp.lt.s32.totalorder %v10336_v34, 0  ;;  %v2363_v17 = vsel %vm2351_vm3, %v2345_v11, %v2362_v16  ;;  %v2424_v59 = vshrl.u32 %v2423_v56, 23 }
  0xea   : > { %v2288_v44 = vshrl.u32 %v2270_v23, %v2286_v15  ;;  %v2291_v63 = vadd.s32 127, %v2290_v31  ;;  %v2364_v13 = vsel %vm2350_vm0, %v2361_v45, %v2363_v17  ;;  %v10524_v57 = vand.u32 8388607, %v14903_v22 }
  0xeb   : > { %v8280_v23 = vadd.s32 4294967294, %v530_v47  ;;  %v10514_v52 = vmul.u32.u64.low %v10458_v32, %v2360_v50  ;;  %v10515_v58 = vmul.u32.u64.high %v10458_v32, %v2360_v50, %v10514_v52  ;;  %v518_v56 = vadd.s32 %v10422_v51, %v10428_v54 }
  0xec   : > { %v2289_v53 = vor.u32 %v2288_v44, %v2287_v36  ;;  %v2292_v4 = vshll.u32 %v2291_v63, 23  ;;  %v10519_v20 = vmul.u32.u64.low %v10458_v32, %v2364_v13  ;;  %v10520_v10 = vmul.u32.u64.high %v10458_v32, %v2364_v13, %v10519_v20 }
  0xed   : > { %vm8281_vm5 = vcmp.lt.s32.totalorder %v8280_v23, 0  ;;  %v2356_v11 = vsel %vm2350_vm0, %v2353_v42, %v2355_v49  ;;  %v8350_v15 = vadd.s32 4294967169, %v2424_v59  ;;  %v2303_v40 = vsel %vm10488_vm2, 0, %v10477_v12 }
  0xee   : > { %v2293_v8 = vor.u32 4788187, %v2292_v4  ;;  %v2296_v37 = vcvt.s32.f32 %v2289_v53  ;;  %v533_v36 = vsel %vm8281_vm5, 0, %v8280_v23  ;;  %v548_v63 = vsub.s32 4, %v10465_v43 }
  0xef   : > { %v534_v41 = vsub.s32 32, %v533_v36  ;;  %v538_v44 = vsub.s32 4294967266, %v533_v36  ;;  %v2375_v2 = vadd.s32 1, %v10515_v58  ;;  %v2372_v51 = vmul.u32 %v10458_v32, %v2356_v11 }
  0xf0   : > { %v2294_v31 = vand.u32 2147483647, %v2293_v8  ;;  %vm2374_vm6 = vc.u32 %v10520_v10, %v10514_v52  ;;  %v2430_v54 = vadd.s32 1, %v8350_v15  ;;  %v535_v39 = vshll.u32 %v10479_v55, %v533_v36 }
  0xf1   : > { %v536_v42 = vshrl.u32 %v518_v56, %v534_v41  ;;  %v539_v47 = vadd.s32 127, %v538_v44  ;;  %v2376_v12 = vsel %vm2374_vm6, %v2375_v2, %v10515_v58  ;;  %v10540_v50 = vand.u32 3, %v2303_v40 }
  0xf2   : > { %v2297_v45 = vmul.f32 %v2296_v37, %v2294_v31  ;;  %v2377_v16 = vadd.s32 %v2376_v12, %v2372_v51  ;;  %vm2431_vm7 = vcmp.gt.s32.totalorder %v2430_v54, 0  ;;  %v10545_v32 = vsel %vm464_vm4, %v548_v63, %v10465_v43 }
  0xf3   : > { %v537_v53 = vor.u32 %v536_v42, %v535_v39  ;;  %v540_v4 = vshll.u32 %v539_v47, 23  ;;  %v2432_v17 = vsel %vm2431_vm7, %v2430_v54, 0  ;;  %v2428_v23 = vor.u32 8388608, %v10524_v57 }
  0xf4   : > { %v2298_v49 = vxor.u32 2147483648, %v2297_v45  ;;  %v2378_v59 = vadd.s32 536870912, %v2377_v16  ;;  %v2434_v13 = vand.u32 31, %v2432_v17  ;;  %vm10555_vm8 = vcmp.le.f32.partialorder %v462_v38, 0.7853982 }
  0xf5   : > { %v541_v43 = vor.u32 4788187, %v540_v4  ;;  %v10559_v20 = vshrl.u32 %v2432_v17, 5  ;;  %v774_v56 = vand.u32 2139095040, %v10453_v60  ;;  %v544_v31 = vcvt.s32.f32 %v537_v53 }
  0xf6   : > { %v2299_v55 = vsel %vm2216_vm13, %v2298_v49, %v2297_v45  ;;  %v10562_v11 = vshrl.u32 %v2378_v59, 30  ;;  %v2435_v57 = vsub.s32 32, %v2434_v13  ;;  %v2437_v15 = vshll.u32 %v14927_v0, %v2434_v13 }
  0xf7   : > { %v2302_v58 = vsel %vm10488_vm2, %v10333_v33, %v2299_v55  ;;  %v542_v21 = vand.u32 2147483647, %v541_v43  ;;  %v2440_v37 = vshll.u32 %v14925_v3, %v2434_v13  ;;  %v2443_v41 = vshll.u32 %v14922_v6, %v2434_v13 }
  0xf8   : > { %9945 = vcosq.f32 %v2302_v58  ;;  %v2380_v38 = vshll.u32 %v10562_v11, 30  ;;  %v2438_v40 = vshrl.u32 %v14925_v3, %v2435_v57  ;;  %v2441_v36 = vshrl.u32 %v14922_v6, %v2435_v57 }
  0xf9   : > { %9947 = vsinq.f32 %v2302_v58  ;;  %v545_v44 = vmul.f32 %v544_v31, %v542_v21  ;;  %v2444_v63 = vshrl.u32 %v14910_v9, %v2435_v57  ;;  %v2446_v2 = vshll.u32 %v14910_v9, %v2434_v13 }
  0xfa   : > { %v2447_v45 = vshrl.u32 %v14905_v14, %v2435_v57  ;;  %v10573_v51 = vsub.s32 %v2377_v16, %v2380_v38  ;;  %v2439_v54 = vor.u32 %v2438_v40, %v2437_v15  ;;  %v2442_v39 = vor.u32 %v2441_v36, %v2440_v37 }
  0xfb   : > { %v2449_v42 = vshll.u32 %v14905_v14, %v2434_v13  ;;  %v546_v47 = vxor.u32 2147483648, %v545_v44  ;;  %v2450_v49 = vshrl.u32 %v14908_v18, %v2435_v57  ;;  %v775_v53 = vshrl.u32 %v774_v56, 23 }
  0xfc   : > { %v2448_v12 = vor.u32 %v2447_v45, %v2446_v2  ;;  %v2383_v4 = vsub.s32 0, %v10573_v51  ;;  %v2436_v17 = vshrl.u32 %v14927_v0, %v2435_v57  ;;  %v2445_v55 = vor.u32 %v2444_v63, %v2443_v41 }
  0xfd   : > { %vm2452_vm9 = vcmp.lt.s32.totalorder %v10559_v20, 1  ;;  %v547_v16 = vsel %vm464_vm4, %v546_v47, %v545_v44  ;;  %v2451_v59 = vor.u32 %v2450_v49, %v2449_v42  ;;  %vm2454_vm10 = vcmp.lt.s32.totalorder %v10559_v20, 3 }
  0xfe   : > { %vm2455_vm11 = vcmp.lt.s32.totalorder %v10559_v20, 4  ;;  %v550_v13 = vsel %vm10555_vm8, %v10336_v34, %v547_v16  ;;  %v8347_v58 = vmin.u32 %v2383_v4, %v10573_v51  ;;  %vm2453_vm12 = vcmp.lt.s32.totalorder %v10559_v20, 2 }
  0xff   : > { %v2460_v43 = vsel %vm2452_vm9, %v2439_v54, %v2442_v39  ;;  %9949 = vcosq.f32 %v550_v13  ;;  %v2457_v56 = vsel %vm2455_vm11, %v2445_v55, 2102212464  ;;  %v2461_v57 = vsel %vm2455_vm11, %v2448_v12, 920167782 }
 0x100   : > { %v2468_v15 = vshll.u32 %v2428_v23, 8  ;;  %v551_v31 = vsel %vm10555_vm8, 0, %v10545_v32  ;;  %9951 = vsinq.f32 %v550_v13  ;;  %v2462_v37 = vsel %vm2454_vm10, %v2445_v55, %v2461_v57 }
 0x101   : > { %v2464_v38 = vsel %vm2452_vm9, %v2442_v39, %v2445_v55  ;;  %v2385_v36 = vclz %v8347_v58  ;;  %v2463_v41 = vsel %vm2453_vm12, %v2460_v43, %v2462_v37  ;;  %v2465_v23 = vsel %vm2455_vm11, %v2451_v59, 1326507024 }
 0x102   : > { %v9946_v21 = vpop.eup %9945  ;;  %v8290_v44 = vadd.s32 4294967169, %v775_v53  ;;  %v2456_v32 = vsel %vm2452_vm9, %v2436_v17, %v2439_v54  ;;  %v2458_v8 = vsel %vm2454_vm10, %v2442_v39, %v2457_v56  ;;  %v2466_v2 = vsel %vm2454_vm10, %v2448_v12, %v2465_v23 }
 0x103   : > { %v9948_v40 = vpop.eup %9947  ;;  %v2313_v63 = vxor.u32 2147483648, %v9946_v21  ;;  %v2467_v42 = vsel %vm2453_vm12, %v2464_v38, %v2466_v2  ;;  %v10614_v47 = vmul.u32.u64.low %v2468_v15, %v2463_v41  ;;  %v10615_v49 = vmul.u32.u64.high %v2468_v15, %v2463_v41, %v10614_v47 }
 0x104   : > { %v2310_v45 = vxor.u32 2147483648, %v9948_v40  ;;  %v3880_v53 = vsub.s32 4, %v10269_v7  ;;  %v3900_v4 = vsub.s32 5, %v10269_v7  ;;  %v8348_v17 = vadd.s32 4294967294, %v2385_v36 }
 0x105   : > { %v10620_v55 = vmul.u32.u64.low %v2468_v15, %v2467_v42  ;;  %v10621_v54 = vmul.u32.u64.high %v2468_v15, %v2467_v42, %v10620_v55  ;;  %v14902_v39 = vand.u32 2147483647, %v10453_v60  ;;  %v781_v16 = vadd.s32 1, %v8290_v44 }
 0x106   : > { %vm2309_vm13 = vcmp.eq.s32.totalorder %v10540_v50, 0  ;;  %vm2312_vm14 = vcmp.eq.s32.totalorder %v10540_v50, 2  ;;  %v555_v12 = vand.u32 3, %v551_v31  ;;  %v2459_v59 = vsel %vm2453_vm12, %v2456_v32, %v2458_v8 }
 0x107   : > { %v2311_v13 = vsel %vm2309_vm13, %v9946_v21, %v2310_v45  ;;  %v2314_v58 = vsel %vm2312_vm14, %v2313_v63, %v9948_v40  ;;  %v2478_v43 = vadd.s32 1, %v10615_v49  ;;  %vm782_vm15 = vcmp.gt.s32.totalorder %v781_v16, 0 }
 0x108   : > { %v10632_v56 = vrot.slane %v10308_v24, %v3936_v61  ;;  %v10635_v57 = vrot.slane %v10308_v24, %v3880_v53  ;;  %v10638_v37 = vrot.slane %v10308_v24, %v3900_v4  ;;  %vm2477_vm0 = vc.u32 %v10621_v54, %v10614_v47 }
 0x109   : > { %v9950_v20 = vpop.eup %9949  ;;  %vm2308_vm1 = vcmp.lt.s32.totalorder %v10540_v50, 2  ;;  %vm8349_vm2 = vcmp.lt.s32.totalorder %v8348_v17, 0  ;;  %v2475_v21 = vmul.u32 %v2468_v15, %v2459_v59  ;;  %v783_v31 = vsel %vm782_vm15, %v781_v16, 0 }
 0x10a   : > { %15033 = vst [vmem:[#allocation10_spill] sm:$0xff] %v10632_v56  ;;  %15034 = vst [vmem:[#allocation11_spill] sm:$0xff] %v10635_v57  ;;  %v9952_v38 = vpop.eup %9951  ;;  %v2315_v7 = vsel %vm2308_vm1, %v2311_v13, %v2314_v58  ;;  %v561_v40 = vxor.u32 2147483648, %v9950_v20  ;;  %v2479_v61 = vsel %vm2477_vm0, %v2478_v43, %v10615_v49  ;;  %v778_v36 = vand.u32 8388607, %v14902_v39 }
 0x10b   : > { %15035 = vst [vmem:[#allocation12_spill] sm:$0xff] %v10638_v37  ;;  %vm2306_vm3 = vweird.f32 %v10333_v33  ;;  %v558_v24 = vxor.u32 2147483648, %v9952_v38  ;;  %vm560_vm4 = vcmp.eq.s32.totalorder %v555_v12, 2  ;;  %v785_v41 = vand.u32 31, %v783_v31 }
 0x10c   : > { %vm556_vm5 = vcmp.lt.s32.totalorder %v555_v12, 2  ;;  %vm557_vm6 = vcmp.eq.s32.totalorder %v555_v12, 0  ;;  %v562_v23 = vsel %vm560_vm4, %v561_v40, %v9952_v38  ;;  %v10647_v50 = vsel %vm8349_vm2, 0, %v8348_v17 }
 0x10d   : > { %v2316_v15 = vsel %vm2306_vm3, nan, %v2315_v7  ;;  %v559_v44 = vsel %vm557_vm6, %v9950_v20, %v558_v24  ;;  %v2480_v63 = vadd.s32 %v2479_v61, %v2475_v21  ;;  %v786_v32 = vsub.s32 32, %v785_v41 }
 0x10e   : > { %vm554_vm7 = vweird.f32 %v10336_v34  ;;  %v563_v8 = vsel %vm556_vm5, %v559_v44, %v562_v23  ;;  %v3902_v2 = vmul.f32 %v10638_v37, %v10326_v30  ;;  %v779_v45 = vor.u32 8388608, %v778_v36 }
 0x10f   : > { %v564_v33 = vsel %vm554_vm7, nan, %v563_v8  ;;  %v2393_v42 = vsub.s32 4294967266, %v10647_v50  ;;  %v789_v49 = vshrl.u32 %v14925_v3, %v786_v32  ;;  %v792_v53 = vshrl.u32 %v14922_v6, %v786_v32 }
 0x110   : > { %v3862_v4 = vmul.f32 %v2316_v15, %v564_v33  ;;  %v788_v55 = vshll.u32 %v14927_v0, %v785_v41  ;;  %v791_v17 = vshll.u32 %v14925_v3, %v785_v41  ;;  %v795_v16 = vshrl.u32 %v14910_v9, %v786_v32 }
 0x111   : > { %v2481_v34 = vadd.s32 536870912, %v2480_v63  ;;  %v794_v12 = vshll.u32 %v14922_v6, %v785_v41  ;;  %v797_v30 = vshll.u32 %v14910_v9, %v785_v41  ;;  %v798_v59 = vshrl.u32 %v14905_v14, %v786_v32 }
 0x112   : > { %v3882_v13 = vmul.f32 %v10635_v57, %v3862_v4  ;;  %v784_v58 = vshrl.u32 %v783_v31, 5  ;;  %v790_v43 = vor.u32 %v789_v49, %v788_v55  ;;  %v793_v20 = vor.u32 %v792_v53, %v791_v17 }
 0x113   : > { %v796_v21 = vor.u32 %v795_v16, %v794_v12  ;;  %v799_v38 = vor.u32 %v798_v59, %v797_v30  ;;  %v800_v7 = vshll.u32 %v14905_v14, %v785_v41  ;;  %v801_v40 = vshrl.u32 %v14908_v18, %v786_v32 }
 0x114   : > { %v3938_v61 = vmul.f32 %v10632_v56, %v10324_v29  ;;  %v3918_v36 = vadd.f32 %v3902_v2, %v3882_v13  ;;  %v2373_v24 = vadd.s32 %v10514_v52, %v10520_v10  ;;  %v2394_v23 = vadd.s32 127, %v2393_v42 }
 0x115   : > { %v2389_v15 = vsub.s32 32, %v10647_v50  ;;  %v10669_v44 = vshrl.u32 %v2481_v34, 30  ;;  %v802_v31 = vor.u32 %v801_v40, %v800_v7  ;;  %v819_v8 = vshll.u32 %v779_v45, 8 }
 0x116   : > { %v10671_v33 = vadd.f32 %v3938_v61, %v3918_v36  ;;  %v787_v41 = vshrl.u32 %v14927_v0, %v786_v32  ;;  %vm803_vm8 = vcmp.lt.s32.totalorder %v784_v58, 1  ;;  %vm806_vm9 = vcmp.lt.s32.totalorder %v784_v58, 4  ;;  %v10679_v32 = vpop.permute.xlu0 %349 }
 0x117   : > { %vm805_vm10 = vcmp.lt.s32.totalorder %v784_v58, 3  ;;  %v808_v49 = vsel %vm806_vm9, %v796_v21, 2102212464  ;;  %v811_v29 = vsel %vm803_vm8, %v790_v43, %v793_v20  ;;  %v812_v2 = vsel %vm806_vm9, %v799_v38, 920167782 }
 0x118   : > { %v2395_v53 = vshll.u32 %v2394_v23, 23  ;;  %vm804_vm11 = vcmp.lt.s32.totalorder %v784_v58, 2  ;;  %v813_v52 = vsel %vm805_vm10, %v796_v21, %v812_v2  ;;  %v815_v10 = vsel %vm803_vm8, %v793_v20, %v796_v21 }
 0x119   : > { %v2483_v42 = vshll.u32 %v10669_v44, 30  ;;  %v807_v4 = vsel %vm803_vm8, %v787_v41, %v790_v43  ;;  %v814_v55 = vsel %vm804_vm11, %v811_v29, %v813_v52  ;;  %v816_v17 = vsel %vm806_vm9, %v802_v31, 1326507024 }
 0x11a   : > { %v809_v45 = vsel %vm805_vm10, %v793_v20, %v808_v49  ;;  %v817_v16 = vsel %vm805_vm10, %v799_v38, %v816_v17  ;;  %v10675_v34 = vmul.u32.u64.low %v819_v8, %v814_v55  ;;  %v10676_v12 = vmul.u32.u64.high %v819_v8, %v814_v55, %v10675_v34 }
 0x11b   : > { %v818_v30 = vsel %vm804_vm11, %v815_v10, %v817_v16  ;;  %v2391_v59 = vshrl.u32 %v2373_v24, %v2389_v15  ;;  %v810_v58 = vsel %vm804_vm11, %v807_v4, %v809_v45  ;;  %v427_v21 = vmul.f32 %v10314_v26, %v10679_v32 }
 0x11c   : > { %v10681_v13 = vmul.u32.u64.low %v819_v8, %v818_v30  ;;  %v10682_v7 = vmul.u32.u64.high %v819_v8, %v818_v30, %v10681_v13  ;;  %v2390_v43 = vshll.u32 %v10573_v51, %v10647_v50  ;;  %v2396_v20 = vor.u32 4788187, %v2395_v53  ;;  %v10699_v50 = vpop.permute.xlu1 %2123 }
 0x11d   : > { %v10688_v38 = vsub.s32 %v2480_v63, %v2483_v42  ;;  %v829_v40 = vadd.s32 1, %v10676_v12  ;;  %v10692_v61 = vadd.f32 %v10322_v28, %v427_v21  ;;  %v826_v24 = vmul.u32 %v819_v8, %v810_v58 }
 0x11e   : > { %v2392_v36 = vor.u32 %v2391_v59, %v2390_v43  ;;  %vm828_vm12 = vc.u32 %v10682_v7, %v10675_v34  ;;  %v2397_v15 = vand.u32 2147483647, %v2396_v20  ;;  %v2181_v52 = vmul.f32 %v10311_v25, %v10699_v50 }
 0x11f   : > { %v830_v23 = vsel %vm828_vm12, %v829_v40, %v10676_v12  ;;  %v2486_v31 = vsub.s32 0, %v10688_v38  ;;  %v568_v51 = vand.u32 2139095040, %v10692_v61  ;;  %v14904_v4 = vand.u32 2147483647, %v10692_v61 }
 0x120   : > { %v831_v41 = vadd.s32 %v830_v23, %v826_v24  ;;  %v2399_v63 = vcvt.s32.f32 %v2392_v36  ;;  %v10709_v16 = vadd.f32 %v10319_v27, %v2181_v52  ;;  %vm10715_vm14 = vcmp.le.f32.partialorder %v2317_v62, 0.7853982 }
 0x121   : > { %v569_v29 = vshrl.u32 %v568_v51, 23  ;;  %v8351_v53 = vmin.u32 %v2486_v31, %v10688_v38  ;;  %vm2319_vm15 = vcmp.lt.s32.totalorder %v10351_v46, 0  ;;  %v572_v13 = vand.u32 8388607, %v14904_v4 }
 0x122   : > { %v832_v49 = vadd.s32 536870912, %v831_v41  ;;  %v2400_v2 = vmul.f32 %v2399_v63, %v2397_v15  ;;  %v2403_v20 = vsub.s32 4, %v10562_v11  ;;  %v2526_v40 = vand.u32 2139095040, %v10709_v16 }
 0x123   : > { %v8282_v10 = vadd.s32 4294967169, %v569_v29  ;;  %v2488_v45 = vclz %v8351_v53  ;;  %v573_v63 = vor.u32 8388608, %v572_v13 }
 0x124   : > { %v10702_v8 = vshrl.u32 %v832_v49, 30  ;;  %v2401_v17 = vxor.u32 2147483648, %v2400_v2  ;;  %v2527_v1 = vshrl.u32 %v2526_v40, 23  ;;  %v2404_v40 = vsel %vm2319_vm15, %v2403_v20, %v10562_v11 }
 0x125   : > { %v575_v55 = vadd.s32 1, %v8282_v10  ;;  %v8352_v43 = vadd.s32 4294967294, %v2488_v45  ;;  %v613_v39 = vshll.u32 %v573_v63, 8 }
 0x126   : > { %v834_v42 = vshll.u32 %v10702_v8, 30  ;;  %v2402_v21 = vsel %vm2319_vm15, %v2401_v17, %v2400_v2 }
 0x127   : > { %vm576_vm13 = vcmp.gt.s32.totalorder %v575_v55, 0  ;;  %v2405_v53 = vsel %vm10715_vm14, %v10351_v46, %v2402_v21  ;;  %vm8353_vm1 = vcmp.lt.s32.totalorder %v8352_v43, 0 }
 0x128   : > { %v10711_v12 = vsub.s32 %v831_v41, %v834_v42  ;;  %v577_v30 = vsel %vm576_vm13, %v575_v55, 0  ;;  %9953 = vcosq.f32 %v2405_v53  ;;  %v2491_v63 = vsel %vm8353_vm1, 0, %v8352_v43 }
 0x129   : > { %v579_v58 = vand.u32 31, %v577_v30  ;;  %v578_v36 = vshrl.u32 %v577_v30, 5  ;;  %9955 = vsinq.f32 %v2405_v53  ;;  %v2492_v20 = vsub.s32 32, %v2491_v63 }
 0x12a   : > { %v837_v15 = vsub.s32 0, %v10711_v12 }
 0x12b   : > { %v580_v24 = vsub.s32 32, %v579_v58  ;;  %v582_v62 = vshll.u32 %v14927_v0, %v579_v58  ;;  %v585_v23 = vshll.u32 %v14925_v3, %v579_v58  ;;  %v588_v31 = vshll.u32 %v14922_v6, %v579_v58 }
 0x12c   : > { %v591_v41 = vshll.u32 %v14910_v9, %v579_v58  ;;  %v594_v51 = vshll.u32 %v14905_v14, %v579_v58  ;;  %vm597_vm0 = vcmp.lt.s32.totalorder %v578_v36, 1  ;;  %v8291_v30 = vmin.u32 %v837_v15, %v10711_v12 }
 0x12d   : > { %v583_v49 = vshrl.u32 %v14925_v3, %v580_v24  ;;  %v586_v29 = vshrl.u32 %v14922_v6, %v580_v24  ;;  %v589_v2 = vshrl.u32 %v14910_v9, %v580_v24  ;;  %v581_v52 = vshrl.u32 %v14927_v0, %v580_v24 }
 0x12e   : > { %v592_v10 = vshrl.u32 %v14905_v14, %v580_v24  ;;  %v595_v42 = vshrl.u32 %v14908_v18, %v580_v24  ;;  %vm599_vm2 = vcmp.lt.s32.totalorder %v578_v36, 3  ;;  %vm600_vm3 = vcmp.lt.s32.totalorder %v578_v36, 4 }
 0x12f   : > { %v584_v55 = vor.u32 %v583_v49, %v582_v62  ;;  %v587_v17 = vor.u32 %v586_v29, %v585_v23  ;;  %v590_v45 = vor.u32 %v589_v2, %v588_v31  ;;  %vm598_vm4 = vcmp.lt.s32.totalorder %v578_v36, 2 }
 0x130   : > { %v593_v13 = vor.u32 %v592_v10, %v591_v41  ;;  %v596_v58 = vor.u32 %v595_v42, %v594_v51  ;;  %v839_v31 = vclz %v8291_v30  ;;  %v8354_v15 = vadd.s32 4294967169, %v2527_v1 }
 0x131   : > { %v601_v21 = vsel %vm597_vm0, %v581_v52, %v584_v55  ;;  %v602_v22 = vsel %vm600_vm3, %v590_v45, 2102212464  ;;  %v605_v4 = vsel %vm597_vm0, %v584_v55, %v587_v17  ;;  %v609_v62 = vsel %vm597_vm0, %v587_v17, %v590_v45 }
 0x132   : > { %v603_v14 = vsel %vm599_vm2, %v587_v17, %v602_v22  ;;  %v606_v24 = vsel %vm600_vm3, %v593_v13, 920167782  ;;  %v610_v23 = vsel %vm600_vm3, %v596_v58, 1326507024  ;;  %v8292_v42 = vadd.s32 4294967294, %v839_v31 }
 0x133   : > { %v607_v49 = vsel %vm599_vm2, %v590_v45, %v606_v24  ;;  %v611_v51 = vsel %vm599_vm2, %v593_v13, %v610_v23  ;;  %v604_v22 = vsel %vm598_vm4, %v601_v21, %v603_v14  ;;  %v2533_v11 = vadd.s32 1, %v8354_v15 }
 0x134   : > { %v608_v41 = vsel %vm598_vm4, %v605_v4, %v607_v49  ;;  %v612_v29 = vsel %vm598_vm4, %v609_v62, %v611_v51  ;;  %v2406_v4 = vsel %vm10715_vm14, 0, %v2404_v40  ;;  %v2496_v55 = vsub.s32 4294967266, %v2491_v63 }
 0x135   : > { %v10752_v2 = vmul.u32.u64.low %v613_v39, %v612_v29  ;;  %v10753_v52 = vmul.u32.u64.high %v613_v39, %v612_v29, %v10752_v2  ;;  %v10755_v10 = vmul.u32.u64.low %v613_v39, %v608_v41  ;;  %v10756_v1 = vmul.u32.u64.high %v613_v39, %v608_v41, %v10755_v10 }
 0x136   : > { %v620_v43 = vmul.u32 %v613_v39, %v604_v22  ;;  %vm2534_vm5 = vcmp.gt.s32.totalorder %v2533_v11, 0  ;;  %v14907_v36 = vand.u32 2147483647, %v10709_v16  ;;  %v2476_v45 = vadd.s32 %v10614_v47, %v10621_v54  ;;  %v10777_v47 = vpop.eup %9953 }
 0x137   : > { %vm622_vm6 = vc.u32 %v10753_v52, %v10755_v10  ;;  %v623_v14 = vadd.s32 1, %v10756_v1  ;;  %v2535_v17 = vsel %vm2534_vm5, %v2533_v11, 0  ;;  %vm8293_vm7 = vcmp.lt.s32.totalorder %v8292_v42, 0  ;;  %v9956_v11 = vpop.eup %9955 }
 0x138   : > { %v2537_v53 = vand.u32 31, %v2535_v17  ;;  %v10767_v30 = vand.u32 3, %v2406_v4  ;;  %v2493_v39 = vshll.u32 %v10688_v38, %v2491_v63  ;;  %v2494_v13 = vshrl.u32 %v2476_v45, %v2492_v20 }
 0x139   : > { %v624_v59 = vsel %vm622_vm6, %v623_v14, %v10756_v1  ;;  %v2497_v24 = vadd.s32 127, %v2496_v55  ;;  %v10771_v62 = vsel %vm8293_vm7, 0, %v8292_v42  ;;  %v2530_v23 = vand.u32 8388607, %v14907_v36 }
 0x13a   : > { %v625_v58 = vadd.s32 %v624_v59, %v620_v43  ;;  %v2538_v21 = vsub.s32 32, %v2537_v53  ;;  %v10775_v31 = vshrl.u32 %v2535_v17, 5  ;;  %v2540_v49 = vshll.u32 %v14927_v0, %v2537_v53 }
 0x13b   : > { %v2543_v38 = vshll.u32 %v14925_v3, %v2537_v53  ;;  %v2549_v51 = vshll.u32 %v14910_v9, %v2537_v53  ;;  %v15038_v63 = vmov 920167782   ;;  %v2546_v1 = vshll.u32 %v14922_v6, %v2537_v53 }
 0x13c   : > { %v626_v54 = vadd.s32 536870912, %v625_v58  ;;  %v2541_v15 = vshrl.u32 %v14925_v3, %v2538_v21  ;;  %v2544_v40 = vshrl.u32 %v14922_v6, %v2538_v21  ;;  %v2547_v41 = vshrl.u32 %v14910_v9, %v2538_v21 }
 0x13d   : > { %v2550_v22 = vshrl.u32 %v15038_v63, %v2538_v21  ;;  %v2553_v42 = vshrl.u32 %v14908_v18, %v2538_v21  ;;  %v847_v4 = vsub.s32 4294967266, %v10771_v62  ;;  %v2552_v43 = vshll.u32 %v15038_v63, %v2537_v53 }
 0x13e   : > { %v10786_v29 = vshrl.u32 %v626_v54, 30  ;;  %v2542_v2 = vor.u32 %v2541_v15, %v2540_v49  ;;  %v2545_v20 = vor.u32 %v2544_v40, %v2543_v38  ;;  %v2416_v14 = vxor.u32 2147483648, %v10777_v47  ;;  %v10794_v54 = vpop.permute.xlu0 %354 }
 0x13f   : > { %v2551_v55 = vor.u32 %v2550_v22, %v2549_v51  ;;  %v2531_v45 = vor.u32 8388608, %v2530_v23  ;;  %v2548_v59 = vor.u32 %v2547_v41, %v2546_v1  ;;  %v10796_v49 = vor.u32 %v2494_v13, %v2493_v39 }
 0x140   : > { %v628_v17 = vshll.u32 %v10786_v29, 30  ;;  %v2498_v15 = vshll.u32 %v2497_v24, 23  ;;  %vm2415_vm8 = vcmp.eq.s32.totalorder %v10767_v30, 2  ;;  %v2554_v36 = vor.u32 %v2553_v42, %v2552_v43 }
 0x141   : > { %vm2555_vm9 = vcmp.lt.s32.totalorder %v10775_v31, 1  ;;  %v2413_v38 = vxor.u32 2147483648, %v9956_v11  ;;  %vm2558_vm10 = vcmp.lt.s32.totalorder %v10775_v31, 4  ;;  %v848_v23 = vadd.s32 127, %v847_v4 }
 0x142   : > { %v10800_v40 = vsub.s32 %v625_v58, %v628_v17  ;;  %v2563_v53 = vsel %vm2555_vm9, %v2542_v2, %v2545_v20  ;;  %vm2557_vm11 = vcmp.lt.s32.totalorder %v10775_v31, 3  ;;  %v2564_v41 = vsel %vm2558_vm10, %v2551_v55, 920167782 }
 0x143   : > { %v428_v39 = vmul.f32 %v10314_v26, %v10794_v54  ;;  %vm2556_vm12 = vcmp.lt.s32.totalorder %v10775_v31, 2  ;;  %v2565_v58 = vsel %vm2557_vm11, %v2548_v59, %v2564_v41  ;;  %v2571_v24 = vshll.u32 %v2531_v45, 8 }
 0x144   : > { %v631_v13 = vsub.s32 0, %v10800_v40  ;;  %v2560_v51 = vsel %vm2558_vm10, %v2548_v59, 2102212464  ;;  %v2566_v22 = vsel %vm2556_vm12, %v2563_v53, %v2565_v58  ;;  %v2567_v1 = vsel %vm2555_vm9, %v2545_v20, %v2548_v59 }
 0x145   : > { %v2568_v42 = vsel %vm2558_vm10, %v2554_v36, 1326507024  ;;  %v2499_v4 = vor.u32 4788187, %v2498_v15  ;;  %v843_v43 = vsub.s32 32, %v10771_v62  ;;  %v2539_v18 = vshrl.u32 %v14927_v0, %v2538_v21 }
 0x146   : > { %v8283_v17 = vmin.u32 %v631_v13, %v10800_v40  ;;  %v2569_v9 = vsel %vm2557_vm11, %v2551_v55, %v2568_v42  ;;  %v10821_v41 = vmul.u32.u64.low %v2571_v24, %v2566_v22  ;;  %v10822_v45 = vmul.u32.u64.high %v2571_v24, %v2566_v22, %v10821_v41 }
 0x147   : > { %v10826_v53 = vadd.f32 %v10322_v28, %v428_v39  ;;  %v2559_v36 = vsel %vm2555_vm9, %v2539_v18, %v2542_v2  ;;  %v2561_v59 = vsel %vm2557_vm11, %v2545_v20, %v2560_v51  ;;  %v2570_v21 = vsel %vm2556_vm12, %v2567_v1, %v2569_v9 }
 0x148   : > { %v633_v58 = vclz %v8283_v17  ;;  %v827_v55 = vadd.s32 %v10675_v34, %v10682_v7  ;;  %v849_v15 = vshll.u32 %v848_v23, 23  ;;  %vm2412_vm13 = vcmp.eq.s32.totalorder %v10767_v30, 0 }
 0x149   : > { %v10836_v13 = vmul.u32.u64.low %v2571_v24, %v2570_v21  ;;  %v10837_v22 = vmul.u32.u64.high %v2571_v24, %v2570_v21, %v10836_v13  ;;  %v2417_v39 = vsel %vm2415_vm8, %v2416_v14, %v9956_v11  ;;  %v2562_v2 = vsel %vm2556_vm12, %v2559_v36, %v2561_v59 }
 0x14a   : > { %v8284_v42 = vadd.s32 4294967294, %v633_v58  ;;  %v845_v18 = vshrl.u32 %v827_v55, %v843_v43  ;;  %v2581_v20 = vadd.s32 1, %v10822_v45  ;;  %v671_v9 = vand.u32 2139095040, %v10826_v53 }
 0x14b   : > { %v2500_v51 = vand.u32 2147483647, %v2499_v4  ;;  %v2502_v34 = vcvt.s32.f32 %v10796_v49  ;;  %v2414_v7 = vsel %vm2412_vm13, %v10777_v47, %v2413_v38  ;;  %v844_v23 = vshll.u32 %v10711_v12, %v10771_v62 }
 0x14c   : > { %vm8285_vm14 = vcmp.lt.s32.totalorder %v8284_v42, 0  ;;  %v850_v1 = vor.u32 4788187, %v849_v15  ;;  %vm2580_vm15 = vc.u32 %v10837_v22, %v10821_v41  ;;  %v621_v31 = vadd.s32 %v10755_v10, %v10753_v52 }
 0x14d   : > { %v636_v11 = vsel %vm8285_vm14, 0, %v8284_v42  ;;  %v2578_v17 = vmul.u32 %v2571_v24, %v2562_v2  ;;  %v846_v4 = vor.u32 %v845_v18, %v844_v23  ;;  %v2582_v49 = vsel %vm2580_vm15, %v2581_v20, %v10822_v45 }
 0x14e   : > { %v637_v14 = vsub.s32 32, %v636_v11  ;;  %v641_v43 = vsub.s32 4294967266, %v636_v11  ;;  %v668_v47 = vand.u32 2147483647, %v10826_v53  ;;  %v672_v38 = vshrl.u32 %v671_v9, 23 }
 0x14f   : > { %v638_v58 = vshll.u32 %v10800_v40, %v636_v11  ;;  %v2583_v36 = vadd.s32 %v2582_v49, %v2578_v17  ;;  %vm2422_vm0 = vcmp.lt.s32.totalorder %v10446_v19, 0  ;;  %v2503_v59 = vmul.f32 %v2502_v34, %v2500_v51 }
 0x150   : > { %v639_v12 = vshrl.u32 %v621_v31, %v637_v14  ;;  %v642_v62 = vadd.s32 127, %v641_v43  ;;  %v851_v21 = vand.u32 2147483647, %v850_v1  ;;  %v8286_v55 = vadd.s32 4294967169, %v672_v38 }
 0x151   : > { %vm2411_vm1 = vcmp.lt.s32.totalorder %v10767_v30, 2  ;;  %v2584_v24 = vadd.s32 536870912, %v2583_v36  ;;  %v853_v15 = vcvt.s32.f32 %v846_v4  ;;  %vm2409_vm2 = vweird.f32 %v10351_v46 }
 0x152   : > { %v640_v52 = vor.u32 %v639_v12, %v638_v58  ;;  %v643_v10 = vshll.u32 %v642_v62, 23  ;;  %v2418_v45 = vsel %vm2411_vm1, %v2414_v7, %v2417_v39  ;;  %v678_v13 = vadd.s32 1, %v8286_v55 }
 0x153   : > { %v651_v40 = vsub.s32 4, %v10786_v29  ;;  %v10861_v18 = vshrl.u32 %v2584_v24, 30  ;;  %v675_v2 = vand.u32 8388607, %v668_v47  ;;  %v2504_v20 = vxor.u32 2147483648, %v2503_v59 }
 0x154   : > { %v644_v42 = vor.u32 4788187, %v643_v10  ;;  %v10865_v9 = vmul.f32 %v853_v15, %v851_v21  ;;  %v2506_v30 = vsub.s32 4, %v10669_v44  ;;  %vm679_vm3 = vcmp.gt.s32.totalorder %v678_v13, 0 }
 0x155   : > { %v647_v34 = vcvt.s32.f32 %v640_v52  ;;  %v2586_v46 = vshll.u32 %v10861_v18, 30  ;;  %v680_v39 = vsel %vm679_vm3, %v678_v13, 0  ;;  %v10869_v7 = vsel %vm2409_vm2, nan, %v2418_v45 }
 0x156   : > { %v645_v51 = vand.u32 2147483647, %v644_v42  ;;  %v15039_v23 = vand.u32 2147483647, %v10692_v61  ;;  %vm567_vm5 = vcmp.lt.s32.totalorder %v10692_v61, 0  ;;  %v682_v11 = vand.u32 31, %v680_v39 }
 0x157   : > { %v652_v14 = vsel %vm567_vm5, %v651_v40, %v10786_v29  ;;  %v10881_v43 = vsub.s32 %v2583_v36, %v2586_v46  ;;  %v676_v17 = vor.u32 8388608, %v675_v2  ;;  %v10885_v4 = vsel %vm2422_vm0, %v2504_v20, %v2503_v59 }
 0x158   : > { %vm10873_vm4 = vcmp.le.f32.partialorder %v15039_v23, 0.7853982  ;;  %v648_v31 = vmul.f32 %v647_v34, %v645_v51  ;;  %v683_v49 = vsub.s32 32, %v682_v11  ;;  %v685_v38 = vshll.u32 %v14927_v0, %v682_v11 }
 0x159   : > { %v688_v58 = vshll.u32 %v14925_v3, %v682_v11  ;;  %v855_v12 = vxor.u32 2147483648, %v10865_v9  ;;  %v2589_v21 = vsub.s32 0, %v10881_v43  ;;  %v691_v55 = vshll.u32 %v14922_v6, %v682_v11 }
 0x15a   : > { %v649_v62 = vxor.u32 2147483648, %v648_v31  ;;  %v654_v29 = vsel %vm10873_vm4, 0, %v652_v14  ;;  %v686_v36 = vshrl.u32 %v14925_v3, %v683_v49  ;;  %v689_v59 = vshrl.u32 %v14922_v6, %v683_v49 }
 0x15b   : > { %v15042_v52 = vmov 2102212464   ;;  %v8355_v15 = vmin.u32 %v2589_v21, %v10881_v43  ;;  %v681_v45 = vshrl.u32 %v680_v39, 5  ;;  %v10900_v13 = vshll.u32 %v676_v17, 8 }
 0x15c   : > { %v692_v10 = vshrl.u32 %v15042_v52, %v683_v49  ;;  %v650_v24 = vsel %vm567_vm5, %v649_v62, %v648_v31  ;;  %v684_v40 = vshrl.u32 %v14927_v0, %v683_v49  ;;  %v687_v2 = vor.u32 %v686_v36, %v685_v38 }
 0x15d   : > { %v653_v42 = vsel %vm10873_vm4, %v10692_v61, %v650_v24  ;;  %v690_v20 = vor.u32 %v689_v59, %v688_v58  ;;  %v2591_v51 = vclz %v8355_v15  ;;  %v694_v46 = vshll.u32 %v15042_v52, %v682_v11 }
 0x15e   : > { %9957 = vcosq.f32 %v653_v42  ;;  %v693_v34 = vor.u32 %v692_v10, %v691_v55  ;;  %v15043_v23 = vand.u32 2147483647, %v10446_v19  ;;  %v695_v39 = vshrl.u32 %v15038_v63, %v683_v49  ;;  %v10917_v10 = vpop.permute.xlu0 %369 }
 0x15f   : > { %9959 = vsinq.f32 %v653_v42  ;;  %v697_v1 = vshll.u32 %v15038_v63, %v682_v11  ;;  %v15046_v14 = vmov 1326507024   ;;  %vm773_vm7 = vcmp.lt.s32.totalorder %v10453_v60, 0 }
 0x160   : > { %vm10909_vm6 = vcmp.le.f32.partialorder %v15043_v23, 0.7853982  ;;  %v698_v17 = vshrl.u32 %v15046_v14, %v683_v49  ;;  %v8356_v38 = vadd.s32 4294967294, %v2591_v51  ;;  %vm700_vm8 = vcmp.lt.s32.totalorder %v681_v45, 1 }
 0x161   : > { %vm701_vm9 = vcmp.lt.s32.totalorder %v681_v45, 2  ;;  %vm702_vm10 = vcmp.lt.s32.totalorder %v681_v45, 3  ;;  %v696_v58 = vor.u32 %v695_v39, %v694_v46  ;;  %vm703_vm11 = vcmp.lt.s32.totalorder %v681_v45, 4 }
 0x162   : > { %v699_v62 = vor.u32 %v698_v17, %v697_v1  ;;  %v704_v21 = vsel %vm700_vm8, %v684_v40, %v687_v2  ;;  %vm8357_vm12 = vcmp.lt.s32.totalorder %v8356_v38, 0  ;;  %v705_v55 = vsel %vm703_vm11, %v693_v34, 2102212464 }
 0x163   : > { %v708_v36 = vsel %vm700_vm8, %v687_v2, %v690_v20  ;;  %v712_v59 = vsel %vm700_vm8, %v690_v20, %v693_v34  ;;  %v15047_v11 = vand.u32 2147483647, %v10453_v60  ;;  %v2594_v24 = vsel %vm8357_vm12, 0, %v8356_v38 }
 0x164   : > { %v706_v15 = vsel %vm702_vm10, %v690_v20, %v705_v55  ;;  %v709_v42 = vsel %vm703_vm11, %v696_v58, 920167782  ;;  %v713_v51 = vsel %vm703_vm11, %v699_v62, 1326507024  ;;  %v658_v46 = vand.u32 3, %v654_v29 }
 0x165   : > { %vm10921_vm13 = vcmp.le.f32.partialorder %v15047_v11, 0.7853982  ;;  %v2579_v40 = vadd.s32 %v10821_v41, %v10837_v22  ;;  %v2595_v23 = vsub.s32 32, %v2594_v24  ;;  %v2599_v2 = vsub.s32 4294967266, %v2594_v24 }
 0x166   : > { %vm657_vm14 = vweird.f32 %v10692_v61  ;;  %v707_v39 = vsel %vm701_vm9, %v704_v21, %v706_v15  ;;  %v710_v1 = vsel %vm702_vm10, %v693_v34, %v709_v42  ;;  %v714_v17 = vsel %vm702_vm10, %v696_v58, %v713_v51 }
 0x167   : > { %v431_v38 = vmul.f32 %v10314_v26, %v10917_v10  ;;  %v2597_v20 = vshrl.u32 %v2579_v40, %v2595_v23  ;;  %v2600_v55 = vadd.s32 127, %v2599_v2  ;;  %v711_v29 = vsel %vm701_vm9, %v708_v36, %v710_v1 }
 0x168   : > { %v715_v62 = vsel %vm701_vm9, %v712_v59, %v714_v17  ;;  %v10941_v11 = vmul.u32.u64.low %v10900_v13, %v711_v29  ;;  %v10942_v21 = vmul.u32.u64.high %v10900_v13, %v711_v29, %v10941_v11  ;;  %v9958_v34 = vpop.eup %9957  ;;  %v2508_v58 = vsel %vm10909_vm6, %v10446_v19, %v10885_v4 }
 0x169   : > { %v10937_v41 = vmul.u32.u64.low %v10900_v13, %v715_v62  ;;  %v10938_v22 = vmul.u32.u64.high %v10900_v13, %v715_v62, %v10937_v41  ;;  %v857_v15 = vsub.s32 4, %v10702_v8  ;;  %v2596_v45 = vshll.u32 %v10881_v43, %v2594_v24  ;;  %v9960_v59 = vpop.eup %9959 }
 0x16a   : > { %v2601_v36 = vshll.u32 %v2600_v55, 23  ;;  %v856_v42 = vsel %vm773_vm7, %v855_v12, %v10865_v9  ;;  %vm663_vm15 = vcmp.eq.s32.totalorder %v658_v46, 2  ;;  %v664_v51 = vxor.u32 2147483648, %v9958_v34 }
 0x16b   : > { %v10957_v40 = vadd.f32 %v10322_v28, %v431_v38  ;;  %v661_v23 = vxor.u32 2147483648, %v9960_v59  ;;  %v2598_v2 = vor.u32 %v2597_v20, %v2596_v45  ;;  %v723_v1 = vmul.u32 %v10900_v13, %v707_v39  ;;  %v10966_v38 = vpop.permute.xlu1 %364 }
 0x16c   : > { %v2602_v4 = vor.u32 4788187, %v2601_v36  ;;  %vm660_vm1 = vcmp.eq.s32.totalorder %v658_v46, 0  ;;  %v665_v43 = vsel %vm663_vm15, %v664_v51, %v9960_v59  ;;  %vm725_vm2 = vc.u32 %v10938_v22, %v10941_v11 }
 0x16d   : > { %v726_v24 = vadd.s32 1, %v10942_v21  ;;  %v859_v9 = vsel %vm10921_vm13, %v10453_v60, %v856_v42  ;;  %vm659_vm3 = vcmp.lt.s32.totalorder %v658_v46, 2  ;;  %v662_v12 = vsel %vm660_vm1, %v9958_v34, %v661_v23 }
 0x16e   : > { %v2603_v17 = vand.u32 2147483647, %v2602_v4  ;;  %9961 = vcosq.f32 %v2508_v58  ;;  %v666_v20 = vsel %vm659_vm3, %v662_v12, %v665_v43  ;;  %v980_v39 = vand.u32 2139095040, %v10957_v40 }
 0x16f   : > { %v727_v13 = vsel %vm725_vm2, %v726_v24, %v10942_v21  ;;  %9963 = vsinq.f32 %v2508_v58  ;;  %v667_v55 = vsel %vm657_vm14, nan, %v666_v20  ;;  %v2605_v29 = vcvt.s32.f32 %v2598_v2 }
 0x170   : > { %v728_v62 = vadd.s32 %v727_v13, %v723_v1  ;;  %9965 = vcosq.f32 %v859_v9  ;;  %v3863_v41 = vmul.f32 %v10869_v7, %v667_v55  ;;  %v430_v46 = vmul.f32 %v10314_v26, %v10966_v38 }
 0x171   : > { %9967 = vsinq.f32 %v859_v9  ;;  %v2606_v34 = vmul.f32 %v2605_v29, %v2603_v17  ;;  %v3903_v21 = vmul.f32 %v10638_v37, %v10679_v32  ;;  %v981_v58 = vshrl.u32 %v980_v39, 23 }
 0x172   : > { %v729_v45 = vadd.s32 536870912, %v728_v62  ;;  %v3883_v36 = vmul.f32 %v10635_v57, %v3863_v41  ;;  %v858_v61 = vsel %vm773_vm7, %v857_v15, %v10702_v8  ;;  %v2507_v7 = vsel %vm2422_vm0, %v2506_v30, %v10669_v44 }
 0x173   : > { %v3939_v42 = vmul.f32 %v10632_v56, %v10338_v35  ;;  %v10991_v23 = vadd.f32 %v10322_v28, %v430_v46  ;;  %v2607_v32 = vxor.u32 2147483648, %v2606_v34  ;;  %v860_v8 = vsel %vm10921_vm13, 0, %v858_v61 }
 0x174   : > { %v10986_v59 = vshrl.u32 %v729_v45, 30  ;;  %v3919_v51 = vadd.f32 %v3903_v21, %v3883_v36  ;;  %v2509_v15 = vsel %vm10909_vm6, 0, %v2507_v7  ;;  %v8298_v44 = vadd.s32 4294967169, %v981_v58 }
 0x175   : > { %vm2525_vm0 = vcmp.lt.s32.totalorder %v10709_v16, 0  ;;  %v877_v35 = vand.u32 2139095040, %v10991_v23  ;;  %v864_v9 = vand.u32 3, %v860_v8  ;;  %v2513_v49 = vand.u32 3, %v2509_v15 }
 0x176   : > { %v731_v2 = vshll.u32 %v10986_v59, 30  ;;  %v3955_v4 = vadd.f32 %v3939_v42, %v3919_v51  ;;  %v2608_v12 = vsel %vm2525_vm0, %v2607_v32, %v2606_v34  ;;  %v987_v31 = vadd.s32 1, %v8298_v44 }
 0x177   : > { %v15051_v39 = vand.u32 2147483647, %v10709_v16  ;;  %v878_v46 = vshrl.u32 %v877_v35, 23  ;;  %vm866_vm5 = vcmp.eq.s32.totalorder %v864_v9, 0  ;;  %vm2515_vm6 = vcmp.eq.s32.totalorder %v2513_v49, 0 }
 0x178   : > { %v732_v30 = vsub.s32 %v728_v62, %v731_v2  ;;  %v9962_v1 = vpop.eup %9961  ;;  %v10999_v43 = vpack.c.bf16 %v3955_v4, %v10671_v33  ;;  %v14912_v45 = vand.u32 2147483647, %v10957_v40  ;;  %vm2518_vm7 = vcmp.eq.s32.totalorder %v2513_v49, 2 }
 0x179   : > { %v9964_v24 = vpop.eup %9963  ;;  %vm11008_vm4 = vcmp.le.f32.partialorder %v15051_v39, 0.7853982  ;;  %v2519_v41 = vxor.u32 2147483648, %v9962_v1  ;;  %vm988_vm8 = vcmp.gt.s32.totalorder %v987_v31, 0  ;;  %v2609_v58 = vsub.s32 4, %v10861_v18 }
 0x17a   : > { %15050 = vst [vmem:[#allocation13_spill] sm:$0xff] %v10999_v43  ;;  %v734_v17 = vsub.s32 0, %v732_v30  ;;  %v9966_v20 = vpop.eup %9965  ;;  %9295 = vmatprep.mubr.bf16.mxu0 %v10999_v43  ;;  %v2611_v29 = vsel %vm11008_vm4, %v10709_v16, %v2608_v12  ;;  %v2516_v62 = vxor.u32 2147483648, %v9964_v24  ;;  %v8294_v7 = vadd.s32 4294967169, %v878_v46 }
 0x17b   : > { %v9968_v13 = vpop.eup %9967  ;;  %v870_v21 = vxor.u32 2147483648, %v9966_v20  ;;  %9969 = vcosq.f32 %v2611_v29  ;;  %vm869_vm9 = vcmp.eq.s32.totalorder %v864_v9, 2  ;;  %v2520_v51 = vsel %vm2518_vm7, %v2519_v41, %v9964_v24 }
 0x17c   : > { %v8287_v55 = vmin.u32 %v734_v17, %v732_v30  ;;  %v867_v36 = vxor.u32 2147483648, %v9968_v13  ;;  %9971 = vsinq.f32 %v2611_v29  ;;  %v2517_v42 = vsel %vm2515_vm6, %v9962_v1, %v2516_v62 }
 0x17d   : > { %v984_v32 = vand.u32 8388607, %v14912_v45  ;;  %v989_v2 = vsel %vm988_vm8, %v987_v31, 0  ;;  %v884_v4 = vadd.s32 1, %v8294_v7  ;;  %v871_v15 = vsel %vm869_vm9, %v870_v21, %v9968_v13 }
 0x17e   : > { %v736_v34 = vclz %v8287_v55  ;;  %v868_v8 = vsel %vm866_vm5, %v9966_v20, %v867_v36  ;;  %vm2514_vm11 = vcmp.lt.s32.totalorder %v2513_v49, 2  ;;  %v2610_v35 = vsel %vm2525_vm0, %v2609_v58, %v10861_v18 }
 0x17f   : > { %v724_v12 = vadd.s32 %v10941_v11, %v10938_v22  ;;  %vm865_vm12 = vcmp.lt.s32.totalorder %v864_v9, 2  ;;  %v2521_v17 = vsel %vm2514_vm11, %v2517_v42, %v2520_v51  ;;  %v991_v39 = vand.u32 31, %v989_v2 }
 0x180   : > { %v8288_v61 = vadd.s32 4294967294, %v736_v34  ;;  %vm885_vm13 = vcmp.gt.s32.totalorder %v884_v4, 0  ;;  %v985_v20 = vor.u32 8388608, %v984_v32  ;;  %v11027_v49 = vmul.f32 %v10638_v37, %v10432_v5  ;;  %v11054_v32 = vpop.permute.xlu0 %374 }
 0x181   : > { %v872_v13 = vsel %vm865_vm12, %v868_v8, %v871_v15  ;;  %v2612_v18 = vsel %vm11008_vm4, 0, %v2610_v35  ;;  %vm2512_vm14 = vweird.f32 %v10446_v19  ;;  %v886_v9 = vsel %vm885_vm13, %v884_v4, 0 }
 0x182   : > { %vm8289_vm10 = vcmp.lt.s32.totalorder %v8288_v61, 0  ;;  %vm863_vm15 = vweird.f32 %v10453_v60  ;;  %v11033_v62 = vsel %vm2512_vm14, nan, %v2521_v17  ;;  %vm670_vm1 = vcmp.lt.s32.totalorder %v10826_v53, 0 }
 0x183   : > { %v739_v44 = vsel %vm8289_vm10, 0, %v8288_v61  ;;  %v11038_v5 = vsel %vm863_vm15, nan, %v872_v13  ;;  %v2616_v46 = vand.u32 3, %v2612_v18  ;;  %vm11042_vm2 = vcmp.le.f32.partialorder %v668_v47, 0.7853982 }
 0x184   : > { %v740_v1 = vsub.s32 32, %v739_v44  ;;  %v744_v24 = vsub.s32 4294967266, %v739_v44  ;;  %v741_v31 = vshll.u32 %v732_v30, %v739_v44  ;;  %v11036_v30 = vsub.s32 32, %v991_v39 }
 0x185   : > { %v9970_v41 = vpop.eup %9969  ;;  %v11046_v34 = vshll.u32 %v985_v20, 8  ;;  %v11048_v36 = vshrl.u32 %v989_v2, 5  ;;  %v994_v21 = vshll.u32 %v14927_v0, %v991_v39  ;;  %v14914_v58 = vand.u32 2147483647, %v10991_v23 }
 0x186   : > { %v742_v55 = vshrl.u32 %v724_v12, %v740_v1  ;;  %v745_v29 = vadd.s32 127, %v744_v24  ;;  %v9972_v60 = vpop.eup %9971  ;;  %v888_v61 = vand.u32 31, %v886_v9  ;;  %v997_v51 = vshll.u32 %v14925_v3, %v991_v39 }
 0x187   : > { %v1000_v47 = vshll.u32 %v14922_v6, %v991_v39  ;;  %v754_v4 = vsub.s32 4, %v10986_v59  ;;  %v995_v8 = vshrl.u32 %v14925_v3, %v11036_v30  ;;  %v998_v2 = vshrl.u32 %v14922_v6, %v11036_v30 }
 0x188   : > { %v743_v22 = vor.u32 %v742_v55, %v741_v31  ;;  %v746_v11 = vshll.u32 %v745_v29, 23  ;;  %v1001_v15 = vshrl.u32 %v15042_v52, %v11036_v30  ;;  %vm2617_vm3 = vcmp.lt.s32.totalorder %v2616_v46, 2 }
 0x189   : > { %v2619_v44 = vxor.u32 2147483648, %v9972_v60  ;;  %v2622_v35 = vxor.u32 2147483648, %v9970_v41  ;;  %vm2618_vm0 = vcmp.eq.s32.totalorder %v2616_v46, 0  ;;  %vm2621_vm4 = vcmp.eq.s32.totalorder %v2616_v46, 2 }
 0x18a   : > { %v747_v19 = vor.u32 4788187, %v746_v11  ;;  %v750_v42 = vcvt.s32.f32 %v743_v22  ;;  %v11063_v1 = vsub.s32 32, %v888_v61  ;;  %v432_v24 = vmul.f32 %v10314_v26, %v11054_v32 }
 0x18b   : > { %vm2615_vm5 = vweird.f32 %v10709_v16  ;;  %v1003_v31 = vshll.u32 %v15042_v52, %v991_v39  ;;  %v1004_v55 = vshrl.u32 %v15038_v63, %v11036_v30  ;;  %vm1009_vm6 = vcmp.lt.s32.totalorder %v11048_v36, 1 }
 0x18c   : > { %v748_v7 = vand.u32 2147483647, %v747_v19  ;;  %v755_v29 = vsel %vm670_vm1, %v754_v4, %v10986_v59  ;;  %v11075_v20 = vor.u32 %v995_v8, %v994_v21  ;;  %v11077_v13 = vor.u32 %v998_v2, %v997_v51 }
 0x18d   : > { %v11079_v18 = vor.u32 %v1001_v15, %v1000_v47  ;;  %v2620_v22 = vsel %vm2618_vm0, %v9970_v41, %v2619_v44  ;;  %v2623_v11 = vsel %vm2621_vm4, %v2622_v35, %v9972_v60  ;;  %v1007_v59 = vshrl.u32 %v15046_v14, %v11036_v30 }
 0x18e   : > { %v751_v12 = vmul.f32 %v750_v42, %v748_v7  ;;  %v1006_v7 = vshll.u32 %v15038_v63, %v991_v39  ;;  %v901_v21 = vshrl.u32 %v15038_v63, %v11063_v1  ;;  %v11092_v51 = vadd.f32 %v10322_v28, %v432_v24 }
 0x18f   : > { %v757_v41 = vsel %vm11042_vm2, 0, %v755_v29  ;;  %v1005_v60 = vor.u32 %v1004_v55, %v1003_v31  ;;  %v904_v39 = vshrl.u32 %v15046_v14, %v11063_v1  ;;  %v2624_v47 = vsel %vm2617_vm3, %v2620_v22, %v2623_v11 }
 0x190   : > { %v752_v17 = vxor.u32 2147483648, %v751_v12  ;;  %v11099_v4 = vshrl.u32 %v886_v9, 5  ;;  %v900_v8 = vshll.u32 %v15042_v52, %v888_v61  ;;  %v892_v2 = vshrl.u32 %v14925_v3, %v11063_v1 }
 0x191   : > { %v895_v15 = vshrl.u32 %v14922_v6, %v11063_v1  ;;  %v898_v33 = vshrl.u32 %v15042_v52, %v11063_v1  ;;  %v903_v44 = vshll.u32 %v15038_v63, %v888_v61  ;;  %v1008_v35 = vor.u32 %v1007_v59, %v1006_v7 }
 0x192   : > { %v753_v19 = vsel %vm670_vm1, %v752_v17, %v751_v12  ;;  %vm1012_vm7 = vcmp.lt.s32.totalorder %v11048_v36, 4  ;;  %v902_v46 = vor.u32 %v901_v21, %v900_v8  ;;  %v1083_v9 = vand.u32 2139095040, %v11092_v51 }
 0x193   : > { %v756_v42 = vsel %vm11042_vm2, %v10826_v53, %v753_v19  ;;  %v891_v12 = vshll.u32 %v14927_v0, %v888_v61  ;;  %v894_v24 = vshll.u32 %v14925_v3, %v888_v61  ;;  %v897_v17 = vshll.u32 %v14922_v6, %v888_v61 }
 0x194   : > { %9973 = vcosq.f32 %v756_v42  ;;  %v905_v31 = vor.u32 %v904_v39, %v903_v44  ;;  %v2625_v55 = vsel %vm2615_vm5, nan, %v2624_v47  ;;  %v761_v29 = vand.u32 3, %v757_v41 }
 0x195   : > { %9975 = vsinq.f32 %v756_v42  ;;  %v881_v22 = vand.u32 8388607, %v14914_v58  ;;  %v1084_v11 = vshrl.u32 %v1083_v9, 23  ;;  %v11118_v19 = vor.u32 %v892_v2, %v891_v12 }
 0x196   : > { %v11120_v7 = vor.u32 %v895_v15, %v894_v24  ;;  %v899_v42 = vor.u32 %v898_v33, %v897_v17  ;;  %vm909_vm8 = vcmp.lt.s32.totalorder %v11099_v4, 4  ;;  %vm760_vm9 = vweird.f32 %v10826_v53 }
 0x197   : > { %vm1010_vm10 = vcmp.lt.s32.totalorder %v11048_v36, 2  ;;  %vm1011_vm11 = vcmp.lt.s32.totalorder %v11048_v36, 3  ;;  %v1017_v16 = vsel %vm1009_vm6, %v11075_v20, %v11077_v13  ;;  %v915_v61 = vsel %vm909_vm8, %v902_v46, 920167782 }
 0x198   : > { %v1018_v59 = vsel %vm1012_vm7, %v1005_v60, 920167782  ;;  %v1021_v21 = vsel %vm1009_vm6, %v11077_v13, %v11079_v18  ;;  %v919_v41 = vsel %vm909_vm8, %v905_v31, 1326507024  ;;  %v8302_v39 = vadd.s32 4294967169, %v1084_v11 }
 0x199   : > { %v3865_v47 = vmul.f32 %v2625_v55, %v11038_v5  ;;  %v1022_v8 = vsel %vm1012_vm7, %v1008_v35, 1326507024  ;;  %vm906_vm12 = vcmp.lt.s32.totalorder %v11099_v4, 1  ;;  %vm908_vm13 = vcmp.lt.s32.totalorder %v11099_v4, 3 }
 0x19a   : > { %vm766_vm14 = vcmp.eq.s32.totalorder %v761_v29, 2  ;;  %v882_v15 = vor.u32 8388608, %v881_v22  ;;  %v914_v33 = vsel %vm906_vm12, %v11118_v19, %v11120_v7  ;;  %v916_v44 = vsel %vm908_vm13, %v899_v42, %v915_v61  ;;  %v11162_v22 = vpop.permute.xlu1 %2127 }
 0x19b   : > { %v1019_v35 = vsel %vm1011_vm11, %v11079_v18, %v1018_v59  ;;  %v918_v12 = vsel %vm906_vm12, %v11120_v7, %v899_v42  ;;  %v920_v24 = vsel %vm908_vm13, %v902_v46, %v919_v41  ;;  %v1023_v31 = vsel %vm1011_vm11, %v1005_v60, %v1022_v8 }
 0x19c   : > { %vm907_vm15 = vcmp.lt.s32.totalorder %v11099_v4, 2  ;;  %v1090_v55 = vadd.s32 1, %v8302_v39  ;;  %v3885_v11 = vmul.f32 %v10635_v57, %v3865_v47  ;;  %vm763_vm1 = vcmp.eq.s32.totalorder %v761_v29, 0 }
 0x19d   : > { %v917_v59 = vsel %vm907_vm15, %v914_v33, %v916_v44  ;;  %vm762_vm2 = vcmp.lt.s32.totalorder %v761_v29, 2  ;;  %v921_v46 = vsel %vm907_vm15, %v918_v12, %v920_v24  ;;  %v922_v41 = vshll.u32 %v882_v15, 8 }
 0x19e   : > { %v9974_v2 = vpop.eup %9973  ;;  %v1020_v39 = vsel %vm1010_vm10, %v1017_v16, %v1019_v35  ;;  %v1024_v8 = vsel %vm1010_vm10, %v1021_v21, %v1023_v31  ;;  %v2182_v47 = vmul.f32 %v10311_v25, %v11162_v22  ;;  %vm1091_vm3 = vcmp.gt.s32.totalorder %v1090_v55, 0 }
 0x19f   : > { %v9976_v9 = vpop.eup %9975  ;;  %v767_v5 = vxor.u32 2147483648, %v9974_v2  ;;  %v11178_v33 = vmul.u32.u64.low %v922_v41, %v917_v59  ;;  %v11179_v29 = vmul.u32.u64.high %v922_v41, %v917_v59, %v11178_v33  ;;  %v3941_v21 = vmul.f32 %v10632_v56, %v10699_v50 }
 0x1a0   : > { %v764_v17 = vxor.u32 2147483648, %v9976_v9  ;;  %v11184_v15 = vmul.u32.u64.low %v922_v41, %v921_v46  ;;  %v11185_v16 = vmul.u32.u64.high %v922_v41, %v921_v46, %v11184_v15  ;;  %v3904_v44 = vmul.f32 %v10638_v37, %v10794_v54 }
 0x1a1   : > { %v768_v61 = vsel %vm766_vm14, %v767_v5, %v9976_v9  ;;  %v11192_v53 = vmul.u32.u64.low %v11046_v34, %v1020_v39  ;;  %v11193_v5 = vmul.u32.u64.high %v11046_v34, %v1020_v39, %v11192_v53  ;;  %v911_v24 = vsel %vm909_vm8, %v899_v42, 2102212464 }
 0x1a2   : > { %v765_v45 = vsel %vm763_vm1, %v9974_v2, %v764_v17  ;;  %v3921_v2 = vadd.f32 %v11027_v49, %v3885_v11  ;;  %v11198_v49 = vmul.u32.u64.low %v11046_v34, %v1024_v8  ;;  %v11199_v12 = vmul.u32.u64.high %v11046_v34, %v1024_v8, %v11198_v49 }
 0x1a3   : > { %v769_v60 = vsel %vm762_vm2, %v765_v45, %v768_v61  ;;  %v11204_v50 = vadd.f32 %v10319_v27, %v2182_v47  ;;  %v3940_v54 = vmul.f32 %v10632_v56, %v10417_v48  ;;  %v890_v11 = vshrl.u32 %v14927_v0, %v11063_v1 }
 0x1a4   : > { %v770_v9 = vsel %vm760_vm9, nan, %v769_v60  ;;  %v3957_v17 = vadd.f32 %v3941_v21, %v3921_v2  ;;  %v993_v46 = vshrl.u32 %v14927_v0, %v11036_v30  ;;  %v1014_v48 = vsel %vm1012_vm7, %v11079_v18, 2102212464 }
 0x1a5   : > { %v3864_v45 = vmul.f32 %v11033_v62, %v770_v9  ;;  %v1092_v62 = vsel %vm1091_vm3, %v1090_v55, 0  ;;  %15056 = vst [vmem:[#allocation14_spill] sm:$0xff] %v11204_v50  ;;  %v910_v42 = vsel %vm906_vm12, %v890_v11, %v11118_v19  ;;  %v912_v55 = vsel %vm908_vm13, %v11120_v7, %v911_v24 }
 0x1a6   : > { %v1094_v61 = vand.u32 31, %v1092_v62  ;;  %v932_v60 = vadd.s32 1, %v11179_v29  ;;  %v2629_v1 = vand.u32 2139095040, %v11204_v50  ;;  %vm931_vm0 = vc.u32 %v11185_v16, %v11178_v33 }
 0x1a7   : > { %v3884_v35 = vmul.f32 %v10635_v57, %v3864_v45  ;;  %v1035_v30 = vadd.s32 1, %v11193_v5  ;;  %v913_v19 = vsel %vm907_vm15, %v910_v42, %v912_v55  ;;  %v1013_v18 = vsel %vm1009_vm6, %v993_v46, %v11075_v20 }
 0x1a8   : > { %v11230_v8 = vsub.s32 32, %v1094_v61  ;;  %v1015_v7 = vsel %vm1011_vm11, %v11077_v13, %v1014_v48  ;;  %vm1034_vm4 = vc.u32 %v11199_v12, %v11192_v53  ;;  %v933_v47 = vsel %vm931_vm0, %v932_v60, %v11179_v29 }
 0x1a9   : > { %v3920_v31 = vadd.f32 %v3904_v44, %v3884_v35  ;;  %v2630_v9 = vshrl.u32 %v2629_v1, 23  ;;  %v929_v2 = vmul.u32 %v922_v41, %v913_v19  ;;  %v1016_v4 = vsel %vm1010_vm10, %v1013_v18, %v1015_v7 }
 0x1aa   : > { %v1036_v45 = vsel %vm1034_vm4, %v1035_v30, %v11193_v5  ;;  %v1106_v15 = vshll.u32 %v15042_v52, %v1094_v61  ;;  %v1107_v20 = vshrl.u32 %v15038_v63, %v11230_v8  ;;  %v14913_v13 = vand.u32 2147483647, %v11092_v51 }
 0x1ab   : > { %v3956_v59 = vadd.f32 %v3940_v54, %v3920_v31  ;;  %v934_v21 = vadd.s32 %v933_v47, %v929_v2  ;;  %v11248_v44 = vshrl.u32 %v1092_v62, 5  ;;  %v1097_v35 = vshll.u32 %v14927_v0, %v1094_v61 }
 0x1ac   : > { %v1100_v29 = vshll.u32 %v14925_v3, %v1094_v61  ;;  %v1109_v41 = vshll.u32 %v15038_v63, %v1094_v61  ;;  %v1110_v36 = vshrl.u32 %v15046_v14, %v11230_v8  ;;  %v8358_v5 = vadd.s32 4294967169, %v2630_v9 }
 0x1ad   : > { %v11223_v39 = vpack.c.bf16 %v3957_v17, %v3956_v59  ;;  %v1098_v49 = vshrl.u32 %v14925_v3, %v11230_v8  ;;  %v1101_v24 = vshrl.u32 %v14922_v6, %v11230_v8  ;;  %v1103_v54 = vshll.u32 %v14922_v6, %v1094_v61  ;;  %v11262_v17 = vpop.permute.xlu0 %2135 }
 0x1ae   : > { %v1104_v62 = vshrl.u32 %v15042_v52, %v11230_v8  ;;  %15058 = vst [vmem:[#allocation16_spill] sm:$0xff] %v11262_v17  ;;  %v1032_v31 = vmul.u32 %v11046_v34, %v1016_v4  ;;  %v1108_v11 = vor.u32 %v1107_v20, %v1106_v15  ;;  %v1087_v59 = vand.u32 8388607, %v14913_v13 }
 0x1af   : > { %15057 = vst [vmem:[#allocation15_spill] sm:$0xff] %v11223_v39  ;;  %vm1115_vm5 = vcmp.lt.s32.totalorder %v11248_v44, 4  ;;  %v2636_v46 = vadd.s32 1, %v8358_v5  ;;  %v935_v55 = vadd.s32 536870912, %v934_v21  ;;  %v1111_v48 = vor.u32 %v1110_v36, %v1109_v41 }
 0x1b0   : > { %v11268_v42 = vadd.s32 %v1036_v45, %v1032_v31  ;;  %v2184_v61 = vmul.f32 %v10311_v25, %v11262_v17  ;;  %v1099_v60 = vor.u32 %v1098_v49, %v1097_v35  ;;  %v1102_v1 = vor.u32 %v1101_v24, %v1100_v29 }
 0x1b1   : > { %v1105_v30 = vor.u32 %v1104_v62, %v1103_v54  ;;  %vm2637_vm6 = vcmp.gt.s32.totalorder %v2636_v46, 0  ;;  %vm1112_vm7 = vcmp.lt.s32.totalorder %v11248_v44, 1  ;;  %vm1114_vm8 = vcmp.lt.s32.totalorder %v11248_v44, 3 }
 0x1b2   : > { %v1121_v34 = vsel %vm1115_vm5, %v1108_v11, 920167782  ;;  %v2638_v19 = vsel %vm2637_vm6, %v2636_v46, 0  ;;  %v1088_v18 = vor.u32 8388608, %v1087_v59  ;;  %v11276_v7 = vshrl.u32 %v935_v55, 30 }
 0x1b3   : > { %v1125_v47 = vsel %vm1115_vm5, %v1111_v48, 1326507024  ;;  %vm1113_vm9 = vcmp.lt.s32.totalorder %v11248_v44, 2  ;;  %v1120_v9 = vsel %vm1112_vm7, %v1099_v60, %v1102_v1  ;;  %v1122_v2 = vsel %vm1114_vm8, %v1105_v30, %v1121_v34 }
 0x1b4   : > { %v2640_v4 = vand.u32 31, %v2638_v19  ;;  %v1038_v45 = vadd.s32 536870912, %v11268_v42  ;;  %v11287_v15 = vadd.f32 %v10319_v27, %v2184_v61  ;;  %v1124_v20 = vsel %vm1112_vm7, %v1102_v1, %v1105_v30 }
 0x1b5   : > { %v1126_v35 = vsel %vm1114_vm8, %v1108_v11, %v1125_v47  ;;  %v1128_v29 = vshll.u32 %v1088_v18, 8  ;;  %v1123_v41 = vsel %vm1113_vm9, %v1120_v9, %v1122_v2  ;;  %v937_v36 = vshll.u32 %v11276_v7, 30 }
 0x1b6   : > { %15059 = vst [vmem:[#allocation17_spill] sm:$0xff] %v11287_v15  ;;  %v11296_v5 = vsub.s32 32, %v2640_v4  ;;  %v11298_v49 = vshrl.u32 %v1038_v45, 30  ;;  %v1127_v24 = vsel %vm1113_vm9, %v1124_v20, %v1126_v35  ;;  %v2835_v54 = vand.u32 2139095040, %v11287_v15 }
 0x1b7   : > { %v11303_v62 = vmul.u32.u64.low %v1128_v29, %v1123_v41  ;;  %v11304_v31 = vmul.u32.u64.high %v1128_v29, %v1123_v41, %v11303_v62  ;;  %v14921_v11 = vand.u32 2147483647, %v11204_v50  ;;  %v11308_v59 = vsub.s32 %v934_v21, %v937_v36 }
 0x1b8   : > { %v11310_v46 = vmul.u32.u64.low %v1128_v29, %v1127_v24  ;;  %v11311_v55 = vmul.u32.u64.high %v1128_v29, %v1127_v24, %v11310_v46  ;;  %v2653_v48 = vshrl.u32 %v15038_v63, %v11296_v5  ;;  %v1040_v61 = vshll.u32 %v11298_v49, 30 }
 0x1b9   : > { %v2656_v34 = vshrl.u32 %v15046_v14, %v11296_v5  ;;  %v2836_v18 = vshrl.u32 %v2835_v54, 23  ;;  %v1096_v47 = vshrl.u32 %v14927_v0, %v11230_v8  ;;  %v1117_v9 = vsel %vm1115_vm5, %v1105_v30, 2102212464 }
 0x1ba   : > { %v2644_v21 = vshrl.u32 %v14925_v3, %v11296_v5  ;;  %v2652_v2 = vshll.u32 %v15042_v52, %v2640_v4  ;;  %v11325_v45 = vshrl.u32 %v2638_v19, 5  ;;  %v2647_v20 = vshrl.u32 %v14922_v6, %v11296_v5 }
 0x1bb   : > { %v2650_v35 = vshrl.u32 %v15042_v52, %v11296_v5  ;;  %v2655_v41 = vshll.u32 %v15038_v63, %v2640_v4  ;;  %v940_v8 = vsub.s32 0, %v11308_v59  ;;  %v2633_v30 = vand.u32 8388607, %v14921_v11 }
 0x1bc   : > { %v2643_v36 = vshll.u32 %v14927_v0, %v2640_v4  ;;  %v2654_v24 = vor.u32 %v2653_v48, %v2652_v2  ;;  %v2646_v54 = vshll.u32 %v14925_v3, %v2640_v4  ;;  %v2649_v19 = vshll.u32 %v14922_v6, %v2640_v4 }
 0x1bd   : > { %v2657_v46 = vor.u32 %v2656_v34, %v2655_v41  ;;  %v8366_v13 = vadd.s32 4294967169, %v2836_v18  ;;  %v1116_v58 = vsel %vm1112_vm7, %v1096_v47, %v1099_v60  ;;  %v1118_v43 = vsel %vm1114_vm8, %v1102_v1, %v1117_v9 }
 0x1be   : > { %v1138_v39 = vadd.s32 1, %v11304_v31  ;;  %v2645_v57 = vor.u32 %v2644_v21, %v2643_v36  ;;  %v2648_v17 = vor.u32 %v2647_v20, %v2646_v54  ;;  %v2651_v11 = vor.u32 %v2650_v35, %v2649_v19 }
 0x1bf   : > { %vm2661_vm10 = vcmp.lt.s32.totalorder %v11325_v45, 4  ;;  %v2842_v48 = vadd.s32 1, %v8366_v13  ;;  %vm1137_vm11 = vc.u32 %v11311_v55, %v11303_v62  ;;  %v11349_v34 = vsub.s32 %v11268_v42, %v1040_v61 }
 0x1c0   : > { %v2667_v4 = vsel %vm2661_vm10, %v2654_v24, 920167782  ;;  %v1119_v60 = vsel %vm1113_vm9, %v1116_v58, %v1118_v43  ;;  %v2671_v1 = vsel %vm2661_vm10, %v2657_v46, 1326507024  ;;  %v8295_v18 = vmin.u32 %v940_v8, %v11308_v59 }
 0x1c1   : > { %vm2658_vm12 = vcmp.lt.s32.totalorder %v11325_v45, 1  ;;  %vm2660_vm13 = vcmp.lt.s32.totalorder %v11325_v45, 3  ;;  %vm2843_vm14 = vcmp.gt.s32.totalorder %v2842_v48, 0  ;;  %v1139_v13 = vsel %vm1137_vm11, %v1138_v39, %v11304_v31 }
 0x1c2   : > { %v2634_v47 = vor.u32 8388608, %v2633_v30  ;;  %v2666_v42 = vsel %vm2658_vm12, %v2645_v57, %v2648_v17  ;;  %v2668_v44 = vsel %vm2660_vm13, %v2651_v11, %v2667_v4  ;;  %v1135_v43 = vmul.u32 %v1128_v29, %v1119_v60 }
 0x1c3   : > { %v2670_v58 = vsel %vm2658_vm12, %v2648_v17, %v2651_v11  ;;  %v2672_v61 = vsel %vm2660_vm13, %v2654_v24, %v2671_v1  ;;  %v2844_v9 = vsel %vm2843_vm14, %v2842_v48, 0  ;;  %vm2659_vm15 = vcmp.lt.s32.totalorder %v11325_v45, 2 }
 0x1c4   : > { %v1140_v21 = vadd.s32 %v1139_v13, %v1135_v43  ;;  %v2669_v39 = vsel %vm2659_vm15, %v2666_v42, %v2668_v44  ;;  %v2846_v31 = vand.u32 31, %v2844_v9  ;;  %v2673_v2 = vsel %vm2659_vm15, %v2670_v58, %v2672_v61 }
 0x1c5   : > { %v2674_v20 = vshll.u32 %v2634_v47, 8  ;;  %v1043_v29 = vsub.s32 0, %v11349_v34  ;;  %v942_v35 = vclz %v8295_v18  ;;  %v2663_v48 = vsel %vm2661_vm10, %v2651_v11, 2102212464 }
 0x1c6   : > { %v11377_v30 = vsub.s32 32, %v2846_v31  ;;  %v1141_v36 = vadd.s32 536870912, %v1140_v21  ;;  %v2642_v4 = vshrl.u32 %v14927_v0, %v11296_v5  ;;  %v14924_v60 = vand.u32 2147483647, %v11287_v15 }
 0x1c7   : > { %v11373_v41 = vmul.u32.u64.low %v2674_v20, %v2669_v39  ;;  %v11374_v8 = vmul.u32.u64.high %v2674_v20, %v2669_v39, %v11373_v41  ;;  %v11379_v24 = vmul.u32.u64.low %v2674_v20, %v2673_v2  ;;  %v11380_v54 = vmul.u32.u64.high %v2674_v20, %v2673_v2, %v11379_v24 }
 0x1c8   : > { %v8299_v19 = vmin.u32 %v1043_v29, %v11349_v34  ;;  %v8296_v46 = vadd.s32 4294967294, %v942_v35  ;;  %v2858_v1 = vshll.u32 %v15042_v52, %v2846_v31  ;;  %v2859_v18 = vshrl.u32 %v15038_v63, %v11377_v30 }
 0x1c9   : > { %v11391_v13 = vshrl.u32 %v1141_v36, 30  ;;  %v11393_v47 = vshrl.u32 %v2844_v9, 5  ;;  %v2861_v42 = vshll.u32 %v15038_v63, %v2846_v31  ;;  %v2862_v44 = vshrl.u32 %v15046_v14, %v11377_v30 }
 0x1ca   : > { %v2662_v11 = vsel %vm2658_vm12, %v2642_v4, %v2645_v57  ;;  %v2664_v5 = vsel %vm2660_vm13, %v2648_v17, %v2663_v48  ;;  %v2849_v43 = vshll.u32 %v14927_v0, %v2846_v31  ;;  %v2852_v58 = vshll.u32 %v14925_v3, %v2846_v31 }
 0x1cb   : > { %v2850_v61 = vshrl.u32 %v14925_v3, %v11377_v30  ;;  %v2853_v9 = vshrl.u32 %v14922_v6, %v11377_v30  ;;  %v2855_v39 = vshll.u32 %v14922_v6, %v2846_v31  ;;  %v2856_v2 = vshrl.u32 %v15042_v52, %v11377_v30 }
 0x1cc   : > { %v2684_v57 = vadd.s32 1, %v11374_v8  ;;  %v2860_v29 = vor.u32 %v2859_v18, %v2858_v1  ;;  %vm2683_vm1 = vc.u32 %v11380_v54, %v11373_v41  ;;  %v2839_v17 = vand.u32 8388607, %v14924_v60  ;;  %v11420_v1 = vpop.permute.xlu1 %2131 }
 0x1cd   : > { %v2863_v35 = vor.u32 %v2862_v44, %v2861_v42  ;;  %vm2867_vm2 = vcmp.lt.s32.totalorder %v11393_v47, 4  ;;  %v1045_v36 = vclz %v8299_v19  ;;  %v1143_v24 = vshll.u32 %v11391_v13, 30  ;;  %15060 = vst [vmem:[#allocation18_spill] sm:$0xff] %v11420_v1 }
 0x1ce   : > { %v2665_v31 = vsel %vm2659_vm15, %v2662_v11, %v2664_v5  ;;  %vm8297_vm3 = vcmp.lt.s32.totalorder %v8296_v46, 0  ;;  %v2851_v48 = vor.u32 %v2850_v61, %v2849_v43  ;;  %v2854_v4 = vor.u32 %v2853_v9, %v2852_v58 }
 0x1cf   : > { %v2857_v6 = vor.u32 %v2856_v2, %v2855_v39  ;;  %v2685_v18 = vsel %vm2683_vm1, %v2684_v57, %v11374_v8  ;;  %vm2864_vm0 = vcmp.lt.s32.totalorder %v11393_v47, 1  ;;  %vm2866_vm4 = vcmp.lt.s32.totalorder %v11393_v47, 3 }
 0x1d0   : > { %v2873_v19 = vsel %vm2867_vm2, %v2860_v29, 920167782  ;;  %v2681_v42 = vmul.u32 %v2674_v20, %v2665_v31  ;;  %v2840_v44 = vor.u32 8388608, %v2839_v17  ;;  %v2877_v45 = vsel %vm2867_vm2, %v2863_v35, 1326507024 }
 0x1d1   : > { %v945_v11 = vsel %vm8297_vm3, 0, %v8296_v46  ;;  %v11429_v5 = vsub.s32 %v1140_v21, %v1143_v24  ;;  %v2183_v43 = vmul.f32 %v10311_v25, %v11420_v1  ;;  %vm2865_vm5 = vcmp.lt.s32.totalorder %v11393_v47, 2  ;;  %v11442_v46 = vpop.permute.xlu0 %2151 }
 0x1d2   : > { %v2686_v58 = vadd.s32 %v2685_v18, %v2681_v42  ;;  %v2872_v8 = vsel %vm2864_vm0, %v2851_v48, %v2854_v4  ;;  %v2874_v61 = vsel %vm2866_vm4, %v2857_v6, %v2873_v19  ;;  %v8300_v20 = vadd.s32 4294967294, %v1045_v36  ;;  %15061 = vst [vmem:[#allocation19_spill] sm:$0xff] %v11442_v46 }
 0x1d3   : > { %v2876_v9 = vsel %vm2864_vm0, %v2854_v4, %v2857_v6  ;;  %v2878_v21 = vsel %vm2866_vm4, %v2860_v29, %v2877_v45  ;;  %v950_v39 = vsub.s32 4294967266, %v945_v11  ;;  %v2880_v2 = vshll.u32 %v2840_v44, 8 }
 0x1d4   : > { %v2875_v57 = vsel %vm2865_vm5, %v2872_v8, %v2874_v61  ;;  %v11447_v17 = vadd.f32 %v10319_v27, %v2183_v43  ;;  %v1146_v35 = vsub.s32 0, %v11429_v5  ;;  %v2687_v24 = vadd.s32 536870912, %v2686_v58 }
 0x1d5   : > { %v2879_v36 = vsel %vm2865_vm5, %v2876_v9, %v2878_v21  ;;  %v2188_v31 = vmul.f32 %v10311_v25, %v11442_v46  ;;  %vm8301_vm6 = vcmp.lt.s32.totalorder %v8300_v20, 0  ;;  %v930_v29 = vadd.s32 %v11178_v33, %v11185_v16 }
 0x1d6   : > { %15062 = vst [vmem:[#allocation20_spill] sm:$0xff] %v11447_v17  ;;  %v946_v18 = vsub.s32 32, %v945_v11  ;;  %v951_v19 = vadd.s32 127, %v950_v39  ;;  %v11456_v42 = vmul.u32.u64.low %v2880_v2, %v2875_v57  ;;  %v11457_v44 = vmul.u32.u64.high %v2880_v2, %v2875_v57, %v11456_v42 }
 0x1d7   : > { %v2848_v45 = vshrl.u32 %v14927_v0, %v11377_v30  ;;  %v11462_v43 = vmul.u32.u64.low %v2880_v2, %v2879_v36  ;;  %v11463_v8 = vmul.u32.u64.high %v2880_v2, %v2879_v36, %v11462_v43  ;;  %v2732_v61 = vand.u32 2139095040, %v11447_v17 }
 0x1d8   : > { %15063 = vst [vmem:[#allocation21_spill] sm:$0xff] %v11456_v42  ;;  %v8303_v9 = vmin.u32 %v1146_v35, %v11429_v5  ;;  %v11467_v21 = vshrl.u32 %v2687_v24, 30  ;;  %v2869_v33 = vsel %vm2867_vm2, %v2857_v6, 2102212464  ;;  %v11472_v16 = vadd.f32 %v10319_v27, %v2188_v31 }
 0x1d9   : > { %15064 = vst [vmem:[#allocation22_spill] sm:$0xff] %v11463_v8  ;;  %v2733_v39 = vshrl.u32 %v2732_v61, 23  ;;  %v11474_v57 = vsel %vm8301_vm6, 0, %v8300_v20  ;;  %v948_v60 = vshrl.u32 %v930_v29, %v946_v18  ;;  %v952_v30 = vshll.u32 %v951_v19, 23 }
 0x1da   : > { %15065 = vst [vmem:[#allocation23_spill] sm:$0xff] %v11467_v21  ;;  %15066 = vst [vmem:[#allocation24_spill] sm:$0xff] %v11472_v16  ;;  %v2868_v36 = vsel %vm2864_vm0, %v2848_v45, %v2851_v48  ;;  %v2870_v43 = vsel %vm2866_vm4, %v2854_v4, %v2869_v33  ;;  %v1148_v24 = vclz %v8303_v9  ;;  %v2689_v3 = vshll.u32 %v11467_v21, 30 }
 0x1db   : > { %v8362_v35 = vadd.s32 4294967169, %v2733_v39  ;;  %v3247_v6 = vand.u32 2139095040, %v11472_v16  ;;  %v947_v31 = vshll.u32 %v11308_v59, %v945_v11  ;;  %v1053_v20 = vsub.s32 4294967266, %v11474_v57 }
 0x1dc   : > { %v2871_v29 = vsel %vm2865_vm5, %v2868_v36, %v2870_v43  ;;  %v2890_v18 = vadd.s32 1, %v11457_v44  ;;  %v953_v19 = vor.u32 4788187, %v952_v30  ;;  %vm2889_vm7 = vc.u32 %v11463_v8, %v11456_v42 }
 0x1dd   : > { %v2739_v0 = vadd.s32 1, %v8362_v35  ;;  %v949_v48 = vor.u32 %v948_v60, %v947_v31  ;;  %v8304_v4 = vadd.s32 4294967294, %v1148_v24  ;;  %v11489_v45 = vsub.s32 %v2686_v58, %v2689_v3 }
 0x1de   : > { %v3248_v9 = vshrl.u32 %v3247_v6, 23  ;;  %v2887_v59 = vmul.u32 %v2880_v2, %v2871_v29  ;;  %v14929_v11 = vand.u32 2147483647, %v11447_v17  ;;  %v1033_v47 = vadd.s32 %v11192_v53, %v11199_v12 }
 0x1df   : > { %vm2740_vm8 = vcmp.gt.s32.totalorder %v2739_v0, 0  ;;  %v11496_v33 = vmul.f32 %v10638_v37, %v10917_v10  ;;  %v2891_v60 = vsel %vm2889_vm7, %v2890_v18, %v11457_v44  ;;  %v1049_v30 = vsub.s32 32, %v11474_v57 }
 0x1e0   : > { %v2741_v61 = vsel %vm2740_vm8, %v2739_v0, 0  ;;  %v1054_v36 = vadd.s32 127, %v1053_v20  ;;  %v954_v3 = vand.u32 2147483647, %v953_v19  ;;  %v956_v58 = vcvt.s32.f32 %v949_v48 }
 0x1e1   : > { %15067 = vst [vmem:[#allocation25_spill] sm:$0xff] %v11496_v33  ;;  %v2743_v39 = vand.u32 31, %v2741_v61  ;;  %vm8305_vm9 = vcmp.lt.s32.totalorder %v8304_v4, 0  ;;  %v2692_v0 = vsub.s32 0, %v11489_v45  ;;  %v8382_v43 = vadd.s32 4294967169, %v3248_v9 }
 0x1e2   : > { %v11501_v35 = vadd.s32 %v2891_v60, %v2887_v59  ;;  %v2736_v53 = vand.u32 8388607, %v14929_v11  ;;  %v2742_v10 = vshrl.u32 %v2741_v61, 5  ;;  %v15068_v12 = vmov 683565275  }
 0x1e3   : > { %v2744_v2 = vsub.s32 32, %v2743_v39  ;;  %v2746_v24 = vshll.u32 %v15068_v12, %v2743_v39  ;;  %v15069_v44 = vmov 2475754826   ;;  %v15070_v20 = vmov 2131351028  }
 0x1e4   : > { %v2749_v31 = vshll.u32 %v15069_v44, %v2743_v39  ;;  %v2752_v48 = vshll.u32 %v15070_v20, %v2743_v39  ;;  %v2755_v19 = vshll.u32 %v15042_v52, %v2743_v39  ;;  %v2758_v11 = vshll.u32 %v15038_v63, %v2743_v39 }
 0x1e5   : > { %v2747_v6 = vshrl.u32 %v15069_v44, %v2744_v2  ;;  %v2750_v29 = vshrl.u32 %v15070_v20, %v2744_v2  ;;  %v2753_v18 = vshrl.u32 %v15042_v52, %v2744_v2  ;;  %v2756_v9 = vshrl.u32 %v15038_v63, %v2744_v2 }
 0x1e6   : > { %v2759_v59 = vshrl.u32 %v15046_v14, %v2744_v2  ;;  %v3254_v46 = vadd.s32 1, %v8382_v43  ;;  %v1050_v33 = vshll.u32 %v11349_v34, %v11474_v57  ;;  %v2737_v17 = vor.u32 8388608, %v2736_v53 }
 0x1e7   : > { %v2748_v60 = vor.u32 %v2747_v6, %v2746_v24  ;;  %v2751_v61 = vor.u32 %v2750_v29, %v2749_v31  ;;  %v2754_v1 = vor.u32 %v2753_v18, %v2752_v48  ;;  %v2757_v27 = vor.u32 %v2756_v9, %v2755_v19  ;;  %v11531_v19 = vpop.permute.xlu1 %379 }
 0x1e8   : > { %v1051_v25 = vshrl.u32 %v1033_v47, %v1049_v30  ;;  %v1055_v15 = vshll.u32 %v1054_v36, 23  ;;  %v957_v42 = vmul.f32 %v956_v58, %v954_v3  ;;  %v2760_v8 = vor.u32 %v2759_v59, %v2758_v11  ;;  %15071 = vst [vmem:[#allocation26_spill] sm:$0xff] %v11531_v19 }
 0x1e9   : > { %v11518_v21 = vsel %vm8305_vm9, 0, %v8304_v4  ;;  %v8359_v50 = vmin.u32 %v2692_v0, %v11489_v45  ;;  %vm2761_vm10 = vcmp.lt.s32.totalorder %v2742_v10, 1  ;;  %vm2764_vm11 = vcmp.lt.s32.totalorder %v2742_v10, 4 }
 0x1ea   : > { %v2893_v39 = vadd.s32 536870912, %v11501_v35  ;;  %v2769_v43 = vsel %vm2761_vm10, %v2748_v60, %v2751_v61  ;;  %v2770_v24 = vsel %vm2764_vm11, %v2757_v27, 920167782  ;;  %vm3255_vm12 = vcmp.gt.s32.totalorder %v3254_v46, 0 }
 0x1eb   : > { %v2745_v34 = vshrl.u32 %v15068_v12, %v2744_v2  ;;  %vm2763_vm13 = vcmp.lt.s32.totalorder %v2742_v10, 3  ;;  %v2766_v57 = vsel %vm2764_vm11, %v2754_v1, 2102212464  ;;  %v2777_v47 = vshll.u32 %v2737_v17, 8 }
 0x1ec   : > { %vm2762_vm14 = vcmp.lt.s32.totalorder %v2742_v10, 2  ;;  %v2771_v30 = vsel %vm2763_vm13, %v2754_v1, %v2770_v24  ;;  %v2773_v11 = vsel %vm2761_vm10, %v2751_v61, %v2754_v1  ;;  %v2774_v36 = vsel %vm2764_vm11, %v2760_v8, 1326507024 }
 0x1ed   : > { %v2694_v4 = vclz %v8359_v50  ;;  %v2765_v3 = vsel %vm2761_vm10, %v2745_v34, %v2748_v60  ;;  %v2772_v58 = vsel %vm2762_vm14, %v2769_v43, %v2771_v30  ;;  %v3256_v0 = vsel %vm3255_vm12, %v3254_v46, 0 }
 0x1ee   : > { %v2767_v53 = vsel %vm2763_vm13, %v2751_v61, %v2766_v57  ;;  %v2775_v6 = vsel %vm2763_vm13, %v2757_v27, %v2774_v36  ;;  %v11524_v31 = vmul.u32.u64.low %v2777_v47, %v2772_v58  ;;  %v11525_v29 = vmul.u32.u64.high %v2777_v47, %v2772_v58, %v11524_v31 }
 0x1ef   : > { %v1052_v18 = vor.u32 %v1051_v25, %v1050_v33  ;;  %v1056_v2 = vor.u32 4788187, %v1055_v15  ;;  %v11528_v48 = vshrl.u32 %v2893_v39, 30  ;;  %v2776_v17 = vsel %vm2762_vm14, %v2773_v11, %v2775_v6 }
 0x1f0   : > { %v958_v1 = vxor.u32 2147483648, %v957_v42  ;;  %v11533_v50 = vmul.u32.u64.low %v2777_v47, %v2776_v17  ;;  %v11534_v8 = vmul.u32.u64.high %v2777_v47, %v2776_v17, %v11533_v50  ;;  %v3258_v9 = vand.u32 31, %v3256_v0 }
 0x1f1   : > { %v11538_v27 = vmul.f32 %v10638_v37, %v10966_v38  ;;  %v1156_v46 = vsub.s32 4294967266, %v11518_v21  ;;  %v8360_v59 = vadd.s32 4294967294, %v2694_v4  ;;  %v2768_v25 = vsel %vm2762_vm14, %v2765_v3, %v2767_v53 }
 0x1f2   : > { %v1063_v15 = vsub.s32 4, %v11298_v49  ;;  %vm876_vm15 = vcmp.lt.s32.totalorder %v10991_v23, 0  ;;  %v2787_v33 = vadd.s32 1, %v11525_v29  ;;  %v433_v60 = vmul.f32 %v10314_v26, %v11531_v19 }
 0x1f3   : > { %15072 = vst [vmem:[#allocation27_spill] sm:$0xff] %v11538_v27  ;;  %v1057_v61 = vand.u32 2147483647, %v1056_v2  ;;  %v1059_v39 = vcvt.s32.f32 %v1052_v18  ;;  %v15073_v43 = vand.u32 2147483647, %v10991_v23  ;;  %v2895_v10 = vshll.u32 %v11528_v48, 30 }
 0x1f4   : > { %v11554_v24 = vsub.s32 32, %v3258_v9  ;;  %v959_v34 = vsel %vm876_vm15, %v958_v1, %v957_v42  ;;  %v2784_v30 = vmul.u32 %v2777_v47, %v2768_v25  ;;  %vm2786_vm2 = vc.u32 %v11534_v8, %v11524_v31 }
 0x1f5   : > { %vm11549_vm1 = vcmp.le.f32.partialorder %v15073_v43, 0.7853982  ;;  %v1152_v11 = vsub.s32 32, %v11518_v21  ;;  %v1157_v36 = vadd.s32 127, %v1156_v46  ;;  %vm8361_vm3 = vcmp.lt.s32.totalorder %v8360_v59, 0 }
 0x1f6   : > { %v2788_v4 = vsel %vm2786_vm2, %v2787_v33, %v11525_v29  ;;  %v14946_v58 = vand.u32 2147483647, %v11472_v16  ;;  %v3270_v53 = vshll.u32 %v15042_v52, %v3258_v9  ;;  %v11568_v42 = vadd.f32 %v10322_v28, %v433_v60 }
 0x1f7   : > { %v11563_v3 = vadd.s32 %v2788_v4, %v2784_v30  ;;  %v11571_v47 = vsub.s32 %v11501_v35, %v2895_v10  ;;  %v11573_v6 = vshrl.u32 %v3256_v0, 5  ;;  %v3271_v18 = vshrl.u32 %v15038_v63, %v11554_v24 }
 0x1f8   : > { %15076 = vst [vmem:[#allocation28_spill] sm:$0xff] %v11568_v42  ;;  %v3273_v2 = vshll.u32 %v15038_v63, %v3258_v9  ;;  %v3261_v29 = vshll.u32 %v15068_v12, %v3258_v9  ;;  %v3264_v17 = vshll.u32 %v15069_v44, %v3258_v9  ;;  %v3267_v1 = vshll.u32 %v15070_v20, %v3258_v9 }
 0x1f9   : > { %v3274_v50 = vshrl.u32 %v15046_v14, %v11554_v24  ;;  %v2790_v46 = vadd.s32 536870912, %v11563_v3  ;;  %v3262_v35 = vshrl.u32 %v15069_v44, %v11554_v24  ;;  %v3265_v0 = vshrl.u32 %v15070_v20, %v11554_v24 }
 0x1fa   : > { %v3268_v25 = vshrl.u32 %v15042_v52, %v11554_v24  ;;  %v1060_v33 = vmul.f32 %v1059_v39, %v1057_v61  ;;  %v1136_v60 = vadd.s32 %v11303_v62, %v11311_v55  ;;  %v11593_v9 = vsel %vm8361_vm3, 0, %v8360_v59 }
 0x1fb   : > { %v3272_v43 = vor.u32 %v3271_v18, %v3270_v53  ;;  %vm979_vm0 = vcmp.lt.s32.totalorder %v10957_v40, 0  ;;  %v2898_v10 = vsub.s32 0, %v11571_v47  ;;  %v3251_v30 = vand.u32 8388607, %v14946_v58 }
 0x1fc   : > { %v3275_v4 = vor.u32 %v3274_v50, %v3273_v2  ;;  %vm3279_vm4 = vcmp.lt.s32.totalorder %v11573_v6, 4  ;;  %v962_v61 = vsel %vm11549_vm1, %v10991_v23, %v959_v34  ;;  %v1154_v39 = vshrl.u32 %v1136_v60, %v1152_v11 }
 0x1fd   : > { %v1158_v62 = vshll.u32 %v1157_v36, 23  ;;  %v1186_v55 = vand.u32 2139095040, %v11568_v42  ;;  %v11604_v59 = vshrl.u32 %v2790_v46, 30  ;;  %v11606_v53 = vor.u32 %v3262_v35, %v3261_v29 }
 0x1fe   : > { %v11608_v18 = vor.u32 %v3265_v0, %v3264_v17  ;;  %v3269_v57 = vor.u32 %v3268_v25, %v3267_v1  ;;  %v2702_v58 = vsub.s32 4294967266, %v11593_v9  ;;  %vm3276_vm5 = vcmp.lt.s32.totalorder %v11573_v6, 1 }
 0x1ff   : > { %vm3278_vm6 = vcmp.lt.s32.totalorder %v11573_v6, 3  ;;  %v3285_v34 = vsel %vm3279_vm4, %v3272_v43, 920167782  ;;  %v1061_v11 = vxor.u32 2147483648, %v1060_v33  ;;  %v8367_v36 = vmin.u32 %v2898_v10, %v11571_v47 }
 0x200   : > { %v3252_v2 = vor.u32 8388608, %v3251_v30  ;;  %v3289_v29 = vsel %vm3279_vm4, %v3275_v4, 1326507024  ;;  %9977 = vcosq.f32 %v962_v61  ;;  %v1153_v17 = vshll.u32 %v11429_v5, %v11518_v21 }
 0x201   : > { %v1159_v1 = vor.u32 4788187, %v1158_v62  ;;  %v1187_v50 = vshrl.u32 %v1186_v55, 23  ;;  %v2792_v46 = vshll.u32 %v11604_v59, 30  ;;  %vm3277_vm7 = vcmp.lt.s32.totalorder %v11573_v6, 2 }
 0x202   : > { %v3284_v35 = vsel %vm3276_vm5, %v11606_v53, %v11608_v18  ;;  %v3286_v0 = vsel %vm3278_vm6, %v3269_v57, %v3285_v34  ;;  %v15077_v25 = vand.u32 2147483647, %v10957_v40  ;;  %v1155_v5 = vor.u32 %v1154_v39, %v1153_v17 }
 0x203   : > { %v2703_v21 = vadd.s32 127, %v2702_v58  ;;  %v3288_v10 = vsel %vm3276_vm5, %v11608_v18, %v3269_v57  ;;  %v3290_v30 = vsel %vm3278_vm6, %v3272_v43, %v3289_v29  ;;  %9979 = vsinq.f32 %v962_v61 }
 0x204   : > { %vm11630_vm8 = vcmp.le.f32.partialorder %v15077_v25, 0.7853982  ;;  %v2698_v4 = vsub.s32 32, %v11593_v9  ;;  %v2900_v62 = vclz %v8367_v36  ;;  %v11640_v55 = vshll.u32 %v3252_v2, 8 }
 0x205   : > { %v11647_v39 = vsel %vm979_vm0, %v1063_v15, %v11298_v49  ;;  %v11651_v58 = vmul.f32 %v10638_v37, %v11054_v32  ;;  %v3287_v43 = vsel %vm3277_vm7, %v3284_v35, %v3286_v0  ;;  %v8306_v61 = vadd.s32 4294967169, %v1187_v50 }
 0x206   : > { %v1160_v34 = vand.u32 2147483647, %v1159_v1  ;;  %v2682_v36 = vadd.s32 %v11373_v41, %v11380_v54  ;;  %v11658_v2 = vsub.s32 %v11563_v3, %v2792_v46  ;;  %v3291_v29 = vsel %vm3277_vm7, %v3288_v10, %v3290_v30 }
 0x207   : > { %15080 = vst [vmem:[#allocation29_spill] sm:$0xff] %v11651_v58  ;;  %v1062_v49 = vsel %vm979_vm0, %v1061_v11, %v1060_v33  ;;  %v15081_v32 = vsub.s32 4, %v11276_v7  ;;  %v1162_v17 = vcvt.s32.f32 %v1155_v5  ;;  %v2704_v1 = vshll.u32 %v2703_v21, 23 }
 0x208   : > { %v2700_v50 = vshrl.u32 %v2682_v36, %v2698_v4  ;;  %v8368_v35 = vadd.s32 4294967294, %v2900_v62  ;;  %v11670_v41 = vmul.u32.u64.low %v11640_v55, %v3287_v43  ;;  %v11671_v54 = vmul.u32.u64.high %v11640_v55, %v3287_v43, %v11670_v41  ;;  %v15086_v62 = vld [vmem:[#allocation14_spill] sm:$0xff] }
 0x209   : > { %v961_v15 = vsel %vm876_vm15, %v15081_v32, %v11276_v7  ;;  %v3260_v3 = vshrl.u32 %v15068_v12, %v11554_v24  ;;  %v11677_v33 = vmul.u32.u64.low %v11640_v55, %v3291_v29  ;;  %v11678_v11 = vmul.u32.u64.high %v11640_v55, %v3291_v29, %v11677_v33 }
 0x20a   : > { %v1193_v46 = vadd.s32 1, %v8306_v61  ;;  %v1163_v0 = vmul.f32 %v1162_v17, %v1160_v34  ;;  %v2699_v7 = vshll.u32 %v11489_v45, %v11593_v9  ;;  %v2795_v25 = vsub.s32 0, %v11658_v2  ;;  %v9978_v21 = vpop.eup %9977  ;;  %v15093_v9 = vld [vmem:[#allocation16_spill] sm:$0xff] }
 0x20b   : > { %v3281_v5 = vsel %vm3279_vm4, %v3269_v57, 2102212464  ;;  %vm1082_vm9 = vcmp.lt.s32.totalorder %v11092_v51, 0  ;;  %v1166_v10 = vsub.s32 4, %v11391_v13  ;;  %v2705_v24 = vor.u32 4788187, %v2704_v1  ;;  %v11720_v1 = vpop.permute.xlu0 %389 }
 0x20c   : > { %v11689_v30 = vmul.f32 %v10632_v56, %v11162_v22  ;;  %v1065_v4 = vsel %vm11630_vm8, %v10957_v40, %v1062_v49  ;;  %v15083_v45 = vand.u32 2147483647, %v11092_v51  ;;  %v963_v57 = vsel %vm11549_vm1, 0, %v961_v15  ;;  %v15090_v49 = vld [vmem:[#allocation23_spill] sm:$0xff]  ;;  %15091 = vst [vmem:[#allocation14_spill] sm:$0xff] %v11720_v1 }
 0x20d   : > { %vm2628_vm11 = vcmp.lt.s32.totalorder %v15086_v62, 0  ;;  %v2701_v43 = vor.u32 %v2700_v50, %v2699_v7  ;;  %vm8369_vm12 = vcmp.lt.s32.totalorder %v8368_v35, 0  ;;  %v3280_v22 = vsel %vm3276_vm5, %v3260_v3, %v11606_v53  ;;  %v9980_v34 = vpop.eup %9979 }
 0x20e   : > { %15082 = vst [vmem:[#allocation30_spill] sm:$0xff] %v11689_v30  ;;  %vm11696_vm10 = vcmp.le.f32.partialorder %v15083_v45, 0.7853982  ;;  %v3282_v61 = vsel %vm3278_vm6, %v11608_v18, %v3281_v5  ;;  %vm1194_vm13 = vcmp.gt.s32.totalorder %v1193_v46, 0  ;;  %v1164_v36 = vxor.u32 2147483648, %v1163_v0  ;;  %v15106_v30 = vld [vmem:[#allocation8_spill] sm:$0xff] }
 0x20f   : > { %v15087_v29 = vand.u32 2147483647, %v15086_v62  ;;  %v2712_v32 = vsub.s32 4, %v15090_v49  ;;  %v8363_v15 = vmin.u32 %v2795_v25, %v11658_v2  ;;  %9981 = vcosq.f32 %v1065_v4 }
 0x210   : > { %v1167_v53 = vsel %vm1082_vm9, %v1166_v10, %v11391_v13  ;;  %v967_v17 = vand.u32 3, %v963_v57  ;;  %v2706_v18 = vand.u32 2147483647, %v2705_v24  ;;  %v11722_v50 = vsel %vm8369_vm12, 0, %v8368_v35 }
 0x211   : > { %vm11711_vm14 = vcmp.le.f32.partialorder %v15087_v29, 0.7853982  ;;  %v3283_v3 = vsel %vm3277_vm7, %v3280_v22, %v3282_v61  ;;  %v3302_v33 = vadd.s32 1, %v11671_v54  ;;  %v1195_v7 = vsel %vm1194_vm13, %v1193_v46, 0 }
 0x212   : > { %v970_v5 = vxor.u32 2147483648, %v9980_v34  ;;  %v973_v45 = vxor.u32 2147483648, %v9978_v21  ;;  %v2708_v25 = vcvt.s32.f32 %v2701_v43  ;;  %vm3301_vm15 = vc.u32 %v11678_v11, %v11670_v41 }
 0x213   : > { %v1165_v13 = vsel %vm1082_vm9, %v1164_v36, %v1163_v0  ;;  %v2713_v35 = vsel %vm2628_vm11, %v2712_v32, %v15090_v49  ;;  %v2797_v10 = vclz %v8363_v15  ;;  %v435_v6 = vmul.f32 %v10314_v26, %v11720_v1 }
 0x214   : > { %v2709_v24 = vmul.f32 %v2708_v25, %v2706_v18  ;;  %v2908_v46 = vsub.s32 4294967266, %v11722_v50  ;;  %v3299_v57 = vmul.u32 %v11640_v55, %v3283_v3  ;;  %v1197_v43 = vand.u32 31, %v1195_v7 }
 0x215   : > { %9983 = vsinq.f32 %v1065_v4  ;;  %vm969_vm1 = vcmp.eq.s32.totalorder %v967_v17, 0  ;;  %vm972_vm2 = vcmp.eq.s32.totalorder %v967_v17, 2  ;;  %v3303_v22 = vsel %vm3301_vm15, %v3302_v33, %v11671_v54 }
 0x216   : > { %v971_v0 = vsel %vm969_vm1, %v9978_v21, %v970_v5  ;;  %v974_v61 = vsel %vm972_vm2, %v973_v45, %v9980_v34  ;;  %v1169_v36 = vsel %vm11696_vm10, 0, %v1167_v53  ;;  %v1066_v29 = vsel %vm11630_vm8, 0, %v11647_v39  ;;  %v15095_v45 = vld [vmem:[#allocation22_spill] sm:$0xff] }
 0x217   : > { %v1168_v49 = vsel %vm11696_vm10, %v11092_v51, %v1165_v13  ;;  %v2715_v55 = vsel %vm11711_vm14, 0, %v2713_v35  ;;  %v8364_v4 = vadd.s32 4294967294, %v2797_v10  ;;  %v11750_v32 = vadd.f32 %v10322_v28, %v435_v6 }
 0x218   : > { %v2710_v54 = vxor.u32 2147483648, %v2709_v24  ;;  %v2909_v21 = vadd.s32 127, %v2908_v46  ;;  %v11752_v34 = vadd.s32 %v3303_v22, %v3299_v57  ;;  %v11754_v15 = vsub.s32 32, %v1197_v43 }
 0x219   : > { %15092 = vst [vmem:[#allocation23_spill] sm:$0xff] %v11750_v32  ;;  %vm968_vm3 = vcmp.lt.s32.totalorder %v967_v17, 2  ;;  %v11756_v60 = vand.u32 3, %v1169_v36  ;;  %v2904_v39 = vsub.s32 32, %v11722_v50  ;;  %v11761_v53 = vmul.f32 %v10632_v56, %v15093_v9  ;;  %v11763_v18 = vpop.eup %9981  ;;  %v15096_v17 = vld [vmem:[#allocation21_spill] sm:$0xff] }
 0x21a   : > { %9985 = vcosq.f32 %v1168_v49  ;;  %v11765_v3 = vsel %vm968_vm3, %v971_v0, %v974_v61  ;;  %v11767_v33 = vand.u32 3, %v2715_v55  ;;  %v11769_v5 = vand.u32 3, %v1066_v29 }
 0x21b   : > { %15094 = vst [vmem:[#allocation16_spill] sm:$0xff] %v11761_v53  ;;  %9987 = vsinq.f32 %v1168_v49  ;;  %v2888_v25 = vadd.s32 %v15096_v17, %v15095_v45  ;;  %vm8365_vm0 = vcmp.lt.s32.totalorder %v8364_v4, 0  ;;  %v1392_v13 = vand.u32 2139095040, %v11750_v32 }
 0x21c   : > { %v2711_v35 = vsel %vm2628_vm11, %v2710_v54, %v2709_v24  ;;  %v2910_v10 = vshll.u32 %v2909_v21, 23  ;;  %v3305_v6 = vadd.s32 536870912, %v11752_v34  ;;  %v1210_v46 = vshrl.u32 %v15038_v63, %v11754_v15 }
 0x21d   : > { %v2905_v57 = vshll.u32 %v11571_v47, %v11722_v50  ;;  %v2906_v22 = vshrl.u32 %v2888_v25, %v2904_v39  ;;  %v1213_v61 = vshrl.u32 %v15046_v14, %v11754_v15  ;;  %v11784_v36 = vsel %vm8365_vm0, 0, %v8364_v4 }
 0x21e   : > { %v11786_v29 = vshrl.u32 %v1195_v7, 5  ;;  %v1209_v24 = vshll.u32 %v15042_v52, %v1197_v43  ;;  %v1393_v49 = vshrl.u32 %v1392_v13, 23  ;;  %v1201_v54 = vshrl.u32 %v15069_v44, %v11754_v15 }
 0x21f   : > { %v9984_v55 = vpop.eup %9983  ;;  %v1204_v47 = vshrl.u32 %v15070_v20, %v11754_v15  ;;  %v1207_v50 = vshrl.u32 %v15042_v52, %v11754_v15  ;;  %v1212_v21 = vshll.u32 %v15038_v63, %v1197_v43  ;;  %v2911_v39 = vor.u32 4788187, %v2910_v10 }
 0x220   : > { %v11796_v4 = vshrl.u32 %v3305_v6, 30  ;;  %v1200_v7 = vshll.u32 %v15068_v12, %v1197_v43  ;;  %v1211_v9 = vor.u32 %v1210_v46, %v1209_v24  ;;  %vm1072_vm4 = vcmp.eq.s32.totalorder %v11769_v5, 0 }
 0x221   : > { %v1203_v45 = vshll.u32 %v15069_v44, %v1197_v43  ;;  %v1206_v17 = vshll.u32 %v15070_v20, %v1197_v43  ;;  %v1214_v25 = vor.u32 %v1213_v61, %v1212_v21  ;;  %v8314_v13 = vadd.s32 4294967169, %v1393_v49  ;;  %v11827_v21 = vpop.permute.xlu1 %2139 }
 0x222   : > { %15097 = vst [vmem:[#allocation22_spill] sm:$0xff] %v11796_v4  ;;  %v2714_v0 = vsel %vm11711_vm14, %v15086_v62, %v2711_v35  ;;  %v2907_v53 = vor.u32 %v2906_v22, %v2905_v57  ;;  %v2805_v10 = vsub.s32 4294967266, %v11784_v36  ;;  %v15098_v6 = vand.u32 2147483647, %v11568_v42  ;;  %15099 = vst [vmem:[#allocation21_spill] sm:$0xff] %v11827_v21 }
 0x223   : > { %v11808_v58 = vor.u32 %v1201_v54, %v1200_v7  ;;  %v11810_v46 = vor.u32 %v1204_v47, %v1203_v45  ;;  %v11812_v24 = vor.u32 %v1207_v50, %v1206_v17  ;;  %vm1218_vm5 = vcmp.lt.s32.totalorder %v11786_v29, 4 }
 0x224   : > { %v1190_v1 = vand.u32 8388607, %v15098_v6  ;;  %v11815_v43 = vpop.eup %9985  ;;  %v1073_v61 = vxor.u32 2147483648, %v9984_v55  ;;  %v1076_v38 = vxor.u32 2147483648, %v11763_v18  ;;  %v3307_v35 = vshll.u32 %v11796_v4, 30  ;;  %v15101_v6 = vld [vmem:[#allocation6_spill] sm:$0xff] }
 0x225   : > { %v1224_v57 = vsel %vm1218_vm5, %v1211_v9, 920167782  ;;  %v11821_v22 = vpop.eup %9987  ;;  %9989 = vcosq.f32 %v2714_v0  ;;  %v2912_v49 = vand.u32 2147483647, %v2911_v39  ;;  %v1228_v54 = vsel %vm1218_vm5, %v1214_v25, 1326507024 }
 0x226   : > { %v1399_v47 = vadd.s32 1, %v8314_v13  ;;  %9991 = vsinq.f32 %v2714_v0  ;;  %v2914_v50 = vcvt.s32.f32 %v2907_v53  ;;  %vm1215_vm6 = vcmp.lt.s32.totalorder %v11786_v29, 1  ;;  %v15100_v53 = vld [vmem:[#allocation17_spill] sm:$0xff] }
 0x227   : > { %vm1217_vm7 = vcmp.lt.s32.totalorder %v11786_v29, 3  ;;  %vm966_vm8 = vweird.f32 %v10991_v23  ;;  %v2806_v7 = vadd.s32 127, %v2805_v10  ;;  %v1191_v45 = vor.u32 8388608, %v1190_v1 }
 0x228   : > { %v1223_v39 = vsel %vm1215_vm6, %v11808_v58, %v11810_v46  ;;  %v1225_v0 = vsel %vm1217_vm7, %v11812_v24, %v1224_v57  ;;  %vm2834_vm9 = vcmp.lt.s32.totalorder %v15100_v53, 0  ;;  %v2801_v17 = vsub.s32 32, %v11784_v36 }
 0x229   : > { %v11840_v25 = vsub.s32 %v11752_v34, %v3307_v35  ;;  %v1227_v1 = vsel %vm1215_vm6, %v11810_v46, %v11812_v24  ;;  %v1229_v13 = vsel %vm1217_vm7, %v1211_v9, %v1228_v54  ;;  %vm1175_vm10 = vcmp.eq.s32.totalorder %v11756_v60, 0 }
 0x22a   : > { %vm1178_vm11 = vcmp.eq.s32.totalorder %v11756_v60, 2  ;;  %v2915_v10 = vmul.f32 %v2914_v50, %v2912_v49  ;;  %vm1216_vm12 = vcmp.lt.s32.totalorder %v11786_v29, 2  ;;  %vm1400_vm13 = vcmp.gt.s32.totalorder %v1399_v47, 0 }
 0x22b   : > { %v2185_v34 = vmul.f32 %v15101_v6, %v11827_v21  ;;  %v1074_v35 = vsel %vm1072_vm4, %v11763_v18, %v1073_v61  ;;  %vm1075_vm14 = vcmp.eq.s32.totalorder %v11769_v5, 2  ;;  %v2785_v9 = vadd.s32 %v11524_v31, %v11534_v8 }
 0x22c   : > { %v1226_v57 = vsel %vm1216_vm12, %v1223_v39, %v1225_v0  ;;  %v15102_v49 = vand.u32 2147483647, %v15100_v53  ;;  %v1077_v50 = vsel %vm1075_vm14, %v1076_v38, %v9984_v55  ;;  %v2807_v6 = vshll.u32 %v2806_v7, 23 }
 0x22d   : > { %v1230_v21 = vsel %vm1216_vm12, %v1227_v1, %v1229_v13  ;;  %v11869_v18 = vshll.u32 %v1191_v45, 8  ;;  %v1179_v61 = vxor.u32 2147483648, %v11815_v43  ;;  %v2803_v4 = vshrl.u32 %v2785_v9, %v2801_v17 }
 0x22e   : > { %vm11863_vm15 = vcmp.le.f32.partialorder %v15102_v49, 0.7853982  ;;  %v3310_v31 = vsub.s32 0, %v11840_v25  ;;  %v1401_v8 = vsel %vm1400_vm13, %v1399_v47, 0  ;;  %v2916_v39 = vxor.u32 2147483648, %v2915_v10 }
 0x22f   : > { %v11874_v0 = vmul.u32.u64.low %v11869_v18, %v1226_v57  ;;  %v11875_v49 = vmul.u32.u64.high %v11869_v18, %v1226_v57, %v11874_v0  ;;  %v11879_v55 = vadd.f32 %v15106_v30, %v2185_v34  ;;  %v1176_v38 = vxor.u32 2147483648, %v11821_v22  ;;  %v11888_v1 = vpop.eup %9989 }
 0x230   : > { %v2802_v7 = vshll.u32 %v11658_v2, %v11784_v36  ;;  %v11885_v45 = vmul.u32.u64.low %v11869_v18, %v1230_v21  ;;  %v11886_v17 = vmul.u32.u64.high %v11869_v18, %v1230_v21, %v11885_v45  ;;  %v2918_v47 = vsub.s32 4, %v11528_v48  ;;  %v11892_v57 = vpop.eup %9991 }
 0x231   : > { %15105 = vst [vmem:[#allocation31_spill] sm:$0xff] %v11874_v0  ;;  %15107 = vst [vmem:[#allocation32_spill] sm:$0xff] %v11879_v55  ;;  %vm1071_vm1 = vcmp.lt.s32.totalorder %v11769_v5, 2  ;;  %v2808_v13 = vor.u32 4788187, %v2807_v6  ;;  %v1403_v9 = vand.u32 31, %v1401_v8  ;;  %v8383_v36 = vmin.u32 %v3310_v31, %v11840_v25 }
 0x232   : > { %15108 = vst [vmem:[#allocation33_spill] sm:$0xff] %v11886_v17  ;;  %v11897_v34 = vsel %vm966_vm8, nan, %v11765_v3  ;;  %vm2724_vm2 = vcmp.eq.s32.totalorder %v11767_v33, 2  ;;  %v2804_v2 = vor.u32 %v2803_v4, %v2802_v7  ;;  %v2917_v21 = vsel %vm2834_vm9, %v2916_v39, %v2915_v10  ;;  %v15109_v5 = vld [vmem:[#allocation18_spill] sm:$0xff] }
 0x233   : > { %v11903_v45 = vsel %vm1071_vm1, %v1074_v35, %v1077_v50  ;;  %v11907_v6 = vmul.f32 %v10632_v56, %v15109_v5  ;;  %v2938_v30 = vand.u32 2139095040, %v11879_v55  ;;  %v2725_v23 = vxor.u32 2147483648, %v11888_v1 }
 0x234   : > { %v11914_v3 = vsel %vm1175_vm10, %v11815_v43, %v1176_v38  ;;  %v11919_v4 = vsel %vm1178_vm11, %v1179_v61, %v11821_v22  ;;  %v1220_v10 = vsel %vm1218_vm5, %v11812_v24, 2102212464  ;;  %v11927_v35 = vsel %vm2834_vm9, %v2918_v47, %v11528_v48 }
 0x235   : > { %15110 = vst [vmem:[#allocation18_spill] sm:$0xff] %v11907_v6  ;;  %v2809_v50 = vand.u32 2147483647, %v2808_v13  ;;  %v1199_v31 = vshrl.u32 %v15068_v12, %v11754_v15  ;;  %v11931_v43 = vsub.s32 32, %v1403_v9  ;;  %v2920_v22 = vsel %vm11863_vm15, %v15100_v53, %v2917_v21 }
 0x236   : > { %v2811_v61 = vcvt.s32.f32 %v2804_v2  ;;  %v3312_v39 = vclz %v8383_v36  ;;  %v14951_v38 = vand.u32 2147483647, %v11750_v32  ;;  %v1221_v48 = vsel %vm1217_vm7, %v11810_v46, %v1220_v10 }
 0x237   : > { %v1219_v24 = vsel %vm1215_vm6, %v1199_v31, %v11808_v58  ;;  %v1241_v15 = vadd.s32 1, %v11875_v49  ;;  %v2939_v7 = vshrl.u32 %v2938_v30, 23  ;;  %v11948_v13 = vsel %vm2724_vm2, %v2725_v23, %v11892_v57  ;;  %v15111_v58 = vld [vmem:[#allocation20_spill] sm:$0xff] }
 0x238   : > { %vm1240_vm3 = vc.u32 %v11886_v17, %v11874_v0  ;;  %9993 = vcosq.f32 %v2920_v22  ;;  %vm2731_vm0 = vcmp.lt.s32.totalorder %v15111_v58, 0  ;;  %v2812_v46 = vmul.f32 %v2811_v61, %v2809_v50 }
 0x239   : > { %v1415_v30 = vshll.u32 %v15042_v52, %v1403_v9  ;;  %v1416_v36 = vshrl.u32 %v15038_v63, %v11931_v43  ;;  %v8384_v21 = vadd.s32 4294967294, %v3312_v39  ;;  %v1222_v5 = vsel %vm1216_vm12, %v1219_v24, %v1221_v48 }
 0x23a   : > { %v1396_v23 = vand.u32 8388607, %v14951_v38  ;;  %v11963_v10 = vshrl.u32 %v1401_v8, 5  ;;  %v1242_v31 = vsel %vm1240_vm3, %v1241_v15, %v11875_v49  ;;  %v1406_v2 = vshll.u32 %v15068_v12, %v1403_v9 }
 0x23b   : > { %v1409_v50 = vshll.u32 %v15069_v44, %v1403_v9  ;;  %v8370_v61 = vadd.s32 4294967169, %v2939_v7  ;;  %v1407_v47 = vshrl.u32 %v15069_v44, %v11931_v43  ;;  %v1410_v39 = vshrl.u32 %v15070_v20, %v11931_v43 }
 0x23c   : > { %v1412_v29 = vshll.u32 %v15070_v20, %v1403_v9  ;;  %v1413_v24 = vshrl.u32 %v15042_v52, %v11931_v43  ;;  %v2813_v8 = vxor.u32 2147483648, %v2812_v46  ;;  %v1238_v48 = vmul.u32 %v11869_v18, %v1222_v5 }
 0x23d   : > { %v1417_v49 = vor.u32 %v1416_v36, %v1415_v30  ;;  %v2945_v15 = vadd.s32 1, %v8370_v61  ;;  %vm8385_vm4 = vcmp.lt.s32.totalorder %v8384_v21, 0  ;;  %v1418_v38 = vshll.u32 %v15038_v63, %v1403_v9 }
 0x23e   : > { %v1419_v7 = vshrl.u32 %v15046_v14, %v11931_v43  ;;  %vm1424_vm5 = vcmp.lt.s32.totalorder %v11963_v10, 4  ;;  %v11980_v32 = vadd.s32 %v1242_v31, %v1238_v48  ;;  %v1397_v6 = vor.u32 8388608, %v1396_v23 }
 0x23f   : > { %v14960_v56 = vand.u32 2147483647, %v11879_v55  ;;  %vm2946_vm6 = vcmp.gt.s32.totalorder %v2945_v15, 0  ;;  %v11983_v42 = vor.u32 %v1407_v47, %v1406_v2  ;;  %v11985_v37 = vor.u32 %v1410_v39, %v1409_v50 }
 0x240   : > { %v11987_v18 = vor.u32 %v1413_v24, %v1412_v29  ;;  %v2947_v30 = vsel %vm2946_vm6, %v2945_v15, 0  ;;  %vm1421_vm7 = vcmp.lt.s32.totalorder %v11963_v10, 1  ;;  %vm1423_vm8 = vcmp.lt.s32.totalorder %v11963_v10, 3 }
 0x241   : > { %v1430_v9 = vsel %vm1424_vm5, %v1417_v49, 920167782  ;;  %v2949_v36 = vand.u32 31, %v2947_v30  ;;  %9995 = vsinq.f32 %v2920_v22  ;;  %v11995_v5 = vsel %vm2731_vm0, %v2813_v8, %v2812_v46 }
 0x242   : > { %v11998_v47 = vsel %vm8385_vm4, 0, %v8384_v21  ;;  %v1420_v2 = vor.u32 %v1419_v7, %v1418_v38  ;;  %v12000_v23 = vpop.eup %9993  ;;  %v1244_v31 = vadd.s32 536870912, %v11980_v32  ;;  %v12003_v50 = vshll.u32 %v1397_v6, 8 }
 0x243   : > { %v2942_v61 = vand.u32 8388607, %v14960_v56  ;;  %v2950_v39 = vsub.s32 32, %v2949_v36  ;;  %vm1422_vm9 = vcmp.lt.s32.totalorder %v11963_v10, 2  ;;  %v1429_v22 = vsel %vm1421_vm7, %v11983_v42, %v11985_v37 }
 0x244   : > { %v1431_v38 = vsel %vm1423_vm8, %v11987_v18, %v1430_v9  ;;  %v1433_v6 = vsel %vm1421_vm7, %v11985_v37, %v11987_v18  ;;  %v2952_v46 = vshll.u32 %v15068_v12, %v2949_v36  ;;  %v2955_v29 = vshll.u32 %v15069_v44, %v2949_v36 }
 0x245   : > { %v2953_v21 = vshrl.u32 %v15069_v44, %v2950_v39  ;;  %v2956_v24 = vshrl.u32 %v15070_v20, %v2950_v39  ;;  %v1434_v8 = vsel %vm1424_vm5, %v1420_v2, 1326507024  ;;  %v2948_v48 = vshrl.u32 %v2947_v30, 5 }
 0x246   : > { %v2958_v15 = vshll.u32 %v15070_v20, %v2949_v36  ;;  %v2959_v7 = vshrl.u32 %v15042_v52, %v2950_v39  ;;  %vm2721_vm10 = vcmp.eq.s32.totalorder %v11767_v33, 0  ;;  %v15112_v9 = vand.u32 2147483647, %v15111_v58 }
 0x247   : > { %v2954_v55 = vor.u32 %v2953_v21, %v2952_v46  ;;  %v2957_v19 = vor.u32 %v2956_v24, %v2955_v29  ;;  %v2961_v0 = vshll.u32 %v15042_v52, %v2949_v36  ;;  %v2962_v17 = vshrl.u32 %v15038_v63, %v2950_v39 }
 0x248   : > { %vm12030_vm11 = vcmp.le.f32.partialorder %v15112_v9, 0.7853982  ;;  %v2943_v2 = vor.u32 8388608, %v2942_v61  ;;  %v2960_v30 = vor.u32 %v2959_v7, %v2958_v15  ;;  %v2964_v27 = vshll.u32 %v15038_v63, %v2949_v36 }
 0x249   : > { %v2965_v16 = vshrl.u32 %v15046_v14, %v2950_v39  ;;  %vm1069_vm12 = vweird.f32 %v10957_v40  ;;  %v1432_v9 = vsel %vm1422_vm9, %v1429_v22, %v1431_v38  ;;  %v1435_v53 = vsel %vm1423_vm8, %v1417_v49, %v1434_v8 }
 0x24a   : > { %v2951_v46 = vshrl.u32 %v15068_v12, %v2950_v39  ;;  %v2963_v21 = vor.u32 %v2962_v17, %v2961_v0  ;;  %vm2967_vm13 = vcmp.lt.s32.totalorder %v2948_v48, 1  ;;  %vm2969_vm14 = vcmp.lt.s32.totalorder %v2948_v48, 3 }
 0x24b   : > { %v2966_v29 = vor.u32 %v2965_v16, %v2964_v27  ;;  %vm2970_vm1 = vcmp.lt.s32.totalorder %v2948_v48, 4  ;;  %vm2720_vm2 = vcmp.lt.s32.totalorder %v11767_v33, 2  ;;  %vm1174_vm3 = vcmp.lt.s32.totalorder %v11756_v60, 2  ;;  %v12048_v38 = vpop.eup %9995  ;;  %v12051_v27 = vpop.permute.xlu0 %394 }
 0x24c   : > { %v2972_v36 = vsel %vm2970_vm1, %v2960_v30, 2102212464  ;;  %v2975_v61 = vsel %vm2967_vm13, %v2954_v55, %v2957_v19  ;;  %v2976_v24 = vsel %vm2970_vm1, %v2963_v21, 920167782  ;;  %v2979_v22 = vsel %vm2967_vm13, %v2957_v19, %v2960_v30  ;;  %15115 = vst [vmem:[#allocation20_spill] sm:$0xff] %v12051_v27 }
 0x24d   : > { %vm2968_vm4 = vcmp.lt.s32.totalorder %v2948_v48, 2  ;;  %v2977_v49 = vsel %vm2969_vm14, %v2960_v30, %v2976_v24  ;;  %v2980_v0 = vsel %vm2970_vm1, %v2966_v29, 1326507024  ;;  %v2983_v16 = vshll.u32 %v2943_v2, 8 }
 0x24e   : > { %v1436_v17 = vsel %vm1422_vm9, %v1433_v6, %v1435_v53  ;;  %v2971_v39 = vsel %vm2967_vm13, %v2951_v46, %v2954_v55  ;;  %v2978_v8 = vsel %vm2968_vm4, %v2975_v61, %v2977_v49  ;;  %v2981_v15 = vsel %vm2969_vm14, %v2963_v21, %v2980_v0 }
 0x24f   : > { %vm1172_vm6 = vweird.f32 %v11092_v51  ;;  %v2973_v7 = vsel %vm2969_vm14, %v2957_v19, %v2972_v36  ;;  %v2982_v14 = vsel %vm2968_vm4, %v2979_v22, %v2981_v15  ;;  %vm2718_vm1 = vweird.f32 %v15086_v62 }
 0x250   : > { %v12061_v30 = vmul.u32.u64.low %v2983_v16, %v2978_v8  ;;  %v12062_v29 = vmul.u32.u64.high %v2983_v16, %v2978_v8, %v12061_v30  ;;  %v12066_v2 = vshrl.u32 %v1244_v31, 30  ;;  %v436_v6 = vmul.f32 %v10314_v26, %v12051_v27 }
 0x251   : > { %v12068_v53 = vmul.u32.u64.low %v2983_v16, %v2982_v14  ;;  %v12069_v55 = vmul.u32.u64.high %v2983_v16, %v2982_v14, %v12068_v53  ;;  %v15116_v46 = vxor.u32 2147483648, %v11892_v57  ;;  %v12082_v21 = vsel %vm12030_vm11, %v15111_v58, %v11995_v5 }
 0x252   : > { %v12085_v31 = vmul.u32.u64.low %v12003_v50, %v1432_v9  ;;  %v12086_v36 = vmul.u32.u64.high %v12003_v50, %v1432_v9, %v12085_v31  ;;  %v1405_v14 = vshrl.u32 %v15068_v12, %v11931_v43  ;;  %v12099_v24 = vsel %vm1069_vm12, nan, %v11903_v45  ;;  %v12106_v43 = vpop.permute.xlu1 %384 }
 0x253   : > { %v2723_v19 = vsel %vm2721_vm10, %v11888_v1, %v15116_v46  ;;  %v12092_v57 = vmul.u32.u64.low %v12003_v50, %v1436_v17  ;;  %v12093_v61 = vmul.u32.u64.high %v12003_v50, %v1436_v17, %v12092_v57  ;;  %v2974_v1 = vsel %vm2968_vm4, %v2971_v39, %v2973_v7  ;;  %15117 = vst [vmem:[#allocation34_spill] sm:$0xff] %v12106_v43 }
 0x254   : > { %v3320_v5 = vsub.s32 4294967266, %v11998_v47  ;;  %v1426_v9 = vsel %vm1424_vm5, %v11987_v18, 2102212464  ;;  %v2993_v22 = vadd.s32 1, %v12062_v29  ;;  %v15118_v48 = vsel %vm11863_vm15, 0, %v11927_v35 }
 0x255   : > { %v12112_v49 = vand.u32 3, %v15118_v48  ;;  %v1246_v40 = vshll.u32 %v12066_v2, 30  ;;  %vm2992_vm10 = vc.u32 %v12069_v55, %v12061_v30  ;;  %v12118_v45 = vadd.f32 %v10322_v28, %v436_v6 }
 0x256   : > { %v2727_v18 = vsel %vm2720_vm2, %v2723_v19, %v11948_v13  ;;  %v1181_v54 = vsel %vm1174_vm3, %v11914_v3, %v11919_v4  ;;  %9997 = vcosq.f32 %v12082_v21  ;;  %v2990_v35 = vmul.u32 %v2983_v16, %v2974_v1 }
 0x257   : > { %v1425_v0 = vsel %vm1421_vm7, %v1405_v14, %v11983_v42  ;;  %v1427_v17 = vsel %vm1423_vm8, %v11985_v37, %v1426_v9  ;;  %v2994_v39 = vsel %vm2992_vm10, %v2993_v22, %v12062_v29  ;;  %v434_v33 = vmul.f32 %v10314_v26, %v12106_v43 }
 0x258   : > { %v2815_v13 = vsub.s32 4, %v11604_v59  ;;  %v3316_v60 = vsub.s32 32, %v11998_v47  ;;  %v3321_v3 = vadd.s32 127, %v3320_v5  ;;  %v2995_v4 = vadd.s32 %v2994_v39, %v2990_v35 }
 0x259   : > { %v12141_v16 = vsel %vm1172_vm6, nan, %v1181_v54  ;;  %vm2930_vm15 = vcmp.eq.s32.totalorder %v12112_v49, 2  ;;  %v12145_v42 = vsub.s32 %v11980_v32, %v1246_v40  ;;  %v1495_v37 = vand.u32 2139095040, %v12118_v45  ;;  %v15119_v54 = vld [vmem:[#allocation11_spill] sm:$0xff] }
 0x25a   : > { %v2728_v8 = vsel %vm2718_vm1, nan, %v2727_v18  ;;  %v3300_v15 = vadd.s32 %v11670_v41, %v11678_v11  ;;  %v1428_v7 = vsel %vm1422_vm9, %v1425_v0, %v1427_v17  ;;  %v1447_v51 = vadd.s32 1, %v12086_v36 }
 0x25b   : > { %vm2926_vm5 = vcmp.lt.s32.totalorder %v12112_v49, 2  ;;  %vm1446_vm7 = vc.u32 %v12093_v61, %v12085_v31  ;;  %v2996_v32 = vadd.s32 536870912, %v2995_v4  ;;  %v1496_v29 = vshrl.u32 %v1495_v37, 23 }
 0x25c   : > { %v12159_v53 = vadd.f32 %v10322_v28, %v434_v33  ;;  %v2931_v62 = vxor.u32 2147483648, %v12000_v23  ;;  %v2816_v41 = vsel %vm2731_vm0, %v2815_v13, %v11604_v59  ;;  %v3318_v11 = vshrl.u32 %v3300_v15, %v3316_v60 }
 0x25d   : > { %v3322_v10 = vshll.u32 %v3321_v3, 23  ;;  %v2928_v6 = vxor.u32 2147483648, %v12048_v38  ;;  %v1249_v46 = vsub.s32 0, %v12145_v42  ;;  %v1444_v19 = vmul.u32 %v12003_v50, %v1428_v7 }
 0x25e   : > { %v8318_v14 = vadd.s32 4294967169, %v1496_v29  ;;  %v3866_v57 = vmul.f32 %v2728_v8, %v11897_v34  ;;  %v3317_v1 = vshll.u32 %v11840_v25, %v11998_v47  ;;  %v1448_v5 = vsel %vm1446_vm7, %v1447_v51, %v12086_v36 }
 0x25f   : > { %v14970_v9 = vand.u32 2147483647, %v12118_v45  ;;  %v2818_v59 = vsel %vm12030_vm11, 0, %v2816_v41  ;;  %v12175_v22 = vshrl.u32 %v2996_v32, 30  ;;  %v1289_v40 = vand.u32 2139095040, %v12159_v53 }
 0x260   : > { %v1502_v48 = vadd.s32 1, %v8318_v14  ;;  %v12178_v18 = vpop.eup %9997  ;;  %vm2927_vm0 = vcmp.eq.s32.totalorder %v12112_v49, 0  ;;  %v2932_v25 = vsel %vm2930_vm15, %v2931_v62, %v12048_v38  ;;  %v12184_v34 = vor.u32 %v3318_v11, %v3317_v1 }
 0x261   : > { %v12186_v47 = vor.u32 4788187, %v3322_v10  ;;  %v2929_v56 = vsel %vm2927_vm0, %v12000_v23, %v2928_v6  ;;  %v8307_v50 = vmin.u32 %v1249_v46, %v12145_v42  ;;  %v12190_v36 = vadd.s32 %v1448_v5, %v1444_v19 }
 0x262   : > { %vm1503_vm8 = vcmp.gt.s32.totalorder %v1502_v48, 0  ;;  %v12193_v35 = vmul.f32 %v15119_v54, %v3866_v57  ;;  %v12195_v0 = vand.u32 3, %v2818_v59  ;;  %v1499_v17 = vand.u32 8388607, %v14970_v9 }
 0x263   : > { %v1504_v38 = vsel %vm1503_vm8, %v1502_v48, 0  ;;  %9999 = vsinq.f32 %v12082_v21  ;;  %v2998_v39 = vshll.u32 %v12175_v22, 30  ;;  %v1290_v23 = vshrl.u32 %v1289_v40, 23 }
 0x264   : > { %v1506_v33 = vand.u32 31, %v1504_v38  ;;  %v12203_v13 = vsel %vm2926_vm5, %v2929_v56, %v2932_v25  ;;  %v2828_v60 = vxor.u32 2147483648, %v12178_v18  ;;  %v3324_v3 = vand.u32 2147483647, %v12186_v47  ;;  %v15121_v56 = vld [vmem:[#allocation17_spill] sm:$0xff] }
 0x265   : > { %v3326_v37 = vcvt.s32.f32 %v12184_v34  ;;  %v1251_v8 = vclz %v8307_v50  ;;  %v1450_v15 = vadd.s32 536870912, %v12190_v36  ;;  %v1500_v51 = vor.u32 8388608, %v1499_v17 }
 0x266   : > { %v1507_v7 = vsub.s32 32, %v1506_v33  ;;  %v1509_v21 = vshll.u32 %v15068_v12, %v1506_v33  ;;  %v1505_v32 = vshrl.u32 %v1504_v38, 5  ;;  %v1512_v29 = vshll.u32 %v15069_v44, %v1506_v33 }
 0x267   : > { %v1515_v49 = vshll.u32 %v15070_v20, %v1506_v33  ;;  %v12212_v62 = vsub.s32 %v2995_v4, %v2998_v39  ;;  %v8310_v10 = vadd.s32 4294967169, %v1290_v23  ;;  %v1518_v19 = vshll.u32 %v15042_v52, %v1506_v33  ;;  %v12226_v39 = vpop.permute.xlu0 %409 }
 0x268   : > { %v1510_v41 = vshrl.u32 %v15069_v44, %v1507_v7  ;;  %v1513_v11 = vshrl.u32 %v15070_v20, %v1507_v7  ;;  %v1508_v6 = vshrl.u32 %v15068_v12, %v1507_v7  ;;  %v1516_v46 = vshrl.u32 %v15042_v52, %v1507_v7  ;;  %15122 = vst [vmem:[#allocation17_spill] sm:$0xff] %v12226_v39 }
 0x269   : > { %v1519_v14 = vshrl.u32 %v15038_v63, %v1507_v7  ;;  %v1521_v5 = vshll.u32 %v15038_v63, %v1506_v33  ;;  %v15120_v59 = vmov 1326507024   ;;  %v8308_v48 = vadd.s32 4294967294, %v1251_v8 }
 0x26a   : > { %v1511_v57 = vor.u32 %v1510_v41, %v1509_v21  ;;  %v1514_v1 = vor.u32 %v1513_v11, %v1512_v29  ;;  %v1522_v4 = vshrl.u32 %v15120_v59, %v1507_v7  ;;  %v1517_v40 = vor.u32 %v1516_v46, %v1515_v49 }
 0x26b   : > { %v1520_v25 = vor.u32 %v1519_v14, %v1518_v19  ;;  %vm1524_vm9 = vcmp.lt.s32.totalorder %v1505_v32, 1  ;;  %vm2924_vm11 = vweird.f32 %v15121_v56  ;;  %v12223_v50 = vshrl.u32 %v1450_v15, 30 }
 0x26c   : > { %v3001_v17 = vsub.s32 0, %v12212_v62  ;;  %v1523_v38 = vor.u32 %v1522_v4, %v1521_v5  ;;  %vm1526_vm12 = vcmp.lt.s32.totalorder %v1505_v32, 3  ;;  %vm2824_vm13 = vcmp.eq.s32.totalorder %v12195_v0, 0 }
 0x26d   : > { %vm1525_vm14 = vcmp.lt.s32.totalorder %v1505_v32, 2  ;;  %vm1527_vm2 = vcmp.lt.s32.totalorder %v1505_v32, 4  ;;  %v1540_v33 = vshll.u32 %v1500_v51, 8  ;;  %v1296_v23 = vadd.s32 1, %v8310_v10  ;;  %v10000_v8 = vpop.eup %9999 }
 0x26e   : > { %v1528_v7 = vsel %vm1524_vm9, %v1508_v6, %v1511_v57  ;;  %v1529_v21 = vsel %vm1527_vm2, %v1517_v40, 2102212464  ;;  %v1532_v29 = vsel %vm1524_vm9, %v1511_v57, %v1514_v1  ;;  %v1533_v15 = vsel %vm1527_vm2, %v1520_v25, 920167782 }
 0x26f   : > { %v1530_v49 = vsel %vm1526_vm12, %v1514_v1, %v1529_v21  ;;  %v1534_v41 = vsel %vm1526_vm12, %v1517_v40, %v1533_v15  ;;  %v14971_v11 = vand.u32 2147483647, %v12159_v53  ;;  %v439_v46 = vmul.f32 %v10314_v26, %v12226_v39 }
 0x270   : > { %v8371_v19 = vmin.u32 %v3001_v17, %v12212_v62  ;;  %v1535_v51 = vsel %vm1525_vm14, %v1532_v29, %v1534_v41  ;;  %v1536_v10 = vsel %vm1524_vm9, %v1514_v1, %v1517_v40  ;;  %v1537_v6 = vsel %vm1527_vm2, %v1523_v38, 1326507024 }
 0x271   : > { %v2825_v14 = vxor.u32 2147483648, %v10000_v8  ;;  %vm8309_vm3 = vcmp.lt.s32.totalorder %v8308_v48, 0  ;;  %v1531_v57 = vsel %vm1525_vm14, %v1528_v7, %v1530_v49  ;;  %v1538_v5 = vsel %vm1526_vm12, %v1520_v25, %v1537_v6 }
 0x272   : > { %v1539_v4 = vsel %vm1525_vm14, %v1536_v10, %v1538_v5  ;;  %v12242_v21 = vmul.u32.u64.low %v1540_v33, %v1535_v51  ;;  %v12243_v15 = vmul.u32.u64.high %v1540_v33, %v1535_v51, %v12242_v21  ;;  %vm1297_vm4 = vcmp.gt.s32.totalorder %v1296_v23, 0 }
 0x273   : > { %v1452_v17 = vshll.u32 %v12223_v50, 30  ;;  %v12247_v9 = vmul.u32.u64.low %v1540_v33, %v1539_v4  ;;  %v12248_v29 = vmul.u32.u64.high %v1540_v33, %v1539_v4, %v12247_v9  ;;  %v12251_v1 = vadd.f32 %v10322_v28, %v439_v46 }
 0x274   : > { %vm2823_vm6 = vcmp.lt.s32.totalorder %v12195_v0, 2  ;;  %vm2827_vm1 = vcmp.eq.s32.totalorder %v12195_v0, 2  ;;  %v3003_v40 = vclz %v8371_v19  ;;  %v1293_v32 = vand.u32 8388607, %v14971_v11 }
 0x275   : > { %15123 = vst [vmem:[#allocation35_spill] sm:$0xff] %v12251_v1  ;;  %v1298_v25 = vsel %vm1297_vm4, %v1296_v23, 0  ;;  %v2934_v38 = vsel %vm2924_vm11, nan, %v12203_v13  ;;  %v12264_v9 = vmul.f32 %v3326_v37, %v3324_v3  ;;  %v1547_v7 = vmul.u32 %v1540_v33, %v1531_v57 }
 0x276   : > { %v1300_v49 = vand.u32 31, %v1298_v25  ;;  %v2826_v41 = vsel %vm2824_vm13, %v12178_v18, %v2825_v14  ;;  %v2829_v46 = vsel %vm2827_vm1, %v2828_v60, %v10000_v8  ;;  %v12272_v23 = vsel %vm8309_vm3, 0, %v8308_v48 }
 0x277   : > { %v1550_v13 = vadd.s32 1, %v12243_v15  ;;  %v12276_v47 = vsub.s32 %v12190_v36, %v1452_v17  ;;  %vm1549_vm10 = vc.u32 %v12248_v29, %v12242_v21  ;;  %v1804_v3 = vand.u32 2139095040, %v12251_v1 }
 0x278   : > { %v1301_v34 = vsub.s32 32, %v1300_v49  ;;  %v8372_v37 = vadd.s32 4294967294, %v3003_v40  ;;  %v1294_v33 = vor.u32 8388608, %v1293_v32  ;;  %v1303_v18 = vshll.u32 %v15068_v12, %v1300_v49 }
 0x279   : > { %v1551_v56 = vsel %vm1549_vm10, %v1550_v13, %v12243_v15  ;;  %v1306_v8 = vshll.u32 %v15069_v44, %v1300_v49  ;;  %v1309_v36 = vshll.u32 %v15070_v20, %v1300_v49  ;;  %v1312_v10 = vshll.u32 %v15042_v52, %v1300_v49 }
 0x27a   : > { %v12283_v60 = vadd.s32 %v1551_v56, %v1547_v7  ;;  %v1304_v48 = vshrl.u32 %v15069_v44, %v1301_v34  ;;  %v1307_v19 = vshrl.u32 %v15070_v20, %v1301_v34  ;;  %v1310_v51 = vshrl.u32 %v15042_v52, %v1301_v34 }
 0x27b   : > { %v1313_v6 = vshrl.u32 %v15038_v63, %v1301_v34  ;;  %v3868_v14 = vmul.f32 %v2934_v38, %v12141_v16  ;;  %v3328_v57 = vxor.u32 2147483648, %v12264_v9  ;;  %v1299_v5 = vshrl.u32 %v1298_v25, 5 }
 0x27c   : > { %v1805_v4 = vshrl.u32 %v1804_v3, 23  ;;  %vm2821_vm15 = vweird.f32 %v15111_v58  ;;  %v1305_v15 = vor.u32 %v1304_v48, %v1303_v18  ;;  %v1308_v17 = vor.u32 %v1307_v19, %v1306_v8  ;;  %v15124_v48 = vld [vmem:[#allocation24_spill] sm:$0xff] }
 0x27d   : > { %v1311_v40 = vor.u32 %v1310_v51, %v1309_v36  ;;  %v1314_v32 = vor.u32 %v1313_v6, %v1312_v10  ;;  %v2830_v7 = vsel %vm2823_vm6, %v2826_v41, %v2829_v46  ;;  %v1259_v13 = vsub.s32 4294967266, %v12272_v23 }
 0x27e   : > { %v1315_v56 = vshll.u32 %v15038_v63, %v1300_v49  ;;  %v1316_v11 = vshrl.u32 %v15120_v59, %v1301_v34  ;;  %v1455_v16 = vsub.s32 0, %v12276_v47  ;;  %vm8373_vm5 = vcmp.lt.s32.totalorder %v8372_v37, 0 }
 0x27f   : > { %v1553_v25 = vadd.s32 536870912, %v12283_v60  ;;  %v1334_v38 = vshll.u32 %v1294_v33, 8  ;;  %vm1318_vm7 = vcmp.lt.s32.totalorder %v1299_v5, 1  ;;  %vm1321_vm0 = vcmp.lt.s32.totalorder %v1299_v5, 4 }
 0x280   : > { %v1317_v3 = vor.u32 %v1316_v11, %v1315_v56  ;;  %v8330_v18 = vadd.s32 4294967169, %v1805_v4  ;;  %vm3246_vm8 = vcmp.lt.s32.totalorder %v15124_v48, 0  ;;  %vm1320_vm9 = vcmp.lt.s32.totalorder %v1299_v5, 3 }
 0x281   : > { %v1323_v0 = vsel %vm1321_vm0, %v1311_v40, 2102212464  ;;  %v1326_v41 = vsel %vm1318_vm7, %v1305_v15, %v1308_v17  ;;  %v1327_v46 = vsel %vm1321_vm0, %v1314_v32, 920167782  ;;  %v1302_v49 = vshrl.u32 %v15068_v12, %v1301_v34 }
 0x282   : > { %vm1319_vm11 = vcmp.lt.s32.totalorder %v1299_v5, 2  ;;  %v1328_v8 = vsel %vm1320_vm9, %v1311_v40, %v1327_v46  ;;  %v1330_v36 = vsel %vm1318_vm7, %v1308_v17, %v1311_v40  ;;  %v12307_v19 = vsel %vm8373_vm5, 0, %v8372_v37 }
 0x283   : > { %v12309_v11 = vshrl.u32 %v1553_v25, 30  ;;  %v1329_v33 = vsel %vm1319_vm11, %v1326_v41, %v1328_v8  ;;  %v1331_v51 = vsel %vm1321_vm0, %v1317_v3, 1326507024  ;;  %v1260_v10 = vadd.s32 127, %v1259_v13 }
 0x284   : > { %v1322_v6 = vsel %vm1318_vm7, %v1302_v49, %v1305_v15  ;;  %v1324_v4 = vsel %vm1320_vm9, %v1308_v17, %v1323_v0  ;;  %v1332_v56 = vsel %vm1320_vm9, %v1314_v32, %v1331_v51  ;;  %v15125_v39 = vand.u32 2147483647, %v15124_v48  ;;  %v15131_v51 = vld [vmem:[#allocation26_spill] sm:$0xff] }
 0x285   : > { %v1333_v40 = vsel %vm1319_vm11, %v1330_v36, %v1332_v56  ;;  %v12320_v37 = vmul.u32.u64.low %v1334_v38, %v1329_v33  ;;  %v12321_v46 = vmul.u32.u64.high %v1334_v38, %v1329_v33, %v12320_v37  ;;  %v1811_v25 = vadd.s32 1, %v8330_v18  ;;  %v15129_v18 = vld [vmem:[#allocation33_spill] sm:$0xff]  ;;  %v15130_v36 = vld [vmem:[#allocation31_spill] sm:$0xff]  ;;  %v15132_v56 = vld [vmem:[#allocation12_spill] sm:$0xff] }
 0x286   : > { %vm12315_vm12 = vcmp.le.f32.partialorder %v15125_v39, 0.7853982  ;;  %v2831_v13 = vsel %vm2821_vm15, nan, %v2830_v7  ;;  %v1255_v15 = vsub.s32 32, %v12272_v23  ;;  %v8315_v17 = vmin.u32 %v1455_v16, %v12276_v47  ;;  %v15128_v39 = vld [vmem:[#allocation27_spill] sm:$0xff] }
 0x287   : > { %v3011_v32 = vsub.s32 4294967266, %v12307_v19  ;;  %v3922_v3 = vadd.f32 %v15128_v39, %v12193_v35  ;;  %v1555_v0 = vshll.u32 %v12309_v11, 30  ;;  %v3888_v8 = vmul.f32 %v15119_v54, %v3868_v14 }
 0x288   : > { %v12332_v41 = vmul.u32.u64.low %v1334_v38, %v1333_v40  ;;  %v12333_v49 = vmul.u32.u64.high %v1334_v38, %v1333_v40, %v12332_v41  ;;  %v1239_v58 = vadd.s32 %v15130_v36, %v15129_v18  ;;  %v1325_v7 = vsel %vm1319_vm11, %v1322_v6, %v1324_v4  ;;  %v15134_v18 = vld [vmem:[#allocation28_spill] sm:$0xff]  ;;  %v15135_v6 = vld [vmem:[#allocation30_spill] sm:$0xff] }
 0x289   : > { %vm1812_vm13 = vcmp.gt.s32.totalorder %v1811_v25, 0  ;;  %v3867_v16 = vmul.f32 %v2831_v13, %v12099_v24  ;;  %v1261_v33 = vshll.u32 %v1260_v10, 23  ;;  %v12342_v27 = vmul.f32 %v15132_v56, %v15131_v51  ;;  %v15136_v13 = vld [vmem:[#allocation29_spill] sm:$0xff]  ;;  %v15137_v51 = vld [vmem:[#allocation14_spill] sm:$0xff] }
 0x28a   : > { %v1344_v35 = vadd.s32 1, %v12321_v46  ;;  %v3329_v40 = vsel %vm3246_vm8, %v3328_v57, %v12264_v9  ;;  %v1257_v14 = vshrl.u32 %v1239_v58, %v1255_v15  ;;  %v1457_v39 = vclz %v8315_v17 }
 0x28b   : > { %15133 = vst [vmem:[#allocation24_spill] sm:$0xff] %v12342_v27  ;;  %v3012_v41 = vadd.s32 127, %v3011_v32  ;;  %vm1185_vm14 = vcmp.lt.s32.totalorder %v15134_v18, 0  ;;  %v12350_v5 = vsub.s32 %v12283_v60, %v1555_v0  ;;  %v1341_v24 = vmul.u32 %v1334_v38, %v1325_v7 }
 0x28c   : > { %vm1343_vm2 = vc.u32 %v12333_v49, %v12320_v37  ;;  %v1813_v10 = vsel %vm1812_vm13, %v1811_v25, 0  ;;  %v3958_v4 = vadd.f32 %v15135_v6, %v3922_v3  ;;  %v3924_v36 = vadd.f32 %v15136_v13, %v3888_v8  ;;  %v15143_v13 = vld [vmem:[#allocation21_spill] sm:$0xff] }
 0x28d   : > { %v12358_v9 = vmul.f32 %v15132_v56, %v15137_v51  ;;  %v1345_v57 = vsel %vm1343_vm2, %v1344_v35, %v12321_v46  ;;  %v3887_v15 = vmul.f32 %v15119_v54, %v3867_v16  ;;  %v1256_v60 = vshll.u32 %v12145_v42, %v12272_v23  ;;  %v15139_v35 = vld [vmem:[#allocation16_spill] sm:$0xff]  ;;  %v15144_v51 = vld [vmem:[#allocation10_spill] sm:$0xff] }
 0x28e   : > { %v1262_v38 = vor.u32 4788187, %v1261_v33  ;;  %v1346_v17 = vadd.s32 %v1345_v57, %v1341_v24  ;;  %v3332_v25 = vsel %vm12315_vm12, %v15124_v48, %v3329_v40  ;;  %v8316_v32 = vadd.s32 4294967294, %v1457_v39  ;;  %v15141_v33 = vld [vmem:[#allocation22_spill] sm:$0xff]  ;;  %v15142_v40 = vld [vmem:[#allocation25_spill] sm:$0xff] }
 0x28f   : > { %15138 = vst [vmem:[#allocation27_spill] sm:$0xff] %v12358_v9  ;;  %v3007_v3 = vsub.s32 32, %v12307_v19  ;;  %v1815_v0 = vand.u32 31, %v1813_v10  ;;  %v1258_v8 = vor.u32 %v1257_v14, %v1256_v60  ;;  %v3013_v58 = vshll.u32 %v3012_v41, 23 }
 0x290   : > { %v1558_v7 = vsub.s32 0, %v12350_v5  ;;  %v1347_v46 = vadd.s32 536870912, %v1346_v17  ;;  %v12370_v16 = vadd.f32 %v15139_v35, %v3924_v36  ;;  %v1269_v42 = vsub.s32 4, %v12066_v2 }
 0x291   : > { %v2991_v23 = vadd.s32 %v12061_v30, %v12069_v55  ;;  %v3330_v24 = vsub.s32 4, %v15141_v33  ;;  %v3923_v39 = vadd.f32 %v15142_v40, %v3887_v15  ;;  %v1263_v6 = vand.u32 2147483647, %v1262_v38 }
 0x292   : > { %15140 = vst [vmem:[#allocation33_spill] sm:$0xff] %v12370_v16  ;;  %v12379_v14 = vmul.f32 %v15144_v51, %v15143_v13  ;;  %v12381_v41 = vshrl.u32 %v1347_v46, 30  ;;  %10001 = vcosq.f32 %v3332_v25  ;;  %v15146_v36 = vand.u32 2147483647, %v15134_v18  ;;  %v15154_v51 = vld [vmem:[#allocation8_spill] sm:$0xff] }
 0x293   : > { %vm8317_vm4 = vcmp.lt.s32.totalorder %v8316_v32, 0  ;;  %v3009_v30 = vshrl.u32 %v2991_v23, %v3007_v3  ;;  %v12389_v55 = vsub.s32 32, %v1815_v0  ;;  %v1265_v60 = vcvt.s32.f32 %v1258_v8  ;;  %v12401_v23 = vpop.permute.xlu1 %2143  ;;  %v15150_v8 = vld [vmem:[#allocation18_spill] sm:$0xff] }
 0x294   : > { %15145 = vst [vmem:[#allocation31_spill] sm:$0xff] %v12379_v14  ;;  %vm12385_vm3 = vcmp.le.f32.partialorder %v15146_v36, 0.7853982  ;;  %v3014_v15 = vor.u32 4788187, %v3013_v58  ;;  %v8319_v38 = vmin.u32 %v1558_v7, %v12350_v5  ;;  %v1349_v35 = vshll.u32 %v12381_v41, 30 }
 0x295   : > { %10003 = vsinq.f32 %v3332_v25  ;;  %v1270_v46 = vsel %vm1185_vm14, %v1269_v42, %v12066_v2  ;;  %v3008_v40 = vshll.u32 %v12212_v62, %v12307_v19  ;;  %v3331_v3 = vsel %vm3246_vm8, %v3330_v24, %v15141_v33  ;;  %15149 = vst [vmem:[#allocation26_spill] sm:$0xff] %v12401_v23  ;;  %v15151_v24 = vld [vmem:[#allocation6_spill] sm:$0xff] }
 0x296   : > { %v3959_v58 = vadd.f32 %v15150_v8, %v3923_v39  ;;  %v1266_v13 = vmul.f32 %v1265_v60, %v1263_v6  ;;  %v12404_v7 = vsel %vm8317_vm4, 0, %v8316_v32  ;;  %v12407_v16 = vsub.s32 %v1346_v17, %v1349_v35 }
 0x297   : > { %v3010_v36 = vor.u32 %v3009_v30, %v3008_v40  ;;  %v1827_v2 = vshll.u32 %v15042_v52, %v1815_v0  ;;  %v1828_v62 = vshrl.u32 %v15038_v63, %v12389_v55  ;;  %v3015_v19 = vand.u32 2147483647, %v3014_v15 }
 0x298   : > { %v1560_v42 = vclz %v8319_v38  ;;  %v12412_v33 = vshrl.u32 %v1813_v10, 5  ;;  %v2186_v39 = vmul.f32 %v15151_v24, %v12401_v23  ;;  %v1818_v32 = vshll.u32 %v15068_v12, %v1815_v0 }
 0x299   : > { %v1819_v6 = vshrl.u32 %v15069_v44, %v12389_v55  ;;  %v1830_v17 = vshll.u32 %v15038_v63, %v1815_v0  ;;  %v1831_v30 = vshrl.u32 %v15120_v59, %v12389_v55  ;;  %v1821_v60 = vshll.u32 %v15069_v44, %v1815_v0 }
 0x29a   : > { %v1822_v15 = vshrl.u32 %v15070_v20, %v12389_v55  ;;  %v1824_v10 = vshll.u32 %v15070_v20, %v1815_v0  ;;  %v1825_v38 = vshrl.u32 %v15042_v52, %v12389_v55  ;;  %v12428_v35 = vpack.c.bf16 %v3959_v58, %v3958_v4  ;;  %v15155_v58 = vld [vmem:[#allocation32_spill] sm:$0xff] }
 0x29b   : > { %v3017_v40 = vcvt.s32.f32 %v3010_v36  ;;  %v1352_v8 = vsub.s32 0, %v12407_v16  ;;  %v1829_v25 = vor.u32 %v1828_v62, %v1827_v2  ;;  %v1272_v9 = vsel %vm12385_vm3, 0, %v1270_v46 }
 0x29c   : > { %15152 = vst [vmem:[#allocation28_spill] sm:$0xff] %v12428_v35  ;;  %v15153_v14 = vand.u32 2147483647, %v12251_v1  ;;  %vm1836_vm6 = vcmp.lt.s32.totalorder %v12412_v33, 4  ;;  %v12437_v23 = vadd.f32 %v15154_v51, %v2186_v39  ;;  %v12439_v0 = vpop.eup %10001  ;;  %v1267_v56 = vxor.u32 2147483648, %v1266_v13 }
 0x29d   : > { %v1465_v4 = vsub.s32 4294967266, %v12404_v7  ;;  %vm2937_vm1 = vcmp.lt.s32.totalorder %v15155_v58, 0  ;;  %v3018_v36 = vmul.f32 %v3017_v40, %v3015_v19  ;;  %v1832_v2 = vor.u32 %v1831_v30, %v1830_v17 }
 0x29e   : > { %v1808_v27 = vand.u32 8388607, %v15153_v14  ;;  %v8320_v62 = vadd.s32 4294967294, %v1560_v42  ;;  %v1820_v35 = vor.u32 %v1819_v6, %v1818_v32  ;;  %v1823_v46 = vor.u32 %v1822_v15, %v1821_v60 }
 0x29f   : > { %v1826_v43 = vor.u32 %v1825_v38, %v1824_v10  ;;  %v12443_v1 = vpop.eup %10003  ;;  %v8311_v14 = vmin.u32 %v1352_v8, %v12407_v16  ;;  %vm1833_vm10 = vcmp.lt.s32.totalorder %v12412_v33, 1  ;;  %vm1835_vm15 = vcmp.lt.s32.totalorder %v12412_v33, 3 }
 0x2a0   : > { %v1842_v39 = vsel %vm1836_vm6, %v1829_v25, 920167782  ;;  %v12450_v54 = vand.u32 3, %v1272_v9  ;;  %v15156_v19 = vand.u32 2147483647, %v15155_v58  ;;  %v3333_v32 = vsel %vm12315_vm12, 0, %v3331_v3 }
 0x2a1   : > { %v1809_v6 = vor.u32 8388608, %v1808_v27  ;;  %v3041_v17 = vand.u32 2139095040, %v12437_v23  ;;  %v1268_v30 = vsel %vm1185_vm14, %v1267_v56, %v1266_v13  ;;  %v1461_v60 = vsub.s32 32, %v12404_v7 }
 0x2a2   : > { %vm12454_vm5 = vcmp.le.f32.partialorder %v15156_v19, 0.7853982  ;;  %v3019_v15 = vxor.u32 2147483648, %v3018_v36  ;;  %v1846_v9 = vsel %vm1836_vm6, %v1832_v2, 1326507024  ;;  %vm8321_vm7 = vcmp.lt.s32.totalorder %v8320_v62, 0 }
 0x2a3   : > { %vm1834_vm0 = vcmp.lt.s32.totalorder %v12412_v33, 2  ;;  %v1841_v10 = vsel %vm1833_vm10, %v1820_v35, %v1823_v46  ;;  %v1843_v27 = vsel %vm1835_vm15, %v1826_v43, %v1842_v39  ;;  %v1445_v34 = vadd.s32 %v12085_v31, %v12093_v61 }
 0x2a4   : > { %v1466_v3 = vadd.s32 127, %v1465_v4  ;;  %v12473_v56 = vand.u32 3, %v3333_v32  ;;  %v1354_v13 = vclz %v8311_v14  ;;  %v1845_v38 = vsel %vm1833_vm10, %v1823_v46, %v1826_v43 }
 0x2a5   : > { %v1847_v40 = vsel %vm1835_vm15, %v1829_v25, %v1846_v9  ;;  %v12479_v8 = vshll.u32 %v1809_v6, 8  ;;  %v3042_v2 = vshrl.u32 %v3041_v17, 23  ;;  %v1271_v39 = vsel %vm12385_vm3, %v15134_v18, %v1268_v30 }
 0x2a6   : > { %v12484_v19 = vsel %vm8321_vm7, 0, %v8320_v62  ;;  %v1817_v31 = vshrl.u32 %v15068_v12, %v12389_v55  ;;  %v1844_v61 = vsel %vm1834_vm0, %v1841_v10, %v1843_v27  ;;  %v1462_v4 = vshll.u32 %v12276_v47, %v12404_v7 }
 0x2a7   : > { %v1463_v14 = vshrl.u32 %v1445_v34, %v1461_v60  ;;  %v3020_v25 = vsel %vm2937_vm1, %v3019_v15, %v3018_v36  ;;  %v8374_v32 = vadd.s32 4294967169, %v3042_v2  ;;  %v1467_v6 = vshll.u32 %v1466_v3, 23 }
 0x2a8   : > { %v8312_v17 = vadd.s32 4294967294, %v1354_v13  ;;  %v1838_v57 = vsel %vm1836_vm6, %v1826_v43, 2102212464  ;;  %v1848_v62 = vsel %vm1834_vm0, %v1845_v38, %v1847_v40  ;;  %v1568_v55 = vsub.s32 4294967266, %v12484_v19  ;;  %v12518_v13 = vpop.permute.xlu0 %414 }
 0x2a9   : > { %v12500_v30 = vmul.u32.u64.low %v12479_v8, %v1844_v61  ;;  %v12501_v9 = vmul.u32.u64.high %v12479_v8, %v1844_v61, %v12500_v30  ;;  %v3048_v47 = vadd.s32 1, %v8374_v32  ;;  %v3021_v7 = vsub.s32 4, %v12175_v22  ;;  %15160 = vst [vmem:[#allocation29_spill] sm:$0xff] %v12518_v13 }
 0x2aa   : > { %v3023_v36 = vsel %vm12454_vm5, %v15155_v58, %v3020_v25  ;;  %v1837_v43 = vsel %vm1833_vm10, %v1817_v31, %v1820_v35  ;;  %v14981_v60 = vand.u32 2147483647, %v12437_v23  ;;  %v1839_v15 = vsel %vm1835_vm15, %v1823_v46, %v1838_v57 }
 0x2ab   : > { %15159 = vst [vmem:[#allocation30_spill] sm:$0xff] %v12500_v30  ;;  %v12514_v10 = vmul.u32.u64.low %v12479_v8, %v1848_v62  ;;  %v12515_v27 = vmul.u32.u64.high %v12479_v8, %v1848_v62, %v12514_v10  ;;  %vm3049_vm8 = vcmp.gt.s32.totalorder %v3048_v47, 0  ;;  %10005 = vcosq.f32 %v1271_v39 }
 0x2ac   : > { %vm8313_vm9 = vcmp.lt.s32.totalorder %v8312_v17, 0  ;;  %v3050_v3 = vsel %vm3049_vm8, %v3048_v47, 0  ;;  %10007 = vsinq.f32 %v1271_v39  ;;  %v12520_v38 = vor.u32 %v1463_v14, %v1462_v4 }
 0x2ad   : > { %v1569_v35 = vadd.s32 127, %v1568_v55  ;;  %v3052_v40 = vand.u32 31, %v3050_v3  ;;  %v12522_v2 = vor.u32 4788187, %v1467_v6  ;;  %v12527_v46 = vsel %vm2937_vm1, %v3021_v7, %v12175_v22 }
 0x2ae   : > { %10009 = vcosq.f32 %v3023_v36  ;;  %v1840_v31 = vsel %vm1834_vm0, %v1837_v43, %v1839_v15  ;;  %v12531_v61 = vsel %vm8313_vm9, 0, %v8312_v17  ;;  %v3045_v39 = vand.u32 8388607, %v14981_v60 }
 0x2af   : > { %v3053_v4 = vsub.s32 32, %v3052_v40  ;;  %v440_v14 = vmul.f32 %v10314_v26, %v12518_v13  ;;  %10011 = vsinq.f32 %v3023_v36  ;;  %v1548_v25 = vadd.s32 %v12242_v21, %v12248_v29 }
 0x2b0   : > { %v1564_v22 = vsub.s32 32, %v12484_v19  ;;  %v12542_v32 = vadd.s32 %v12320_v37, %v12333_v49  ;;  %v1570_v33 = vshll.u32 %v1569_v35, 23  ;;  %v1856_v6 = vmul.u32 %v12479_v8, %v1840_v31 }
 0x2b1   : > { %v1859_v17 = vadd.s32 1, %v12501_v9  ;;  %v3056_v57 = vshrl.u32 %v15069_v44, %v3053_v4  ;;  %v1362_v62 = vsub.s32 4294967266, %v12531_v61  ;;  %v3055_v55 = vshll.u32 %v15068_v12, %v3052_v40 }
 0x2b2   : > { %v3059_v47 = vshrl.u32 %v15070_v20, %v3053_v4  ;;  %v3062_v21 = vshrl.u32 %v15042_v52, %v3053_v4  ;;  %vm1858_vm11 = vc.u32 %v12515_v27, %v12500_v30  ;;  %v3046_v29 = vor.u32 8388608, %v3045_v39 }
 0x2b3   : > { %v3058_v37 = vshll.u32 %v15069_v44, %v3052_v40  ;;  %v12555_v49 = vadd.f32 %v10322_v28, %v440_v14  ;;  %v3051_v8 = vshrl.u32 %v3050_v3, 5  ;;  %v3057_v7 = vor.u32 %v3056_v57, %v3055_v55 }
 0x2b4   : > { %v3061_v36 = vshll.u32 %v15070_v20, %v3052_v40  ;;  %v3064_v43 = vshll.u32 %v15042_v52, %v3052_v40  ;;  %v3065_v10 = vshrl.u32 %v15038_v63, %v3053_v4  ;;  %v3067_v35 = vshll.u32 %v15038_v63, %v3052_v40 }
 0x2b5   : > { %15161 = vst [vmem:[#allocation14_spill] sm:$0xff] %v12555_v49  ;;  %v3060_v15 = vor.u32 %v3059_v47, %v3058_v37  ;;  %v3068_v31 = vshrl.u32 %v15120_v59, %v3053_v4  ;;  %v12562_v60 = vpop.eup %10005  ;;  %v1565_v39 = vshll.u32 %v12350_v5, %v12484_v19  ;;  %v1566_v14 = vshrl.u32 %v1548_v25, %v1564_v22 }
 0x2b6   : > { %v1860_v3 = vsel %vm1858_vm11, %v1859_v17, %v12501_v9  ;;  %v3063_v57 = vor.u32 %v3062_v21, %v3061_v36  ;;  %v12567_v55 = vpop.eup %10007  ;;  %v12569_v34 = vor.u32 4788187, %v1570_v33  ;;  %v3066_v47 = vor.u32 %v3065_v10, %v3064_v43 }
 0x2b7   : > { %v3069_v37 = vor.u32 %v3068_v31, %v3067_v35  ;;  %v1907_v13 = vand.u32 2139095040, %v12555_v49  ;;  %v1358_v28 = vsub.s32 32, %v12531_v61  ;;  %v1363_v26 = vadd.s32 127, %v1362_v62 }
 0x2b8   : > { %v12572_v40 = vpop.eup %10009  ;;  %vm3070_vm12 = vcmp.lt.s32.totalorder %v3051_v8, 1  ;;  %vm3073_vm13 = vcmp.lt.s32.totalorder %v3051_v8, 4  ;;  %v12575_v5 = vadd.s32 %v1860_v3, %v1856_v6  ;;  %v3086_v25 = vshll.u32 %v3046_v29, 8 }
 0x2b9   : > { %v3078_v19 = vsel %vm3070_vm12, %v3057_v7, %v3060_v15  ;;  %v3079_v9 = vsel %vm3073_vm13, %v3066_v47, 920167782  ;;  %v12578_v22 = vpop.eup %10011  ;;  %v3054_v33 = vshrl.u32 %v15068_v12, %v3053_v4  ;;  %vm3072_vm14 = vcmp.lt.s32.totalorder %v3051_v8, 3 }
 0x2ba   : > { %v3075_v17 = vsel %vm3073_vm13, %v3063_v57, 2102212464  ;;  %v3082_v21 = vsel %vm3070_vm12, %v3060_v15, %v3063_v57  ;;  %vm3339_vm2 = vcmp.eq.s32.totalorder %v12473_v56, 0  ;;  %vm3071_vm3 = vcmp.lt.s32.totalorder %v3051_v8, 2 }
 0x2bb   : > { %v3080_v62 = vsel %vm3072_vm14, %v3063_v57, %v3079_v9  ;;  %v3083_v36 = vsel %vm3073_vm13, %v3069_v37, 1326507024  ;;  %v1908_v43 = vshrl.u32 %v1907_v13, 23  ;;  %v1364_v6 = vshll.u32 %v1363_v26, 23 }
 0x2bc   : > { %v3074_v10 = vsel %vm3070_vm12, %v3054_v33, %v3057_v7  ;;  %v3081_v35 = vsel %vm3071_vm3, %v3078_v19, %v3080_v62  ;;  %v3084_v29 = vsel %vm3072_vm14, %v3066_v47, %v3083_v36  ;;  %vm1278_vm4 = vcmp.eq.s32.totalorder %v12450_v54, 0 }
 0x2bd   : > { %vm1281_vm6 = vcmp.eq.s32.totalorder %v12450_v54, 2  ;;  %vm3342_vm1 = vcmp.eq.s32.totalorder %v12473_v56, 2  ;;  %v3076_v4 = vsel %vm3072_vm14, %v3060_v15, %v3075_v17  ;;  %v3085_v31 = vsel %vm3071_vm3, %v3082_v21, %v3084_v29 }
 0x2be   : > { %v12589_v3 = vmul.u32.u64.low %v3086_v25, %v3081_v35  ;;  %v12590_v30 = vmul.u32.u64.high %v3086_v25, %v3081_v35, %v12589_v3  ;;  %v1469_v26 = vand.u32 2147483647, %v12522_v2  ;;  %v3024_v13 = vsel %vm12454_vm5, 0, %v12527_v46 }
 0x2bf   : > { %v3343_v7 = vxor.u32 2147483648, %v12439_v0  ;;  %v1567_v57 = vor.u32 %v1566_v14, %v1565_v39  ;;  %v1360_v47 = vshrl.u32 %v12542_v32, %v1358_v28  ;;  %v8334_v15 = vadd.s32 4294967169, %v1908_v43  ;;  %v15162_v39 = vld [vmem:[#allocation23_spill] sm:$0xff] }
 0x2c0   : > { %v12599_v37 = vmul.u32.u64.low %v3086_v25, %v3085_v31  ;;  %v12600_v19 = vmul.u32.u64.high %v3086_v25, %v3085_v31, %v12599_v37  ;;  %v1471_v9 = vcvt.s32.f32 %v12520_v38  ;;  %v1282_v33 = vxor.u32 2147483648, %v12562_v60 }
 0x2c1   : > { %v1862_v17 = vadd.s32 536870912, %v12575_v5  ;;  %v3077_v2 = vsel %vm3071_vm3, %v3074_v10, %v3076_v4  ;;  %vm3338_vm10 = vcmp.lt.s32.totalorder %v12473_v56, 2  ;;  %v1572_v42 = vand.u32 2147483647, %v12569_v34 }
 0x2c2   : > { %v1359_v46 = vshll.u32 %v12407_v16, %v12531_v61  ;;  %v1365_v28 = vor.u32 4788187, %v1364_v6  ;;  %v3096_v32 = vadd.s32 1, %v12590_v30  ;;  %vm1391_vm15 = vcmp.lt.s32.totalorder %v15162_v39, 0 }
 0x2c3   : > { %v1472_v14 = vmul.f32 %v1471_v9, %v1469_v26  ;;  %v1279_v38 = vxor.u32 2147483648, %v12567_v55  ;;  %v3028_v21 = vand.u32 3, %v3024_v13  ;;  %v1574_v62 = vcvt.s32.f32 %v1567_v57 }
 0x2c4   : > { %v1361_v36 = vor.u32 %v1360_v47, %v1359_v46  ;;  %v3093_v8 = vmul.u32 %v3086_v25, %v3077_v2  ;;  %vm3095_vm5 = vc.u32 %v12600_v19, %v12589_v3  ;;  %v1914_v43 = vadd.s32 1, %v8334_v15  ;;  %v9745_v25 = vld [vmem:[%s14890_s2] sm:$0xff]  }
 0x2c5   : > { %v3034_v34 = vxor.u32 2147483648, %v12572_v40  ;;  %v15163_v16 = vxor.u32 2147483648, %v12443_v1  ;;  %v12621_v6 = vshrl.u32 %v1862_v17, 30  ;;  %v3097_v10 = vsel %vm3095_vm5, %v3096_v32, %v12590_v30  ;;  %9279 = vmatprep.subr.bf16.mxu0 %v9745_v25 }
 0x2c6   : > { %v15165_v35 = vand.u32 2147483647, %v15162_v39  ;;  %v3031_v29 = vxor.u32 2147483648, %v12578_v22  ;;  %vm3336_vm0 = vweird.f32 %v15124_v48  ;;  %v1575_v4 = vmul.f32 %v1574_v62, %v1572_v42  ;;  %9280 = vmatpush3.bf16.msra.mxu0 %v9745_v25  ;;  %v15193_v25 = vld [vmem:[#allocation9_spill] sm:$0xff] }
 0x2c7   : > { %v3341_v61 = vsel %vm3339_vm2, %v12439_v0, %v15163_v16  ;;  %15164 = vst [vmem:[#allocation16_spill] sm:$0xff] %v12621_v6  ;;  %v1366_v31 = vand.u32 2147483647, %v1365_v28  ;;  %v3098_v26 = vadd.s32 %v3097_v10, %v3093_v8  ;;  %v1473_v13 = vxor.u32 2147483648, %v1472_v14 }
 0x2c8   : > { %vm12626_vm7 = vcmp.le.f32.partialorder %v15165_v35, 0.7853982  ;;  %v1280_v0 = vsel %vm1278_vm4, %v12562_v60, %v1279_v38  ;;  %v1283_v30 = vsel %vm1281_vm6, %v1282_v33, %v12567_v55  ;;  %vm3027_vm8 = vweird.f32 %v15155_v58  ;;  %v12694_v58 = vpop.permute.xlu1 %2147 }
 0x2c9   : > { %v3344_v57 = vsel %vm3342_vm1, %v3343_v7, %v12443_v1  ;;  %vm1275_vm9 = vweird.f32 %v15134_v18  ;;  %vm3033_vm11 = vcmp.eq.s32.totalorder %v3028_v21, 2  ;;  %v1368_v47 = vcvt.s32.f32 %v1361_v36 }
 0x2ca   : > { %v3099_v37 = vadd.s32 536870912, %v3098_v26  ;;  %vm1915_vm12 = vcmp.gt.s32.totalorder %v1914_v43, 0  ;;  %vm3030_vm13 = vcmp.eq.s32.totalorder %v3028_v21, 0  ;;  %v3035_v15 = vsel %vm3033_vm11, %v3034_v34, %v12578_v22 }
 0x2cb   : > { %v1578_v60 = vsub.s32 4, %v12309_v11  ;;  %v1864_v9 = vshll.u32 %v12621_v6, 30  ;;  %v3032_v55 = vsel %vm3030_vm13, %v12572_v40, %v3031_v29  ;;  %v1576_v33 = vxor.u32 2147483648, %v1575_v4 }
 0x2cc   : > { %v1369_v17 = vmul.f32 %v1368_v47, %v1366_v31  ;;  %v12647_v2 = vshrl.u32 %v3099_v37, 30  ;;  %v1475_v1 = vsub.s32 4, %v12223_v50  ;;  %vm1277_vm14 = vcmp.lt.s32.totalorder %v12450_v54, 2 }
 0x2cd   : > { %v3345_v7 = vsel %vm3338_vm10, %v3341_v61, %v3344_v57  ;;  %v1916_v42 = vsel %vm1915_vm12, %v1914_v43, 0  ;;  %v1474_v22 = vsel %vm1391_vm15, %v1473_v13, %v1472_v14  ;;  %vm3029_vm2 = vcmp.lt.s32.totalorder %v3028_v21, 2 }
 0x2ce   : > { %vm1494_vm3 = vcmp.lt.s32.totalorder %v12118_v45, 0  ;;  %v3101_v40 = vshll.u32 %v12647_v2, 30  ;;  %v1284_v46 = vsel %vm1277_vm14, %v1280_v0, %v1283_v30  ;;  %v3036_v28 = vsel %vm3029_vm2, %v3032_v55, %v3035_v15 }
 0x2cf   : > { %v1579_v32 = vsel %vm1494_vm3, %v1578_v60, %v12309_v11  ;;  %v12659_v38 = vsub.s32 %v12575_v5, %v1864_v9  ;;  %v1577_v54 = vsel %vm1494_vm3, %v1576_v33, %v1575_v4  ;;  %v1370_v62 = vxor.u32 2147483648, %v1369_v17 }
 0x2d0   : > { %v12661_v56 = vsub.s32 %v3098_v26, %v3101_v40  ;;  %v1918_v36 = vand.u32 31, %v1916_v42  ;;  %v12666_v14 = vsel %vm1391_vm15, %v1475_v1, %v12223_v50  ;;  %v1477_v21 = vsel %vm12626_vm7, %v15162_v39, %v1474_v22 }
 0x2d1   : > { %v12673_v11 = vsel %vm3336_vm0, nan, %v3345_v7  ;;  %v15169_v5 = vand.u32 2147483647, %v12118_v45  ;;  %v3037_v43 = vsel %vm3027_vm8, nan, %v3036_v28  ;;  %v1372_v34 = vsub.s32 4, %v12381_v41 }
 0x2d2   : > { %15168 = vst [vmem:[#allocation22_spill] sm:$0xff] %v12673_v11  ;;  %v3104_v16 = vsub.s32 0, %v12661_v56  ;;  %v1285_v48 = vsel %vm1275_vm9, nan, %v1284_v46  ;;  %vm1288_vm6 = vcmp.lt.s32.totalorder %v12159_v53, 0  ;;  %v1867_v10 = vsub.s32 0, %v12659_v38 }
 0x2d3   : > { %vm12677_vm4 = vcmp.le.f32.partialorder %v15169_v5, 0.7853982  ;;  %10013 = vcosq.f32 %v1477_v21  ;;  %v1371_v35 = vsel %vm1288_vm6, %v1370_v62, %v1369_v17  ;;  %v12697_v4 = vsub.s32 32, %v1918_v36 }
 0x2d4   : > { %v1581_v50 = vsel %vm12677_vm4, 0, %v1579_v32  ;;  %v1580_v61 = vsel %vm12677_vm4, %v12118_v45, %v1577_v54  ;;  %v8375_v29 = vmin.u32 %v3104_v16, %v12661_v56  ;;  %10015 = vsinq.f32 %v1477_v21 }
 0x2d5   : > { %v12699_v31 = vmul.f32 %v3037_v43, %v1285_v48  ;;  %v12701_v18 = vand.u32 3, %v1581_v50  ;;  %v15172_v26 = vand.u32 2147483647, %v12159_v53  ;;  %10017 = vcosq.f32 %v1580_v61 }
 0x2d6   : > { %v12710_v0 = vsel %vm1288_vm6, %v1372_v34, %v12381_v41  ;;  %v3106_v30 = vclz %v8375_v29  ;;  %v2187_v57 = vmul.f32 %v15151_v24, %v12694_v58  ;;  %10019 = vsinq.f32 %v1580_v61 }
 0x2d7   : > { %vm12705_vm1 = vcmp.le.f32.partialorder %v15172_v26, 0.7853982  ;;  %v12718_v37 = vmin.u32 %v1867_v10, %v12659_v38  ;;  %v14988_v15 = vand.u32 2147483647, %v12555_v49  ;;  %v1930_v9 = vshll.u32 %v15042_v52, %v1918_v36 }
 0x2d8   : > { %v1374_v47 = vsel %vm12705_vm1, %v12159_v53, %v1371_v35  ;;  %v8376_v60 = vadd.s32 4294967294, %v3106_v30  ;;  %v1931_v41 = vshrl.u32 %v15038_v63, %v12697_v4  ;;  %v12725_v55 = vadd.f32 %v15154_v51, %v2187_v57 }
 0x2d9   : > { %v12727_v33 = vshrl.u32 %v1916_v42, 5  ;;  %v1921_v17 = vshll.u32 %v15068_v12, %v1918_v36  ;;  %v1933_v1 = vshll.u32 %v15038_v63, %v1918_v36  ;;  %v1934_v7 = vshrl.u32 %v15120_v59, %v12697_v4 }
 0x2da   : > { %vm8377_vm10 = vcmp.lt.s32.totalorder %v8376_v60, 0  ;;  %v1922_v22 = vshrl.u32 %v15069_v44, %v12697_v4  ;;  %v1924_v40 = vshll.u32 %v15069_v44, %v1918_v36  ;;  %v1925_v46 = vshrl.u32 %v15070_v20, %v12697_v4 }
 0x2db   : > { %v3109_v28 = vsel %vm8377_vm10, 0, %v8376_v60  ;;  %v1927_v42 = vshll.u32 %v15070_v20, %v1918_v36  ;;  %v1928_v32 = vshrl.u32 %v15042_v52, %v12697_v4  ;;  %v3144_v54 = vand.u32 2139095040, %v12725_v55  ;;  %v12762_v60 = vpop.permute.xlu0 %2167 }
 0x2dc   : > { %v3094_v62 = vadd.s32 %v12589_v3, %v12600_v19  ;;  %v3110_v21 = vsub.s32 32, %v3109_v28  ;;  %v3114_v5 = vsub.s32 4294967266, %v3109_v28  ;;  %v1932_v8 = vor.u32 %v1931_v41, %v1930_v9  ;;  %15175 = vst [vmem:[#allocation25_spill] sm:$0xff] %v12762_v60 }
 0x2dd   : > { %v1911_v43 = vand.u32 8388607, %v14988_v15  ;;  %v1935_v50 = vor.u32 %v1934_v7, %v1933_v1  ;;  %vm1939_vm15 = vcmp.lt.s32.totalorder %v12727_v33, 4  ;;  %v3145_v34 = vshrl.u32 %v3144_v54, 23  ;;  %v12747_v16 = vpop.eup %10013 }
 0x2de   : > { %v3112_v36 = vshrl.u32 %v3094_v62, %v3110_v21  ;;  %v3115_v48 = vadd.s32 127, %v3114_v5  ;;  %v12749_v61 = vor.u32 %v1922_v22, %v1921_v17  ;;  %v12751_v10 = vor.u32 %v1925_v46, %v1924_v40  ;;  %v12753_v35 = vpop.eup %10015  ;;  %v15176_v21 = vld [vmem:[#allocation11_spill] sm:$0xff] }
 0x2df   : > { %10021 = vcosq.f32 %v1374_v47  ;;  %v1929_v3 = vor.u32 %v1928_v32, %v1927_v42  ;;  %vm1936_vm5 = vcmp.lt.s32.totalorder %v12727_v33, 1  ;;  %v8378_v19 = vadd.s32 4294967169, %v3145_v34  ;;  %v12756_v29 = vpop.eup %10017 }
 0x2e0   : > { %v3111_v26 = vshll.u32 %v12661_v56, %v3109_v28  ;;  %v3116_v30 = vshll.u32 %v3115_v48, 23  ;;  %vm1938_vm0 = vcmp.lt.s32.totalorder %v12727_v33, 3  ;;  %v1945_v57 = vsel %vm1939_vm15, %v1932_v8, 920167782  ;;  %v12764_v9 = vpop.eup %10019 }
 0x2e1   : > { %v1869_v41 = vclz %v12718_v37  ;;  %v1912_v17 = vor.u32 8388608, %v1911_v43  ;;  %v1949_v1 = vsel %vm1939_vm15, %v1935_v50, 1326507024  ;;  %v3151_v7 = vadd.s32 1, %v8378_v19 }
 0x2e2   : > { %v3113_v22 = vor.u32 %v3112_v36, %v3111_v26  ;;  %v3117_v40 = vor.u32 4788187, %v3116_v30  ;;  %vm1937_vm8 = vcmp.lt.s32.totalorder %v12727_v33, 2  ;;  %v1944_v56 = vsel %vm1936_vm5, %v12749_v61, %v12751_v10 }
 0x2e3   : > { %v1946_v46 = vsel %vm1938_vm0, %v1929_v3, %v1945_v57  ;;  %v14989_v28 = vand.u32 2147483647, %v12725_v55  ;;  %vm3152_vm9 = vcmp.gt.s32.totalorder %v3151_v7, 0  ;;  %v2192_v37 = vmul.f32 %v15151_v24, %v12762_v60 }
 0x2e4   : > { %v3118_v42 = vand.u32 2147483647, %v3117_v40  ;;  %v1948_v32 = vsel %vm1936_vm5, %v12751_v10, %v1929_v3  ;;  %v1950_v54 = vsel %vm1938_vm0, %v1932_v8, %v1949_v1  ;;  %v3153_v62 = vsel %vm3152_vm9, %v3151_v7, 0 }
 0x2e5   : > { %v12786_v5 = vmul.f32 %v15176_v21, %v12699_v31  ;;  %10023 = vsinq.f32 %v1374_v47  ;;  %v3155_v50 = vand.u32 31, %v3153_v62  ;;  %v12791_v34 = vadd.s32 4294967294, %v1869_v41 }
 0x2e6   : > { %v3120_v36 = vcvt.s32.f32 %v3113_v22  ;;  %v1947_v48 = vsel %vm1937_vm8, %v1944_v56, %v1946_v46  ;;  %v12795_v19 = vshll.u32 %v1912_v17, 8  ;;  %v1951_v8 = vsel %vm1937_vm8, %v1948_v32, %v1950_v54 }
 0x2e7   : > { %v3148_v31 = vand.u32 8388607, %v14989_v28  ;;  %v3156_v47 = vsub.s32 32, %v3155_v50  ;;  %v12802_v26 = vadd.f32 %v15154_v51, %v2192_v37  ;;  %v12804_v57 = vshrl.u32 %v3153_v62, 5 }
 0x2e8   : > { %v3121_v30 = vmul.f32 %v3120_v36, %v3118_v42  ;;  %v3158_v41 = vshll.u32 %v15068_v12, %v3155_v50  ;;  %v3161_v1 = vshll.u32 %v15069_v44, %v3155_v50  ;;  %vm3040_vm11 = vcmp.lt.s32.totalorder %v12437_v23, 0 }
 0x2e9   : > { %15177 = vst [vmem:[#allocation21_spill] sm:$0xff] %v12802_v26  ;;  %v12808_v7 = vpop.eup %10021  ;;  %v3159_v17 = vshrl.u32 %v15069_v44, %v3156_v47  ;;  %v3162_v22 = vshrl.u32 %v15070_v20, %v3156_v47  ;;  %v3164_v40 = vshll.u32 %v15070_v20, %v3155_v50  ;;  %v3167_v56 = vshll.u32 %v15042_v52, %v3155_v50 }
 0x2ea   : > { %v3165_v46 = vshrl.u32 %v15042_v52, %v3156_v47  ;;  %v3168_v37 = vshrl.u32 %v15038_v63, %v3156_v47  ;;  %v3170_v42 = vshll.u32 %v15038_v63, %v3155_v50  ;;  %v3171_v32 = vshrl.u32 %v15120_v59, %v3156_v47 }
 0x2eb   : > { %v1920_v54 = vshrl.u32 %v15068_v12, %v12697_v4  ;;  %v3160_v62 = vor.u32 %v3159_v17, %v3158_v41  ;;  %v3163_v36 = vor.u32 %v3162_v22, %v3161_v1  ;;  %v3659_v15 = vand.u32 2139095040, %v12802_v26 }
 0x2ec   : > { %vm8333_vm12 = vcmp.lt.s32.totalorder %v12791_v34, 0  ;;  %v15178_v28 = vand.u32 2147483647, %v12437_v23  ;;  %v1941_v50 = vsel %vm1939_vm15, %v1929_v3, 2102212464  ;;  %v3166_v60 = vor.u32 %v3165_v46, %v3164_v40 }
 0x2ed   : > { %v3169_v49 = vor.u32 %v3168_v37, %v3167_v56  ;;  %v3172_v6 = vor.u32 %v3171_v32, %v3170_v42  ;;  %v12832_v4 = vmul.u32.u64.low %v12795_v19, %v1951_v8  ;;  %v12833_v41 = vmul.u32.u64.high %v12795_v19, %v1951_v8, %v12832_v4 }
 0x2ee   : > { %vm12825_vm13 = vcmp.le.f32.partialorder %v15178_v28, 0.7853982  ;;  %v12836_v1 = vmul.u32.u64.low %v12795_v19, %v1947_v48  ;;  %v12837_v17 = vmul.u32.u64.high %v12795_v19, %v1947_v48, %v12836_v1  ;;  %v3122_v22 = vxor.u32 2147483648, %v3121_v30 }
 0x2ef   : > { %15181 = vst [vmem:[#allocation18_spill] sm:$0xff] %v12833_v41  ;;  %v3149_v28 = vor.u32 8388608, %v3148_v31  ;;  %vm3173_vm14 = vcmp.lt.s32.totalorder %v12804_v57, 1  ;;  %vm3176_vm2 = vcmp.lt.s32.totalorder %v12804_v57, 4  ;;  %v12842_v11 = vpop.eup %10023  ;;  %vm3175_vm3 = vcmp.lt.s32.totalorder %v12804_v57, 3 }
 0x2f0   : > { %15182 = vst [vmem:[#allocation8_spill] sm:$0xff] %v12836_v1  ;;  %v3181_v3 = vsel %vm3173_vm14, %v3160_v62, %v3163_v36  ;;  %v3182_v8 = vsel %vm3176_vm2, %v3169_v49, 920167782  ;;  %v3660_v40 = vshrl.u32 %v3659_v15, 23  ;;  %v3178_v56 = vsel %vm3176_vm2, %v3166_v60, 2102212464 }
 0x2f1   : > { %v3183_v48 = vsel %vm3175_vm3, %v3166_v60, %v3182_v8  ;;  %v3185_v31 = vsel %vm3173_vm14, %v3163_v36, %v3166_v60  ;;  %v3186_v46 = vsel %vm3176_vm2, %v3172_v6, 1326507024  ;;  %v1940_v37 = vsel %vm1936_vm5, %v1920_v54, %v12749_v61 }
 0x2f2   : > { %v1942_v42 = vsel %vm1938_vm0, %v12751_v10, %v1941_v50  ;;  %v3157_v32 = vshrl.u32 %v15068_v12, %v3156_v47  ;;  %vm3174_vm4 = vcmp.lt.s32.totalorder %v12804_v57, 2  ;;  %v3123_v15 = vsel %vm3040_vm11, %v3122_v22, %v3121_v30 }
 0x2f3   : > { %v3184_v4 = vsel %vm3174_vm4, %v3181_v3, %v3183_v48  ;;  %v3187_v6 = vsel %vm3175_vm3, %v3169_v49, %v3186_v46  ;;  %v3189_v60 = vshll.u32 %v3149_v28, 8  ;;  %v3179_v10 = vsel %vm3175_vm3, %v3163_v36, %v3178_v56  ;;  %v15183_v49 = vld [vmem:[#allocation34_spill] sm:$0xff]  ;;  %v15184_v28 = vld [vmem:[#allocation12_spill] sm:$0xff] }
 0x2f4   : > { %v3177_v61 = vsel %vm3173_vm14, %v3157_v32, %v3160_v62  ;;  %v3188_v47 = vsel %vm3174_vm4, %v3185_v31, %v3187_v6  ;;  %v8398_v54 = vadd.s32 4294967169, %v3660_v40  ;;  %vm1590_vm6 = vcmp.eq.s32.totalorder %v12701_v18, 2  ;;  %v15185_v36 = vld [vmem:[#allocation26_spill] sm:$0xff]  ;;  %v15188_v48 = vld [vmem:[#allocation24_spill] sm:$0xff] }
 0x2f5   : > { %v12871_v50 = vmul.u32.u64.low %v3189_v60, %v3188_v47  ;;  %v12872_v8 = vmul.u32.u64.high %v3189_v60, %v3188_v47, %v12871_v50  ;;  %v12874_v30 = vmul.u32.u64.low %v3189_v60, %v3184_v4  ;;  %v12875_v22 = vmul.u32.u64.high %v3189_v60, %v3184_v4, %v12874_v30  ;;  %v15186_v56 = vld [vmem:[#allocation10_spill] sm:$0xff] }
 0x2f6   : > { %v12881_v3 = vmul.f32 %v15184_v28, %v15183_v49  ;;  %v3126_v62 = vsel %vm12825_vm13, %v12437_v23, %v3123_v15  ;;  %v12888_v40 = vmul.f32 %v15186_v56, %v15185_v36  ;;  %v12892_v31 = vadd.f32 %v15188_v48, %v12786_v5  ;;  %v15192_v36 = vld [vmem:[#allocation7_spill] sm:$0xff] }
 0x2f7   : > { %v1943_v46 = vsel %vm1937_vm8, %v1940_v37, %v1942_v42  ;;  %v1962_v32 = vadd.s32 1, %v12837_v17  ;;  %v3180_v4 = vsel %vm3174_vm4, %v3177_v61, %v3179_v10  ;;  %v12902_v15 = vsel %vm8333_vm12, 0, %v12791_v34  ;;  %v12921_v37 = vpop.permute.xlu1 %399  ;;  %v15191_v42 = vld [vmem:[#allocation30_spill] sm:$0xff] }
 0x2f8   : > { %15187 = vst [vmem:[#allocation32_spill] sm:$0xff] %v12888_v40  ;;  %v15189_v6 = vsel %vm12705_vm1, 0, %v12710_v0  ;;  %vm1961_vm10 = vc.u32 %v12833_v41, %v12836_v1  ;;  %v1478_v33 = vsel %vm12626_vm7, 0, %v12666_v14  ;;  %10025 = vcosq.f32 %v3126_v62  ;;  %15190 = vst [vmem:[#allocation23_spill] sm:$0xff] %v12921_v37 }
 0x2f9   : > { %v12908_v47 = vand.u32 3, %v15189_v6  ;;  %vm3198_vm15 = vc.u32 %v12872_v8, %v12874_v30  ;;  %v3199_v5 = vadd.s32 1, %v12875_v22  ;;  %v3666_v34 = vadd.s32 1, %v8398_v54 }
 0x2fa   : > { %vm1587_vm5 = vcmp.eq.s32.totalorder %v12701_v18, 0  ;;  %v3124_v13 = vsub.s32 4, %v12647_v2  ;;  %10027 = vsinq.f32 %v3126_v62  ;;  %v1959_v0 = vmul.u32 %v12795_v19, %v1943_v46  ;;  %v9746_v46 = vld [vmem:[%s14890_s2 + $0x8] sm:$0xff]  }
 0x2fb   : > { %v3196_v57 = vmul.u32 %v3189_v60, %v3180_v4  ;;  %v1591_v14 = vxor.u32 2147483648, %v12756_v29  ;;  %v1857_v61 = vadd.s32 %v15191_v42, %v12515_v27  ;;  %v1963_v10 = vsel %vm1961_vm10, %v1962_v32, %v12837_v17  ;;  %9281 = vmatprep.subr.bf16.mxu0 %v9746_v46 }
 0x2fc   : > { %v3200_v54 = vsel %vm3198_vm15, %v3199_v5, %v12875_v22  ;;  %v1877_v50 = vsub.s32 4294967266, %v12902_v15  ;;  %v1385_v19 = vxor.u32 2147483648, %v12808_v7  ;;  %v12933_v60 = vand.u32 3, %v1478_v33  ;;  %9282 = vmatpush3.bf16.msra.mxu0 %v9746_v46 }
 0x2fd   : > { %v3201_v49 = vadd.s32 %v3200_v54, %v3196_v57  ;;  %vm1380_vm7 = vcmp.lt.s32.totalorder %v12908_v47, 2  ;;  %v1382_v62 = vxor.u32 2147483648, %v12842_v11  ;;  %vm3667_vm1 = vcmp.gt.s32.totalorder %v3666_v34, 0 }
 0x2fe   : > { %v437_v27 = vmul.f32 %v15192_v36, %v12921_v37  ;;  %vm1381_vm0 = vcmp.eq.s32.totalorder %v12908_v47, 0  ;;  %v3125_v17 = vsel %vm3040_vm11, %v3124_v13, %v12647_v2  ;;  %v12943_v22 = vadd.s32 %v1963_v10, %v1959_v0 }
 0x2ff   : > { %v3202_v48 = vadd.s32 536870912, %v3201_v49  ;;  %v1588_v32 = vxor.u32 2147483648, %v12764_v9  ;;  %v12952_v4 = vsel %vm1590_vm6, %v1591_v14, %v12764_v9  ;;  %v1873_v6 = vsub.s32 32, %v12902_v15 }
 0x300   : > { %vm1378_vm8 = vweird.f32 %v12159_v53  ;;  %vm1384_vm9 = vcmp.eq.s32.totalorder %v12908_v47, 2  ;;  %v1878_v2 = vadd.s32 127, %v1877_v50  ;;  %vm1483_vm11 = vcmp.lt.s32.totalorder %v12933_v60, 2 }
 0x301   : > { %v1386_v33 = vsel %vm1384_vm9, %v1385_v19, %v12842_v11  ;;  %v12959_v5 = vshrl.u32 %v3202_v48, 30  ;;  %v3668_v13 = vsel %vm3667_vm1, %v3666_v34, 0  ;;  %v1383_v9 = vsel %vm1381_vm0, %v12808_v7, %v1382_v62 }
 0x302   : > { %v3127_v0 = vsel %vm12825_vm13, 0, %v3125_v17  ;;  %v1485_v57 = vxor.u32 2147483648, %v12753_v35  ;;  %v12969_v14 = vadd.f32 %v15193_v25, %v437_v27  ;;  %v1965_v11 = vadd.s32 536870912, %v12943_v22  ;;  %v10026_v54 = vpop.eup %10025 }
 0x303   : > { %v1488_v42 = vxor.u32 2147483648, %v12747_v16  ;;  %v3204_v34 = vshll.u32 %v12959_v5, 30  ;;  %v12978_v43 = vsel %vm1587_vm5, %v12756_v29, %v1588_v32  ;;  %v1874_v7 = vshll.u32 %v12659_v38, %v12902_v15 }
 0x304   : > { %15194 = vst [vmem:[#allocation11_spill] sm:$0xff] %v12969_v14  ;;  %v1875_v50 = vshrl.u32 %v1857_v61, %v1873_v6  ;;  %v3670_v19 = vand.u32 31, %v3668_v13  ;;  %v10028_v62 = vpop.eup %10027  ;;  %v1879_v27 = vshll.u32 %v1878_v2, 23  ;;  %v3131_v17 = vand.u32 3, %v3127_v0 }
 0x305   : > { %vm1484_vm12 = vcmp.eq.s32.totalorder %v12933_v60, 0  ;;  %v12983_v48 = vsub.s32 %v3201_v49, %v3204_v34  ;;  %v1387_v46 = vsel %vm1380_vm7, %v1383_v9, %v1386_v33  ;;  %vm1487_vm13 = vcmp.eq.s32.totalorder %v12933_v60, 2 }
 0x306   : > { %v1486_v10 = vsel %vm1484_vm12, %v12747_v16, %v1485_v57  ;;  %v1598_v29 = vand.u32 2139095040, %v12969_v14  ;;  %v12990_v32 = vshrl.u32 %v1965_v11, 30  ;;  %v1489_v38 = vsel %vm1487_vm13, %v1488_v42, %v12753_v35 }
 0x307   : > { %v3207_v15 = vsub.s32 0, %v12983_v48  ;;  %v15196_v61 = vand.u32 2147483647, %v12802_v26  ;;  %v12998_v49 = vor.u32 %v1875_v50, %v1874_v7  ;;  %v3134_v47 = vxor.u32 2147483648, %v10028_v62 }
 0x308   : > { %15195 = vst [vmem:[#allocation34_spill] sm:$0xff] %v12990_v32  ;;  %v3137_v2 = vxor.u32 2147483648, %v10026_v54  ;;  %v13000_v33 = vsub.s32 32, %v3670_v19  ;;  %v13002_v16 = vor.u32 4788187, %v1879_v27  ;;  %v13006_v9 = vsel %vm1378_vm8, nan, %v1387_v46 }
 0x309   : > { %v12996_v6 = vand.u32 8388607, %v15196_v61  ;;  %vm3132_vm14 = vcmp.lt.s32.totalorder %v3131_v17, 2  ;;  %v8379_v35 = vmin.u32 %v3207_v15, %v12983_v48  ;;  %vm3133_vm2 = vcmp.eq.s32.totalorder %v3131_v17, 0 }
 0x30a   : > { %vm3136_vm3 = vcmp.eq.s32.totalorder %v3131_v17, 2  ;;  %v13011_v0 = vsel %vm1483_vm11, %v1486_v10, %v1489_v38  ;;  %v1599_v57 = vshrl.u32 %v1598_v29, 23  ;;  %v1967_v11 = vshll.u32 %v12990_v32, 30 }
 0x30b   : > { %v3209_v42 = vclz %v8379_v35  ;;  %v3664_v34 = vor.u32 8388608, %v12996_v6  ;;  %v3135_v53 = vsel %vm3133_vm2, %v10026_v54, %v3134_v47  ;;  %v3138_v50 = vsel %vm3136_vm3, %v3137_v2, %v10028_v62 }
 0x30c   : > { %v3673_v27 = vshll.u32 %v15068_v12, %v3670_v19  ;;  %v3674_v46 = vshrl.u32 %v15069_v44, %v13000_v33  ;;  %vm3130_vm4 = vweird.f32 %v12437_v23  ;;  %vm3143_vm6 = vcmp.lt.s32.totalorder %v12725_v55, 0 }
 0x30d   : > { %v8380_v60 = vadd.s32 4294967294, %v3209_v42  ;;  %v3682_v10 = vshll.u32 %v15042_v52, %v3670_v19  ;;  %v3683_v29 = vshrl.u32 %v15038_v63, %v13000_v33  ;;  %v8322_v38 = vadd.s32 4294967169, %v1599_v57 }
 0x30e   : > { %v3197_v54 = vadd.s32 %v12874_v30, %v12872_v8  ;;  %v13026_v62 = vshrl.u32 %v3668_v13, 5  ;;  %v3676_v15 = vshll.u32 %v15069_v44, %v3670_v19  ;;  %v3677_v61 = vshrl.u32 %v15070_v20, %v13000_v33 }
 0x30f   : > { %vm8381_vm10 = vcmp.lt.s32.totalorder %v8380_v60, 0  ;;  %v3679_v6 = vshll.u32 %v15070_v20, %v3670_v19  ;;  %v3680_v47 = vshrl.u32 %v15042_v52, %v13000_v33  ;;  %v1605_v2 = vadd.s32 1, %v8322_v38 }
 0x310   : > { %v3139_v35 = vsel %vm3132_vm14, %v3135_v53, %v3138_v50  ;;  %v3212_v57 = vsel %vm8381_vm10, 0, %v8380_v60  ;;  %v3685_v42 = vshll.u32 %v15038_v63, %v3670_v19  ;;  %v3686_v8 = vshrl.u32 %v15120_v59, %v13000_v33 }
 0x311   : > { %v3213_v30 = vsub.s32 32, %v3212_v57  ;;  %v3217_v13 = vsub.s32 4294967266, %v3212_v57  ;;  %v13038_v7 = vor.u32 %v3674_v46, %v3673_v27  ;;  %v3684_v32 = vor.u32 %v3683_v29, %v3682_v10  ;;  %v13049_v46 = vpop.permute.xlu1 %2155 }
 0x312   : > { %v3227_v26 = vsub.s32 4, %v12959_v5  ;;  %v13041_v37 = vor.u32 %v3677_v61, %v3676_v15  ;;  %vm3691_vm15 = vcmp.lt.s32.totalorder %v13026_v62, 4  ;;  %vm1606_vm5 = vcmp.gt.s32.totalorder %v1605_v2, 0  ;;  %15197 = vst [vmem:[#allocation26_spill] sm:$0xff] %v13049_v46 }
 0x313   : > { %v3214_v17 = vshll.u32 %v12983_v48, %v3212_v57  ;;  %v3215_v53 = vshrl.u32 %v3197_v54, %v3213_v30  ;;  %v3218_v50 = vadd.s32 127, %v3217_v13  ;;  %v13045_v19 = vor.u32 %v3680_v47, %v3679_v6 }
 0x314   : > { %v3687_v60 = vor.u32 %v3686_v8, %v3685_v42  ;;  %vm3688_vm7 = vcmp.lt.s32.totalorder %v13026_v62, 1  ;;  %vm3690_vm1 = vcmp.lt.s32.totalorder %v13026_v62, 3  ;;  %v1607_v27 = vsel %vm1606_vm5, %v1605_v2, 0 }
 0x315   : > { %v15198_v10 = vand.u32 2147483647, %v12725_v55  ;;  %v3216_v38 = vor.u32 %v3215_v53, %v3214_v17  ;;  %v3219_v48 = vshll.u32 %v3218_v50, 23  ;;  %v3697_v54 = vsel %vm3691_vm15, %v3684_v32, 920167782 }
 0x316   : > { %v1609_v15 = vand.u32 31, %v1607_v27  ;;  %v3140_v61 = vsel %vm3130_vm4, nan, %v3139_v35  ;;  %v13062_v6 = vsub.s32 %v12943_v22, %v1967_v11  ;;  %v13067_v47 = vsel %vm3143_vm6, %v3227_v26, %v12959_v5  ;;  %v9747_v5 = vld [vmem:[%s14890_s2 + $0x10] sm:$0xff]  }
 0x317   : > { %vm13053_vm0 = vcmp.le.f32.partialorder %v15198_v10, 0.7853982  ;;  %v13069_v2 = vshll.u32 %v3664_v34, 8  ;;  %v3220_v57 = vor.u32 4788187, %v3219_v48  ;;  %v2189_v13 = vmul.f32 %v15151_v24, %v13049_v46  ;;  %9283 = vmatprep.subr.bf16.mxu0 %v9747_v5 }
 0x318   : > { %v15201_v42 = vand.u32 2147483647, %v12969_v14  ;;  %v1610_v30 = vsub.s32 32, %v1609_v15  ;;  %vm3689_vm8 = vcmp.lt.s32.totalorder %v13026_v62, 2  ;;  %v3696_v23 = vsel %vm3688_vm7, %v13038_v7, %v13041_v37  ;;  %9284 = vmatpush3.bf16.msra.mxu0 %v9747_v5 }
 0x319   : > { %v3698_v26 = vsel %vm3690_vm1, %v13045_v19, %v3697_v54  ;;  %v3701_v22 = vsel %vm3691_vm15, %v3687_v60, 1326507024  ;;  %v3221_v11 = vand.u32 2147483647, %v3220_v57  ;;  %v3223_v34 = vcvt.s32.f32 %v3216_v38 }
 0x31a   : > { %v1602_v8 = vand.u32 8388607, %v15201_v42  ;;  %v1613_v35 = vshrl.u32 %v15069_v44, %v1610_v30  ;;  %v1616_v17 = vshrl.u32 %v15070_v20, %v1610_v30  ;;  %v1612_v53 = vshll.u32 %v15068_v12, %v1609_v15 }
 0x31b   : > { %v1615_v50 = vshll.u32 %v15069_v44, %v1609_v15  ;;  %v1619_v10 = vshrl.u32 %v15042_v52, %v1610_v30  ;;  %v1622_v48 = vshrl.u32 %v15038_v63, %v1610_v30  ;;  %v3224_v60 = vmul.f32 %v3223_v34, %v3221_v11 }
 0x31c   : > { %v1603_v54 = vor.u32 8388608, %v1602_v8  ;;  %v1618_v42 = vshll.u32 %v15070_v20, %v1609_v15  ;;  %v13096_v57 = vadd.f32 %v15154_v51, %v2189_v13  ;;  %v1608_v38 = vshrl.u32 %v1607_v27, 5 }
 0x31d   : > { %v1614_v46 = vor.u32 %v1613_v35, %v1612_v53  ;;  %v1617_v1 = vor.u32 %v1616_v17, %v1615_v50  ;;  %v1621_v41 = vshll.u32 %v15042_v52, %v1609_v15  ;;  %v3225_v24 = vxor.u32 2147483648, %v3224_v60 }
 0x31e   : > { %v1620_v14 = vor.u32 %v1619_v10, %v1618_v42  ;;  %v1624_v28 = vshll.u32 %v15038_v63, %v1609_v15  ;;  %v1625_v40 = vshrl.u32 %v15120_v59, %v1610_v30  ;;  %v3870_v11 = vmul.f32 %v3140_v61, %v13006_v9 }
 0x31f   : > { %v3230_v8 = vsel %vm13053_vm0, 0, %v13067_v47  ;;  %v3700_v27 = vsel %vm3688_vm7, %v13041_v37, %v13045_v19  ;;  %v1623_v13 = vor.u32 %v1622_v48, %v1621_v41  ;;  %v3226_v5 = vsel %vm3143_vm6, %v3225_v24, %v3224_v60 }
 0x320   : > { %v3699_v15 = vsel %vm3689_vm8, %v3696_v23, %v3698_v26  ;;  %v3702_v34 = vsel %vm3690_vm1, %v3684_v32, %v3701_v22  ;;  %v1626_v9 = vor.u32 %v1625_v40, %v1624_v28  ;;  %vm1586_vm9 = vcmp.lt.s32.totalorder %v12701_v18, 2 }
 0x321   : > { %v3229_v61 = vsel %vm13053_vm0, %v12725_v55, %v3226_v5  ;;  %vm1627_vm11 = vcmp.lt.s32.totalorder %v1608_v38, 1  ;;  %vm1630_vm12 = vcmp.lt.s32.totalorder %v1608_v38, 4  ;;  %v1643_v47 = vshll.u32 %v1603_v54, 8 }
 0x322   : > { %vm1481_vm13 = vweird.f32 %v15162_v39  ;;  %10029 = vcosq.f32 %v3229_v61  ;;  %v1632_v24 = vsel %vm1630_vm12, %v1620_v14, 2102212464  ;;  %v1635_v41 = vsel %vm1627_vm11, %v1614_v46, %v1617_v1  ;;  %v9748_v39 = vld [vmem:[%s14890_s2 + $0x18] sm:$0xff]  }
 0x323   : > { %v3350_v23 = vand.u32 2139095040, %v13096_v57  ;;  %10031 = vsinq.f32 %v3229_v61  ;;  %v1611_v28 = vshrl.u32 %v15068_v12, %v1610_v30  ;;  %vm1629_vm14 = vcmp.lt.s32.totalorder %v1608_v38, 3  ;;  %9285 = vmatprep.subr.bf16.mxu0 %v9748_v39 }
 0x324   : > { %v1636_v40 = vsel %vm1630_vm12, %v1623_v13, 920167782  ;;  %vm1628_vm2 = vcmp.lt.s32.totalorder %v1608_v38, 2  ;;  %v1639_v29 = vsel %vm1627_vm11, %v1617_v1, %v1620_v14  ;;  %v1640_v26 = vsel %vm1630_vm12, %v1626_v9, 1326507024  ;;  %9286 = vmatpush3.bf16.msra.mxu0 %v9748_v39 }
 0x325   : > { %v1637_v32 = vsel %vm1629_vm14, %v1620_v14, %v1636_v40  ;;  %v1631_v22 = vsel %vm1627_vm11, %v1611_v28, %v1614_v46  ;;  %v1633_v35 = vsel %vm1629_vm14, %v1617_v1, %v1632_v24  ;;  %v1641_v53 = vsel %vm1629_vm14, %v1623_v13, %v1640_v26  ;;  %v13176_v40 = vpop.permute.xlu1 %404 }
 0x326   : > { %v1638_v17 = vsel %vm1628_vm2, %v1635_v41, %v1637_v32  ;;  %v3703_v50 = vsel %vm3689_vm8, %v3700_v27, %v3702_v34  ;;  %v1642_v10 = vsel %vm1628_vm2, %v1639_v29, %v1641_v53  ;;  %v3672_v60 = vshrl.u32 %v15068_v12, %v13000_v33  ;;  %15202 = vst [vmem:[#allocation10_spill] sm:$0xff] %v13176_v40  ;;  %v9749_v53 = vld [vmem:[%s14890_s2 + $0x20] sm:$0xff]  }
 0x327   : > { %v13129_v48 = vmul.u32.u64.low %v1643_v47, %v1638_v17  ;;  %v13130_v30 = vmul.u32.u64.high %v1643_v47, %v1638_v17, %v13129_v48  ;;  %v13135_v14 = vmul.u32.u64.low %v1643_v47, %v1642_v10  ;;  %v13136_v54 = vmul.u32.u64.high %v1643_v47, %v1642_v10, %v13135_v14  ;;  %9287 = vmatprep.subr.bf16.mxu0 %v9749_v53 }
 0x328   : > { %v3351_v46 = vshrl.u32 %v3350_v23, 23  ;;  %v3234_v1 = vand.u32 3, %v3230_v8  ;;  %v13139_v42 = vmul.u32.u64.low %v13069_v2, %v3699_v15  ;;  %v13140_v13 = vmul.u32.u64.high %v13069_v2, %v3699_v15, %v13139_v42  ;;  %9288 = vmatpush3.bf16.msra.mxu0 %v9749_v53 }
 0x329   : > { %v1634_v27 = vsel %vm1628_vm2, %v1631_v22, %v1633_v35  ;;  %v3693_v5 = vsel %vm3691_vm15, %v13045_v19, 2102212464  ;;  %v13148_v34 = vmul.u32.u64.low %v13069_v2, %v3703_v50  ;;  %v13149_v9 = vmul.u32.u64.high %v13069_v2, %v3703_v50, %v13148_v34 }
 0x32a   : > { %v8386_v33 = vadd.s32 4294967169, %v3351_v46  ;;  %v1593_v8 = vsel %vm1586_vm9, %v12978_v43, %v12952_v4  ;;  %v1881_v15 = vand.u32 2147483647, %v13002_v16  ;;  %v1883_v61 = vcvt.s32.f32 %v12998_v49 }
 0x32b   : > { %v1653_v38 = vadd.s32 1, %v13130_v30  ;;  %v1970_v24 = vsub.s32 0, %v13062_v6  ;;  %v1491_v19 = vsel %vm1481_vm13, nan, %v13011_v0  ;;  %v1650_v41 = vmul.u32 %v1643_v47, %v1634_v27 }
 0x32c   : > { %vm1652_vm3 = vc.u32 %v13136_v54, %v13129_v48  ;;  %v10030_v23 = vpop.eup %10029  ;;  %vm1584_vm4 = vweird.f32 %v12118_v45  ;;  %v3692_v18 = vsel %vm3688_vm7, %v3672_v60, %v13038_v7  ;;  %v3694_v4 = vsel %vm3690_vm1, %v13041_v37, %v3693_v5  ;;  %v15203_v5 = vld [vmem:[#allocation31_spill] sm:$0xff] }
 0x32d   : > { %v1654_v43 = vsel %vm1652_vm3, %v1653_v38, %v13130_v30  ;;  %v3357_v49 = vadd.s32 1, %v8386_v33  ;;  %v10032_v16 = vpop.eup %10031  ;;  %v3890_v0 = vmul.f32 %v15176_v21, %v3870_v11  ;;  %vm3235_vm6 = vcmp.lt.s32.totalorder %v3234_v1, 2 }
 0x32e   : > { %v3240_v47 = vxor.u32 2147483648, %v10030_v23  ;;  %v1655_v28 = vadd.s32 %v1654_v43, %v1650_v41  ;;  %v3237_v7 = vxor.u32 2147483648, %v10032_v16  ;;  %vm3239_vm10 = vcmp.eq.s32.totalorder %v3234_v1, 2  ;;  %v15204_v43 = vld [vmem:[#allocation32_spill] sm:$0xff] }
 0x32f   : > { %v15007_v32 = vand.u32 2147483647, %v13096_v57  ;;  %vm3358_vm15 = vcmp.gt.s32.totalorder %v3357_v49, 0  ;;  %vm3236_vm5 = vcmp.eq.s32.totalorder %v3234_v1, 0  ;;  %v3695_v29 = vsel %vm3689_vm8, %v3692_v18, %v3694_v4 }
 0x330   : > { %v3241_v37 = vsel %vm3239_vm10, %v3240_v47, %v10032_v16  ;;  %v1656_v26 = vadd.s32 536870912, %v1655_v28  ;;  %v3238_v22 = vsel %vm3236_vm5, %v10030_v23, %v3237_v7  ;;  %v3714_v11 = vadd.s32 1, %v13140_v13  ;;  %v15205_v47 = vld [vmem:[#allocation27_spill] sm:$0xff] }
 0x331   : > { %v3359_v35 = vsel %vm3358_vm15, %v3357_v49, 0  ;;  %v438_v17 = vmul.f32 %v15192_v36, %v13176_v40  ;;  %vm3233_vm7 = vweird.f32 %v12725_v55  ;;  %v3242_v50 = vsel %vm3235_vm6, %v3238_v22, %v3241_v37 }
 0x332   : > { %vm3713_vm1 = vc.u32 %v13149_v9, %v13139_v42  ;;  %v13191_v62 = vshrl.u32 %v1656_v26, 30  ;;  %v13194_v10 = vmin.u32 %v1970_v24, %v13062_v6  ;;  %v3243_v30 = vsel %vm3233_vm7, nan, %v3242_v50 }
 0x333   : > { %v3354_v60 = vand.u32 8388607, %v15007_v32  ;;  %v3361_v14 = vand.u32 31, %v3359_v35  ;;  %v3926_v46 = vadd.f32 %v12881_v3, %v3890_v0  ;;  %v3871_v27 = vmul.f32 %v3243_v30, %v1491_v19  ;;  %v9750_v3 = vld [vmem:[%s14890_s2 + $0x28] sm:$0xff]   ;;  %v9751_v0 = vld [vmem:[%s14890_s2 + $0x30] sm:$0xff]  }
 0x334   : > { %v3711_v55 = vmul.u32 %v13069_v2, %v3695_v29  ;;  %v1658_v1 = vshll.u32 %v13191_v62, 30  ;;  %v13203_v34 = vadd.f32 %v15203_v5, %v12892_v31  ;;  %v3715_v33 = vsel %vm3713_vm1, %v3714_v11, %v13140_v13  ;;  %9289 = vmatprep.subr.bf16.mxu0 %v9750_v3 }
 0x335   : > { %v3362_v38 = vsub.s32 32, %v3361_v14  ;;  %v13207_v24 = vadd.f32 %v15193_v25, %v438_v17  ;;  %v13214_v2 = vsel %vm1584_vm4, nan, %v1593_v8  ;;  %v13216_v19 = vmul.f32 %v1883_v61, %v1881_v15  ;;  %9290 = vmatpush3.bf16.msra.mxu0 %v9750_v3 }
 0x336   : > { %v3891_v41 = vmul.f32 %v15176_v21, %v3871_v27  ;;  %v13219_v31 = vsub.s32 %v1655_v28, %v1658_v1  ;;  %v3947_v13 = vmul.f32 %v15186_v56, %v12694_v58  ;;  %v3355_v23 = vor.u32 8388608, %v3354_v60  ;;  %9291 = vmatprep.subr.bf16.mxu0 %v9751_v0 }
 0x337   : > { %v3365_v18 = vshrl.u32 %v15069_v44, %v3362_v38  ;;  %v3368_v4 = vshrl.u32 %v15070_v20, %v3362_v38  ;;  %v13226_v49 = vadd.f32 %v15204_v43, %v3926_v46  ;;  %v1972_v45 = vclz %v13194_v10 }
 0x338   : > { %v13229_v8 = vadd.s32 %v3715_v33, %v3711_v55  ;;  %v1661_v15 = vsub.s32 0, %v13219_v31  ;;  %v3364_v61 = vshll.u32 %v15068_v12, %v3361_v14  ;;  %v3367_v58 = vshll.u32 %v15069_v44, %v3361_v14 }
 0x339   : > { %v3371_v39 = vshrl.u32 %v15042_v52, %v3362_v38  ;;  %v1701_v16 = vand.u32 2139095040, %v13207_v24  ;;  %v3927_v28 = vadd.f32 %v15205_v47, %v3891_v41  ;;  %v3360_v37 = vshrl.u32 %v3359_v35, 5  ;;  %9292 = vmatpush3.bf16.msra.mxu0 %v9751_v0  ;;  %v15206_v47 = vld [vmem:[#allocation15_spill] sm:$0xff] }
 0x33a   : > { %v8323_v7 = vmin.u32 %v1661_v15, %v13219_v31  ;;  %v3370_v29 = vshll.u32 %v15070_v20, %v3361_v14  ;;  %v1651_v26 = vadd.s32 %v13129_v48, %v13136_v54  ;;  %v3366_v22 = vor.u32 %v3365_v18, %v3364_v61  ;;  %v9752_v48 = vld [vmem:[%s14890_s2 + $0x38] sm:$0xff]  }
 0x33b   : > { %v3369_v11 = vor.u32 %v3368_v4, %v3367_v58  ;;  %v13244_v17 = vshll.u32 %v3355_v23, 8  ;;  %v3373_v30 = vshll.u32 %v15042_v52, %v3361_v14  ;;  %v3374_v60 = vshrl.u32 %v15038_v63, %v3362_v38  ;;  %9293 = vmatprep.subr.bf16.mxu0 %v9752_v48 }
 0x33c   : > { %v1663_v53 = vclz %v8323_v7  ;;  %v3372_v50 = vor.u32 %v3371_v39, %v3370_v29  ;;  %v3363_v46 = vshrl.u32 %v15068_v12, %v3362_v38  ;;  %v3376_v35 = vshll.u32 %v15038_v63, %v3361_v14 }
 0x33d   : > { %v3377_v27 = vshrl.u32 %v15120_v59, %v3362_v38  ;;  %v1702_v55 = vshrl.u32 %v1701_v16, 23  ;;  %v3963_v54 = vadd.f32 %v3947_v13, %v3927_v28  ;;  %v3375_v5 = vor.u32 %v3374_v60, %v3373_v30  ;;  %9294 = vmatpush3.bf16.msra.mxu0 %v9752_v48  ;;  %v15208_v48 = vld [vmem:[#allocation33_spill] sm:$0xff] }
 0x33e   : > { %v8324_v1 = vadd.s32 4294967294, %v1663_v53  ;;  %vm3379_vm0 = vcmp.lt.s32.totalorder %v3360_v37, 1  ;;  %vm3380_vm8 = vcmp.lt.s32.totalorder %v3360_v37, 2  ;;  %vm3382_vm9 = vcmp.lt.s32.totalorder %v3360_v37, 4 }
 0x33f   : > { %v3378_v33 = vor.u32 %v3377_v27, %v3376_v35  ;;  %v3387_v3 = vsel %vm3379_vm0, %v3366_v22, %v3369_v11  ;;  %vm3381_vm12 = vcmp.lt.s32.totalorder %v3360_v37, 3  ;;  %v3384_v14 = vsel %vm3382_vm9, %v3372_v50, 2102212464 }
 0x340   : > { %vm8325_vm11 = vcmp.lt.s32.totalorder %v8324_v1, 0  ;;  %v3388_v41 = vsel %vm3382_vm9, %v3375_v5, 920167782  ;;  %v3391_v18 = vsel %vm3379_vm0, %v3369_v11, %v3372_v50  ;;  %v3383_v15 = vsel %vm3379_vm0, %v3363_v46, %v3366_v22  ;;  %9296 = vmatmul.mubr.bf16.vlgmr.msra.gmra.mrb[0].mxu0 %v15206_v47 }
 0x341   : > { %v1666_v38 = vsel %vm8325_vm11, 0, %v8324_v1  ;;  %v3389_v23 = vsel %vm3381_vm12, %v3372_v50, %v3388_v41  ;;  %v3392_v4 = vsel %vm3382_vm9, %v3378_v33, 1326507024  ;;  %v3385_v58 = vsel %vm3381_vm12, %v3369_v11, %v3384_v14  ;;  %v15207_v50 = vld [vmem:[#allocation28_spill] sm:$0xff] }
 0x342   : > { %v1667_v13 = vsub.s32 32, %v1666_v38  ;;  %v1671_v43 = vsub.s32 4294967266, %v1666_v38  ;;  %v3390_v61 = vsel %vm3380_vm8, %v3387_v3, %v3389_v23  ;;  %v3393_v39 = vsel %vm3381_vm12, %v3375_v5, %v3392_v4  ;;  %9299 = vmatprep.mubr.bf16.mxu0 %v15207_v50 }
 0x343   : > { %v13259_v16 = vmul.u32.u64.low %v13244_v17, %v3390_v61  ;;  %v13260_v0 = vmul.u32.u64.high %v13244_v17, %v3390_v61, %v13259_v16  ;;  %v3394_v29 = vsel %vm3380_vm8, %v3391_v18, %v3393_v39  ;;  %v8326_v53 = vadd.s32 4294967169, %v1702_v55  ;;  %v15210_v55 = vld [vmem:[#allocation22_spill] sm:$0xff]  ;;  %v15217_v61 = vld [vmem:[#allocation16_spill] sm:$0xff] }
 0x344   : > { %v1669_v28 = vshrl.u32 %v1651_v26, %v1667_v13  ;;  %v1672_v7 = vadd.s32 127, %v1671_v43  ;;  %v3717_v22 = vadd.s32 536870912, %v13229_v8  ;;  %v15006_v60 = vand.u32 2147483647, %v13207_v24  ;;  %v15215_v13 = vld [vmem:[#allocation12_spill] sm:$0xff] }
 0x345   : > { %v13268_v30 = vmul.u32.u64.low %v13244_v17, %v3394_v29  ;;  %v13269_v11 = vmul.u32.u64.high %v13244_v17, %v3394_v29, %v13268_v30  ;;  %v1668_v46 = vshll.u32 %v13219_v31, %v1666_v38  ;;  %v3386_v27 = vsel %vm3380_vm8, %v3383_v15, %v3385_v58  ;;  %v15216_v15 = vld [vmem:[#allocation35_spill] sm:$0xff] }
 0x346   : > { %v1673_v35 = vshll.u32 %v1672_v7, 23  ;;  %v1708_v26 = vadd.s32 1, %v8326_v53  ;;  %v13276_v1 = vpack.c.bf16 %v13203_v34, %v15208_v48  ;;  %v3872_v5 = vmul.f32 %v15210_v55, %v13214_v2 }
 0x347   : > { %v8336_v33 = vadd.s32 4294967294, %v1972_v45  ;;  %v3405_v3 = vadd.s32 1, %v13260_v0  ;;  %v13284_v14 = vpack.c.bf16 %v3963_v54, %v13226_v49  ;;  %v1670_v31 = vor.u32 %v1669_v28, %v1668_v46  ;;  %v15213_v54 = vld [vmem:[#allocation19_spill] sm:$0xff] }
 0x348   : > { %15209 = vst [vmem:[#allocation24_spill] sm:$0xff] %v13276_v1  ;;  %v1674_v41 = vor.u32 4788187, %v1673_v35  ;;  %vm1709_vm13 = vcmp.gt.s32.totalorder %v1708_v26, 0  ;;  %v1885_v37 = vxor.u32 2147483648, %v13216_v19  ;;  %v3402_v38 = vmul.u32 %v13244_v17, %v3386_v27  ;;  %9300 = vmatmul.mubr.bf16.gmra.mrb[4].mxu0 %v13276_v1  ;;  %v15214_v17 = vld [vmem:[#allocation20_spill] sm:$0xff] }
 0x349   : > { %15211 = vst [vmem:[#allocation30_spill] sm:$0xff] %v13284_v14  ;;  %vm3404_vm14 = vc.u32 %v13269_v11, %v13259_v16  ;;  %v1710_v34 = vsel %vm1709_vm13, %v1708_v26, 0  ;;  %v13290_v2 = vshrl.u32 %v3717_v22, 30  ;;  %v1705_v49 = vand.u32 8388607, %v15006_v60  ;;  %9303 = vmatprep.mubr.bf16.mxu0 %v13284_v14 }
 0x34a   : > { %v1675_v10 = vand.u32 2147483647, %v1674_v41  ;;  %v3406_v45 = vsel %vm3404_vm14, %v3405_v3, %v13260_v0  ;;  %v13297_v23 = vmul.f32 %v15186_v56, %v15213_v54  ;;  %vm8337_vm2 = vcmp.lt.s32.totalorder %v8336_v33, 0  ;;  %v15218_v3 = vld [vmem:[#allocation11_spill] sm:$0xff] }
 0x34b   : > { %15212 = vst [vmem:[#allocation7_spill] sm:$0xff] %v13290_v2  ;;  %v3407_v18 = vadd.s32 %v3406_v45, %v3402_v38  ;;  %v1712_v4 = vand.u32 31, %v1710_v34  ;;  %v13302_v43 = vmul.f32 %v15215_v13, %v15214_v17  ;;  %vm1803_vm3 = vcmp.lt.s32.totalorder %v15216_v15, 0  ;;  %v13328_v38 = vpop.permute.xlu1 %2159 }
 0x34c   : > { %v1677_v39 = vcvt.s32.f32 %v1670_v31  ;;  %v3892_v0 = vmul.f32 %v15176_v21, %v3872_v5  ;;  %v13311_v28 = vsel %vm1803_vm3, %v1885_v37, %v13216_v19  ;;  %v13313_v53 = vsel %vm8337_vm2, 0, %v8336_v33  ;;  %15219 = vst [vmem:[#allocation9_spill] sm:$0xff] %v13328_v38 }
 0x34d   : > { %v3408_v7 = vadd.s32 536870912, %v3407_v18  ;;  %v1713_v29 = vsub.s32 32, %v1712_v4  ;;  %v3719_v22 = vshll.u32 %v13290_v2, 30  ;;  %v1706_v46 = vor.u32 8388608, %v1705_v49  ;;  %v9753_v2 = vld [vmem:[#allocation3 + $0x80] sm:$0xff]  }
 0x34e   : > { %v1678_v30 = vmul.f32 %v1677_v39, %v1675_v10  ;;  %v1715_v27 = vshll.u32 %v15068_v12, %v1712_v4  ;;  %v1718_v48 = vshll.u32 %v15069_v44, %v1712_v4  ;;  %v1721_v19 = vshll.u32 %v15070_v20, %v1712_v4  ;;  %9311 = vmatprep.subr.bf16.mxu0 %v9753_v2 }
 0x34f   : > { %v13316_v35 = vshrl.u32 %v3408_v7, 30  ;;  %v1716_v26 = vshrl.u32 %v15069_v44, %v1713_v29  ;;  %v1719_v55 = vshrl.u32 %v15070_v20, %v1713_v29  ;;  %v1722_v5 = vshrl.u32 %v15042_v52, %v1713_v29  ;;  %9312 = vmatpush3.bf16.msra.mxu0 %v9753_v2 }
 0x350   : > { %v1725_v33 = vshrl.u32 %v15038_v63, %v1713_v29  ;;  %vm1597_vm4 = vcmp.lt.s32.totalorder %v15218_v3, 0  ;;  %v1711_v41 = vshrl.u32 %v1710_v34, 5  ;;  %v1724_v37 = vshll.u32 %v15042_v52, %v1712_v4 }
 0x351   : > { %v3410_v31 = vshll.u32 %v13316_v35, 30  ;;  %v15220_v10 = vand.u32 2147483647, %v15218_v3  ;;  %v1717_v49 = vor.u32 %v1716_v26, %v1715_v27  ;;  %v1720_v54 = vor.u32 %v1719_v55, %v1718_v48 }
 0x352   : > { %v1723_v17 = vor.u32 %v1722_v5, %v1721_v19  ;;  %v13337_v39 = vsub.s32 %v13229_v8, %v3719_v22  ;;  %v1679_v7 = vxor.u32 2147483648, %v1678_v30  ;;  %v1726_v34 = vor.u32 %v1725_v33, %v1724_v37 }
 0x353   : > { %vm13332_vm6 = vcmp.le.f32.partialorder %v15220_v10, 0.7853982  ;;  %v13339_v60 = vsub.s32 %v3407_v18, %v3410_v31  ;;  %v1727_v32 = vshll.u32 %v15038_v63, %v1712_v4  ;;  %v1728_v58 = vshrl.u32 %v15120_v59, %v1713_v29  ;;  %v15223_v10 = vld [vmem:[#allocation6_spill] sm:$0xff] }
 0x354   : > { %v1746_v14 = vshll.u32 %v1706_v46, 8  ;;  %v2190_v1 = vmul.f32 %v15223_v10, %v13328_v38  ;;  %v1714_v27 = vshrl.u32 %v15068_v12, %v1713_v29  ;;  %vm1730_vm10 = vcmp.lt.s32.totalorder %v1711_v41, 1 }
 0x355   : > { %v3413_v50 = vsub.s32 0, %v13339_v60  ;;  %vm1733_vm15 = vcmp.lt.s32.totalorder %v1711_v41, 4  ;;  %v1729_v8 = vor.u32 %v1728_v58, %v1727_v32  ;;  %v1738_v26 = vsel %vm1730_vm10, %v1717_v49, %v1720_v54 }
 0x356   : > { %v1735_v22 = vsel %vm1733_vm15, %v1723_v17, 2102212464  ;;  %v1739_v18 = vsel %vm1733_vm15, %v1726_v34, 920167782  ;;  %v1680_v48 = vsel %vm1597_vm4, %v1679_v7, %v1678_v30  ;;  %vm1731_vm5 = vcmp.lt.s32.totalorder %v1711_v41, 2 }
 0x357   : > { %v8387_v4 = vmin.u32 %v3413_v50, %v13339_v60  ;;  %vm1732_vm7 = vcmp.lt.s32.totalorder %v1711_v41, 3  ;;  %v1734_v46 = vsel %vm1730_vm10, %v1714_v27, %v1717_v49  ;;  %v1742_v19 = vsel %vm1730_vm10, %v1720_v54, %v1723_v17 }
 0x358   : > { %v1740_v55 = vsel %vm1732_vm7, %v1723_v17, %v1739_v18  ;;  %v1743_v5 = vsel %vm1733_vm15, %v1729_v8, 1326507024  ;;  %v1736_v31 = vsel %vm1732_vm7, %v1720_v54, %v1735_v22  ;;  %v13357_v30 = vadd.f32 %v15154_v51, %v2190_v1 }
 0x359   : > { %v3415_v33 = vclz %v8387_v4  ;;  %v1741_v29 = vsel %vm1731_vm5, %v1738_v26, %v1740_v55  ;;  %v1744_v37 = vsel %vm1732_vm7, %v1726_v34, %v1743_v5  ;;  %v1683_v50 = vsel %vm13332_vm6, %v15218_v3, %v1680_v48 }
 0x35a   : > { %v1745_v32 = vsel %vm1731_vm5, %v1742_v19, %v1744_v37  ;;  %v13352_v58 = vmul.u32.u64.low %v1746_v14, %v1741_v29  ;;  %v13353_v47 = vmul.u32.u64.high %v1746_v14, %v1741_v29, %v13352_v58  ;;  %v3928_v54 = vadd.f32 %v13302_v43, %v3892_v0 }
 0x35b   : > { %v8388_v49 = vadd.s32 4294967294, %v3415_v33  ;;  %v13362_v17 = vmul.u32.u64.low %v1746_v14, %v1745_v32  ;;  %v13363_v7 = vmul.u32.u64.high %v1746_v14, %v1745_v32, %v13362_v17  ;;  %v15224_v34 = vand.u32 2147483647, %v15216_v15  ;;  %v15228_v32 = vld [vmem:[#allocation18_spill] sm:$0xff] }
 0x35c   : > { %v15227_v1 = vsub.s32 4, %v15217_v61  ;;  %v3453_v22 = vand.u32 2139095040, %v13357_v30  ;;  %v1980_v0 = vsub.s32 4294967266, %v13313_v53  ;;  %v1737_v26 = vsel %vm1731_vm5, %v1734_v46, %v1736_v31 }
 0x35d   : > { %vm13368_vm1 = vcmp.le.f32.partialorder %v15224_v34, 0.7853982  ;;  %vm8389_vm0 = vcmp.lt.s32.totalorder %v8388_v49, 0  ;;  %v3722_v18 = vsub.s32 0, %v13337_v39  ;;  %10033 = vcosq.f32 %v1683_v50 }
 0x35e   : > { %v13377_v8 = vsel %vm1803_vm3, %v15227_v1, %v15217_v61  ;;  %v13384_v43 = vsel %vm13368_vm1, %v15216_v15, %v13311_v28  ;;  %v3418_v48 = vsel %vm8389_vm0, 0, %v8388_v49  ;;  %v1756_v61 = vadd.s32 1, %v13353_v47  ;;  %v15229_v49 = vld [vmem:[#allocation8_spill] sm:$0xff] }
 0x35f   : > { %v1681_v4 = vsub.s32 4, %v13191_v62  ;;  %v3403_v55 = vadd.s32 %v13259_v16, %v13269_v11  ;;  %v3419_v19 = vsub.s32 32, %v3418_v48  ;;  %v3423_v5 = vsub.s32 4294967266, %v3418_v48 }
 0x360   : > { %v3433_v28 = vsub.s32 4, %v13316_v35  ;;  %v1753_v33 = vmul.u32 %v1746_v14, %v1737_v26  ;;  %vm1755_vm8 = vc.u32 %v13363_v7, %v13352_v58  ;;  %v3454_v41 = vshrl.u32 %v3453_v22, 23 }
 0x361   : > { %v3420_v46 = vshll.u32 %v13339_v60, %v3418_v48  ;;  %v3421_v31 = vshrl.u32 %v3403_v55, %v3419_v19  ;;  %v3424_v29 = vadd.s32 127, %v3423_v5  ;;  %v1757_v37 = vsel %vm1755_vm8, %v1756_v61, %v13353_v47 }
 0x362   : > { %v1960_v17 = vadd.s32 %v15229_v49, %v15228_v32  ;;  %v8399_v16 = vmin.u32 %v3722_v18, %v13337_v39  ;;  %v1758_v11 = vadd.s32 %v1757_v37, %v1753_v33  ;;  %v8390_v34 = vadd.s32 4294967169, %v3454_v41 }
 0x363   : > { %v1682_v14 = vsel %vm1597_vm4, %v1681_v4, %v13191_v62  ;;  %vm3349_vm9 = vcmp.lt.s32.totalorder %v13096_v57, 0  ;;  %v3422_v1 = vor.u32 %v3421_v31, %v3420_v46  ;;  %v3425_v22 = vshll.u32 %v3424_v29, 23 }
 0x364   : > { %10035 = vsinq.f32 %v1683_v50  ;;  %v1759_v60 = vadd.s32 536870912, %v1758_v11  ;;  %v15012_v26 = vand.u32 2147483647, %v13357_v30  ;;  %v3460_v47 = vadd.s32 1, %v8390_v34 }
 0x365   : > { %v1976_v48 = vsub.s32 32, %v13313_v53  ;;  %v13407_v61 = vadd.s32 127, %v1980_v0  ;;  %v3426_v18 = vor.u32 4788187, %v3425_v22  ;;  %v3434_v55 = vsel %vm3349_vm9, %v3433_v28, %v13316_v35 }
 0x366   : > { %v3724_v19 = vclz %v8399_v16  ;;  %v15230_v62 = vand.u32 2147483647, %v13096_v57  ;;  %v13418_v50 = vshrl.u32 %v1759_v60, 30  ;;  %vm3461_vm12 = vcmp.gt.s32.totalorder %v3460_v47, 0 }
 0x367   : > { %v1684_v5 = vsel %vm13332_vm6, 0, %v1682_v14  ;;  %v3427_v0 = vand.u32 2147483647, %v3426_v18  ;;  %v3429_v33 = vcvt.s32.f32 %v3422_v1  ;;  %v3462_v41 = vsel %vm3461_vm12, %v3460_v47, 0  ;;  %v13422_v46 = vpop.eup %10033 }
 0x368   : > { %vm13414_vm11 = vcmp.le.f32.partialorder %v15230_v62, 0.7853982  ;;  %v1761_v28 = vshll.u32 %v13418_v50, 30  ;;  %v3457_v31 = vand.u32 8388607, %v15012_v26  ;;  %v3464_v29 = vand.u32 31, %v3462_v41 }
 0x369   : > { %v3436_v35 = vsel %vm13414_vm11, 0, %v3434_v55  ;;  %v13430_v37 = vadd.f32 %v13297_v23, %v3928_v54  ;;  %10037 = vcosq.f32 %v13384_v43  ;;  %v13433_v45 = vshrl.u32 %v1960_v17, %v1976_v48 }
 0x36a   : > { %v3430_v32 = vmul.f32 %v3429_v33, %v3427_v0  ;;  %v13436_v16 = vadd.s32 4294967294, %v3724_v19  ;;  %v13438_v34 = vsub.s32 %v1758_v11, %v1761_v28  ;;  %v3465_v14 = vsub.s32 32, %v3464_v29 }
 0x36b   : > { %v13440_v1 = vand.u32 3, %v1684_v5  ;;  %v13443_v47 = vand.u32 3, %v3436_v35  ;;  %v3458_v54 = vor.u32 8388608, %v3457_v31  ;;  %v3467_v17 = vshll.u32 %v15068_v12, %v3464_v29 }
 0x36c   : > { %v3431_v60 = vxor.u32 2147483648, %v3430_v32  ;;  %v1764_v23 = vsub.s32 0, %v13438_v34  ;;  %v3468_v48 = vshrl.u32 %v15069_v44, %v3465_v14  ;;  %v3470_v11 = vshll.u32 %v15069_v44, %v3464_v29 }
 0x36d   : > { %v3471_v55 = vshrl.u32 %v15070_v20, %v3465_v14  ;;  %v3474_v19 = vshrl.u32 %v15042_v52, %v3465_v14  ;;  %v3463_v33 = vshrl.u32 %v3462_v41, 5  ;;  %v3473_v35 = vshll.u32 %v15070_v20, %v3464_v29 }
 0x36e   : > { %v3432_v18 = vsel %vm3349_vm9, %v3431_v60, %v3430_v32  ;;  %v10036_v62 = vpop.eup %10035  ;;  %v8327_v0 = vmin.u32 %v1764_v23, %v13438_v34  ;;  %vm8401_vm13 = vcmp.lt.s32.totalorder %v13436_v16, 0  ;;  %vm1690_vm14 = vcmp.eq.s32.totalorder %v13440_v1, 0  ;;  %v13463_v23 = vpop.permute.xlu1 %2163 }
 0x36f   : > { %v3435_v5 = vsel %vm13414_vm11, %v13096_v57, %v3432_v18  ;;  %vm1693_vm2 = vcmp.eq.s32.totalorder %v13440_v1, 2  ;;  %v3469_v28 = vor.u32 %v3468_v48, %v3467_v17  ;;  %v3472_v31 = vor.u32 %v3471_v55, %v3470_v11  ;;  %15233 = vst [vmem:[#allocation31_spill] sm:$0xff] %v13463_v23 }
 0x370   : > { %10039 = vcosq.f32 %v3435_v5  ;;  %v3476_v32 = vshll.u32 %v15042_v52, %v3464_v29  ;;  %v1766_v60 = vclz %v8327_v0  ;;  %v3475_v4 = vor.u32 %v3474_v19, %v3473_v35 }
 0x371   : > { %10041 = vsinq.f32 %v3435_v5  ;;  %v3477_v18 = vshrl.u32 %v15038_v63, %v3465_v14  ;;  %v1691_v41 = vxor.u32 2147483648, %v10036_v62  ;;  %v3479_v26 = vshll.u32 %v15038_v63, %v3464_v29 }
 0x372   : > { %v3480_v49 = vshrl.u32 %v15120_v59, %v3465_v14  ;;  %v13467_v22 = vshll.u32 %v3458_v54, 8  ;;  %v8328_v38 = vadd.s32 4294967294, %v1766_v60  ;;  %vm3482_vm3 = vcmp.lt.s32.totalorder %v3463_v33, 1  ;;  %v9754_v60 = vld [vmem:[#allocation3 + $0x88] sm:$0xff]  }
 0x373   : > { %v3478_v17 = vor.u32 %v3477_v18, %v3476_v32  ;;  %vm3485_vm4 = vcmp.lt.s32.totalorder %v3463_v33, 4  ;;  %v13469_v48 = vpop.eup %10037  ;;  %v3490_v19 = vsel %vm3482_vm3, %v3469_v28, %v3472_v31  ;;  %v2191_v5 = vmul.f32 %v15223_v10, %v13463_v23  ;;  %9313 = vmatprep.subr.bf16.mxu0 %v9754_v60 }
 0x374   : > { %v3481_v11 = vor.u32 %v3480_v49, %v3479_v26  ;;  %v3487_v55 = vsel %vm3485_vm4, %v3475_v4, 2102212464  ;;  %vm8329_vm6 = vcmp.lt.s32.totalorder %v8328_v38, 0  ;;  %v3466_v29 = vshrl.u32 %v15068_v12, %v3465_v14  ;;  %9314 = vmatpush3.bf16.msra.mxu0 %v9754_v60  ;;  %v9756_v60 = vld [vmem:[#allocation3 + $0x98] sm:$0xff]  }
 0x375   : > { %vm3484_vm10 = vcmp.lt.s32.totalorder %v3463_v33, 3  ;;  %v3491_v54 = vsel %vm3485_vm4, %v3478_v17, 920167782  ;;  %vm3483_vm15 = vcmp.lt.s32.totalorder %v3463_v33, 2  ;;  %v3494_v35 = vsel %vm3482_vm3, %v3472_v31, %v3475_v4 }
 0x376   : > { %v3492_v0 = vsel %vm3484_vm10, %v3475_v4, %v3491_v54  ;;  %v3495_v32 = vsel %vm3485_vm4, %v3481_v11, 1326507024  ;;  %v13476_v26 = vsel %vm8329_vm6, 0, %v8328_v38  ;;  %v3486_v49 = vsel %vm3482_vm3, %v3466_v29, %v3469_v28 }
 0x377   : > { %v3488_v18 = vsel %vm3484_vm10, %v3472_v31, %v3487_v55  ;;  %v3493_v23 = vsel %vm3483_vm15, %v3490_v19, %v3492_v0  ;;  %v3496_v40 = vsel %vm3484_vm10, %v3478_v17, %v3495_v32  ;;  %v13486_v2 = vadd.f32 %v15154_v51, %v2191_v5  ;;  %v9755_v5 = vld [vmem:[#allocation3 + $0x90] sm:$0xff]  }
 0x378   : > { %v13481_v15 = vmul.u32.u64.low %v13467_v22, %v3493_v23  ;;  %v13482_v14 = vmul.u32.u64.high %v13467_v22, %v3493_v23, %v13481_v15  ;;  %vm1687_vm5 = vweird.f32 %v15218_v3  ;;  %v1692_v38 = vsel %vm1690_vm14, %v13422_v46, %v1691_v41  ;;  %9315 = vmatprep.subr.bf16.mxu0 %v9755_v5 }
 0x379   : > { %v15234_v28 = vxor.u32 2147483648, %v13422_v46  ;;  %v3497_v4 = vsel %vm3483_vm15, %v3494_v35, %v3496_v40  ;;  %v1774_v17 = vsub.s32 4294967266, %v13476_v26  ;;  %v3489_v11 = vsel %vm3483_vm15, %v3486_v49, %v3488_v18  ;;  %9316 = vmatpush3.bf16.msra.mxu0 %v9755_v5 }
 0x37a   : > { %v10040_v23 = vpop.eup %10039  ;;  %v13500_v55 = vmul.u32.u64.low %v13467_v22, %v3497_v4  ;;  %v13501_v19 = vmul.u32.u64.high %v13467_v22, %v3497_v4, %v13500_v55  ;;  %v13506_v46 = vsel %vm8401_vm13, 0, %v13436_v16  ;;  %vm1689_vm7 = vcmp.lt.s32.totalorder %v13440_v1, 2  ;;  %9317 = vmatprep.subr.bf16.mxu0 %v9756_v60 }
 0x37b   : > { %v1695_v31 = vsel %vm1693_vm2, %v15234_v28, %v10036_v62  ;;  %v10042_v29 = vpop.eup %10041  ;;  %vm3445_vm0 = vcmp.eq.s32.totalorder %v13443_v47, 2  ;;  %v3446_v40 = vxor.u32 2147483648, %v10040_v23  ;;  %v3508_v33 = vadd.s32 1, %v13482_v14  ;;  %v9757_v55 = vld [vmem:[#allocation3 + $0xa0] sm:$0xff]  }
 0x37c   : > { %v1696_v62 = vsel %vm1689_vm7, %v1692_v38, %v1695_v31  ;;  %v3443_v41 = vxor.u32 2147483648, %v10042_v29  ;;  %v3556_v54 = vand.u32 2139095040, %v13486_v2  ;;  %vm3441_vm8 = vcmp.lt.s32.totalorder %v13443_v47, 2 }
 0x37d   : > { %vm3442_vm9 = vcmp.eq.s32.totalorder %v13443_v47, 0  ;;  %v3447_v0 = vsel %vm3445_vm0, %v3446_v40, %v10042_v29  ;;  %v3505_v16 = vmul.u32 %v13467_v22, %v3489_v11  ;;  %v1775_v1 = vadd.s32 127, %v1774_v17  ;;  %9318 = vmatpush3.bf16.msra.mxu0 %v9756_v60  ;;  %v15236_v40 = vld [vmem:[#allocation23_spill] sm:$0xff] }
 0x37e   : > { %v3444_v35 = vsel %vm3442_vm9, %v10040_v23, %v3443_v41  ;;  %vm3507_vm11 = vc.u32 %v13501_v19, %v13481_v15  ;;  %v3557_v32 = vshrl.u32 %v3556_v54, 23  ;;  %v1697_v49 = vsel %vm1687_vm5, nan, %v1696_v62  ;;  %v15237_v62 = vld [vmem:[#allocation26_spill] sm:$0xff]  ;;  %9319 = vmatprep.subr.bf16.mxu0 %v9757_v55 }
 0x37f   : > { %vm3439_vm12 = vweird.f32 %v13096_v57  ;;  %v3448_v18 = vsel %vm3441_vm8, %v3444_v35, %v3447_v0  ;;  %v3509_v38 = vsel %vm3507_vm11, %v3508_v33, %v13482_v14  ;;  %v1770_v28 = vsub.s32 32, %v13476_v26 }
 0x380   : > { %v3449_v47 = vsel %vm3439_vm12, nan, %v3448_v18  ;;  %v3510_v22 = vadd.s32 %v3509_v38, %v3505_v16  ;;  %v8394_v31 = vadd.s32 4294967169, %v3557_v32  ;;  %10043 = vsinq.f32 %v13384_v43  ;;  %v9758_v32 = vld [vmem:[#allocation3 + $0xa8] sm:$0xff]  }
 0x381   : > { %v1977_v4 = vshll.u32 %v13062_v6, %v13313_v53  ;;  %v3732_v23 = vsub.s32 4294967266, %v13506_v46  ;;  %v3873_v3 = vmul.f32 %v3449_v47, %v1697_v49  ;;  %v1754_v57 = vadd.s32 %v13352_v58, %v13363_v7  ;;  %9320 = vmatpush3.bf16.msra.mxu0 %v9757_v55  ;;  %v13552_v47 = vpop.permute.xlu1 %419 }
 0x382   : > { %v1776_v17 = vshll.u32 %v1775_v1, 23  ;;  %v3511_v14 = vadd.s32 536870912, %v3510_v22  ;;  %v3563_v11 = vadd.s32 1, %v8394_v31  ;;  %v15235_v29 = vshll.u32 %v13407_v61, 23  ;;  %9321 = vmatprep.subr.bf16.mxu0 %v9758_v32 }
 0x383   : > { %v13529_v5 = vor.u32 %v13433_v45, %v1977_v4  ;;  %v3913_v6 = vmul.f32 %v15215_v13, %v15236_v40  ;;  %v3893_v53 = vmul.f32 %v15176_v21, %v3873_v3  ;;  %v3949_v41 = vmul.f32 %v15186_v56, %v15237_v62 }
 0x384   : > { %v13533_v43 = vor.u32 4788187, %v15235_v29  ;;  %v1772_v58 = vshrl.u32 %v1754_v57, %v1770_v28  ;;  %v13540_v7 = vshrl.u32 %v3511_v14, 30  ;;  %vm3564_vm13 = vcmp.gt.s32.totalorder %v3563_v11, 0 }
 0x385   : > { %v3728_v45 = vsub.s32 32, %v13506_v46  ;;  %v13543_v33 = vadd.s32 127, %v3732_v23  ;;  %v3929_v61 = vadd.f32 %v3913_v6, %v3893_v53  ;;  %v3565_v54 = vsel %vm3564_vm13, %v3563_v11, 0  ;;  %9322 = vmatpush3.bf16.msra.mxu0 %v9758_v32 }
 0x386   : > { %v1771_v0 = vshll.u32 %v13438_v34, %v13476_v26  ;;  %v1777_v16 = vor.u32 4788187, %v1776_v17  ;;  %v3513_v35 = vshll.u32 %v13540_v7, 30  ;;  %v3553_v1 = vand.u32 2147483647, %v13486_v2 }
 0x387   : > { %v1986_v60 = vcvt.s32.f32 %v13529_v5  ;;  %v3712_v49 = vadd.s32 %v13139_v42, %v13149_v9  ;;  %v3965_v18 = vadd.f32 %v3949_v41, %v3929_v61  ;;  %v3567_v38 = vand.u32 31, %v3565_v54 }
 0x388   : > { %v1984_v28 = vand.u32 2147483647, %v13533_v43  ;;  %v3729_v34 = vshll.u32 %v13337_v39, %v13506_v46  ;;  %v1773_v26 = vor.u32 %v1772_v58, %v1771_v0  ;;  %v13557_v31 = vsub.s32 %v3510_v22, %v3513_v35  ;;  %v9759_v22 = vld [vmem:[#allocation3 + $0xb0] sm:$0xff]   ;;  %v9760_v35 = vld [vmem:[#allocation3 + $0xb8] sm:$0xff]  }
 0x389   : > { %v13559_v4 = vshrl.u32 %v3712_v49, %v3728_v45  ;;  %v3734_v23 = vshll.u32 %v13543_v33, 23  ;;  %v13563_v3 = vpack.c.bf16 %v3965_v18, %v13430_v37  ;;  %v3568_v42 = vsub.s32 32, %v3567_v38  ;;  %9323 = vmatprep.subr.bf16.mxu0 %v9759_v22 }
 0x38a   : > { %v1778_v9 = vand.u32 2147483647, %v1777_v16  ;;  %v3516_v57 = vsub.s32 0, %v13557_v31  ;;  %v3560_v17 = vand.u32 8388607, %v3553_v1  ;;  %v3570_v14 = vshll.u32 %v15068_v12, %v3567_v38  ;;  %v13569_v11 = vpop.eup %10043  ;;  %v13583_v16 = vpop.permute.xlu1 %2171  ;;  %9324 = vmatpush3.bf16.msra.mxu0 %v9759_v22 }
 0x38b   : > { %v3571_v55 = vshrl.u32 %v15069_v44, %v3568_v42  ;;  %v3573_v29 = vshll.u32 %v15069_v44, %v3567_v38  ;;  %v3574_v37 = vshrl.u32 %v15070_v20, %v3568_v42  ;;  %v3577_v40 = vshrl.u32 %v15042_v52, %v3568_v42  ;;  %9304 = vmatmul.mubr.bf16.gmra.mrb[8].mxu0 %v13563_v3 }
 0x38c   : > { %v1780_v6 = vcvt.s32.f32 %v1773_v26  ;;  %v8391_v53 = vmin.u32 %v3516_v57, %v13557_v31  ;;  %v13577_v62 = vshrl.u32 %v3565_v54, 5  ;;  %v441_v41 = vmul.f32 %v15192_v36, %v13552_v47  ;;  %9325 = vmatprep.subr.bf16.mxu0 %v9760_v35 }
 0x38d   : > { %v3572_v58 = vor.u32 %v3571_v55, %v3570_v14  ;;  %v3575_v45 = vor.u32 %v3574_v37, %v3573_v29  ;;  %v3576_v61 = vshll.u32 %v15070_v20, %v3567_v38  ;;  %v3579_v0 = vshll.u32 %v15042_v52, %v3567_v38 }
 0x38e   : > { %v3518_v32 = vclz %v8391_v53  ;;  %v3580_v49 = vshrl.u32 %v15038_v63, %v3568_v42  ;;  %v3582_v54 = vshll.u32 %v15038_v63, %v3567_v38  ;;  %v3583_v18 = vshrl.u32 %v15120_v59, %v3568_v42  ;;  %9326 = vmatpush3.bf16.msra.mxu0 %v9760_v35 }
 0x38f   : > { %v1781_v26 = vmul.f32 %v1780_v6, %v1778_v9  ;;  %v3506_v36 = vadd.s32 %v13481_v15, %v13501_v19  ;;  %v3561_v57 = vor.u32 8388608, %v3560_v17  ;;  %v3578_v14 = vor.u32 %v3577_v40, %v3576_v61 }
 0x390   : > { %v8392_v55 = vadd.s32 4294967294, %v3518_v32  ;;  %v3581_v29 = vor.u32 %v3580_v49, %v3579_v0  ;;  %v3584_v37 = vor.u32 %v3583_v18, %v3582_v54  ;;  %v2193_v22 = vmul.f32 %v15223_v10, %v13583_v16 }
 0x391   : > { %v3569_v53 = vshrl.u32 %v15068_v12, %v3568_v42  ;;  %vm3585_vm14 = vcmp.lt.s32.totalorder %v13577_v62, 1  ;;  %vm3588_vm2 = vcmp.lt.s32.totalorder %v13577_v62, 4  ;;  %v13596_v38 = vadd.f32 %v15193_v25, %v441_v41 }
 0x392   : > { %vm8393_vm3 = vcmp.lt.s32.totalorder %v8392_v55, 0  ;;  %vm3587_vm4 = vcmp.lt.s32.totalorder %v13577_v62, 3  ;;  %v3593_v15 = vsel %vm3585_vm14, %v3572_v58, %v3575_v45  ;;  %v3594_v19 = vsel %vm3588_vm2, %v3581_v29, 920167782 }
 0x393   : > { %v3521_v9 = vsel %vm8393_vm3, 0, %v8392_v55  ;;  %v3595_v10 = vsel %vm3587_vm4, %v3578_v14, %v3594_v19  ;;  %v3597_v42 = vsel %vm3585_vm14, %v3575_v45, %v3578_v14  ;;  %v3598_v17 = vsel %vm3588_vm2, %v3584_v37, 1326507024 }
 0x394   : > { %v3522_v40 = vsub.s32 32, %v3521_v9  ;;  %v3526_v6 = vsub.s32 4294967266, %v3521_v9  ;;  %vm3586_vm6 = vcmp.lt.s32.totalorder %v13577_v62, 2  ;;  %v3590_v25 = vsel %vm3588_vm2, %v3578_v14, 2102212464 }
 0x395   : > { %v3596_v41 = vsel %vm3586_vm6, %v3593_v15, %v3595_v10  ;;  %v3599_v61 = vsel %vm3587_vm4, %v3581_v29, %v3598_v17  ;;  %v3601_v0 = vshll.u32 %v3561_v57, 8  ;;  %v13611_v35 = vadd.f32 %v15154_v51, %v2193_v22 }
 0x396   : > { %v3524_v32 = vshrl.u32 %v3506_v36, %v3522_v40  ;;  %v3527_v49 = vadd.s32 127, %v3526_v6  ;;  %v3589_v54 = vsel %vm3585_vm14, %v3569_v53, %v3572_v58  ;;  %v3600_v18 = vsel %vm3586_vm6, %v3597_v42, %v3599_v61 }
 0x397   : > { %v3591_v14 = vsel %vm3587_vm4, %v3575_v45, %v3590_v25  ;;  %v13619_v55 = vmul.u32.u64.low %v3601_v0, %v3600_v18  ;;  %v13620_v37 = vmul.u32.u64.high %v3601_v0, %v3600_v18, %v13619_v55  ;;  %v2010_v29 = vand.u32 2139095040, %v13596_v38 }
 0x398   : > { %v3523_v57 = vshll.u32 %v13557_v31, %v3521_v9  ;;  %v3528_v51 = vshll.u32 %v3527_v49, 23  ;;  %v13624_v22 = vmul.u32.u64.low %v3601_v0, %v3596_v41  ;;  %v13625_v36 = vmul.u32.u64.high %v3601_v0, %v3596_v41, %v13624_v22 }
 0x399   : > { %v13632_v58 = vmul.f32 %v1986_v60, %v1984_v28  ;;  %v13638_v45 = vor.u32 %v13559_v4, %v3729_v34  ;;  %v1782_v53 = vxor.u32 2147483648, %v1781_v26  ;;  %v2011_v15 = vshrl.u32 %v2010_v29, 23 }
 0x39a   : > { %v3525_v31 = vor.u32 %v3524_v32, %v3523_v57  ;;  %v3529_v19 = vor.u32 4788187, %v3528_v51  ;;  %v3592_v9 = vsel %vm3586_vm6, %v3589_v54, %v3591_v14  ;;  %v3762_v10 = vand.u32 2139095040, %v13611_v35 }
 0x39b   : > { %vm1700_vm10 = vcmp.lt.s32.totalorder %v13207_v24, 0  ;;  %v1784_v5 = vsub.s32 4, %v13418_v50  ;;  %vm3610_vm15 = vc.u32 %v13620_v37, %v13624_v22  ;;  %v8338_v39 = vadd.s32 4294967169, %v2011_v15 }
 0x39c   : > { %v13649_v46 = vor.u32 4788187, %v3734_v23  ;;  %v3530_v43 = vand.u32 2147483647, %v3529_v19  ;;  %v3611_v60 = vadd.s32 1, %v13625_v36  ;;  %v3763_v28 = vshrl.u32 %v3762_v10, 23 }
 0x39d   : > { %v1783_v4 = vsel %vm1700_vm10, %v1782_v53, %v1781_v26  ;;  %v3608_v62 = vmul.u32 %v3601_v0, %v3592_v9  ;;  %v2017_v42 = vadd.s32 1, %v8338_v39  ;;  %v15238_v17 = vand.u32 2147483647, %v13207_v24 }
 0x39e   : > { %v3532_v33 = vcvt.s32.f32 %v3525_v31  ;;  %v1890_v23 = vsel %vm13368_vm1, 0, %v13377_v8  ;;  %v3612_v6 = vsel %vm3610_vm15, %v3611_v60, %v13625_v36  ;;  %v13668_v25 = vsel %vm1700_vm10, %v1784_v5, %v13418_v50 }
 0x39f   : > { %vm13657_vm5 = vcmp.le.f32.partialorder %v15238_v17, 0.7853982  ;;  %v3613_v26 = vadd.s32 %v3612_v6, %v3608_v62  ;;  %v15019_v41 = vand.u32 2147483647, %v13596_v38  ;;  %vm2018_vm7 = vcmp.gt.s32.totalorder %v2017_v42, 0 }
 0x3a0   : > { %v1786_v61 = vsel %vm13657_vm5, %v13207_v24, %v1783_v4  ;;  %v3533_v0 = vmul.f32 %v3532_v33, %v3530_v43  ;;  %v2019_v32 = vsel %vm2018_vm7, %v2017_v42, 0  ;;  %v8402_v49 = vadd.s32 4294967169, %v3763_v28 }
 0x3a1   : > { %vm3452_vm1 = vcmp.lt.s32.totalorder %v13357_v30, 0  ;;  %v3614_v8 = vadd.s32 536870912, %v3613_v26  ;;  %v2021_v54 = vand.u32 31, %v2019_v32  ;;  %v1787_v50 = vsel %vm13657_vm5, 0, %v13668_v25 }
 0x3a2   : > { %v13679_v18 = vand.u32 3, %v1890_v23  ;;  %v1897_v14 = vxor.u32 2147483648, %v13569_v11  ;;  %v1900_v55 = vxor.u32 2147483648, %v13469_v48  ;;  %10045 = vcosq.f32 %v1786_v61 }
 0x3a3   : > { %v3536_v29 = vsub.s32 4, %v13540_v7  ;;  %v13684_v57 = vshrl.u32 %v3614_v8, 30  ;;  %v2022_v51 = vsub.s32 32, %v2021_v54  ;;  %10047 = vsinq.f32 %v1786_v61 }
 0x3a4   : > { %v3534_v36 = vxor.u32 2147483648, %v3533_v0  ;;  %v2014_v53 = vand.u32 8388607, %v15019_v41  ;;  %v3769_v15 = vadd.s32 1, %v8402_v49  ;;  %v15241_v31 = vand.u32 2147483647, %v13357_v30 }
 0x3a5   : > { %v3616_v9 = vshll.u32 %v13684_v57, 30  ;;  %v13695_v10 = vshrl.u32 %v2019_v32, 5  ;;  %v2024_v5 = vshll.u32 %v15068_v12, %v2021_v54  ;;  %v2027_v39 = vshll.u32 %v15069_v44, %v2021_v54 }
 0x3a6   : > { %vm13690_vm0 = vcmp.le.f32.partialorder %v15241_v31, 0.7853982  ;;  %v2025_v43 = vshrl.u32 %v15069_v44, %v2022_v51  ;;  %v2028_v60 = vshrl.u32 %v15070_v20, %v2022_v51  ;;  %v2031_v28 = vshrl.u32 %v15042_v52, %v2022_v51 }
 0x3a7   : > { %v2034_v4 = vshrl.u32 %v15038_v63, %v2022_v51  ;;  %v13703_v62 = vsub.s32 %v3613_v26, %v3616_v9  ;;  %v2030_v42 = vshll.u32 %v15070_v20, %v2021_v54  ;;  %v2033_v17 = vshll.u32 %v15042_v52, %v2021_v54 }
 0x3a8   : > { %v2037_v33 = vshrl.u32 %v15120_v59, %v2022_v51  ;;  %v13711_v23 = vsel %vm3452_vm1, %v3536_v29, %v13540_v7  ;;  %v2026_v6 = vor.u32 %v2025_v43, %v2024_v5  ;;  %v2029_v61 = vor.u32 %v2028_v60, %v2027_v39  ;;  %v9761_v29 = vld [vmem:[#allocation3 + $0x40] sm:$0xff]   ;;  %v9763_v60 = vld [vmem:[#allocation3 + $0x48] sm:$0xff]  }
 0x3a9   : > { %v2036_v32 = vshll.u32 %v15038_v63, %v2021_v54  ;;  %v3619_v49 = vsub.s32 0, %v13703_v62  ;;  %v2032_v8 = vor.u32 %v2031_v28, %v2030_v42  ;;  %v2035_v26 = vor.u32 %v2034_v4, %v2033_v17  ;;  %8639 = vmatprep.subr.bf16.mxu1 %v9761_v29  ;;  %v9765_v29 = vld [vmem:[#allocation3 + $0x50] sm:$0xff]  }
 0x3aa   : > { %v3759_v31 = vand.u32 2147483647, %v13611_v35  ;;  %v3535_v9 = vsel %vm3452_vm1, %v3534_v36, %v3533_v0  ;;  %v2015_v41 = vor.u32 8388608, %v2014_v53  ;;  %vm3770_vm8 = vcmp.gt.s32.totalorder %v3769_v15, 0  ;;  %v9762_v36 = vld [vmem:[#allocation3] sm:$0xff]  }
 0x3ab   : > { %v2038_v34 = vor.u32 %v2037_v33, %v2036_v32  ;;  %v8395_v27 = vmin.u32 %v3619_v49, %v13703_v62  ;;  %v2023_v7 = vshrl.u32 %v15068_v12, %v2022_v51  ;;  %vm2039_vm9 = vcmp.lt.s32.totalorder %v13695_v10, 1  ;;  %8640 = vmatpush3.bf16.msra.mxu1 %v9762_v36 }
 0x3ac   : > { %vm2042_vm11 = vcmp.lt.s32.totalorder %v13695_v10, 4  ;;  %vm2040_vm12 = vcmp.lt.s32.totalorder %v13695_v10, 2  ;;  %vm2041_vm13 = vcmp.lt.s32.totalorder %v13695_v10, 3  ;;  %v2047_v54 = vsel %vm2039_vm9, %v2026_v6, %v2029_v61  ;;  %v13728_v53 = vpop.eup %10045  ;;  %8641 = vmatprep.subr.bf16.mxu1 %v9763_v60 }
 0x3ad   : > { %v2048_v0 = vsel %vm2042_vm11, %v2035_v26, 920167782  ;;  %v3621_v5 = vclz %v8395_v27  ;;  %v2044_v51 = vsel %vm2042_vm11, %v2032_v8, 2102212464  ;;  %v2051_v43 = vsel %vm2039_vm9, %v2029_v61, %v2032_v8  ;;  %v13736_v28 = vpop.eup %10047 }
 0x3ae   : > { %v2049_v39 = vsel %vm2041_vm13, %v2032_v8, %v2048_v0  ;;  %v3538_v4 = vsel %vm13690_vm0, %v13357_v30, %v3535_v9  ;;  %v2052_v27 = vsel %vm2042_vm11, %v2038_v34, 1326507024  ;;  %v2055_v17 = vshll.u32 %v2015_v41, 8  ;;  %v9764_v0 = vld [vmem:[#allocation3 + $0x8] sm:$0xff]  }
 0x3af   : > { %v2050_v42 = vsel %vm2040_vm12, %v2047_v54, %v2049_v39  ;;  %v8396_v33 = vadd.s32 4294967294, %v3621_v5  ;;  %v2043_v32 = vsel %vm2039_vm9, %v2023_v7, %v2026_v6  ;;  %v2053_v49 = vsel %vm2041_vm13, %v2035_v26, %v2052_v27  ;;  %8642 = vmatpush3.bf16.msra.mxu1 %v9764_v0 }
 0x3b0   : > { %v3771_v8 = vsel %vm3770_vm8, %v3769_v15, 0  ;;  %v2045_v9 = vsel %vm2041_vm13, %v2029_v61, %v2044_v51  ;;  %v2054_v54 = vsel %vm2040_vm12, %v2051_v43, %v2053_v49  ;;  %v13762_v6 = vand.u32 3, %v1787_v50  ;;  %v9766_v50 = vld [vmem:[#allocation3 + $0x10] sm:$0xff]   ;;  %8643 = vmatprep.subr.bf16.mxu1 %v9765_v29 }
 0x3b1   : > { %v13754_v34 = vmul.u32.u64.low %v2055_v17, %v2050_v42  ;;  %v13755_v41 = vmul.u32.u64.high %v2055_v17, %v2050_v42, %v13754_v34  ;;  %vm8397_vm14 = vcmp.lt.s32.totalorder %v8396_v33, 0  ;;  %v3539_v61 = vsel %vm13690_vm0, 0, %v13711_v23 }
 0x3b2   : > { %v13764_v15 = vmul.u32.u64.low %v2055_v17, %v2054_v54  ;;  %v13765_v26 = vmul.u32.u64.high %v2055_v17, %v2054_v54, %v13764_v15  ;;  %v3609_v7 = vadd.s32 %v13624_v22, %v13620_v37  ;;  %v3624_v36 = vsel %vm8397_vm14, 0, %v8396_v33  ;;  %v9767_v37 = vld [vmem:[#allocation3 + $0x58] sm:$0xff]  }
 0x3b3   : > { %v3773_v5 = vand.u32 31, %v3771_v8  ;;  %10049 = vcosq.f32 %v3538_v4  ;;  %v3625_v51 = vsub.s32 32, %v3624_v36  ;;  %v3629_v40 = vsub.s32 4294967266, %v3624_v36  ;;  %8644 = vmatpush3.bf16.msra.mxu1 %v9766_v50  ;;  %v9769_v15 = vld [vmem:[#allocation3 + $0x60] sm:$0xff]  }
 0x3b4   : > { %v2046_v25 = vsel %vm2040_vm12, %v2043_v32, %v2045_v9  ;;  %10051 = vsinq.f32 %v3538_v4  ;;  %v2065_v39 = vadd.s32 1, %v13755_v41  ;;  %v3766_v19 = vand.u32 8388607, %v3759_v31  ;;  %v9768_v9 = vld [vmem:[#allocation3 + $0x18] sm:$0xff]   ;;  %8645 = vmatprep.subr.bf16.mxu1 %v9767_v37 }
 0x3b5   : > { %v13777_v23 = vsub.s32 32, %v3773_v5  ;;  %v13779_v22 = vand.u32 3, %v3539_v61  ;;  %v3626_v43 = vshll.u32 %v13703_v62, %v3624_v36  ;;  %v3627_v60 = vshrl.u32 %v3609_v7, %v3625_v51 }
 0x3b6   : > { %v3630_v42 = vadd.s32 127, %v3629_v40  ;;  %v1794_v10 = vxor.u32 2147483648, %v13736_v28  ;;  %v1797_v27 = vxor.u32 2147483648, %v13728_v53  ;;  %v2062_v4 = vmul.u32 %v2055_v17, %v2046_v25 }
 0x3b7   : > { %vm2064_vm2 = vc.u32 %v13765_v26, %v13754_v34  ;;  %v3628_v33 = vor.u32 %v3627_v60, %v3626_v43  ;;  %v3777_v0 = vshrl.u32 %v15069_v44, %v13777_v23  ;;  %vm3555_vm3 = vcmp.lt.s32.totalorder %v13486_v2, 0  ;;  %8646 = vmatpush3.bf16.msra.mxu1 %v9768_v9  ;;  %v9770_v43 = vld [vmem:[#allocation3 + $0x20] sm:$0xff]  }
 0x3b8   : > { %v3631_v32 = vshll.u32 %v3630_v42, 23  ;;  %v2066_v49 = vsel %vm2064_vm2, %v2065_v39, %v13755_v41  ;;  %v3767_v54 = vor.u32 8388608, %v3766_v19  ;;  %v13790_v29 = vshrl.u32 %v3771_v8, 5  ;;  %8647 = vmatprep.subr.bf16.mxu1 %v9769_v15 }
 0x3b9   : > { %v2067_v62 = vadd.s32 %v2066_v49, %v2062_v4  ;;  %v3780_v17 = vshrl.u32 %v15070_v20, %v13777_v23  ;;  %vm13796_vm4 = vcmp.le.f32.partialorder %v3553_v1, 0.7853982  ;;  %v3776_v7 = vshll.u32 %v15068_v12, %v3773_v5 }
 0x3ba   : > { %v3632_v61 = vor.u32 4788187, %v3631_v32  ;;  %v3779_v36 = vshll.u32 %v15069_v44, %v3773_v5  ;;  %v3783_v8 = vshrl.u32 %v15042_v52, %v13777_v23  ;;  %v3782_v40 = vshll.u32 %v15070_v20, %v3773_v5  ;;  %v9771_v20 = vld [vmem:[#allocation3 + $0x68] sm:$0xff]  }
 0x3bb   : > { %v2068_v51 = vadd.s32 536870912, %v2067_v62  ;;  %v3785_v25 = vshll.u32 %v15042_v52, %v3773_v5  ;;  %v3786_v50 = vshrl.u32 %v15038_v63, %v13777_v23  ;;  %vm3548_vm6 = vcmp.eq.s32.totalorder %v13779_v22, 2  ;;  %8648 = vmatpush3.bf16.msra.mxu1 %v9770_v43 }
 0x3bc   : > { %v3633_v1 = vand.u32 2147483647, %v3632_v61  ;;  %v3635_v39 = vcvt.s32.f32 %v3628_v33  ;;  %v3778_v19 = vor.u32 %v3777_v0, %v3776_v7  ;;  %v3781_v37 = vor.u32 %v3780_v17, %v3779_v36  ;;  %8649 = vmatprep.subr.bf16.mxu1 %v9771_v20  ;;  %v9774_v20 = vld [vmem:[#allocation3 + $0x30] sm:$0xff]  }
 0x3bd   : > { %vm3545_vm10 = vcmp.eq.s32.totalorder %v13779_v22, 0  ;;  %v13810_v44 = vshrl.u32 %v2068_v51, 30  ;;  %v3784_v60 = vor.u32 %v3783_v8, %v3782_v40  ;;  %v3787_v42 = vor.u32 %v3786_v50, %v3785_v25  ;;  %v10050_v4 = vpop.eup %10049  ;;  %v9773_v8 = vld [vmem:[#allocation3 + $0x70] sm:$0xff]  }
 0x3be   : > { %v3789_v52 = vshrl.u32 %v15120_v59, %v13777_v23  ;;  %vm1796_vm15 = vcmp.eq.s32.totalorder %v13762_v6, 2  ;;  %v3636_v32 = vmul.f32 %v3635_v39, %v3633_v1  ;;  %v3639_v33 = vsub.s32 4, %v13684_v57  ;;  %v10052_v9 = vpop.eup %10051 }
 0x3bf   : > { %v3788_v49 = vshll.u32 %v15038_v63, %v3773_v5  ;;  %v13817_v0 = vshll.u32 %v3767_v54, 8  ;;  %vm1793_vm5 = vcmp.eq.s32.totalorder %v13762_v6, 0  ;;  %v2070_v17 = vshll.u32 %v13810_v44, 30  ;;  %v9772_v5 = vld [vmem:[#allocation3 + $0x28] sm:$0xff]  }
 0x3c0   : > { %vm3791_vm7 = vcmp.lt.s32.totalorder %v13790_v29, 1  ;;  %vm3793_vm1 = vcmp.lt.s32.totalorder %v13790_v29, 3  ;;  %vm3794_vm0 = vcmp.lt.s32.totalorder %v13790_v29, 4  ;;  %v3637_v59 = vxor.u32 2147483648, %v3636_v32  ;;  %8650 = vmatpush3.bf16.msra.mxu1 %v9772_v5 }
 0x3c1   : > { %v3790_v15 = vor.u32 %v3789_v52, %v3788_v49  ;;  %v3799_v61 = vsel %vm3791_vm7, %v3778_v19, %v3781_v37  ;;  %v3800_v63 = vsel %vm3794_vm0, %v3787_v42, 920167782  ;;  %v3549_v54 = vxor.u32 2147483648, %v10050_v4  ;;  %8651 = vmatprep.subr.bf16.mxu1 %v9773_v8 }
 0x3c2   : > { %vm1896_vm8 = vcmp.eq.s32.totalorder %v13679_v18, 0  ;;  %v13829_v7 = vsub.s32 %v2067_v62, %v2070_v17  ;;  %vm3792_vm9 = vcmp.lt.s32.totalorder %v13790_v29, 2  ;;  %v3801_v36 = vsel %vm3793_vm1, %v3784_v60, %v3800_v63  ;;  %v9775_v17 = vld [vmem:[#allocation3 + $0x78] sm:$0xff]  }
 0x3c3   : > { %v3546_v51 = vxor.u32 2147483648, %v10052_v9  ;;  %v3638_v40 = vsel %vm3555_vm3, %v3637_v59, %v3636_v32  ;;  %v3775_v25 = vshrl.u32 %v15068_v12, %v13777_v23  ;;  %v3802_v50 = vsel %vm3792_vm9, %v3799_v61, %v3801_v36 }
 0x3c4   : > { %v3641_v62 = vsel %vm13796_vm4, %v13486_v2, %v3638_v40  ;;  %v2073_v1 = vsub.s32 0, %v13829_v7  ;;  %v3796_v39 = vsel %vm3794_vm0, %v3784_v60, 2102212464  ;;  %v3803_v43 = vsel %vm3791_vm7, %v3781_v37, %v3784_v60  ;;  %8652 = vmatpush3.bf16.msra.mxu1 %v9774_v20 }
 0x3c5   : > { %10053 = vcosq.f32 %v3641_v62  ;;  %v3804_v52 = vsel %vm3794_vm0, %v3790_v15, 1326507024  ;;  %v13851_v12 = vmul.u32.u64.low %v13817_v0, %v3802_v50  ;;  %v13852_v23 = vmul.u32.u64.high %v13817_v0, %v3802_v50, %v13851_v12  ;;  %8653 = vmatprep.subr.bf16.mxu1 %v9775_v17 }
 0x3c6   : > { %v3550_v32 = vsel %vm3548_vm6, %v3549_v54, %v10052_v9  ;;  %v3640_v49 = vsel %vm3555_vm3, %v3639_v33, %v13684_v57  ;;  %10055 = vsinq.f32 %v3641_v62  ;;  %v8339_v60 = vmin.u32 %v2073_v1, %v13829_v7 }
 0x3c7   : > { %v3547_v59 = vsel %vm3545_vm10, %v10050_v4, %v3546_v51  ;;  %v3795_v15 = vsel %vm3791_vm7, %v3775_v25, %v3778_v19  ;;  %v3797_v61 = vsel %vm3793_vm1, %v3781_v37, %v3796_v39  ;;  %v3805_v9 = vsel %vm3793_vm1, %v3787_v42, %v3804_v52  ;;  %v15248_v52 = vld [vmem:[#allocation35_spill] sm:$0xff] }
 0x3c8   : > { %v1798_v57 = vsel %vm1796_vm15, %v1797_v27, %v13736_v28  ;;  %vm3544_vm11 = vcmp.lt.s32.totalorder %v13779_v22, 2  ;;  %v2075_v33 = vclz %v8339_v60  ;;  %v3806_v4 = vsel %vm3792_vm9, %v3803_v43, %v3805_v9  ;;  %v9776_v27 = vld [vmem:[#allocation3 + $0x38] sm:$0xff]   ;;  %v15249_v9 = vld [vmem:[#allocation10_spill] sm:$0xff] }
 0x3c9   : > { %v1795_v19 = vsel %vm1793_vm5, %v13728_v53, %v1794_v10  ;;  %v3642_v37 = vsel %vm13796_vm4, 0, %v3640_v49  ;;  %v13885_v42 = vmul.u32.u64.low %v13817_v0, %v3806_v4  ;;  %v13886_v63 = vmul.u32.u64.high %v13817_v0, %v3806_v4, %v13885_v42  ;;  %8654 = vmatpush3.bf16.msra.mxu1 %v9776_v27 }
 0x3ca   : > { %v3551_v22 = vsel %vm3544_vm11, %v3547_v59, %v3550_v32  ;;  %v8340_v5 = vadd.s32 4294967294, %v2075_v33  ;;  %v3798_v54 = vsel %vm3792_vm9, %v3795_v15, %v3797_v61  ;;  %v3817_v28 = vadd.s32 1, %v13852_v23 }
 0x3cb   : > { %vm1792_vm12 = vcmp.lt.s32.totalorder %v13762_v6, 2  ;;  %vm3542_vm13 = vweird.f32 %v13357_v30  ;;  %v1898_v53 = vsel %vm1896_vm8, %v13469_v48, %v1897_v14  ;;  %vm1899_vm14 = vcmp.eq.s32.totalorder %v13679_v18, 2 }
 0x3cc   : > { %v1799_v10 = vsel %vm1792_vm12, %v1795_v19, %v1798_v57  ;;  %v1901_v29 = vsel %vm1899_vm14, %v1900_v55, %v13569_v11  ;;  %v3646_v41 = vand.u32 3, %v3642_v37  ;;  %vm8341_vm2 = vcmp.lt.s32.totalorder %v8340_v5, 0  ;;  %v15250_v37 = vld [vmem:[#allocation17_spill] sm:$0xff] }
 0x3cd   : > { %v3552_v36 = vsel %vm3542_vm13, nan, %v3551_v22  ;;  %v2078_v8 = vsel %vm8341_vm2, 0, %v8340_v5  ;;  %v3814_v6 = vmul.u32 %v13817_v0, %v3798_v54  ;;  %vm3816_vm3 = vc.u32 %v13886_v63, %v13851_v12 }
 0x3ce   : > { %v15246_v30 = vand.u32 2147483647, %v13649_v46  ;;  %v15247_v14 = vcvt.s32.f32 %v13638_v45  ;;  %vm1790_vm4 = vweird.f32 %v13207_v24  ;;  %v2083_v40 = vsub.s32 4294967266, %v2078_v8 }
 0x3cf   : > { %v3818_v48 = vsel %vm3816_vm3, %v3817_v28, %v13852_v23  ;;  %v10054_v11 = vpop.eup %10053  ;;  %v1800_v55 = vsel %vm1790_vm4, nan, %v1799_v10  ;;  %vm1895_vm6 = vcmp.lt.s32.totalorder %v13679_v18, 2  ;;  %v2079_v25 = vsub.s32 32, %v2078_v8  ;;  %v15251_v28 = vld [vmem:[#allocation9_spill] sm:$0xff] }
 0x3d0   : > { %v3739_v51 = vmul.f32 %v15247_v14, %v15246_v30  ;;  %v3819_v0 = vadd.s32 %v3818_v48, %v3814_v6  ;;  %v10056_v50 = vpop.eup %10055  ;;  %v3874_v62 = vmul.f32 %v3552_v36, %v1800_v55  ;;  %v1902_v1 = vsel %vm1895_vm6, %v1898_v53, %v1901_v29  ;;  %v15252_v29 = vld [vmem:[#allocation31_spill] sm:$0xff]  ;;  %v15253_v36 = vld [vmem:[#allocation14_spill] sm:$0xff]  ;;  %v15254_v14 = vld [vmem:[#allocation21_spill] sm:$0xff] }
 0x3d1   : > { %v3652_v39 = vxor.u32 2147483648, %v10054_v11  ;;  %v2084_v43 = vadd.s32 127, %v2083_v40  ;;  %v3649_v46 = vxor.u32 2147483648, %v10056_v50  ;;  %vm3651_vm10 = vcmp.eq.s32.totalorder %v3646_v41, 2 }
 0x3d2   : > { %v2063_v45 = vadd.s32 %v13754_v34, %v13765_v26  ;;  %v3820_v24 = vadd.s32 536870912, %v3819_v0  ;;  %vm1893_vm15 = vweird.f32 %v15248_v52  ;;  %vm3648_vm5 = vcmp.eq.s32.totalorder %v3646_v41, 0 }
 0x3d3   : > { %v3653_v23 = vsel %vm3651_vm10, %v3652_v39, %v10056_v50  ;;  %v2085_v20 = vshll.u32 %v2084_v43, 23  ;;  %vm3647_vm7 = vcmp.lt.s32.totalorder %v3646_v41, 2  ;;  %v3650_v18 = vsel %vm3648_vm5, %v10054_v11, %v3649_v46 }
 0x3d4   : > { %v2081_v32 = vshrl.u32 %v2063_v45, %v2079_v25  ;;  %v13915_v49 = vshrl.u32 %v3820_v24, 30  ;;  %v3894_v60 = vmul.f32 %v15176_v21, %v3874_v62  ;;  %v1903_v17 = vsel %vm1893_vm15, nan, %v1902_v1 }
 0x3d5   : > { %vm3645_vm1 = vweird.f32 %v13486_v2  ;;  %v3654_v59 = vsel %vm3647_vm7, %v3650_v18, %v3653_v23  ;;  %v2080_v34 = vshll.u32 %v13829_v7, %v2078_v8  ;;  %v2086_v26 = vor.u32 4788187, %v2085_v20 }
 0x3d6   : > { %v3655_v15 = vsel %vm3645_vm1, nan, %v3654_v59  ;;  %v3822_v61 = vshll.u32 %v13915_v49, 30  ;;  %v3914_v57 = vmul.f32 %v15215_v13, %v15249_v9  ;;  %v3915_v42 = vmul.f32 %v15215_v13, %v15250_v37 }
 0x3d7   : > { %v3875_v33 = vmul.f32 %v3655_v15, %v1903_v17  ;;  %v2082_v4 = vor.u32 %v2081_v32, %v2080_v34  ;;  %v1988_v27 = vxor.u32 2147483648, %v13632_v58  ;;  %v3740_v5 = vxor.u32 2147483648, %v3739_v51  ;;  %v15261_v17 = vld [vmem:[#allocation7_spill] sm:$0xff] }
 0x3d8   : > { %v3823_v19 = vsub.s32 %v3819_v0, %v3822_v61  ;;  %v3930_v22 = vadd.f32 %v3914_v57, %v3894_v60  ;;  %v2087_v54 = vand.u32 2147483647, %v2086_v26  ;;  %v3950_v53 = vmul.f32 %v15186_v56, %v15251_v28  ;;  %v15265_v26 = vld [vmem:[#allocation34_spill] sm:$0xff] }
 0x3d9   : > { %v3895_v2 = vmul.f32 %v15176_v21, %v3875_v33  ;;  %v3951_v41 = vmul.f32 %v15186_v56, %v15252_v29  ;;  %vm1906_vm0 = vcmp.lt.s32.totalorder %v15253_v36, 0  ;;  %v2089_v8 = vcvt.s32.f32 %v2082_v4 }
 0x3da   : > { %v3825_v7 = vsub.s32 0, %v3823_v19  ;;  %v1989_v30 = vsel %vm1906_vm0, %v1988_v27, %v13632_v58  ;;  %vm3658_vm8 = vcmp.lt.s32.totalorder %v15254_v14, 0  ;;  %v3966_v40 = vadd.f32 %v3950_v53, %v3930_v22 }
 0x3db   : > { %v3931_v10 = vadd.f32 %v3915_v42, %v3895_v2  ;;  %v3741_v11 = vsel %vm3658_vm8, %v3740_v5, %v3739_v51  ;;  %v2090_v55 = vmul.f32 %v2089_v8, %v2087_v54  ;;  %v15255_v0 = vand.u32 2147483647, %v15253_v36 }
 0x3dc   : > { %v8403_v6 = vmin.u32 %v3825_v7, %v3823_v19  ;;  %v15258_v1 = vand.u32 2147483647, %v15254_v14  ;;  %v3815_v24 = vadd.s32 %v13851_v12, %v13886_v63  ;;  %vm2009_vm13 = vcmp.lt.s32.totalorder %v13596_v38, 0 }
 0x3dd   : > { %v3967_v48 = vadd.f32 %v3951_v41, %v3931_v10  ;;  %vm13940_vm9 = vcmp.le.f32.partialorder %v15255_v0, 0.7853982  ;;  %v2091_v46 = vxor.u32 2147483648, %v2090_v55  ;;  %v3742_v59 = vsub.s32 4, %v15261_v17 }
 0x3de   : > { %v3827_v25 = vclz %v8403_v6  ;;  %v1992_v58 = vsel %vm13940_vm9, %v15253_v36, %v1989_v30  ;;  %vm13951_vm11 = vcmp.le.f32.partialorder %v15258_v1, 0.7853982  ;;  %v15262_v15 = vand.u32 2147483647, %v13596_v38 }
 0x3df   : > { %v13944_v62 = vpack.c.bf16 %v3967_v48, %v3966_v40  ;;  %v3744_v43 = vsel %vm13951_vm11, %v15254_v14, %v3741_v11  ;;  %10057 = vcosq.f32 %v1992_v58  ;;  %v2092_v20 = vsel %vm2009_vm13, %v2091_v46, %v2090_v55 }
 0x3e0   : > { %v8404_v51 = vadd.s32 4294967294, %v3827_v25  ;;  %10059 = vcosq.f32 %v3744_v43  ;;  %vm13967_vm14 = vcmp.le.f32.partialorder %v15262_v15, 0.7853982  ;;  %v1990_v61 = vsub.s32 4, %v15265_v26 }
 0x3e1   : > { %9307 = vmatprep.mubr.bf16.mxu0 %v13944_v62  ;;  %10061 = vsinq.f32 %v3744_v43  ;;  %v2095_v9 = vsel %vm13967_vm14, %v13596_v38, %v2092_v20  ;;  %v3743_v33 = vsel %vm3658_vm8, %v3742_v59, %v15261_v17  ;;  %v2093_v54 = vsub.s32 4, %v13810_v44 }
 0x3e2   : > { %vm8405_vm12 = vcmp.lt.s32.totalorder %v8404_v51, 0  ;;  %10063 = vsinq.f32 %v1992_v58  ;;  %v1991_v42 = vsel %vm1906_vm0, %v1990_v61, %v15265_v26  ;;  %v3745_v22 = vsel %vm13951_vm11, 0, %v3743_v33 }
 0x3e3   : > { %v3830_v45 = vsel %vm8405_vm12, 0, %v8404_v51  ;;  %10065 = vcosq.f32 %v2095_v9  ;;  %v1993_v7 = vsel %vm13940_vm9, 0, %v1991_v42  ;;  %v3749_v10 = vand.u32 3, %v3745_v22 }
 0x3e4   : > { %v3831_v52 = vsub.s32 32, %v3830_v45  ;;  %v3835_v23 = vsub.s32 4294967266, %v3830_v45  ;;  %v3832_v18 = vshll.u32 %v3823_v19, %v3830_v45  ;;  %10067 = vsinq.f32 %v2095_v9 }
 0x3e5   : > { %vm3761_vm2 = vcmp.lt.s32.totalorder %v13611_v35, 0  ;;  %vm13989_vm3 = vcmp.le.f32.partialorder %v3759_v31, 0.7853982  ;;  %v3845_v30 = vsub.s32 4, %v13915_v49  ;;  %v1997_v40 = vand.u32 3, %v1993_v7  ;;  %v14002_v31 = vld [vmem:[#allocation3 + $0x140] sm:$0xff]  }
 0x3e6   : > { %v3833_v32 = vshrl.u32 %v3815_v24, %v3831_v52  ;;  %v3836_v60 = vadd.s32 127, %v3835_v23  ;;  %v2094_v48 = vsel %vm2009_vm13, %v2093_v54, %v13810_v44  ;;  %vm3751_vm4 = vcmp.eq.s32.totalorder %v3749_v10, 0  ;;  %9343 = vmatprep.subr.bf16.mxu1 %v14002_v31 }
 0x3e7   : > { %vm3754_vm6 = vcmp.eq.s32.totalorder %v3749_v10, 2  ;;  %v2096_v1 = vsel %vm13967_vm14, 0, %v2094_v48  ;;  %v3846_v44 = vsel %vm3761_vm2, %v3845_v30, %v13915_v49  ;;  %vm1999_vm10 = vcmp.eq.s32.totalorder %v1997_v40, 0 }
 0x3e8   : > { %v3834_v12 = vor.u32 %v3833_v32, %v3832_v18  ;;  %v3837_v63 = vshll.u32 %v3836_v60, 23  ;;  %vm2002_vm15 = vcmp.eq.s32.totalorder %v1997_v40, 2  ;;  %vm3750_vm5 = vcmp.lt.s32.totalorder %v3749_v10, 2  ;;  %v15271_v10 = vld [vmem:[#allocation15_spill] sm:$0xff] }
 0x3e9   : > { %v10058_v37 = vpop.eup %10057  ;;  %v2100_v45 = vand.u32 3, %v2096_v1  ;;  %v3848_v24 = vsel %vm13989_vm3, 0, %v3846_v44  ;;  %vm1998_vm7 = vcmp.lt.s32.totalorder %v1997_v40, 2  ;;  %vm3748_vm1 = vweird.f32 %v15254_v14 }
 0x3ea   : > { %v3838_v57 = vor.u32 4788187, %v3837_v63  ;;  %v3841_v19 = vcvt.s32.f32 %v3834_v12  ;;  %v10060_v27 = vpop.eup %10059  ;;  %v2003_v25 = vxor.u32 2147483648, %v10058_v37  ;;  %v3852_v18 = vand.u32 3, %v3848_v24  ;;  %v9778_v24 = vld [vmem:[#allocation3 + $0x148] sm:$0xff]  }
 0x3eb   : > { %v10062_v5 = vpop.eup %10061  ;;  %v3755_v29 = vxor.u32 2147483648, %v10060_v27  ;;  %vm1996_vm0 = vweird.f32 %v15253_v36  ;;  %vm2102_vm8 = vcmp.eq.s32.totalorder %v2100_v45, 0  ;;  %vm2105_vm9 = vcmp.eq.s32.totalorder %v2100_v45, 2 }
 0x3ec   : > { %v3839_v4 = vand.u32 2147483647, %v3838_v57  ;;  %v10064_v53 = vpop.eup %10063  ;;  %v3752_v41 = vxor.u32 2147483648, %v10062_v5  ;;  %vm2101_vm11 = vcmp.lt.s32.totalorder %v2100_v45, 2  ;;  %vm3857_vm12 = vcmp.eq.s32.totalorder %v3852_v18, 2 }
 0x3ed   : > { %v2000_v55 = vxor.u32 2147483648, %v10064_v53  ;;  %v10066_v0 = vpop.eup %10065  ;;  %v3756_v58 = vsel %vm3754_vm6, %v3755_v29, %v10062_v5  ;;  %v2004_v43 = vsel %vm2002_vm15, %v2003_v25, %v10064_v53  ;;  %vm3854_vm13 = vcmp.eq.s32.totalorder %v3852_v18, 0  ;;  %v15270_v53 = vld [vmem:[#allocation13_spill] sm:$0xff]  ;;  %v15274_v25 = vld [vmem:[#allocation30_spill] sm:$0xff] }
 0x3ee   : > { %v3842_v2 = vmul.f32 %v3841_v19, %v3839_v4  ;;  %v3753_v50 = vsel %vm3751_vm4, %v10060_v27, %v3752_v41  ;;  %v10068_v39 = vpop.eup %10067  ;;  %v2106_v23 = vxor.u32 2147483648, %v10066_v0  ;;  %vm3853_vm14 = vcmp.lt.s32.totalorder %v3852_v18, 2  ;;  %v15268_v4 = vld [vmem:[#allocation29_spill] sm:$0xff] }
 0x3ef   : > { %v2001_v51 = vsel %vm1999_vm10, %v10058_v37, %v2000_v55  ;;  %v3757_v46 = vsel %vm3750_vm5, %v3753_v50, %v3756_v58  ;;  %v2103_v52 = vxor.u32 2147483648, %v10068_v39  ;;  %v3916_v19 = vmul.f32 %v15215_v13, %v15268_v4  ;;  %v9779_v4 = vld [vmem:[#allocation3 + $0x150] sm:$0xff]  }
 0x3f0   : > { %v3843_v28 = vxor.u32 2147483648, %v3842_v2  ;;  %v2005_v20 = vsel %vm1998_vm7, %v2001_v51, %v2004_v43  ;;  %v3758_v49 = vsel %vm3748_vm1, nan, %v3757_v46  ;;  %v2107_v59 = vsel %vm2105_vm9, %v2106_v23, %v10068_v39 }
 0x3f1   : > { %v2006_v60 = vsel %vm1996_vm0, nan, %v2005_v20  ;;  %v2104_v17 = vsel %vm2102_vm8, %v10066_v0, %v2103_v52  ;;  %v3917_v27 = vmul.f32 %v15215_v13, %v13552_v47  ;;  %v15272_v13 = vld [vmem:[#allocation28_spill] sm:$0xff] }
 0x3f2   : > { %v3844_v6 = vsel %vm3761_vm2, %v3843_v28, %v3842_v2  ;;  %v3876_v34 = vmul.f32 %v3758_v49, %v2006_v60  ;;  %v2108_v26 = vsel %vm2101_vm11, %v2104_v17, %v2107_v59  ;;  %vm2099_vm2 = vweird.f32 %v13596_v38  ;;  %v15269_v2 = vld [vmem:[#allocation25_spill] sm:$0xff] }
 0x3f3   : > { %v3847_v11 = vsel %vm13989_vm3, %v13611_v35, %v3844_v6  ;;  %vm3851_vm3 = vweird.f32 %v13611_v35  ;;  %v2109_v57 = vsel %vm2099_vm2, nan, %v2108_v26  ;;  %v3952_v5 = vmul.f32 %v15186_v56, %v15269_v2 }
 0x3f4   : > { %10069 = vcosq.f32 %v3847_v11  ;;  %v3896_v9 = vmul.f32 %v15176_v21, %v3876_v34  ;;  %v3953_v38 = vmul.f32 %v15186_v56, %v13583_v16 }
 0x3f5   : > { %10071 = vsinq.f32 %v3847_v11  ;;  %v15273_v11 = vld [vmem:[#allocation24_spill] sm:$0xff] }
 0x3f6   : > { %v3932_v42 = vadd.f32 %v3916_v19, %v3896_v9 }
 0x3f8   : > { %v3968_v35 = vadd.f32 %v3952_v5, %v3932_v42 }
 0x3fe   : > { %v10070_v32 = vpop.eup %10069 }
 0x3ff   : > { %v10072_v15 = vpop.eup %10071  ;;  %v3858_v12 = vxor.u32 2147483648, %v10070_v32 }
 0x400   : > { %v3855_v63 = vxor.u32 2147483648, %v10072_v15 }
 0x401   : > { %v3859_v61 = vsel %vm3857_vm12, %v3858_v12, %v10072_v15 }
 0x402   : > { %v3856_v14 = vsel %vm3854_vm13, %v10070_v32, %v3855_v63  ;;  %v15275_v32 = vmov 0  }
 0x403   : > { %v3860_v36 = vsel %vm3853_vm14, %v3856_v14, %v3859_v61 }
 0x404   : > { %v3861_v33 = vsel %vm3851_vm3, nan, %v3860_v36 }
 0x405   : > { %v3877_v37 = vmul.f32 %v3861_v33, %v2109_v57 }
 0x407   : > { %v3897_v22 = vmul.f32 %v15176_v21, %v3877_v37  ;;  %v14035_v21 = vld [vmem:[%s14891_s3] ss:$0 sm:$0xff] }
 0x409   : > { %v3933_v54 = vadd.f32 %v3917_v27, %v3897_v22 }
 0x40b   : > { %v3969_v7 = vadd.f32 %v3953_v38, %v3933_v54  ;;  %v9780_v54 = vld [vmem:[#allocation3 + $0x158] sm:$0xff]  }
 0x40d   : > { %v14026_v28 = vpack.c.bf16 %v3969_v7, %v3968_v35 }
 0x40f   : > { %9308 = vmatmul.mubr.bf16.gmra.mrb[12].mxu0 %v14026_v28 }
 0x410   : > { %9327 = vmatprep.mubr.bf16.mxu0 %v15270_v53 }
 0x413   : > { %v9297_v47 = vpop.f32.mrb[0].mxu0 }
 0x414   : > { %v4100_v56 = vadd.f32 %v9297_v47, %v14035_v21  ;;  %v4091_v16 = vpop.f32.mrb[1].mxu0 }
 0x415   : > { %v4092_v29 = vadd.f32 %v14035_v21, %v4091_v16  ;;  %v9298_v41 = vpop.f32.mrb[2].mxu0 }
 0x416   : > { %v4172_v8 = vmul.f32 0.01, %v4100_v56  ;;  %v4103_v6 = vadd.f32 %v9298_v41, %v14035_v21  ;;  %v4094_v30 = vpop.f32.mrb[3].mxu0  ;;  %vm4156_vm4 = vcmp.gt.f32.partialorder %v4100_v56, 0.0  ;;  %v9782_v41 = vld [vmem:[#allocation3 + $0x168] sm:$0xff]  }
 0x417   : > { %9328 = vmatmul.mubr.bf16.vlgmr.msra.gmra.mrb[16].mxu0 %v15271_v10  ;;  %v4170_v40 = vmul.f32 0.01, %v4092_v29  ;;  %v4095_v48 = vadd.f32 %v14035_v21, %v4094_v30  ;;  %vm4154_vm6 = vcmp.gt.f32.partialorder %v4092_v29, 0.0  ;;  %v9785_v30 = vld [vmem:[#allocation3 + $0x100] sm:$0xff]  }
 0x418   : > { %9331 = vmatprep.mubr.bf16.mxu0 %v15272_v13  ;;  %vm4157_vm10 = vcmp.gt.f32.partialorder %v4103_v6, 0.0  ;;  %v4173_v55 = vmul.f32 0.01, %v4103_v6  ;;  %v4188_v50 = vsel %vm4156_vm4, %v4100_v56, %v4172_v8  ;;  %v9783_v8 = vld [vmem:[#allocation3 + $0x170] sm:$0xff]   ;;  %8719 = vmatprep.subr.bf16.mxu0 %v9785_v30 }
 0x419   : > { %vm4155_vm15 = vcmp.gt.f32.partialorder %v4095_v48, 0.0  ;;  %v4171_v0 = vmul.f32 0.01, %v4095_v48  ;;  %v4186_v1 = vsel %vm4154_vm6, %v4092_v29, %v4170_v40  ;;  %v9781_v29 = vld [vmem:[#allocation3 + $0x160] sm:$0xff]  }
 0x41a   : > { %v4189_v58 = vsel %vm4157_vm10, %v4103_v6, %v4173_v55  ;;  %v9784_v6 = vld [vmem:[#allocation3 + $0x178] sm:$0xff]   ;;  %v9786_v40 = vld [vmem:[#allocation3 + $0xc0] sm:$0xff]   ;;  %v9788_v55 = vld [vmem:[#allocation3 + $0xc8] sm:$0xff]  }
 0x41b   : > { %v4187_v44 = vsel %vm4155_vm15, %v4095_v48, %v4171_v0  ;;  %v14043_v39 = vpack.c.bf16 %v4189_v58, %v4188_v50  ;;  %v9301_v51 = vpop.f32.mrb[4].mxu0  ;;  %v9787_v48 = vld [vmem:[#allocation3 + $0x108] sm:$0xff]   ;;  %8720 = vmatpush3.bf16.msra.mxu0 %v9786_v40  ;;  %v9789_v0 = vld [vmem:[#allocation3 + $0x110] sm:$0xff]   ;;  %v9791_v58 = vld [vmem:[#allocation3 + $0x118] sm:$0xff]  }
 0x41c   : > { %v4202_v43 = vpack.c.bf16 %v4187_v44, %v4186_v1  ;;  %v4116_v46 = vadd.f32 %v9301_v51, %v14035_v21  ;;  %v4107_v45 = vpop.f32.mrb[5].mxu0  ;;  %8721 = vmatprep.subr.bf16.mxu0 %v9787_v48  ;;  %v9790_v50 = vld [vmem:[#allocation3 + $0xd0] sm:$0xff]   ;;  %v9792_v1 = vld [vmem:[#allocation3 + $0xd8] sm:$0xff]   ;;  %v9793_v44 = vld [vmem:[#allocation3 + $0x120] sm:$0xff]  }
 0x41d   : > { %v4108_v52 = vadd.f32 %v14035_v21, %v4107_v45  ;;  %v9302_v23 = vpop.f32.mrb[6].mxu0  ;;  %v9794_v51 = vld [vmem:[#allocation3 + $0xe0] sm:$0xff]   ;;  %v9797_v45 = vld [vmem:[#allocation3 + $0x130] sm:$0xff]  }
 0x41e   : > { %4482 = vmatmul.mubr.bf16.vlgmr.msra.gmra.mrb[0].mxu1 %v4202_v43  ;;  %v4176_v20 = vmul.f32 0.01, %v4116_v46  ;;  %v4119_v49 = vadd.f32 %v9302_v23, %v14035_v21  ;;  %v4110_v18 = vpop.f32.mrb[7].mxu0  ;;  %vm4160_vm5 = vcmp.gt.f32.partialorder %v4116_v46, 0.0  ;;  %v9800_v23 = vld [vmem:[#allocation3 + $0xf8] sm:$0xff]  }
 0x41f   : > { %9332 = vmatmul.mubr.bf16.gmra.mrb[20].mxu0 %v15273_v11  ;;  %4489 = vmatprep.mubr.bf16.mxu1 %v15275_v32  ;;  %v4174_v60 = vmul.f32 0.01, %v4108_v52  ;;  %v4111_v17 = vadd.f32 %v14035_v21, %v4110_v18  ;;  %vm4158_vm7 = vcmp.gt.f32.partialorder %v4108_v52, 0.0 }
 0x420   : > { %9335 = vmatprep.mubr.bf16.mxu0 %v15274_v25  ;;  %9344 = vmatpush3.bf16.msra.mxu1 %v14002_v31  ;;  %vm4161_vm1 = vcmp.gt.f32.partialorder %v4119_v49, 0.0  ;;  %v4177_v59 = vmul.f32 0.01, %v4119_v49  ;;  %v4192_v34 = vsel %vm4160_vm5, %v4116_v46, %v4176_v20  ;;  %v9796_v46 = vld [vmem:[#allocation3 + $0xe8] sm:$0xff]   ;;  %v14076_v20 = vld [vmem:[#allocation3 + $0x200] sm:$0xff]  }
 0x421   : > { %9345 = vmatprep.subr.bf16.mxu1 %v9778_v24  ;;  %vm4159_vm0 = vcmp.gt.f32.partialorder %v4111_v17, 0.0  ;;  %v4175_v15 = vmul.f32 0.01, %v4111_v17  ;;  %v4190_v63 = vsel %vm4158_vm7, %v4108_v52, %v4174_v60  ;;  %8722 = vmatpush3.bf16.msra.mxu0 %v9788_v55  ;;  %v9799_v52 = vld [vmem:[#allocation3 + $0x138] sm:$0xff]  }
 0x422   : > { %v4193_v12 = vsel %vm4161_vm1, %v4119_v49, %v4177_v59  ;;  %8723 = vmatprep.subr.bf16.mxu0 %v9789_v0 }
 0x423   : > { %v4191_v26 = vsel %vm4159_vm0, %v4111_v17, %v4175_v15  ;;  %v14053_v61 = vpack.c.bf16 %v4193_v12, %v4192_v34 }
 0x424   : > { %9346 = vmatpush3.bf16.msra.mxu1 %v9778_v24  ;;  %v14055_v14 = vpack.c.bf16 %v4191_v26, %v4190_v63  ;;  %v9798_v24 = vld [vmem:[#allocation3 + $0xf0] sm:$0xff]  }
 0x425   : > { %9347 = vmatprep.subr.bf16.mxu1 %v9779_v4  ;;  %8724 = vmatpush3.bf16.msra.mxu0 %v9790_v50 }
 0x426   : > { %4490 = vmatmul.mubr.bf16.gmra.mrb[4].mxu1 %v14043_v39  ;;  %8725 = vmatprep.subr.bf16.mxu0 %v9791_v58 }
 0x427   : > { %9336 = vmatmul.mubr.bf16.gmra.mrb[24].mxu0 %v13563_v3  ;;  %4497 = vmatprep.mubr.bf16.mxu1 %v15275_v32 }
 0x428   : > { %9339 = vmatprep.mubr.bf16.mxu0 %v13944_v62  ;;  %9348 = vmatpush3.bf16.msra.mxu1 %v9779_v4 }
 0x429   : > { %9349 = vmatprep.subr.bf16.mxu1 %v9780_v54  ;;  %8726 = vmatpush3.bf16.msra.mxu0 %v9792_v1 }
 0x42a   : > { %8727 = vmatprep.subr.bf16.mxu0 %v9793_v44 }
 0x42c   : > { %9350 = vmatpush3.bf16.msra.mxu1 %v9780_v54 }
 0x42d   : > { %9351 = vmatprep.subr.bf16.mxu1 %v9781_v29  ;;  %8728 = vmatpush3.bf16.msra.mxu0 %v9794_v51 }
 0x42e   : > { %4498 = vmatmul.mubr.bf16.gmra.mrb[8].mxu1 %v14055_v14 }
 0x42f   : > { %9340 = vmatmul.mubr.bf16.gmra.mrb[28].mxu0 %v14026_v28  ;;  %4505 = vmatprep.mubr.bf16.mxu1 %v15275_v32 }
 0x430   : > { %4980 = vmatprep.mubr.bf16.mxu0 %v4202_v43  ;;  %9352 = vmatpush3.bf16.msra.mxu1 %v9781_v29  ;;  %v9795_v43 = vld [vmem:[#allocation3 + $0x128] sm:$0xff]  }
 0x431   : > { %9353 = vmatprep.subr.bf16.mxu1 %v9782_v41  ;;  %8729 = vmatprep.subr.bf16.mxu0 %v9795_v43 }
 0x432   : > { %8730 = vmatpush3.bf16.msra.mxu0 %v9796_v46 }
 0x433   : > { %8731 = vmatprep.subr.bf16.mxu0 %v9797_v45 }
 0x434   : > { %9354 = vmatpush3.bf16.msra.mxu1 %v9782_v41 }
 0x435   : > { %9355 = vmatprep.subr.bf16.mxu1 %v9783_v8 }
 0x436   : > { %4506 = vmatmul.mubr.bf16.gmra.mrb[12].mxu1 %v14053_v61  ;;  %8732 = vmatpush3.bf16.msra.mxu0 %v9798_v24 }
 0x437   : > { %4513 = vmatprep.mubr.bf16.mxu1 %v15275_v32  ;;  %8733 = vmatprep.subr.bf16.mxu0 %v9799_v52 }
 0x438   : > { %9356 = vmatpush3.bf16.msra.mxu1 %v9783_v8 }
 0x439   : > { %9357 = vmatprep.subr.bf16.mxu1 %v9784_v6 }
 0x43a   : > { %8734 = vmatpush3.bf16.msra.mxu0 %v9800_v23 }
 0x43b   : > { %9375 = vmatprep.subr.bf16.mxu0 %v14076_v20 }
 0x43c   : > { %9358 = vmatpush3.bf16.msra.mxu1 %v9784_v6 }
 0x45e   : > { %v9305_v31 = vpop.f32.mrb[8].mxu0 }
 0x45f   : > { %v4132_v9 = vadd.f32 %v9305_v31, %v14035_v21  ;;  %v4123_v36 = vpop.f32.mrb[9].mxu0 }
 0x460   : > { %v4124_v57 = vadd.f32 %v14035_v21, %v4123_v36  ;;  %v9306_v33 = vpop.f32.mrb[10].mxu0 }
 0x461   : > { %v4180_v19 = vmul.f32 0.01, %v4132_v9  ;;  %v4135_v37 = vadd.f32 %v9306_v33, %v14035_v21  ;;  %v4126_v42 = vpop.f32.mrb[11].mxu0  ;;  %vm4164_vm8 = vcmp.gt.f32.partialorder %v4132_v9, 0.0 }
 0x462   : > { %v4178_v27 = vmul.f32 0.01, %v4124_v57  ;;  %v4127_v22 = vadd.f32 %v14035_v21, %v4126_v42  ;;  %vm4162_vm9 = vcmp.gt.f32.partialorder %v4124_v57, 0.0 }
 0x463   : > { %vm4165_vm11 = vcmp.gt.f32.partialorder %v4135_v37, 0.0  ;;  %v4181_v2 = vmul.f32 0.01, %v4135_v37  ;;  %v4196_v38 = vsel %vm4164_vm8, %v4132_v9, %v4180_v19 }
 0x464   : > { %vm4163_vm12 = vcmp.gt.f32.partialorder %v4127_v22, 0.0  ;;  %v4179_v5 = vmul.f32 0.01, %v4127_v22  ;;  %v4194_v7 = vsel %vm4162_vm9, %v4124_v57, %v4178_v27 }
 0x465   : > { %v4197_v35 = vsel %vm4165_vm11, %v4135_v37, %v4181_v2 }
 0x466   : > { %v4195_v47 = vsel %vm4163_vm12, %v4127_v22, %v4179_v5  ;;  %v14068_v56 = vpack.c.bf16 %v4197_v35, %v4196_v38 }
 0x467   : > { %v14070_v16 = vpack.c.bf16 %v4195_v47, %v4194_v7  ;;  %v14102_v7 = vld [vmem:[%s14893_s5] ss:$0 sm:$0xff] }
 0x469   : > { %4514 = vmatmul.mubr.bf16.gmra.mrb[16].mxu1 %v14070_v16 }
 0x46a   : > { %4521 = vmatprep.mubr.bf16.mxu1 %v15275_v32 }
 0x471   : > { %4522 = vmatmul.mubr.bf16.gmra.mrb[20].mxu1 %v14068_v56 }
 0x472   : > { %4529 = vmatprep.mubr.bf16.mxu1 %v15275_v32 }
 0x4e2   : > { %v9309_v49 = vpop.f32.mrb[12].mxu0 }
 0x4e3   : > { %v4148_v18 = vadd.f32 %v9309_v49, %v14035_v21  ;;  %v4139_v60 = vpop.f32.mrb[13].mxu0 }
 0x4e4   : > { %v4140_v17 = vadd.f32 %v14035_v21, %v4139_v60  ;;  %v9310_v59 = vpop.f32.mrb[14].mxu0 }
 0x4e5   : > { %v4184_v15 = vmul.f32 0.01, %v4148_v18  ;;  %v4151_v34 = vadd.f32 %v9310_v59, %v14035_v21  ;;  %v4142_v12 = vpop.f32.mrb[15].mxu0  ;;  %vm4168_vm13 = vcmp.gt.f32.partialorder %v4148_v18, 0.0 }
 0x4e6   : > { %v4182_v63 = vmul.f32 0.01, %v4140_v17  ;;  %v4143_v26 = vadd.f32 %v14035_v21, %v4142_v12  ;;  %vm4166_vm14 = vcmp.gt.f32.partialorder %v4140_v17, 0.0 }
 0x4e7   : > { %vm4169_vm2 = vcmp.gt.f32.partialorder %v4151_v34, 0.0  ;;  %v4185_v31 = vmul.f32 0.01, %v4151_v34  ;;  %v4200_v36 = vsel %vm4168_vm13, %v4148_v18, %v4184_v15 }
 0x4e8   : > { %vm4167_vm3 = vcmp.gt.f32.partialorder %v4143_v26, 0.0  ;;  %v4183_v9 = vmul.f32 0.01, %v4143_v26  ;;  %v4198_v4 = vsel %vm4166_vm14, %v4140_v17, %v4182_v63 }
 0x4e9   : > { %v4201_v57 = vsel %vm4169_vm2, %v4151_v34, %v4185_v31 }
 0x4ea   : > { %v9329_v33 = vpop.f32.mrb[16].mxu0  ;;  %v4199_v19 = vsel %vm4167_vm3, %v4143_v26, %v4183_v9  ;;  %v14083_v37 = vpack.c.bf16 %v4201_v57, %v4200_v36 }
 0x4eb   : > { %v4580_v42 = vpop.f32.mrb[17].mxu0  ;;  %v14085_v27 = vpack.c.bf16 %v4199_v19, %v4198_v4 }
 0x4ec   : > { %v9330_v22 = vpop.f32.mrb[18].mxu0 }
 0x4ed   : > { %4530 = vmatmul.mubr.bf16.gmra.mrb[24].mxu1 %v14085_v27  ;;  %v4583_v2 = vpop.f32.mrb[19].mxu0 }
 0x4ee   : > { %4537 = vmatprep.mubr.bf16.mxu1 %v15275_v32 }
 0x4f1   : > { %v8655_v35 = vpop.f32.mrb[0].mxu1 }
 0x4f2   : > { %v14089_v21 = vpop.f32.mrb[20].mxu0  ;;  %v8656_v47 = vpop.f32.mrb[1].mxu1 }
 0x4f3   : > { %v14091_v5 = vpop.f32.mrb[21].mxu0  ;;  %v8657_v29 = vadd.f32 %v8656_v47, %v8655_v35  ;;  %v8658_v41 = vpop.f32.mrb[2].mxu1 }
 0x4f4   : > { %v14093_v54 = vpop.f32.mrb[22].mxu0  ;;  %v8659_v6 = vpop.f32.mrb[3].mxu1 }
 0x4f5   : > { %4538 = vmatmul.mubr.bf16.gmra.mrb[28].mxu1 %v14083_v37  ;;  %v14096_v38 = vpop.f32.mrb[23].mxu0  ;;  %v4484_v40 = vadd.f32 %v8657_v29, %v14102_v7  ;;  %v8660_v48 = vadd.f32 %v8659_v6, %v8658_v41 }
 0x4f6   : > { %9359 = vmatprep.mubr.bf16.mxu1 %v15270_v53 }
 0x4f7   : > { %v4581_v0 = vadd.f32 %v4580_v42, %v4484_v40  ;;  %v4487_v50 = vadd.f32 %v8660_v48, %v14102_v7 }
 0x4f9   : > { %v4675_v58 = vmul.f32 0.01, %v4581_v0  ;;  %v4584_v1 = vadd.f32 %v4583_v2, %v4487_v50  ;;  %v8661_v44 = vpop.f32.mrb[4].mxu1  ;;  %vm4659_vm4 = vcmp.gt.f32.partialorder %v4581_v0, 0.0 }
 0x4fa   : > { %v14104_v32 = vpop.f32.mrb[24].mxu0  ;;  %v8662_v51 = vpop.f32.mrb[5].mxu1 }
 0x4fb   : > { %v14106_v8 = vpop.f32.mrb[25].mxu0  ;;  %vm4660_vm6 = vcmp.gt.f32.partialorder %v4584_v1, 0.0  ;;  %v4676_v46 = vmul.f32 0.01, %v4584_v1  ;;  %v8663_v45 = vadd.f32 %v8662_v51, %v8661_v44  ;;  %v8664_v24 = vpop.f32.mrb[6].mxu1  ;;  %v4691_v18 = vsel %vm4659_vm4, %v4581_v0, %v4675_v58 }
 0x4fc   : > { %v14108_v30 = vpop.f32.mrb[26].mxu0  ;;  %v8665_v23 = vpop.f32.mrb[7].mxu1 }
 0x4fd   : > { %v14111_v55 = vpop.f32.mrb[27].mxu0  ;;  %9360 = vmatmul.mubr.bf16.vlgmr.msra.gmra.mrb[32].mxu1 %v15271_v10  ;;  %v4692_v60 = vsel %vm4660_vm6, %v4584_v1, %v4676_v46  ;;  %v4492_v17 = vadd.f32 %v8663_v45, %v14102_v7  ;;  %v8666_v59 = vadd.f32 %v8665_v23, %v8664_v24 }
 0x4fe   : > { %9363 = vmatprep.mubr.bf16.mxu1 %v15272_v13  ;;  %v4707_v34 = vpack.c.bf16 %v4692_v60, %v4691_v18 }
 0x4ff   : > { %v4589_v12 = vadd.f32 %v9329_v33, %v4492_v17  ;;  %v4495_v63 = vadd.f32 %v8666_v59, %v14102_v7 }
 0x500   : > { %4981 = vmatmul.mubr.bf16.vlgmr.msra.gmra.mrb[32].mxu0 %v4707_v34 }
 0x501   : > { %v4677_v26 = vmul.f32 0.01, %v4589_v12  ;;  %v4592_v31 = vadd.f32 %v9330_v22, %v4495_v63  ;;  %4988 = vmatprep.mubr.bf16.mxu0 %v14043_v39  ;;  %v8667_v9 = vpop.f32.mrb[8].mxu1  ;;  %9376 = vmatpush3.bf16.msra.mxu0 %v14076_v20  ;;  %vm4661_vm10 = vcmp.gt.f32.partialorder %v4589_v12, 0.0  ;;  %v9802_v63 = vld [vmem:[#allocation3 + $0x208] sm:$0xff]  }
 0x502   : > { %v14116_v43 = vpop.f32.mrb[28].mxu0  ;;  %v8668_v36 = vpop.f32.mrb[9].mxu1  ;;  %9377 = vmatprep.subr.bf16.mxu0 %v9802_v63 }
 0x503   : > { %v14118_v52 = vpop.f32.mrb[29].mxu0  ;;  %v4678_v57 = vmul.f32 0.01, %v4592_v31  ;;  %vm4662_vm15 = vcmp.gt.f32.partialorder %v4592_v31, 0.0  ;;  %v8669_v4 = vadd.f32 %v8668_v36, %v8667_v9  ;;  %v8670_v19 = vpop.f32.mrb[10].mxu1  ;;  %v4693_v2 = vsel %vm4661_vm10, %v4589_v12, %v4677_v26  ;;  %v9803_v36 = vld [vmem:[#allocation3 + $0x210] sm:$0xff]  }
 0x504   : > { %v14120_v49 = vpop.f32.mrb[30].mxu0  ;;  %v8671_v42 = vpop.f32.mrb[11].mxu1 }
 0x505   : > { %v14123_v15 = vpop.f32.mrb[31].mxu0  ;;  %9364 = vmatmul.mubr.bf16.gmra.mrb[36].mxu1 %v15273_v11  ;;  %v4694_v35 = vsel %vm4662_vm15, %v4592_v31, %v4678_v57  ;;  %v4500_v33 = vadd.f32 %v8669_v4, %v14102_v7  ;;  %v8672_v47 = vadd.f32 %v8671_v42, %v8670_v19  ;;  %9378 = vmatpush3.bf16.msra.mxu0 %v9802_v63  ;;  %v9823_v63 = vld [vmem:[#allocation3 + $0x1f8] sm:$0xff]  }
 0x506   : > { %9367 = vmatprep.mubr.bf16.mxu1 %v15274_v25  ;;  %v14132_v22 = vpack.c.bf16 %v4694_v35, %v4693_v2  ;;  %9379 = vmatprep.subr.bf16.mxu0 %v9803_v36 }
 0x507   : > { %v4597_v39 = vadd.f32 %v14091_v5, %v4500_v33  ;;  %v4503_v20 = vadd.f32 %v8672_v47, %v14102_v7  ;;  %v9804_v33 = vld [vmem:[#allocation3 + $0x218] sm:$0xff]  }
 0x508   : > { %4989 = vmatmul.mubr.bf16.gmra.mrb[36].mxu0 %v14132_v22 }
 0x509   : > { %4996 = vmatprep.mubr.bf16.mxu0 %v14055_v14  ;;  %v4679_v29 = vmul.f32 0.01, %v4597_v39  ;;  %v4600_v41 = vadd.f32 %v14096_v38, %v4503_v20  ;;  %v8673_v6 = vpop.f32.mrb[12].mxu1  ;;  %vm4663_vm5 = vcmp.gt.f32.partialorder %v4597_v39, 0.0  ;;  %9380 = vmatpush3.bf16.msra.mxu0 %v9803_v36 }
 0x50a   : > { %v8674_v40 = vpop.f32.mrb[13].mxu1  ;;  %9381 = vmatprep.subr.bf16.mxu0 %v9804_v33 }
 0x50b   : > { %v4680_v48 = vmul.f32 0.01, %v4600_v41  ;;  %v8675_v0 = vadd.f32 %v8674_v40, %v8673_v6  ;;  %v8676_v50 = vpop.f32.mrb[14].mxu1  ;;  %vm4664_vm7 = vcmp.gt.f32.partialorder %v4600_v41, 0.0  ;;  %v4695_v44 = vsel %vm4663_vm5, %v4597_v39, %v4679_v29  ;;  %v9805_v40 = vld [vmem:[#allocation3 + $0x220] sm:$0xff]  }
 0x50c   : > { %v8677_v58 = vpop.f32.mrb[15].mxu1 }
 0x50d   : > { %9368 = vmatmul.mubr.bf16.gmra.mrb[40].mxu1 %v13563_v3  ;;  %v4508_v1 = vadd.f32 %v8675_v0, %v14102_v7  ;;  %v8678_v5 = vadd.f32 %v8677_v58, %v8676_v50  ;;  %v4696_v51 = vsel %vm4664_vm7, %v4600_v41, %v4680_v48  ;;  %9382 = vmatpush3.bf16.msra.mxu0 %v9804_v33  ;;  %v9806_v58 = vld [vmem:[#allocation3 + $0x228] sm:$0xff]  }
 0x50e   : > { %9371 = vmatprep.mubr.bf16.mxu1 %v13944_v62  ;;  %v14142_v46 = vpack.c.bf16 %v4696_v51, %v4695_v44  ;;  %9383 = vmatprep.subr.bf16.mxu0 %v9805_v40  ;;  %v9807_v44 = vld [vmem:[#allocation3 + $0x230] sm:$0xff]   ;;  %v9810_v51 = vld [vmem:[#allocation3 + $0x180] sm:$0xff]  }
 0x50f   : > { %v4605_v14 = vadd.f32 %v14089_v21, %v4508_v1  ;;  %v4511_v38 = vadd.f32 %v8678_v5, %v14102_v7 }
 0x510   : > { %4997 = vmatmul.mubr.bf16.gmra.mrb[40].mxu0 %v14142_v46 }
 0x511   : > { %v4681_v45 = vmul.f32 0.01, %v4605_v14  ;;  %v4608_v24 = vadd.f32 %v14093_v54, %v4511_v38  ;;  %5004 = vmatprep.mubr.bf16.mxu0 %v14053_v61  ;;  %vm4665_vm1 = vcmp.gt.f32.partialorder %v4605_v14, 0.0  ;;  %9384 = vmatpush3.bf16.msra.mxu0 %v9805_v40  ;;  %v9812_v38 = vld [vmem:[#allocation3 + $0x188] sm:$0xff]  }
 0x512   : > { %9385 = vmatprep.subr.bf16.mxu0 %v9806_v58 }
 0x513   : > { %v4682_v23 = vmul.f32 0.01, %v4608_v24  ;;  %vm4666_vm0 = vcmp.gt.f32.partialorder %v4608_v24, 0.0  ;;  %v4697_v18 = vsel %vm4665_vm1, %v4605_v14, %v4681_v45  ;;  %v9811_v14 = vld [vmem:[#allocation3 + $0x1c8] sm:$0xff]   ;;  %v9813_v45 = vld [vmem:[#allocation3 + $0x1d0] sm:$0xff]  }
 0x515   : > { %9372 = vmatmul.mubr.bf16.gmra.mrb[44].mxu1 %v14026_v28  ;;  %v4698_v60 = vsel %vm4666_vm0, %v4608_v24, %v4682_v23  ;;  %9386 = vmatpush3.bf16.msra.mxu0 %v9806_v58  ;;  %v9814_v24 = vld [vmem:[#allocation3 + $0x190] sm:$0xff]   ;;  %v9815_v23 = vld [vmem:[#allocation3 + $0x1d8] sm:$0xff]  }
 0x516   : > { %5479 = vmatprep.mubr.bf16.mxu1 %v4707_v34  ;;  %v14149_v17 = vpack.c.bf16 %v4698_v60, %v4697_v18  ;;  %9387 = vmatprep.subr.bf16.mxu0 %v9807_v44  ;;  %v9816_v18 = vld [vmem:[#allocation3 + $0x198] sm:$0xff]   ;;  %v9818_v60 = vld [vmem:[#allocation3 + $0x1a0] sm:$0xff]  }
 0x518   : > { %5005 = vmatmul.mubr.bf16.gmra.mrb[44].mxu0 %v14149_v17 }
 0x519   : > { %5012 = vmatprep.mubr.bf16.mxu0 %v14070_v16  ;;  %9388 = vmatpush3.bf16.msra.mxu0 %v9807_v44 }
 0x53c   : > { %v8679_v21 = vpop.f32.mrb[16].mxu1 }
 0x53d   : > { %v8680_v59 = vpop.f32.mrb[17].mxu1 }
 0x53e   : > { %v8681_v34 = vadd.f32 %v8680_v59, %v8679_v21  ;;  %v8682_v12 = vpop.f32.mrb[18].mxu1  ;;  %v9819_v21 = vld [vmem:[#allocation3 + $0x1e8] sm:$0xff]  }
 0x53f   : > { %v8683_v26 = vpop.f32.mrb[19].mxu1  ;;  %v9820_v59 = vld [vmem:[#allocation3 + $0x1a8] sm:$0xff]  }
 0x540   : > { %v4516_v54 = vadd.f32 %v8681_v34, %v14102_v7  ;;  %v8684_v61 = vadd.f32 %v8683_v26, %v8682_v12  ;;  %v9821_v34 = vld [vmem:[#allocation3 + $0x1f0] sm:$0xff]   ;;  %v9824_v26 = vld [vmem:[#allocation3 + $0x1b8] sm:$0xff]  }
 0x541   : > { %v9822_v12 = vld [vmem:[#allocation3 + $0x1b0] sm:$0xff]  }
 0x542   : > { %v4613_v31 = vadd.f32 %v14106_v8, %v4516_v54  ;;  %v4519_v9 = vadd.f32 %v8684_v61, %v14102_v7  ;;  %v14169_v54 = vld [vmem:[#allocation3 + $0x2c0] sm:$0xff]  }
 0x544   : > { %v4683_v57 = vmul.f32 0.01, %v4613_v31  ;;  %v4616_v4 = vadd.f32 %v14111_v55, %v4519_v9  ;;  %v8685_v16 = vpop.f32.mrb[20].mxu1  ;;  %vm4667_vm8 = vcmp.gt.f32.partialorder %v4613_v31, 0.0 }
 0x545   : > { %v8686_v19 = vpop.f32.mrb[21].mxu1 }
 0x546   : > { %v4684_v42 = vmul.f32 0.01, %v4616_v4  ;;  %v8687_v2 = vadd.f32 %v8686_v19, %v8685_v16  ;;  %v8688_v35 = vpop.f32.mrb[22].mxu1  ;;  %vm4668_vm9 = vcmp.gt.f32.partialorder %v4616_v4, 0.0  ;;  %v4699_v20 = vsel %vm4667_vm8, %v4613_v31, %v4683_v57 }
 0x547   : > { %v8689_v47 = vpop.f32.mrb[23].mxu1 }
 0x548   : > { %v4524_v39 = vadd.f32 %v8687_v2, %v14102_v7  ;;  %v8690_v8 = vadd.f32 %v8689_v47, %v8688_v35  ;;  %v4700_v29 = vsel %vm4668_vm9, %v4616_v4, %v4684_v42 }
 0x549   : > { %v14158_v41 = vpack.c.bf16 %v4700_v29, %v4699_v20 }
 0x54a   : > { %v4621_v55 = vadd.f32 %v14104_v32, %v4524_v39  ;;  %v4527_v6 = vadd.f32 %v8690_v8, %v14102_v7 }
 0x54b   : > { %5013 = vmatmul.mubr.bf16.gmra.mrb[48].mxu0 %v14158_v41 }
 0x54c   : > { %v4685_v48 = vmul.f32 0.01, %v4621_v55  ;;  %v4624_v0 = vadd.f32 %v14108_v30, %v4527_v6  ;;  %5020 = vmatprep.mubr.bf16.mxu0 %v14068_v56  ;;  %vm4669_vm11 = vcmp.gt.f32.partialorder %v4621_v55, 0.0  ;;  %v9808_v56 = vld [vmem:[#allocation3 + $0x238] sm:$0xff]   ;;  %v9809_v30 = vld [vmem:[#allocation3 + $0x1c0] sm:$0xff]  }
 0x54d   : > { %9389 = vmatprep.subr.bf16.mxu0 %v9808_v56  ;;  %8799 = vmatprep.subr.bf16.mxu1 %v9809_v30 }
 0x54e   : > { %v4686_v50 = vmul.f32 0.01, %v4624_v0  ;;  %vm4670_vm12 = vcmp.gt.f32.partialorder %v4624_v0, 0.0  ;;  %v4701_v1 = vsel %vm4669_vm11, %v4621_v55, %v4685_v48  ;;  %9390 = vmatpush3.bf16.msra.mxu0 %v9808_v56  ;;  %8800 = vmatpush3.bf16.msra.mxu1 %v9810_v51 }
 0x54f   : > { %8801 = vmatprep.subr.bf16.mxu1 %v9811_v14 }
 0x550   : > { %v4702_v5 = vsel %vm4670_vm12, %v4624_v0, %v4686_v50 }
 0x551   : > { %v14165_v32 = vpack.c.bf16 %v4702_v5, %v4701_v1 }
 0x552   : > { %8802 = vmatpush3.bf16.msra.mxu1 %v9812_v38 }
 0x553   : > { %5021 = vmatmul.mubr.bf16.gmra.mrb[52].mxu0 %v14165_v32  ;;  %8803 = vmatprep.subr.bf16.mxu1 %v9813_v45 }
 0x554   : > { %5028 = vmatprep.mubr.bf16.mxu0 %v14085_v27  ;;  %v9817_v27 = vld [vmem:[#allocation3 + $0x1e0] sm:$0xff]  }
 0x556   : > { %8804 = vmatpush3.bf16.msra.mxu1 %v9814_v24  ;;  %v14197_v24 = vld [vmem:[%s14893_s5 + $0x1] ss:$0 sm:$0xff] }
 0x557   : > { %8805 = vmatprep.subr.bf16.mxu1 %v9815_v23 }
 0x55a   : > { %8806 = vmatpush3.bf16.msra.mxu1 %v9816_v18 }
 0x55b   : > { %8807 = vmatprep.subr.bf16.mxu1 %v9817_v27 }
 0x55e   : > { %8808 = vmatpush3.bf16.msra.mxu1 %v9818_v60 }
 0x55f   : > { %8809 = vmatprep.subr.bf16.mxu1 %v9819_v21 }
 0x562   : > { %8810 = vmatpush3.bf16.msra.mxu1 %v9820_v59 }
 0x563   : > { %8811 = vmatprep.subr.bf16.mxu1 %v9821_v34 }
 0x566   : > { %8812 = vmatpush3.bf16.msra.mxu1 %v9822_v12 }
 0x567   : > { %8813 = vmatprep.subr.bf16.mxu1 %v9823_v63 }
 0x56a   : > { %8814 = vmatpush3.bf16.msra.mxu1 %v9824_v26 }
 0x56b   : > { %9407 = vmatprep.subr.bf16.mxu1 %v14169_v54 }
 0x5c0   : > { %v8691_v61 = vpop.f32.mrb[24].mxu1 }
 0x5c1   : > { %v8692_v31 = vpop.f32.mrb[25].mxu1 }
 0x5c2   : > { %v8693_v9 = vadd.f32 %v8692_v31, %v8691_v61  ;;  %v8694_v36 = vpop.f32.mrb[26].mxu1 }
 0x5c3   : > { %v8695_v57 = vpop.f32.mrb[27].mxu1 }
 0x5c4   : > { %v4532_v4 = vadd.f32 %v8693_v9, %v14102_v7  ;;  %v8696_v16 = vadd.f32 %v8695_v57, %v8694_v36 }
 0x5c6   : > { %v4629_v19 = vadd.f32 %v14118_v52, %v4532_v4  ;;  %v4535_v42 = vadd.f32 %v8696_v16, %v14102_v7 }
 0x5c8   : > { %v4687_v2 = vmul.f32 0.01, %v4629_v19  ;;  %v4632_v35 = vadd.f32 %v14123_v15, %v4535_v42  ;;  %v8697_v33 = vpop.f32.mrb[28].mxu1  ;;  %vm4671_vm13 = vcmp.gt.f32.partialorder %v4629_v19, 0.0 }
 0x5c9   : > { %v8698_v47 = vpop.f32.mrb[29].mxu1 }
 0x5ca   : > { %v4688_v39 = vmul.f32 0.01, %v4632_v35  ;;  %v8699_v8 = vadd.f32 %v8698_v47, %v8697_v33  ;;  %v8700_v20 = vpop.f32.mrb[30].mxu1  ;;  %vm4672_vm14 = vcmp.gt.f32.partialorder %v4632_v35, 0.0  ;;  %v4703_v40 = vsel %vm4671_vm13, %v4629_v19, %v4687_v2 }
 0x5cb   : > { %v8701_v29 = vpop.f32.mrb[31].mxu1 }
 0x5cc   : > { %v4540_v55 = vadd.f32 %v8699_v8, %v14102_v7  ;;  %v8702_v6 = vadd.f32 %v8701_v29, %v8700_v20  ;;  %v4704_v48 = vsel %vm4672_vm14, %v4632_v35, %v4688_v39 }
 0x5cd   : > { %v14177_v0 = vpack.c.bf16 %v4704_v48, %v4703_v40 }
 0x5ce   : > { %v4637_v52 = vadd.f32 %v14116_v43, %v4540_v55  ;;  %v4543_v50 = vadd.f32 %v8702_v6, %v14102_v7 }
 0x5cf   : > { %5029 = vmatmul.mubr.bf16.gmra.mrb[56].mxu0 %v14177_v0 }
 0x5d0   : > { %v4689_v15 = vmul.f32 0.01, %v4637_v52  ;;  %v4640_v58 = vadd.f32 %v14120_v49, %v4543_v50  ;;  %5036 = vmatprep.mubr.bf16.mxu0 %v14083_v37  ;;  %v9361_v1 = vpop.f32.mrb[32].mxu1  ;;  %vm4673_vm2 = vcmp.gt.f32.partialorder %v4637_v52, 0.0 }
 0x5d1   : > { %v5079_v5 = vpop.f32.mrb[33].mxu1 }
 0x5d2   : > { %v4690_v44 = vmul.f32 0.01, %v4640_v58  ;;  %v9362_v56 = vpop.f32.mrb[34].mxu1  ;;  %vm4674_vm3 = vcmp.gt.f32.partialorder %v4640_v58, 0.0  ;;  %v4705_v51 = vsel %vm4673_vm2, %v4637_v52, %v4689_v15 }
 0x5d3   : > { %v5082_v30 = vpop.f32.mrb[35].mxu1  ;;  %v8735_v37 = vpop.f32.mrb[32].mxu0 }
 0x5d4   : > { %v4706_v14 = vsel %vm4674_vm3, %v4640_v58, %v4690_v44  ;;  %v8736_v23 = vpop.f32.mrb[33].mxu0 }
 0x5d5   : > { %v14184_v38 = vpack.c.bf16 %v4706_v14, %v4705_v51  ;;  %v8737_v18 = vadd.f32 %v8736_v23, %v8735_v37  ;;  %v8738_v27 = vpop.f32.mrb[34].mxu0 }
 0x5d6   : > { %v8739_v60 = vpop.f32.mrb[35].mxu0 }
 0x5d7   : > { %5037 = vmatmul.mubr.bf16.gmra.mrb[60].mxu0 %v14184_v38  ;;  %v4983_v21 = vadd.f32 %v8737_v18, %v14197_v24  ;;  %v8740_v59 = vadd.f32 %v8739_v60, %v8738_v27 }
 0x5d8   : > { %v14187_v7 = vpop.f32.mrb[36].mxu1  ;;  %9391 = vmatprep.mubr.bf16.mxu0 %v15270_v53 }
 0x5d9   : > { %v5095_v43 = vpop.f32.mrb[37].mxu1  ;;  %v5080_v12 = vadd.f32 %v5079_v5, %v4983_v21  ;;  %v4986_v63 = vadd.f32 %v8740_v59, %v14197_v24 }
 0x5da   : > { %v14190_v49 = vpop.f32.mrb[38].mxu1 }
 0x5db   : > { %v14192_v45 = vpop.f32.mrb[39].mxu1  ;;  %v5174_v31 = vmul.f32 0.01, %v5080_v12  ;;  %v5083_v9 = vadd.f32 %v5082_v30, %v4986_v63  ;;  %v8741_v36 = vpop.f32.mrb[36].mxu0  ;;  %vm5158_vm4 = vcmp.gt.f32.partialorder %v5080_v12, 0.0 }
 0x5dc   : > { %v8742_v4 = vpop.f32.mrb[37].mxu0 }
 0x5dd   : > { %vm5159_vm6 = vcmp.gt.f32.partialorder %v5083_v9, 0.0  ;;  %v5175_v16 = vmul.f32 0.01, %v5083_v9  ;;  %v8743_v19 = vadd.f32 %v8742_v4, %v8741_v36  ;;  %v8744_v42 = vpop.f32.mrb[38].mxu0  ;;  %v5190_v35 = vsel %vm5158_vm4, %v5080_v12, %v5174_v31 }
 0x5de   : > { %v8745_v2 = vpop.f32.mrb[39].mxu0 }
 0x5df   : > { %9392 = vmatmul.mubr.bf16.vlgmr.msra.gmra.mrb[64].mxu0 %v15271_v10  ;;  %v5191_v33 = vsel %vm5159_vm6, %v5083_v9, %v5175_v16  ;;  %v4991_v47 = vadd.f32 %v8743_v19, %v14197_v24  ;;  %v8746_v39 = vadd.f32 %v8745_v2, %v8744_v42 }
 0x5e0   : > { %v14201_v34 = vpop.f32.mrb[40].mxu1  ;;  %9395 = vmatprep.mubr.bf16.mxu0 %v15272_v13  ;;  %v5206_v8 = vpack.c.bf16 %v5191_v33, %v5190_v35 }
 0x5e1   : > { %v14205_v26 = vpop.f32.mrb[41].mxu1  ;;  %v5088_v29 = vadd.f32 %v9361_v1, %v4991_v47  ;;  %v4994_v55 = vadd.f32 %v8746_v39, %v14197_v24 }
 0x5e2   : > { %v14207_v61 = vpop.f32.mrb[42].mxu1  ;;  %5480 = vmatmul.mubr.bf16.vlgmr.msra.gmra.mrb[48].mxu1 %v5206_v8 }
 0x5e3   : > { %v14209_v57 = vpop.f32.mrb[43].mxu1  ;;  %v5176_v48 = vmul.f32 0.01, %v5088_v29  ;;  %v5091_v52 = vadd.f32 %v9362_v56, %v4994_v55  ;;  %5487 = vmatprep.mubr.bf16.mxu1 %v14132_v22  ;;  %v8747_v50 = vpop.f32.mrb[40].mxu0  ;;  %9408 = vmatpush3.bf16.msra.mxu1 %v14169_v54  ;;  %vm5160_vm10 = vcmp.gt.f32.partialorder %v5088_v29, 0.0  ;;  %v9826_v55 = vld [vmem:[#allocation3 + $0x2c8] sm:$0xff]  }
 0x5e4   : > { %v8748_v58 = vpop.f32.mrb[41].mxu0  ;;  %9409 = vmatprep.subr.bf16.mxu1 %v9826_v55 }
 0x5e5   : > { %v5177_v5 = vmul.f32 0.01, %v5091_v52  ;;  %vm5161_vm15 = vcmp.gt.f32.partialorder %v5091_v52, 0.0  ;;  %v8749_v1 = vadd.f32 %v8748_v58, %v8747_v50  ;;  %v8750_v44 = vpop.f32.mrb[42].mxu0  ;;  %v5192_v51 = vsel %vm5160_vm10, %v5088_v29, %v5176_v48  ;;  %v9827_v58 = vld [vmem:[#allocation3 + $0x2d0] sm:$0xff]  }
 0x5e6   : > { %v8751_v30 = vpop.f32.mrb[43].mxu0 }
 0x5e7   : > { %9396 = vmatmul.mubr.bf16.gmra.mrb[68].mxu0 %v15273_v11  ;;  %v5193_v14 = vsel %vm5161_vm15, %v5091_v52, %v5177_v5  ;;  %v4999_v37 = vadd.f32 %v8749_v1, %v14197_v24  ;;  %v8752_v23 = vadd.f32 %v8751_v30, %v8750_v44  ;;  %9410 = vmatpush3.bf16.msra.mxu1 %v9826_v55  ;;  %v9847_v55 = vld [vmem:[#allocation3 + $0x2b8] sm:$0xff]  }
 0x5e8   : > { %v14213_v20 = vpop.f32.mrb[44].mxu1  ;;  %9399 = vmatprep.mubr.bf16.mxu0 %v15274_v25  ;;  %v14227_v22 = vpack.c.bf16 %v5193_v14, %v5192_v51  ;;  %9411 = vmatprep.subr.bf16.mxu1 %v9827_v58 }
 0x5e9   : > { %v14217_v6 = vpop.f32.mrb[45].mxu1  ;;  %v5096_v54 = vadd.f32 %v5095_v43, %v4999_v37  ;;  %v5002_v56 = vadd.f32 %v8752_v23, %v14197_v24  ;;  %v9828_v37 = vld [vmem:[#allocation3 + $0x2d8] sm:$0xff]  }
 0x5ea   : > { %v14219_v40 = vpop.f32.mrb[46].mxu1  ;;  %5488 = vmatmul.mubr.bf16.gmra.mrb[52].mxu1 %v14227_v22 }
 0x5eb   : > { %v14223_v15 = vpop.f32.mrb[47].mxu1  ;;  %5495 = vmatprep.mubr.bf16.mxu1 %v14142_v46  ;;  %v5178_v18 = vmul.f32 0.01, %v5096_v54  ;;  %v5099_v27 = vadd.f32 %v14192_v45, %v5002_v56  ;;  %v8753_v60 = vpop.f32.mrb[44].mxu0  ;;  %vm5162_vm5 = vcmp.gt.f32.partialorder %v5096_v54, 0.0  ;;  %9412 = vmatpush3.bf16.msra.mxu1 %v9827_v58 }
 0x5ec   : > { %v8754_v21 = vpop.f32.mrb[45].mxu0  ;;  %9413 = vmatprep.subr.bf16.mxu1 %v9828_v37 }
 0x5ed   : > { %v5179_v59 = vmul.f32 0.01, %v5099_v27  ;;  %v8755_v12 = vadd.f32 %v8754_v21, %v8753_v60  ;;  %v8756_v63 = vpop.f32.mrb[46].mxu0  ;;  %vm5163_vm7 = vcmp.gt.f32.partialorder %v5099_v27, 0.0  ;;  %v5194_v36 = vsel %vm5162_vm5, %v5096_v54, %v5178_v18  ;;  %v9829_v21 = vld [vmem:[#allocation3 + $0x2e0] sm:$0xff]  }
 0x5ee   : > { %v8757_v31 = vpop.f32.mrb[47].mxu0 }
 0x5ef   : > { %9400 = vmatmul.mubr.bf16.gmra.mrb[72].mxu0 %v13563_v3  ;;  %v5007_v9 = vadd.f32 %v8755_v12, %v14197_v24  ;;  %v8758_v43 = vadd.f32 %v8757_v31, %v8756_v63  ;;  %v5195_v4 = vsel %vm5163_vm7, %v5099_v27, %v5179_v59  ;;  %9414 = vmatpush3.bf16.msra.mxu1 %v9828_v37  ;;  %v9830_v31 = vld [vmem:[#allocation3 + $0x2e8] sm:$0xff]  }
 0x5f0   : > { %9403 = vmatprep.mubr.bf16.mxu0 %v13944_v62  ;;  %v14236_v16 = vpack.c.bf16 %v5195_v4, %v5194_v36  ;;  %9415 = vmatprep.subr.bf16.mxu1 %v9829_v21  ;;  %v9831_v36 = vld [vmem:[#allocation3 + $0x2f0] sm:$0xff]   ;;  %v9834_v4 = vld [vmem:[#allocation3 + $0x240] sm:$0xff]  }
 0x5f1   : > { %v5104_v46 = vadd.f32 %v14187_v7, %v5007_v9  ;;  %v5010_v45 = vadd.f32 %v8758_v43, %v14197_v24 }
 0x5f2   : > { %5496 = vmatmul.mubr.bf16.gmra.mrb[56].mxu1 %v14236_v16 }
 0x5f3   : > { %v5180_v19 = vmul.f32 0.01, %v5104_v46  ;;  %v5107_v42 = vadd.f32 %v14190_v49, %v5010_v45  ;;  %5503 = vmatprep.mubr.bf16.mxu1 %v14149_v17  ;;  %vm5164_vm1 = vcmp.gt.f32.partialorder %v5104_v46, 0.0  ;;  %9416 = vmatpush3.bf16.msra.mxu1 %v9829_v21  ;;  %v9836_v45 = vld [vmem:[#allocation3 + $0x248] sm:$0xff]  }
 0x5f4   : > { %9417 = vmatprep.subr.bf16.mxu1 %v9830_v31 }
 0x5f5   : > { %v5181_v2 = vmul.f32 0.01, %v5107_v42  ;;  %vm5165_vm0 = vcmp.gt.f32.partialorder %v5107_v42, 0.0  ;;  %v5196_v35 = vsel %vm5164_vm1, %v5104_v46, %v5180_v19  ;;  %v9835_v46 = vld [vmem:[#allocation3 + $0x288] sm:$0xff]   ;;  %v9837_v19 = vld [vmem:[#allocation3 + $0x290] sm:$0xff]  }
 0x5f7   : > { %9404 = vmatmul.mubr.bf16.gmra.mrb[76].mxu0 %v14026_v28  ;;  %v5197_v33 = vsel %vm5165_vm0, %v5107_v42, %v5181_v2  ;;  %9418 = vmatpush3.bf16.msra.mxu1 %v9830_v31  ;;  %v9838_v42 = vld [vmem:[#allocation3 + $0x250] sm:$0xff]   ;;  %v9839_v2 = vld [vmem:[#allocation3 + $0x298] sm:$0xff]  }
 0x5f8   : > { %5978 = vmatprep.mubr.bf16.mxu0 %v5206_v8  ;;  %v14243_v47 = vpack.c.bf16 %v5197_v33, %v5196_v35  ;;  %9419 = vmatprep.subr.bf16.mxu1 %v9831_v36  ;;  %v9840_v35 = vld [vmem:[#allocation3 + $0x258] sm:$0xff]   ;;  %v9842_v33 = vld [vmem:[#allocation3 + $0x260] sm:$0xff]  }
 0x5fa   : > { %5504 = vmatmul.mubr.bf16.gmra.mrb[60].mxu1 %v14243_v47 }
 0x5fb   : > { %5511 = vmatprep.mubr.bf16.mxu1 %v14158_v41  ;;  %9420 = vmatpush3.bf16.msra.mxu1 %v9831_v36 }
 0x61e   : > { %v8759_v7 = vpop.f32.mrb[48].mxu0 }
 0x61f   : > { %v8760_v39 = vpop.f32.mrb[49].mxu0 }
 0x620   : > { %v8761_v8 = vadd.f32 %v8760_v39, %v8759_v7  ;;  %v8762_v29 = vpop.f32.mrb[50].mxu0  ;;  %v9843_v7 = vld [vmem:[#allocation3 + $0x2a8] sm:$0xff]  }
 0x621   : > { %v8763_v48 = vpop.f32.mrb[51].mxu0  ;;  %v9844_v39 = vld [vmem:[#allocation3 + $0x268] sm:$0xff]  }
 0x622   : > { %v5015_v49 = vadd.f32 %v8761_v8, %v14197_v24  ;;  %v8764_v17 = vadd.f32 %v8763_v48, %v8762_v29  ;;  %v9845_v8 = vld [vmem:[#allocation3 + $0x2b0] sm:$0xff]   ;;  %v9848_v48 = vld [vmem:[#allocation3 + $0x278] sm:$0xff]  }
 0x623   : > { %v9846_v29 = vld [vmem:[#allocation3 + $0x270] sm:$0xff]  }
 0x624   : > { %v5112_v52 = vadd.f32 %v14205_v26, %v5015_v49  ;;  %v5018_v50 = vadd.f32 %v8764_v17, %v14197_v24  ;;  %v14263_v49 = vld [vmem:[#allocation3 + $0x380] sm:$0xff]  }
 0x626   : > { %v5182_v5 = vmul.f32 0.01, %v5112_v52  ;;  %v5115_v1 = vadd.f32 %v14209_v57, %v5018_v50  ;;  %v8765_v41 = vpop.f32.mrb[52].mxu0  ;;  %vm5166_vm8 = vcmp.gt.f32.partialorder %v5112_v52, 0.0 }
 0x627   : > { %v8766_v44 = vpop.f32.mrb[53].mxu0 }
 0x628   : > { %v5183_v30 = vmul.f32 0.01, %v5115_v1  ;;  %v8767_v51 = vadd.f32 %v8766_v44, %v8765_v41  ;;  %v8768_v14 = vpop.f32.mrb[54].mxu0  ;;  %vm5167_vm9 = vcmp.gt.f32.partialorder %v5115_v1, 0.0  ;;  %v5198_v56 = vsel %vm5166_vm8, %v5112_v52, %v5182_v5 }
 0x629   : > { %v8769_v23 = vpop.f32.mrb[55].mxu0 }
 0x62a   : > { %v5023_v54 = vadd.f32 %v8767_v51, %v14197_v24  ;;  %v8770_v26 = vadd.f32 %v8769_v23, %v8768_v14  ;;  %v5199_v18 = vsel %vm5167_vm9, %v5115_v1, %v5183_v30 }
 0x62b   : > { %v14252_v27 = vpack.c.bf16 %v5199_v18, %v5198_v56 }
 0x62c   : > { %v5120_v57 = vadd.f32 %v14201_v34, %v5023_v54  ;;  %v5026_v60 = vadd.f32 %v8770_v26, %v14197_v24 }
 0x62d   : > { %5512 = vmatmul.mubr.bf16.gmra.mrb[64].mxu1 %v14252_v27 }
 0x62e   : > { %v5184_v59 = vmul.f32 0.01, %v5120_v57  ;;  %v5123_v12 = vadd.f32 %v14207_v61, %v5026_v60  ;;  %5519 = vmatprep.mubr.bf16.mxu1 %v14165_v32  ;;  %vm5168_vm11 = vcmp.gt.f32.partialorder %v5120_v57, 0.0  ;;  %v9832_v32 = vld [vmem:[#allocation3 + $0x2f8] sm:$0xff]   ;;  %v9833_v61 = vld [vmem:[#allocation3 + $0x280] sm:$0xff]  }
 0x62f   : > { %9421 = vmatprep.subr.bf16.mxu1 %v9832_v32  ;;  %8879 = vmatprep.subr.bf16.mxu0 %v9833_v61 }
 0x630   : > { %v5185_v63 = vmul.f32 0.01, %v5123_v12  ;;  %vm5169_vm12 = vcmp.gt.f32.partialorder %v5123_v12, 0.0  ;;  %v5200_v9 = vsel %vm5168_vm11, %v5120_v57, %v5184_v59  ;;  %9422 = vmatpush3.bf16.msra.mxu1 %v9832_v32  ;;  %8880 = vmatpush3.bf16.msra.mxu0 %v9834_v4 }
 0x631   : > { %8881 = vmatprep.subr.bf16.mxu0 %v9835_v46 }
 0x632   : > { %v5201_v43 = vsel %vm5169_vm12, %v5123_v12, %v5185_v63 }
 0x633   : > { %v14259_v34 = vpack.c.bf16 %v5201_v43, %v5200_v9 }
 0x634   : > { %8882 = vmatpush3.bf16.msra.mxu0 %v9836_v45 }
 0x635   : > { %5520 = vmatmul.mubr.bf16.gmra.mrb[68].mxu1 %v14259_v34  ;;  %8883 = vmatprep.subr.bf16.mxu0 %v9837_v19 }
 0x636   : > { %5527 = vmatprep.mubr.bf16.mxu1 %v14177_v0  ;;  %v9841_v0 = vld [vmem:[#allocation3 + $0x2a0] sm:$0xff]  }
 0x638   : > { %8884 = vmatpush3.bf16.msra.mxu0 %v9838_v42  ;;  %v14291_v42 = vld [vmem:[%s14893_s5 + $0x2] ss:$0 sm:$0xff] }
 0x639   : > { %8885 = vmatprep.subr.bf16.mxu0 %v9839_v2 }
 0x63c   : > { %8886 = vmatpush3.bf16.msra.mxu0 %v9840_v35 }
 0x63d   : > { %8887 = vmatprep.subr.bf16.mxu0 %v9841_v0 }
 0x640   : > { %8888 = vmatpush3.bf16.msra.mxu0 %v9842_v33 }
 0x641   : > { %8889 = vmatprep.subr.bf16.mxu0 %v9843_v7 }
 0x644   : > { %8890 = vmatpush3.bf16.msra.mxu0 %v9844_v39 }
 0x645   : > { %8891 = vmatprep.subr.bf16.mxu0 %v9845_v8 }
 0x648   : > { %8892 = vmatpush3.bf16.msra.mxu0 %v9846_v29 }
 0x649   : > { %8893 = vmatprep.subr.bf16.mxu0 %v9847_v55 }
 0x64c   : > { %8894 = vmatpush3.bf16.msra.mxu0 %v9848_v48 }
 0x64d   : > { %9439 = vmatprep.subr.bf16.mxu0 %v14263_v49 }
 0x6a2   : > { %v8771_v17 = vpop.f32.mrb[56].mxu0 }
 0x6a3   : > { %v8772_v52 = vpop.f32.mrb[57].mxu0 }
 0x6a4   : > { %v8773_v50 = vadd.f32 %v8772_v52, %v8771_v17  ;;  %v8774_v58 = vpop.f32.mrb[58].mxu0 }
 0x6a5   : > { %v8775_v5 = vpop.f32.mrb[59].mxu0 }
 0x6a6   : > { %v5031_v1 = vadd.f32 %v8773_v50, %v14197_v24  ;;  %v8776_v41 = vadd.f32 %v8775_v5, %v8774_v58 }
 0x6a8   : > { %v5128_v44 = vadd.f32 %v14217_v6, %v5031_v1  ;;  %v5034_v30 = vadd.f32 %v8776_v41, %v14197_v24 }
 0x6aa   : > { %v5186_v51 = vmul.f32 0.01, %v5128_v44  ;;  %v5131_v14 = vadd.f32 %v14223_v15, %v5034_v30  ;;  %v8777_v37 = vpop.f32.mrb[60].mxu0  ;;  %vm5170_vm13 = vcmp.gt.f32.partialorder %v5128_v44, 0.0 }
 0x6ab   : > { %v8778_v23 = vpop.f32.mrb[61].mxu0 }
 0x6ac   : > { %v5187_v54 = vmul.f32 0.01, %v5131_v14  ;;  %v8779_v26 = vadd.f32 %v8778_v23, %v8777_v37  ;;  %v8780_v56 = vpop.f32.mrb[62].mxu0  ;;  %vm5171_vm14 = vcmp.gt.f32.partialorder %v5131_v14, 0.0  ;;  %v5202_v21 = vsel %vm5170_vm13, %v5128_v44, %v5186_v51 }
 0x6ad   : > { %v8781_v18 = vpop.f32.mrb[63].mxu0 }
 0x6ae   : > { %v5039_v57 = vadd.f32 %v8779_v26, %v14197_v24  ;;  %v8782_v60 = vadd.f32 %v8781_v18, %v8780_v56  ;;  %v5203_v59 = vsel %vm5171_vm14, %v5131_v14, %v5187_v54 }
 0x6af   : > { %v14271_v12 = vpack.c.bf16 %v5203_v59, %v5202_v21 }
 0x6b0   : > { %v5136_v6 = vadd.f32 %v14213_v20, %v5039_v57  ;;  %v5042_v63 = vadd.f32 %v8782_v60, %v14197_v24 }
 0x6b1   : > { %5528 = vmatmul.mubr.bf16.gmra.mrb[72].mxu1 %v14271_v12 }
 0x6b2   : > { %v5188_v15 = vmul.f32 0.01, %v5136_v6  ;;  %v5139_v31 = vadd.f32 %v14219_v40, %v5042_v63  ;;  %5535 = vmatprep.mubr.bf16.mxu1 %v14184_v38  ;;  %v9393_v9 = vpop.f32.mrb[64].mxu0  ;;  %vm5172_vm2 = vcmp.gt.f32.partialorder %v5136_v6, 0.0 }
 0x6b3   : > { %v5578_v43 = vpop.f32.mrb[65].mxu0 }
 0x6b4   : > { %v5189_v36 = vmul.f32 0.01, %v5139_v31  ;;  %v9394_v32 = vpop.f32.mrb[66].mxu0  ;;  %vm5173_vm3 = vcmp.gt.f32.partialorder %v5139_v31, 0.0  ;;  %v5204_v4 = vsel %vm5172_vm2, %v5136_v6, %v5188_v15 }
 0x6b5   : > { %v5581_v61 = vpop.f32.mrb[67].mxu0  ;;  %v8815_v38 = vpop.f32.mrb[48].mxu1 }
 0x6b6   : > { %v5205_v46 = vsel %vm5173_vm3, %v5139_v31, %v5189_v36  ;;  %v8816_v2 = vpop.f32.mrb[49].mxu1 }
 0x6b7   : > { %v14278_v45 = vpack.c.bf16 %v5205_v46, %v5204_v4  ;;  %v8817_v35 = vadd.f32 %v8816_v2, %v8815_v38  ;;  %v8818_v0 = vpop.f32.mrb[50].mxu1 }
 0x6b8   : > { %v8819_v33 = vpop.f32.mrb[51].mxu1 }
 0x6b9   : > { %5536 = vmatmul.mubr.bf16.gmra.mrb[76].mxu1 %v14278_v45  ;;  %v5482_v7 = vadd.f32 %v8817_v35, %v14291_v42  ;;  %v8820_v39 = vadd.f32 %v8819_v33, %v8818_v0 }
 0x6ba   : > { %v14281_v24 = vpop.f32.mrb[68].mxu0  ;;  %9423 = vmatprep.mubr.bf16.mxu1 %v15270_v53 }
 0x6bb   : > { %v5594_v20 = vpop.f32.mrb[69].mxu0  ;;  %v5579_v29 = vadd.f32 %v5578_v43, %v5482_v7  ;;  %v5485_v55 = vadd.f32 %v8820_v39, %v14291_v42 }
 0x6bc   : > { %v14284_v40 = vpop.f32.mrb[70].mxu0 }
 0x6bd   : > { %v14286_v19 = vpop.f32.mrb[71].mxu0  ;;  %v5673_v52 = vmul.f32 0.01, %v5579_v29  ;;  %v5582_v50 = vadd.f32 %v5581_v61, %v5485_v55  ;;  %v8821_v58 = vpop.f32.mrb[52].mxu1  ;;  %vm5657_vm4 = vcmp.gt.f32.partialorder %v5579_v29, 0.0 }
 0x6be   : > { %v8822_v1 = vpop.f32.mrb[53].mxu1 }
 0x6bf   : > { %vm5658_vm6 = vcmp.gt.f32.partialorder %v5582_v50, 0.0  ;;  %v5674_v41 = vmul.f32 0.01, %v5582_v50  ;;  %v8823_v44 = vadd.f32 %v8822_v1, %v8821_v58  ;;  %v8824_v30 = vpop.f32.mrb[54].mxu1  ;;  %v5689_v14 = vsel %vm5657_vm4, %v5579_v29, %v5673_v52 }
 0x6c0   : > { %v8825_v51 = vpop.f32.mrb[55].mxu1 }
 0x6c1   : > { %9424 = vmatmul.mubr.bf16.vlgmr.msra.gmra.mrb[80].mxu1 %v15271_v10  ;;  %v5690_v37 = vsel %vm5658_vm6, %v5582_v50, %v5674_v41  ;;  %v5490_v23 = vadd.f32 %v8823_v44, %v14291_v42  ;;  %v8826_v54 = vadd.f32 %v8825_v51, %v8824_v30 }
 0x6c2   : > { %v14295_v8 = vpop.f32.mrb[72].mxu0  ;;  %9427 = vmatprep.mubr.bf16.mxu1 %v15272_v13  ;;  %v5705_v26 = vpack.c.bf16 %v5690_v37, %v5689_v14 }
 0x6c3   : > { %v14299_v48 = vpop.f32.mrb[73].mxu0  ;;  %v5587_v18 = vadd.f32 %v9393_v9, %v5490_v23  ;;  %v5493_v57 = vadd.f32 %v8826_v54, %v14291_v42 }
 0x6c4   : > { %v14301_v17 = vpop.f32.mrb[74].mxu0  ;;  %5979 = vmatmul.mubr.bf16.vlgmr.msra.gmra.mrb[80].mxu0 %v5705_v26 }
 0x6c5   : > { %v14303_v5 = vpop.f32.mrb[75].mxu0  ;;  %v5675_v59 = vmul.f32 0.01, %v5587_v18  ;;  %v5590_v6 = vadd.f32 %v9394_v32, %v5493_v57  ;;  %5986 = vmatprep.mubr.bf16.mxu0 %v14227_v22  ;;  %v8827_v63 = vpop.f32.mrb[56].mxu1  ;;  %9440 = vmatpush3.bf16.msra.mxu0 %v14263_v49  ;;  %vm5659_vm10 = vcmp.gt.f32.partialorder %v5587_v18, 0.0  ;;  %v9850_v57 = vld [vmem:[#allocation3 + $0x388] sm:$0xff]  }
 0x6c6   : > { %v8828_v31 = vpop.f32.mrb[57].mxu1  ;;  %9441 = vmatprep.subr.bf16.mxu0 %v9850_v57 }
 0x6c7   : > { %v5676_v43 = vmul.f32 0.01, %v5590_v6  ;;  %vm5660_vm15 = vcmp.gt.f32.partialorder %v5590_v6, 0.0  ;;  %v8829_v9 = vadd.f32 %v8828_v31, %v8827_v63  ;;  %v8830_v36 = vpop.f32.mrb[58].mxu1  ;;  %v5691_v4 = vsel %vm5659_vm10, %v5587_v18, %v5675_v59  ;;  %v9851_v31 = vld [vmem:[#allocation3 + $0x390] sm:$0xff]  }
 0x6c8   : > { %v8831_v61 = vpop.f32.mrb[59].mxu1 }
 0x6c9   : > { %9428 = vmatmul.mubr.bf16.gmra.mrb[84].mxu1 %v15273_v11  ;;  %v5692_v46 = vsel %vm5660_vm15, %v5590_v6, %v5676_v43  ;;  %v5498_v38 = vadd.f32 %v8829_v9, %v14291_v42  ;;  %v8832_v2 = vadd.f32 %v8831_v61, %v8830_v36  ;;  %9442 = vmatpush3.bf16.msra.mxu0 %v9850_v57  ;;  %v9871_v57 = vld [vmem:[#allocation3 + $0x378] sm:$0xff]  }
 0x6ca   : > { %v14307_v56 = vpop.f32.mrb[76].mxu0  ;;  %9431 = vmatprep.mubr.bf16.mxu1 %v15274_v25  ;;  %v14321_v22 = vpack.c.bf16 %v5692_v46, %v5691_v4  ;;  %9443 = vmatprep.subr.bf16.mxu0 %v9851_v31 }
 0x6cb   : > { %v14311_v60 = vpop.f32.mrb[77].mxu0  ;;  %v5595_v49 = vadd.f32 %v5594_v20, %v5498_v38  ;;  %v5501_v32 = vadd.f32 %v8832_v2, %v14291_v42  ;;  %v9852_v38 = vld [vmem:[#allocation3 + $0x398] sm:$0xff]  }
 0x6cc   : > { %v14313_v21 = vpop.f32.mrb[78].mxu0  ;;  %5987 = vmatmul.mubr.bf16.gmra.mrb[84].mxu0 %v14321_v22 }
 0x6cd   : > { %v14317_v15 = vpop.f32.mrb[79].mxu0  ;;  %5994 = vmatprep.mubr.bf16.mxu0 %v14236_v16  ;;  %v5677_v35 = vmul.f32 0.01, %v5595_v49  ;;  %v5598_v0 = vadd.f32 %v14286_v19, %v5501_v32  ;;  %v8833_v33 = vpop.f32.mrb[60].mxu1  ;;  %vm5661_vm5 = vcmp.gt.f32.partialorder %v5595_v49, 0.0  ;;  %9444 = vmatpush3.bf16.msra.mxu0 %v9851_v31 }
 0x6ce   : > { %v8834_v7 = vpop.f32.mrb[61].mxu1  ;;  %9445 = vmatprep.subr.bf16.mxu0 %v9852_v38 }
 0x6cf   : > { %v5678_v39 = vmul.f32 0.01, %v5598_v0  ;;  %v8835_v29 = vadd.f32 %v8834_v7, %v8833_v33  ;;  %v8836_v55 = vpop.f32.mrb[62].mxu1  ;;  %vm5662_vm7 = vcmp.gt.f32.partialorder %v5598_v0, 0.0  ;;  %v5693_v58 = vsel %vm5661_vm5, %v5595_v49, %v5677_v35  ;;  %v9853_v7 = vld [vmem:[#allocation3 + $0x3a0] sm:$0xff]  }
 0x6d0   : > { %v8837_v52 = vpop.f32.mrb[63].mxu1 }
 0x6d1   : > { %9432 = vmatmul.mubr.bf16.gmra.mrb[88].mxu1 %v13563_v3  ;;  %v5506_v50 = vadd.f32 %v8835_v29, %v14291_v42  ;;  %v8838_v20 = vadd.f32 %v8837_v52, %v8836_v55  ;;  %v5694_v1 = vsel %vm5662_vm7, %v5598_v0, %v5678_v39  ;;  %9446 = vmatpush3.bf16.msra.mxu0 %v9852_v38  ;;  %v9854_v52 = vld [vmem:[#allocation3 + $0x3a8] sm:$0xff]  }
 0x6d2   : > { %9435 = vmatprep.mubr.bf16.mxu1 %v13944_v62  ;;  %v14330_v41 = vpack.c.bf16 %v5694_v1, %v5693_v58  ;;  %9447 = vmatprep.subr.bf16.mxu0 %v9853_v7  ;;  %v9855_v58 = vld [vmem:[#allocation3 + $0x3b0] sm:$0xff]   ;;  %v9858_v1 = vld [vmem:[#allocation3 + $0x300] sm:$0xff]  }
 0x6d3   : > { %v5603_v16 = vadd.f32 %v14281_v24, %v5506_v50  ;;  %v5509_v19 = vadd.f32 %v8838_v20, %v14291_v42 }
 0x6d4   : > { %5995 = vmatmul.mubr.bf16.gmra.mrb[88].mxu0 %v14330_v41 }
 0x6d5   : > { %v5679_v44 = vmul.f32 0.01, %v5603_v16  ;;  %v5606_v30 = vadd.f32 %v14284_v40, %v5509_v19  ;;  %6002 = vmatprep.mubr.bf16.mxu0 %v14243_v47  ;;  %vm5663_vm1 = vcmp.gt.f32.partialorder %v5603_v16, 0.0  ;;  %9448 = vmatpush3.bf16.msra.mxu0 %v9853_v7  ;;  %v9860_v19 = vld [vmem:[#allocation3 + $0x308] sm:$0xff]  }
 0x6d6   : > { %9449 = vmatprep.subr.bf16.mxu0 %v9854_v52 }
 0x6d7   : > { %v5680_v51 = vmul.f32 0.01, %v5606_v30  ;;  %vm5664_vm0 = vcmp.gt.f32.partialorder %v5606_v30, 0.0  ;;  %v5695_v14 = vsel %vm5663_vm1, %v5603_v16, %v5679_v44  ;;  %v9859_v16 = vld [vmem:[#allocation3 + $0x348] sm:$0xff]   ;;  %v9861_v44 = vld [vmem:[#allocation3 + $0x350] sm:$0xff]  }
 0x6d9   : > { %9436 = vmatmul.mubr.bf16.gmra.mrb[92].mxu1 %v14026_v28  ;;  %v5696_v37 = vsel %vm5664_vm0, %v5606_v30, %v5680_v51  ;;  %9450 = vmatpush3.bf16.msra.mxu0 %v9854_v52  ;;  %v9862_v30 = vld [vmem:[#allocation3 + $0x310] sm:$0xff]   ;;  %v9863_v51 = vld [vmem:[#allocation3 + $0x358] sm:$0xff]  }
 0x6da   : > { %6477 = vmatprep.mubr.bf16.mxu1 %v5705_v26  ;;  %v14337_v23 = vpack.c.bf16 %v5696_v37, %v5695_v14  ;;  %9451 = vmatprep.subr.bf16.mxu0 %v9855_v58  ;;  %v9864_v14 = vld [vmem:[#allocation3 + $0x318] sm:$0xff]   ;;  %v9866_v37 = vld [vmem:[#allocation3 + $0x320] sm:$0xff]  }
 0x6dc   : > { %6003 = vmatmul.mubr.bf16.gmra.mrb[92].mxu0 %v14337_v23 }
 0x6dd   : > { %6010 = vmatprep.mubr.bf16.mxu0 %v14252_v27  ;;  %9452 = vmatpush3.bf16.msra.mxu0 %v9855_v58 }
 0x700   : > { %v8839_v24 = vpop.f32.mrb[64].mxu1 }
 0x701   : > { %v8840_v54 = vpop.f32.mrb[65].mxu1 }
 0x702   : > { %v8841_v26 = vadd.f32 %v8840_v54, %v8839_v24  ;;  %v8842_v18 = vpop.f32.mrb[66].mxu1  ;;  %v9867_v24 = vld [vmem:[#allocation3 + $0x368] sm:$0xff]  }
 0x703   : > { %v8843_v59 = vpop.f32.mrb[67].mxu1  ;;  %v9868_v54 = vld [vmem:[#allocation3 + $0x328] sm:$0xff]  }
 0x704   : > { %v5514_v40 = vadd.f32 %v8841_v26, %v14291_v42  ;;  %v8844_v47 = vadd.f32 %v8843_v59, %v8842_v18  ;;  %v9869_v26 = vld [vmem:[#allocation3 + $0x370] sm:$0xff]   ;;  %v9872_v59 = vld [vmem:[#allocation3 + $0x338] sm:$0xff]  }
 0x705   : > { %v9870_v18 = vld [vmem:[#allocation3 + $0x330] sm:$0xff]  }
 0x706   : > { %v5611_v6 = vadd.f32 %v14299_v48, %v5514_v40  ;;  %v5517_v63 = vadd.f32 %v8844_v47, %v14291_v42  ;;  %v14357_v40 = vld [vmem:[#allocation3 + $0x440] sm:$0xff]  }
 0x708   : > { %v5681_v43 = vmul.f32 0.01, %v5611_v6  ;;  %v5614_v9 = vadd.f32 %v14303_v5, %v5517_v63  ;;  %v8845_v27 = vpop.f32.mrb[68].mxu1  ;;  %vm5665_vm8 = vcmp.gt.f32.partialorder %v5611_v6, 0.0 }
 0x709   : > { %v8846_v36 = vpop.f32.mrb[69].mxu1 }
 0x70a   : > { %v5682_v61 = vmul.f32 0.01, %v5614_v9  ;;  %v8847_v4 = vadd.f32 %v8846_v36, %v8845_v27  ;;  %v8848_v46 = vpop.f32.mrb[70].mxu1  ;;  %vm5666_vm9 = vcmp.gt.f32.partialorder %v5614_v9, 0.0  ;;  %v5697_v32 = vsel %vm5665_vm8, %v5611_v6, %v5681_v43 }
 0x70b   : > { %v8849_v2 = vpop.f32.mrb[71].mxu1 }
 0x70c   : > { %v5522_v49 = vadd.f32 %v8847_v4, %v14291_v42  ;;  %v8850_v48 = vadd.f32 %v8849_v2, %v8848_v46  ;;  %v5698_v35 = vsel %vm5666_vm9, %v5614_v9, %v5682_v61 }
 0x70d   : > { %v14346_v0 = vpack.c.bf16 %v5698_v35, %v5697_v32 }
 0x70e   : > { %v5619_v5 = vadd.f32 %v14295_v8, %v5522_v49  ;;  %v5525_v33 = vadd.f32 %v8850_v48, %v14291_v42 }
 0x70f   : > { %6011 = vmatmul.mubr.bf16.gmra.mrb[96].mxu0 %v14346_v0 }
 0x710   : > { %v5683_v39 = vmul.f32 0.01, %v5619_v5  ;;  %v5622_v29 = vadd.f32 %v14301_v17, %v5525_v33  ;;  %6018 = vmatprep.mubr.bf16.mxu0 %v14259_v34  ;;  %vm5667_vm11 = vcmp.gt.f32.partialorder %v5619_v5, 0.0  ;;  %v9856_v34 = vld [vmem:[#allocation3 + $0x3b8] sm:$0xff]   ;;  %v9857_v17 = vld [vmem:[#allocation3 + $0x340] sm:$0xff]  }
 0x711   : > { %9453 = vmatprep.subr.bf16.mxu0 %v9856_v34  ;;  %8959 = vmatprep.subr.bf16.mxu1 %v9857_v17 }
 0x712   : > { %v5684_v55 = vmul.f32 0.01, %v5622_v29  ;;  %vm5668_vm12 = vcmp.gt.f32.partialorder %v5622_v29, 0.0  ;;  %v5699_v50 = vsel %vm5667_vm11, %v5619_v5, %v5683_v39  ;;  %9454 = vmatpush3.bf16.msra.mxu0 %v9856_v34  ;;  %8960 = vmatpush3.bf16.msra.mxu1 %v9858_v1 }
 0x713   : > { %8961 = vmatprep.subr.bf16.mxu1 %v9859_v16 }
 0x714   : > { %v5700_v20 = vsel %vm5668_vm12, %v5622_v29, %v5684_v55 }
 0x715   : > { %v14353_v8 = vpack.c.bf16 %v5700_v20, %v5699_v50 }
 0x716   : > { %8962 = vmatpush3.bf16.msra.mxu1 %v9860_v19 }
 0x717   : > { %6019 = vmatmul.mubr.bf16.gmra.mrb[100].mxu0 %v14353_v8  ;;  %8963 = vmatprep.subr.bf16.mxu1 %v9861_v44 }
 0x718   : > { %6026 = vmatprep.mubr.bf16.mxu0 %v14271_v12  ;;  %v9865_v12 = vld [vmem:[#allocation3 + $0x360] sm:$0xff]  }
 0x71a   : > { %8964 = vmatpush3.bf16.msra.mxu1 %v9862_v30  ;;  %v14385_v30 = vld [vmem:[%s14893_s5 + $0x3] ss:$0 sm:$0xff] }
 0x71b   : > { %8965 = vmatprep.subr.bf16.mxu1 %v9863_v51 }
 0x71e   : > { %8966 = vmatpush3.bf16.msra.mxu1 %v9864_v14 }
 0x71f   : > { %8967 = vmatprep.subr.bf16.mxu1 %v9865_v12 }
 0x722   : > { %8968 = vmatpush3.bf16.msra.mxu1 %v9866_v37 }
 0x723   : > { %8969 = vmatprep.subr.bf16.mxu1 %v9867_v24 }
 0x726   : > { %8970 = vmatpush3.bf16.msra.mxu1 %v9868_v54 }
 0x727   : > { %8971 = vmatprep.subr.bf16.mxu1 %v9869_v26 }
 0x72a   : > { %8972 = vmatpush3.bf16.msra.mxu1 %v9870_v18 }
 0x72b   : > { %8973 = vmatprep.subr.bf16.mxu1 %v9871_v57 }
 0x72e   : > { %8974 = vmatpush3.bf16.msra.mxu1 %v9872_v59 }
 0x72f   : > { %9471 = vmatprep.subr.bf16.mxu1 %v14357_v40 }
 0x784   : > { %v8851_v47 = vpop.f32.mrb[72].mxu1 }
 0x785   : > { %v8852_v6 = vpop.f32.mrb[73].mxu1 }
 0x786   : > { %v8853_v63 = vadd.f32 %v8852_v6, %v8851_v47  ;;  %v8854_v31 = vpop.f32.mrb[74].mxu1 }
 0x787   : > { %v8855_v43 = vpop.f32.mrb[75].mxu1 }
 0x788   : > { %v5530_v9 = vadd.f32 %v8853_v63, %v14291_v42  ;;  %v8856_v27 = vadd.f32 %v8855_v43, %v8854_v31 }
 0x78a   : > { %v5627_v36 = vadd.f32 %v14311_v60, %v5530_v9  ;;  %v5533_v61 = vadd.f32 %v8856_v27, %v14291_v42 }
 0x78c   : > { %v5685_v4 = vmul.f32 0.01, %v5627_v36  ;;  %v5630_v46 = vadd.f32 %v14317_v15, %v5533_v61  ;;  %v8857_v38 = vpop.f32.mrb[76].mxu1  ;;  %vm5669_vm13 = vcmp.gt.f32.partialorder %v5627_v36, 0.0 }
 0x78d   : > { %v8858_v2 = vpop.f32.mrb[77].mxu1 }
 0x78e   : > { %v5686_v49 = vmul.f32 0.01, %v5630_v46  ;;  %v8859_v48 = vadd.f32 %v8858_v2, %v8857_v38  ;;  %v8860_v32 = vpop.f32.mrb[78].mxu1  ;;  %vm5670_vm14 = vcmp.gt.f32.partialorder %v5630_v46, 0.0  ;;  %v5701_v7 = vsel %vm5669_vm13, %v5627_v36, %v5685_v4 }
 0x78f   : > { %v8861_v35 = vpop.f32.mrb[79].mxu1 }
 0x790   : > { %v5538_v5 = vadd.f32 %v8859_v48, %v14291_v42  ;;  %v8862_v33 = vadd.f32 %v8861_v35, %v8860_v32  ;;  %v5702_v39 = vsel %vm5670_vm14, %v5630_v46, %v5686_v49 }
 0x791   : > { %v14365_v29 = vpack.c.bf16 %v5702_v39, %v5701_v7 }
 0x792   : > { %v5635_v60 = vadd.f32 %v14307_v56, %v5538_v5  ;;  %v5541_v55 = vadd.f32 %v8862_v33, %v14291_v42 }
 0x793   : > { %6027 = vmatmul.mubr.bf16.gmra.mrb[104].mxu0 %v14365_v29 }
 0x794   : > { %v5687_v15 = vmul.f32 0.01, %v5635_v60  ;;  %v5638_v52 = vadd.f32 %v14313_v21, %v5541_v55  ;;  %6034 = vmatprep.mubr.bf16.mxu0 %v14278_v45  ;;  %v9425_v50 = vpop.f32.mrb[80].mxu1  ;;  %vm5671_vm2 = vcmp.gt.f32.partialorder %v5635_v60, 0.0 }
 0x795   : > { %v6077_v20 = vpop.f32.mrb[81].mxu1 }
 0x796   : > { %v5688_v58 = vmul.f32 0.01, %v5638_v52  ;;  %v9426_v34 = vpop.f32.mrb[82].mxu1  ;;  %vm5672_vm3 = vcmp.gt.f32.partialorder %v5638_v52, 0.0  ;;  %v5703_v1 = vsel %vm5671_vm2, %v5635_v60, %v5687_v15 }
 0x797   : > { %v6080_v17 = vpop.f32.mrb[83].mxu1  ;;  %v8895_v45 = vpop.f32.mrb[80].mxu0 }
 0x798   : > { %v5704_v16 = vsel %vm5672_vm3, %v5638_v52, %v5688_v58  ;;  %v8896_v51 = vpop.f32.mrb[81].mxu0 }
 0x799   : > { %v14372_v19 = vpack.c.bf16 %v5704_v16, %v5703_v1  ;;  %v8897_v14 = vadd.f32 %v8896_v51, %v8895_v45  ;;  %v8898_v12 = vpop.f32.mrb[82].mxu0 }
 0x79a   : > { %v8899_v37 = vpop.f32.mrb[83].mxu0 }
 0x79b   : > { %6035 = vmatmul.mubr.bf16.gmra.mrb[108].mxu0 %v14372_v19  ;;  %v5981_v24 = vadd.f32 %v8897_v14, %v14385_v30  ;;  %v8900_v54 = vadd.f32 %v8899_v37, %v8898_v12 }
 0x79c   : > { %v14375_v42 = vpop.f32.mrb[84].mxu1  ;;  %9455 = vmatprep.mubr.bf16.mxu0 %v15270_v53 }
 0x79d   : > { %v6093_v56 = vpop.f32.mrb[85].mxu1  ;;  %v6078_v18 = vadd.f32 %v6077_v20, %v5981_v24  ;;  %v5984_v57 = vadd.f32 %v8900_v54, %v14385_v30 }
 0x79e   : > { %v14378_v21 = vpop.f32.mrb[86].mxu1 }
 0x79f   : > { %v14380_v44 = vpop.f32.mrb[87].mxu1  ;;  %v6172_v6 = vmul.f32 0.01, %v6078_v18  ;;  %v6081_v63 = vadd.f32 %v6080_v17, %v5984_v57  ;;  %v8901_v31 = vpop.f32.mrb[84].mxu0  ;;  %vm6156_vm4 = vcmp.gt.f32.partialorder %v6078_v18, 0.0 }
 0x7a0   : > { %v8902_v9 = vpop.f32.mrb[85].mxu0 }
 0x7a1   : > { %vm6157_vm6 = vcmp.gt.f32.partialorder %v6081_v63, 0.0  ;;  %v6173_v27 = vmul.f32 0.01, %v6081_v63  ;;  %v8903_v36 = vadd.f32 %v8902_v9, %v8901_v31  ;;  %v8904_v61 = vpop.f32.mrb[86].mxu0  ;;  %v6188_v46 = vsel %vm6156_vm4, %v6078_v18, %v6172_v6 }
 0x7a2   : > { %v8905_v4 = vpop.f32.mrb[87].mxu0 }
 0x7a3   : > { %9456 = vmatmul.mubr.bf16.vlgmr.msra.gmra.mrb[112].mxu0 %v15271_v10  ;;  %v6189_v38 = vsel %vm6157_vm6, %v6081_v63, %v6173_v27  ;;  %v5989_v2 = vadd.f32 %v8903_v36, %v14385_v30  ;;  %v8906_v49 = vadd.f32 %v8905_v4, %v8904_v61 }
 0x7a4   : > { %v14389_v26 = vpop.f32.mrb[88].mxu1  ;;  %9459 = vmatprep.mubr.bf16.mxu0 %v15272_v13  ;;  %v6204_v48 = vpack.c.bf16 %v6189_v38, %v6188_v46 }
 0x7a5   : > { %v14393_v59 = vpop.f32.mrb[89].mxu1  ;;  %v6086_v35 = vadd.f32 %v9425_v50, %v5989_v2  ;;  %v5992_v5 = vadd.f32 %v8906_v49, %v14385_v30 }
 0x7a6   : > { %v14395_v47 = vpop.f32.mrb[90].mxu1  ;;  %6478 = vmatmul.mubr.bf16.vlgmr.msra.gmra.mrb[96].mxu1 %v6204_v48 }
 0x7a7   : > { %v14397_v43 = vpop.f32.mrb[91].mxu1  ;;  %v6174_v39 = vmul.f32 0.01, %v6086_v35  ;;  %v6089_v60 = vadd.f32 %v9426_v34, %v5992_v5  ;;  %6485 = vmatprep.mubr.bf16.mxu1 %v14321_v22  ;;  %v8907_v55 = vpop.f32.mrb[88].mxu0  ;;  %9472 = vmatpush3.bf16.msra.mxu1 %v14357_v40  ;;  %vm6158_vm10 = vcmp.gt.f32.partialorder %v6086_v35, 0.0  ;;  %v9874_v5 = vld [vmem:[#allocation3 + $0x448] sm:$0xff]  }
 0x7a8   : > { %v8908_v52 = vpop.f32.mrb[89].mxu0  ;;  %9473 = vmatprep.subr.bf16.mxu1 %v9874_v5 }
 0x7a9   : > { %v6175_v20 = vmul.f32 0.01, %v6089_v60  ;;  %vm6159_vm15 = vcmp.gt.f32.partialorder %v6089_v60, 0.0  ;;  %v8909_v50 = vadd.f32 %v8908_v52, %v8907_v55  ;;  %v8910_v58 = vpop.f32.mrb[90].mxu0  ;;  %v6190_v1 = vsel %vm6158_vm10, %v6086_v35, %v6174_v39  ;;  %v9875_v52 = vld [vmem:[#allocation3 + $0x450] sm:$0xff]  }
 0x7aa   : > { %v8911_v17 = vpop.f32.mrb[91].mxu0 }
 0x7ab   : > { %9460 = vmatmul.mubr.bf16.gmra.mrb[116].mxu0 %v15273_v11  ;;  %v6191_v16 = vsel %vm6159_vm15, %v6089_v60, %v6175_v20  ;;  %v5997_v45 = vadd.f32 %v8909_v50, %v14385_v30  ;;  %v8912_v51 = vadd.f32 %v8911_v17, %v8910_v58  ;;  %9474 = vmatpush3.bf16.msra.mxu1 %v9874_v5  ;;  %v9895_v5 = vld [vmem:[#allocation3 + $0x438] sm:$0xff]  }
 0x7ac   : > { %v14401_v32 = vpop.f32.mrb[92].mxu1  ;;  %9463 = vmatprep.mubr.bf16.mxu0 %v15274_v25  ;;  %v14415_v22 = vpack.c.bf16 %v6191_v16, %v6190_v1  ;;  %9475 = vmatprep.subr.bf16.mxu1 %v9875_v52 }
 0x7ad   : > { %v14405_v33 = vpop.f32.mrb[93].mxu1  ;;  %v6094_v40 = vadd.f32 %v6093_v56, %v5997_v45  ;;  %v6000_v34 = vadd.f32 %v8912_v51, %v14385_v30  ;;  %v9876_v45 = vld [vmem:[#allocation3 + $0x458] sm:$0xff]  }
 0x7ae   : > { %v14407_v7 = vpop.f32.mrb[94].mxu1  ;;  %6486 = vmatmul.mubr.bf16.gmra.mrb[100].mxu1 %v14415_v22 }
 0x7af   : > { %v14411_v15 = vpop.f32.mrb[95].mxu1  ;;  %6493 = vmatprep.mubr.bf16.mxu1 %v14330_v41  ;;  %v6176_v14 = vmul.f32 0.01, %v6094_v40  ;;  %v6097_v12 = vadd.f32 %v14380_v44, %v6000_v34  ;;  %v8913_v37 = vpop.f32.mrb[92].mxu0  ;;  %vm6160_vm5 = vcmp.gt.f32.partialorder %v6094_v40, 0.0  ;;  %9476 = vmatpush3.bf16.msra.mxu1 %v9875_v52 }
 0x7b0   : > { %v8914_v24 = vpop.f32.mrb[93].mxu0  ;;  %9477 = vmatprep.subr.bf16.mxu1 %v9876_v45 }
 0x7b1   : > { %v6177_v54 = vmul.f32 0.01, %v6097_v12  ;;  %v8915_v18 = vadd.f32 %v8914_v24, %v8913_v37  ;;  %v8916_v57 = vpop.f32.mrb[94].mxu0  ;;  %vm6161_vm7 = vcmp.gt.f32.partialorder %v6097_v12, 0.0  ;;  %v6192_v31 = vsel %vm6160_vm5, %v6094_v40, %v6176_v14  ;;  %v9877_v24 = vld [vmem:[#allocation3 + $0x460] sm:$0xff]  }
 0x7b2   : > { %v8917_v6 = vpop.f32.mrb[95].mxu0 }
 0x7b3   : > { %9464 = vmatmul.mubr.bf16.gmra.mrb[120].mxu0 %v13563_v3  ;;  %v6005_v63 = vadd.f32 %v8915_v18, %v14385_v30  ;;  %v8918_v56 = vadd.f32 %v8917_v6, %v8916_v57  ;;  %v6193_v9 = vsel %vm6161_vm7, %v6097_v12, %v6177_v54  ;;  %9478 = vmatpush3.bf16.msra.mxu1 %v9876_v45  ;;  %v9878_v6 = vld [vmem:[#allocation3 + $0x468] sm:$0xff]  }
 0x7b4   : > { %9467 = vmatprep.mubr.bf16.mxu0 %v13944_v62  ;;  %v14424_v27 = vpack.c.bf16 %v6193_v9, %v6192_v31  ;;  %9479 = vmatprep.subr.bf16.mxu1 %v9877_v24  ;;  %v9879_v31 = vld [vmem:[#allocation3 + $0x470] sm:$0xff]   ;;  %v9882_v9 = vld [vmem:[#allocation3 + $0x3c0] sm:$0xff]  }
 0x7b5   : > { %v6102_v41 = vadd.f32 %v14375_v42, %v6005_v63  ;;  %v6008_v44 = vadd.f32 %v8918_v56, %v14385_v30 }
 0x7b6   : > { %6494 = vmatmul.mubr.bf16.gmra.mrb[104].mxu1 %v14424_v27 }
 0x7b7   : > { %v6178_v36 = vmul.f32 0.01, %v6102_v41  ;;  %v6105_v61 = vadd.f32 %v14378_v21, %v6008_v44  ;;  %6501 = vmatprep.mubr.bf16.mxu1 %v14337_v23  ;;  %vm6162_vm1 = vcmp.gt.f32.partialorder %v6102_v41, 0.0  ;;  %9480 = vmatpush3.bf16.msra.mxu1 %v9877_v24  ;;  %v9884_v44 = vld [vmem:[#allocation3 + $0x3c8] sm:$0xff]  }
 0x7b8   : > { %9481 = vmatprep.subr.bf16.mxu1 %v9878_v6 }
 0x7b9   : > { %v6179_v4 = vmul.f32 0.01, %v6105_v61  ;;  %vm6163_vm0 = vcmp.gt.f32.partialorder %v6105_v61, 0.0  ;;  %v6194_v46 = vsel %vm6162_vm1, %v6102_v41, %v6178_v36  ;;  %v9883_v41 = vld [vmem:[#allocation3 + $0x408] sm:$0xff]   ;;  %v9885_v36 = vld [vmem:[#allocation3 + $0x410] sm:$0xff]  }
 0x7bb   : > { %9468 = vmatmul.mubr.bf16.gmra.mrb[124].mxu0 %v14026_v28  ;;  %v6195_v38 = vsel %vm6163_vm0, %v6105_v61, %v6179_v4  ;;  %9482 = vmatpush3.bf16.msra.mxu1 %v9878_v6  ;;  %v9886_v61 = vld [vmem:[#allocation3 + $0x3d0] sm:$0xff]   ;;  %v9887_v4 = vld [vmem:[#allocation3 + $0x418] sm:$0xff]  }
 0x7bc   : > { %6976 = vmatprep.mubr.bf16.mxu0 %v6204_v48  ;;  %v14431_v2 = vpack.c.bf16 %v6195_v38, %v6194_v46  ;;  %9483 = vmatprep.subr.bf16.mxu1 %v9879_v31  ;;  %v9888_v46 = vld [vmem:[#allocation3 + $0x3d8] sm:$0xff]   ;;  %v9890_v38 = vld [vmem:[#allocation3 + $0x3e0] sm:$0xff]  }
 0x7be   : > { %6502 = vmatmul.mubr.bf16.gmra.mrb[108].mxu1 %v14431_v2 }
 0x7bf   : > { %6509 = vmatprep.mubr.bf16.mxu1 %v14346_v0  ;;  %9484 = vmatpush3.bf16.msra.mxu1 %v9879_v31 }
 0x7e2   : > { %v8919_v42 = vpop.f32.mrb[96].mxu0 }
 0x7e3   : > { %v8920_v49 = vpop.f32.mrb[97].mxu0 }
 0x7e4   : > { %v8921_v48 = vadd.f32 %v8920_v49, %v8919_v42  ;;  %v8922_v35 = vpop.f32.mrb[98].mxu0  ;;  %v9891_v42 = vld [vmem:[#allocation3 + $0x428] sm:$0xff]  }
 0x7e5   : > { %v8923_v39 = vpop.f32.mrb[99].mxu0  ;;  %v9892_v49 = vld [vmem:[#allocation3 + $0x3e8] sm:$0xff]  }
 0x7e6   : > { %v6013_v21 = vadd.f32 %v8921_v48, %v14385_v30  ;;  %v8924_v23 = vadd.f32 %v8923_v39, %v8922_v35  ;;  %v9893_v48 = vld [vmem:[#allocation3 + $0x430] sm:$0xff]   ;;  %v9896_v39 = vld [vmem:[#allocation3 + $0x3f8] sm:$0xff]  }
 0x7e7   : > { %v9894_v35 = vld [vmem:[#allocation3 + $0x3f0] sm:$0xff]  }
 0x7e8   : > { %v6110_v60 = vadd.f32 %v14393_v59, %v6013_v21  ;;  %v6016_v55 = vadd.f32 %v8924_v23, %v14385_v30  ;;  %v14451_v21 = vld [vmem:[#allocation3 + $0x500] sm:$0xff]  }
 0x7ea   : > { %v6180_v20 = vmul.f32 0.01, %v6110_v60  ;;  %v6113_v50 = vadd.f32 %v14397_v43, %v6016_v55  ;;  %v8925_v0 = vpop.f32.mrb[100].mxu0  ;;  %vm6164_vm8 = vcmp.gt.f32.partialorder %v6110_v60, 0.0 }
 0x7eb   : > { %v8926_v58 = vpop.f32.mrb[101].mxu0 }
 0x7ec   : > { %v6181_v17 = vmul.f32 0.01, %v6113_v50  ;;  %v8927_v1 = vadd.f32 %v8926_v58, %v8925_v0  ;;  %v8928_v16 = vpop.f32.mrb[102].mxu0  ;;  %vm6165_vm9 = vcmp.gt.f32.partialorder %v6113_v50, 0.0  ;;  %v6196_v34 = vsel %vm6164_vm8, %v6110_v60, %v6180_v20 }
 0x7ed   : > { %v8929_v51 = vpop.f32.mrb[103].mxu0 }
 0x7ee   : > { %v6021_v40 = vadd.f32 %v8927_v1, %v14385_v30  ;;  %v8930_v59 = vadd.f32 %v8929_v51, %v8928_v16  ;;  %v6197_v14 = vsel %vm6165_vm9, %v6113_v50, %v6181_v17 }
 0x7ef   : > { %v14440_v12 = vpack.c.bf16 %v6197_v14, %v6196_v34 }
 0x7f0   : > { %v6118_v43 = vadd.f32 %v14389_v26, %v6021_v40  ;;  %v6024_v37 = vadd.f32 %v8930_v59, %v14385_v30 }
 0x7f1   : > { %6510 = vmatmul.mubr.bf16.gmra.mrb[112].mxu1 %v14440_v12 }
 0x7f2   : > { %v6182_v54 = vmul.f32 0.01, %v6118_v43  ;;  %v6121_v18 = vadd.f32 %v14395_v47, %v6024_v37  ;;  %6517 = vmatprep.mubr.bf16.mxu1 %v14353_v8  ;;  %vm6166_vm11 = vcmp.gt.f32.partialorder %v6118_v43, 0.0  ;;  %v9880_v8 = vld [vmem:[#allocation3 + $0x478] sm:$0xff]   ;;  %v9881_v47 = vld [vmem:[#allocation3 + $0x400] sm:$0xff]  }
 0x7f3   : > { %9485 = vmatprep.subr.bf16.mxu1 %v9880_v8  ;;  %9039 = vmatprep.subr.bf16.mxu0 %v9881_v47 }
 0x7f4   : > { %v6183_v57 = vmul.f32 0.01, %v6121_v18  ;;  %vm6167_vm12 = vcmp.gt.f32.partialorder %v6121_v18, 0.0  ;;  %v6198_v63 = vsel %vm6166_vm11, %v6118_v43, %v6182_v54  ;;  %9486 = vmatpush3.bf16.msra.mxu1 %v9880_v8  ;;  %9040 = vmatpush3.bf16.msra.mxu0 %v9882_v9 }
 0x7f5   : > { %9041 = vmatprep.subr.bf16.mxu0 %v9883_v41 }
 0x7f6   : > { %v6199_v56 = vsel %vm6167_vm12, %v6121_v18, %v6183_v57 }
 0x7f7   : > { %v14447_v26 = vpack.c.bf16 %v6199_v56, %v6198_v63 }
 0x7f8   : > { %9042 = vmatpush3.bf16.msra.mxu0 %v9884_v44 }
 0x7f9   : > { %6518 = vmatmul.mubr.bf16.gmra.mrb[116].mxu1 %v14447_v26  ;;  %9043 = vmatprep.subr.bf16.mxu0 %v9885_v36 }
 0x7fa   : > { %6525 = vmatprep.mubr.bf16.mxu1 %v14365_v29  ;;  %v9889_v29 = vld [vmem:[#allocation3 + $0x420] sm:$0xff]  }
 0x7fc   : > { %9044 = vmatpush3.bf16.msra.mxu0 %v9886_v61  ;;  %v14479_v61 = vld [vmem:[%s14893_s5 + $0x4] ss:$0 sm:$0xff] }
 0x7fd   : > { %9045 = vmatprep.subr.bf16.mxu0 %v9887_v4 }
 0x800   : > { %9046 = vmatpush3.bf16.msra.mxu0 %v9888_v46 }
 0x801   : > { %9047 = vmatprep.subr.bf16.mxu0 %v9889_v29 }
 0x804   : > { %9048 = vmatpush3.bf16.msra.mxu0 %v9890_v38 }
 0x805   : > { %9049 = vmatprep.subr.bf16.mxu0 %v9891_v42 }
 0x808   : > { %9050 = vmatpush3.bf16.msra.mxu0 %v9892_v49 }
 0x809   : > { %9051 = vmatprep.subr.bf16.mxu0 %v9893_v48 }
 0x80c   : > { %9052 = vmatpush3.bf16.msra.mxu0 %v9894_v35 }
 0x80d   : > { %9053 = vmatprep.subr.bf16.mxu0 %v9895_v5 }
 0x810   : > { %9054 = vmatpush3.bf16.msra.mxu0 %v9896_v39 }
 0x811   : > { %9503 = vmatprep.subr.bf16.mxu0 %v14451_v21 }
 0x866   : > { %v8931_v23 = vpop.f32.mrb[104].mxu0 }
 0x867   : > { %v8932_v60 = vpop.f32.mrb[105].mxu0 }
 0x868   : > { %v8933_v55 = vadd.f32 %v8932_v60, %v8931_v23  ;;  %v8934_v52 = vpop.f32.mrb[106].mxu0 }
 0x869   : > { %v8935_v20 = vpop.f32.mrb[107].mxu0 }
 0x86a   : > { %v6029_v50 = vadd.f32 %v8933_v55, %v14385_v30  ;;  %v8936_v0 = vadd.f32 %v8935_v20, %v8934_v52 }
 0x86c   : > { %v6126_v58 = vadd.f32 %v14405_v33, %v6029_v50  ;;  %v6032_v17 = vadd.f32 %v8936_v0, %v14385_v30 }
 0x86e   : > { %v6184_v1 = vmul.f32 0.01, %v6126_v58  ;;  %v6129_v16 = vadd.f32 %v14411_v15, %v6032_v17  ;;  %v8937_v45 = vpop.f32.mrb[108].mxu0  ;;  %vm6168_vm13 = vcmp.gt.f32.partialorder %v6126_v58, 0.0 }
 0x86f   : > { %v8938_v51 = vpop.f32.mrb[109].mxu0 }
 0x870   : > { %v6185_v40 = vmul.f32 0.01, %v6129_v16  ;;  %v8939_v59 = vadd.f32 %v8938_v51, %v8937_v45  ;;  %v8940_v34 = vpop.f32.mrb[110].mxu0  ;;  %vm6169_vm14 = vcmp.gt.f32.partialorder %v6129_v16, 0.0  ;;  %v6200_v24 = vsel %vm6168_vm13, %v6126_v58, %v6184_v1 }
 0x871   : > { %v8941_v14 = vpop.f32.mrb[111].mxu0 }
 0x872   : > { %v6037_v43 = vadd.f32 %v8939_v59, %v14385_v30  ;;  %v8942_v37 = vadd.f32 %v8941_v14, %v8940_v34  ;;  %v6201_v54 = vsel %vm6169_vm14, %v6129_v16, %v6185_v40 }
 0x873   : > { %v14459_v18 = vpack.c.bf16 %v6201_v54, %v6200_v24 }
 0x874   : > { %v6134_v33 = vadd.f32 %v14401_v32, %v6037_v43  ;;  %v6040_v57 = vadd.f32 %v8942_v37, %v14385_v30 }
 0x875   : > { %6526 = vmatmul.mubr.bf16.gmra.mrb[120].mxu1 %v14459_v18 }
 0x876   : > { %v6186_v15 = vmul.f32 0.01, %v6134_v33  ;;  %v6137_v6 = vadd.f32 %v14407_v7, %v6040_v57  ;;  %6533 = vmatprep.mubr.bf16.mxu1 %v14372_v19  ;;  %v9457_v63 = vpop.f32.mrb[112].mxu0  ;;  %vm6170_vm2 = vcmp.gt.f32.partialorder %v6134_v33, 0.0 }
 0x877   : > { %v6576_v56 = vpop.f32.mrb[113].mxu0 }
 0x878   : > { %v6187_v31 = vmul.f32 0.01, %v6137_v6  ;;  %v9458_v8 = vpop.f32.mrb[114].mxu0  ;;  %vm6171_vm3 = vcmp.gt.f32.partialorder %v6137_v6, 0.0  ;;  %v6202_v9 = vsel %vm6170_vm2, %v6134_v33, %v6186_v15 }
 0x879   : > { %v6579_v47 = vpop.f32.mrb[115].mxu0  ;;  %v8975_v19 = vpop.f32.mrb[96].mxu1 }
 0x87a   : > { %v6203_v41 = vsel %vm6171_vm3, %v6137_v6, %v6187_v31  ;;  %v8976_v4 = vpop.f32.mrb[97].mxu1 }
 0x87b   : > { %v14466_v44 = vpack.c.bf16 %v6203_v41, %v6202_v9  ;;  %v8977_v46 = vadd.f32 %v8976_v4, %v8975_v19  ;;  %v8978_v29 = vpop.f32.mrb[98].mxu1 }
 0x87c   : > { %v8979_v38 = vpop.f32.mrb[99].mxu1 }
 0x87d   : > { %6534 = vmatmul.mubr.bf16.gmra.mrb[124].mxu1 %v14466_v44  ;;  %v6480_v42 = vadd.f32 %v8977_v46, %v14479_v61  ;;  %v8980_v49 = vadd.f32 %v8979_v38, %v8978_v29 }
 0x87e   : > { %v14469_v30 = vpop.f32.mrb[116].mxu0  ;;  %9487 = vmatprep.mubr.bf16.mxu1 %v15270_v53 }
 0x87f   : > { %v6592_v32 = vpop.f32.mrb[117].mxu0  ;;  %v6577_v35 = vadd.f32 %v6576_v56, %v6480_v42  ;;  %v6483_v5 = vadd.f32 %v8980_v49, %v14479_v61 }
 0x880   : > { %v14472_v7 = vpop.f32.mrb[118].mxu0 }
 0x881   : > { %v14474_v36 = vpop.f32.mrb[119].mxu0  ;;  %v6671_v60 = vmul.f32 0.01, %v6577_v35  ;;  %v6580_v55 = vadd.f32 %v6579_v47, %v6483_v5  ;;  %v8981_v52 = vpop.f32.mrb[100].mxu1  ;;  %vm6655_vm4 = vcmp.gt.f32.partialorder %v6577_v35, 0.0 }
 0x882   : > { %v8982_v50 = vpop.f32.mrb[101].mxu1 }
 0x883   : > { %vm6656_vm6 = vcmp.gt.f32.partialorder %v6580_v55, 0.0  ;;  %v6672_v0 = vmul.f32 0.01, %v6580_v55  ;;  %v8983_v58 = vadd.f32 %v8982_v50, %v8981_v52  ;;  %v8984_v17 = vpop.f32.mrb[102].mxu1  ;;  %v6687_v16 = vsel %vm6655_vm4, %v6577_v35, %v6671_v60 }
 0x884   : > { %v8985_v1 = vpop.f32.mrb[103].mxu1 }
 0x885   : > { %9488 = vmatmul.mubr.bf16.vlgmr.msra.gmra.mrb[128].mxu1 %v15271_v10  ;;  %v6688_v45 = vsel %vm6656_vm6, %v6580_v55, %v6672_v0  ;;  %v6488_v51 = vadd.f32 %v8983_v58, %v14479_v61  ;;  %v8986_v40 = vadd.f32 %v8985_v1, %v8984_v17 }
 0x886   : > { %v14483_v48 = vpop.f32.mrb[120].mxu0  ;;  %9491 = vmatprep.mubr.bf16.mxu1 %v15272_v13  ;;  %v6703_v59 = vpack.c.bf16 %v6688_v45, %v6687_v16 }
 0x887   : > { %v14487_v39 = vpop.f32.mrb[121].mxu0  ;;  %v6585_v14 = vadd.f32 %v9457_v63, %v6488_v51  ;;  %v6491_v43 = vadd.f32 %v8986_v40, %v14479_v61 }
 0x888   : > { %v14489_v23 = vpop.f32.mrb[122].mxu0  ;;  %6977 = vmatmul.mubr.bf16.vlgmr.msra.gmra.mrb[128].mxu0 %v6703_v59 }
 0x889   : > { %v14491_v20 = vpop.f32.mrb[123].mxu0  ;;  %v6673_v54 = vmul.f32 0.01, %v6585_v14  ;;  %v6588_v33 = vadd.f32 %v9458_v8, %v6491_v43  ;;  %6984 = vmatprep.mubr.bf16.mxu0 %v14415_v22  ;;  %v8987_v57 = vpop.f32.mrb[104].mxu1  ;;  %9504 = vmatpush3.bf16.msra.mxu0 %v14451_v21  ;;  %vm6657_vm10 = vcmp.gt.f32.partialorder %v6585_v14, 0.0  ;;  %v9898_v43 = vld [vmem:[#allocation3 + $0x508] sm:$0xff]  }
 0x88a   : > { %v8988_v6 = vpop.f32.mrb[105].mxu1  ;;  %9505 = vmatprep.subr.bf16.mxu0 %v9898_v43 }
 0x88b   : > { %v6674_v56 = vmul.f32 0.01, %v6588_v33  ;;  %vm6658_vm15 = vcmp.gt.f32.partialorder %v6588_v33, 0.0  ;;  %v8989_v63 = vadd.f32 %v8988_v6, %v8987_v57  ;;  %v8990_v31 = vpop.f32.mrb[106].mxu1  ;;  %v6689_v9 = vsel %vm6657_vm10, %v6585_v14, %v6673_v54  ;;  %v9899_v6 = vld [vmem:[#allocation3 + $0x510] sm:$0xff]  }
 0x88c   : > { %v8991_v47 = vpop.f32.mrb[107].mxu1 }
 0x88d   : > { %9492 = vmatmul.mubr.bf16.gmra.mrb[132].mxu1 %v15273_v11  ;;  %v6690_v41 = vsel %vm6658_vm15, %v6588_v33, %v6674_v56  ;;  %v6496_v19 = vadd.f32 %v8989_v63, %v14479_v61  ;;  %v8992_v4 = vadd.f32 %v8991_v47, %v8990_v31  ;;  %9506 = vmatpush3.bf16.msra.mxu0 %v9898_v43  ;;  %v9919_v43 = vld [vmem:[#allocation3 + $0x4f8] sm:$0xff]  }
 0x88e   : > { %v14495_v34 = vpop.f32.mrb[124].mxu0  ;;  %9495 = vmatprep.mubr.bf16.mxu1 %v15274_v25  ;;  %v14509_v22 = vpack.c.bf16 %v6690_v41, %v6689_v9  ;;  %9507 = vmatprep.subr.bf16.mxu0 %v9899_v6 }
 0x88f   : > { %v14499_v37 = vpop.f32.mrb[125].mxu0  ;;  %v6593_v21 = vadd.f32 %v6592_v32, %v6496_v19  ;;  %v6499_v8 = vadd.f32 %v8992_v4, %v14479_v61  ;;  %v9900_v19 = vld [vmem:[#allocation3 + $0x518] sm:$0xff]  }
 0x890   : > { %v14501_v24 = vpop.f32.mrb[126].mxu0  ;;  %6985 = vmatmul.mubr.bf16.gmra.mrb[132].mxu0 %v14509_v22 }
 0x891   : > { %v14505_v15 = vpop.f32.mrb[127].mxu0  ;;  %6992 = vmatprep.mubr.bf16.mxu0 %v14424_v27  ;;  %v6675_v46 = vmul.f32 0.01, %v6593_v21  ;;  %v6596_v29 = vadd.f32 %v14474_v36, %v6499_v8  ;;  %v8993_v38 = vpop.f32.mrb[108].mxu1  ;;  %vm6659_vm5 = vcmp.gt.f32.partialorder %v6593_v21, 0.0  ;;  %9508 = vmatpush3.bf16.msra.mxu0 %v9899_v6 }
 0x892   : > { %v8994_v42 = vpop.f32.mrb[109].mxu1  ;;  %9509 = vmatprep.subr.bf16.mxu0 %v9900_v19 }
 0x893   : > { %v6676_v49 = vmul.f32 0.01, %v6596_v29  ;;  %v8995_v35 = vadd.f32 %v8994_v42, %v8993_v38  ;;  %v8996_v5 = vpop.f32.mrb[110].mxu1  ;;  %vm6660_vm7 = vcmp.gt.f32.partialorder %v6596_v29, 0.0  ;;  %v6691_v52 = vsel %vm6659_vm5, %v6593_v21, %v6675_v46  ;;  %v9901_v42 = vld [vmem:[#allocation3 + $0x520] sm:$0xff]  }
 0x894   : > { %v8997_v60 = vpop.f32.mrb[111].mxu1 }
 0x895   : > { %9496 = vmatmul.mubr.bf16.gmra.mrb[136].mxu1 %v13563_v3  ;;  %v6504_v55 = vadd.f32 %v8995_v35, %v14479_v61  ;;  %v8998_v32 = vadd.f32 %v8997_v60, %v8996_v5  ;;  %v6692_v50 = vsel %vm6660_vm7, %v6596_v29, %v6676_v49  ;;  %9510 = vmatpush3.bf16.msra.mxu0 %v9900_v19  ;;  %v9902_v60 = vld [vmem:[#allocation3 + $0x528] sm:$0xff]  }
 0x896   : > { %9499 = vmatprep.mubr.bf16.mxu1 %v13944_v62  ;;  %v14518_v0 = vpack.c.bf16 %v6692_v50, %v6691_v52  ;;  %9511 = vmatprep.subr.bf16.mxu0 %v9901_v42  ;;  %v9903_v52 = vld [vmem:[#allocation3 + $0x530] sm:$0xff]   ;;  %v9906_v50 = vld [vmem:[#allocation3 + $0x480] sm:$0xff]  }
 0x897   : > { %v6601_v27 = vadd.f32 %v14469_v30, %v6504_v55  ;;  %v6507_v36 = vadd.f32 %v8998_v32, %v14479_v61 }
 0x898   : > { %6993 = vmatmul.mubr.bf16.gmra.mrb[136].mxu0 %v14518_v0 }
 0x899   : > { %v6677_v58 = vmul.f32 0.01, %v6601_v27  ;;  %v6604_v17 = vadd.f32 %v14472_v7, %v6507_v36  ;;  %7000 = vmatprep.mubr.bf16.mxu0 %v14431_v2  ;;  %vm6661_vm1 = vcmp.gt.f32.partialorder %v6601_v27, 0.0  ;;  %9512 = vmatpush3.bf16.msra.mxu0 %v9901_v42  ;;  %v9908_v36 = vld [vmem:[#allocation3 + $0x488] sm:$0xff]  }
 0x89a   : > { %9513 = vmatprep.subr.bf16.mxu0 %v9902_v60 }
 0x89b   : > { %v6678_v1 = vmul.f32 0.01, %v6604_v17  ;;  %vm6662_vm0 = vcmp.gt.f32.partialorder %v6604_v17, 0.0  ;;  %v6693_v16 = vsel %vm6661_vm1, %v6601_v27, %v6677_v58  ;;  %v9907_v27 = vld [vmem:[#allocation3 + $0x4c8] sm:$0xff]   ;;  %v9909_v58 = vld [vmem:[#allocation3 + $0x4d0] sm:$0xff]  }
 0x89d   : > { %9500 = vmatmul.mubr.bf16.gmra.mrb[140].mxu1 %v14026_v28  ;;  %v6694_v45 = vsel %vm6662_vm0, %v6604_v17, %v6678_v1  ;;  %9514 = vmatpush3.bf16.msra.mxu0 %v9902_v60  ;;  %v9910_v17 = vld [vmem:[#allocation3 + $0x490] sm:$0xff]   ;;  %v9911_v1 = vld [vmem:[#allocation3 + $0x4d8] sm:$0xff]  }
 0x89e   : > { %7475 = vmatprep.mubr.bf16.mxu1 %v6703_v59  ;;  %v14525_v51 = vpack.c.bf16 %v6694_v45, %v6693_v16  ;;  %9515 = vmatprep.subr.bf16.mxu0 %v9903_v52  ;;  %v9912_v16 = vld [vmem:[#allocation3 + $0x498] sm:$0xff]   ;;  %v9914_v45 = vld [vmem:[#allocation3 + $0x4a0] sm:$0xff]  }
 0x8a0   : > { %7001 = vmatmul.mubr.bf16.gmra.mrb[140].mxu0 %v14525_v51 }
 0x8a1   : > { %7008 = vmatprep.mubr.bf16.mxu0 %v14440_v12  ;;  %9516 = vmatpush3.bf16.msra.mxu0 %v9903_v52 }
 0x8c4   : > { %v8999_v30 = vpop.f32.mrb[112].mxu1 }
 0x8c5   : > { %v9000_v40 = vpop.f32.mrb[113].mxu1 }
 0x8c6   : > { %v9001_v59 = vadd.f32 %v9000_v40, %v8999_v30  ;;  %v9002_v14 = vpop.f32.mrb[114].mxu1  ;;  %v9915_v30 = vld [vmem:[#allocation3 + $0x4e8] sm:$0xff]  }
 0x8c7   : > { %v9003_v54 = vpop.f32.mrb[115].mxu1  ;;  %v9916_v40 = vld [vmem:[#allocation3 + $0x4a8] sm:$0xff]  }
 0x8c8   : > { %v6512_v7 = vadd.f32 %v9001_v59, %v14479_v61  ;;  %v9004_v2 = vadd.f32 %v9003_v54, %v9002_v14  ;;  %v9917_v59 = vld [vmem:[#allocation3 + $0x4f0] sm:$0xff]   ;;  %v9920_v54 = vld [vmem:[#allocation3 + $0x4b8] sm:$0xff]  }
 0x8c9   : > { %v9918_v14 = vld [vmem:[#allocation3 + $0x4b0] sm:$0xff]  }
 0x8ca   : > { %v6609_v33 = vadd.f32 %v14487_v39, %v6512_v7  ;;  %v6515_v57 = vadd.f32 %v9004_v2, %v14479_v61  ;;  %v14548_v7 = vld [vmem:[%s14894_s6 + $0x80] sm:$0xff]  }
 0x8cc   : > { %v6679_v56 = vmul.f32 0.01, %v6609_v33  ;;  %v6612_v63 = vadd.f32 %v14491_v20, %v6515_v57  ;;  %v9005_v12 = vpop.f32.mrb[116].mxu1  ;;  %vm6663_vm8 = vcmp.gt.f32.partialorder %v6609_v33, 0.0 }
 0x8cd   : > { %v9006_v31 = vpop.f32.mrb[117].mxu1 }
 0x8ce   : > { %v6680_v47 = vmul.f32 0.01, %v6612_v63  ;;  %v9007_v9 = vadd.f32 %v9006_v31, %v9005_v12  ;;  %v9008_v41 = vpop.f32.mrb[118].mxu1  ;;  %vm6664_vm9 = vcmp.gt.f32.partialorder %v6612_v63, 0.0  ;;  %v6695_v8 = vsel %vm6663_vm8, %v6609_v33, %v6679_v56 }
 0x8cf   : > { %v9009_v4 = vpop.f32.mrb[119].mxu1 }
 0x8d0   : > { %v6520_v21 = vadd.f32 %v9007_v9, %v14479_v61  ;;  %v9010_v39 = vadd.f32 %v9009_v4, %v9008_v41  ;;  %v6696_v46 = vsel %vm6664_vm9, %v6612_v63, %v6680_v47 }
 0x8d1   : > { %v14534_v29 = vpack.c.bf16 %v6696_v46, %v6695_v8 }
 0x8d2   : > { %v6617_v20 = vadd.f32 %v14483_v48, %v6520_v21  ;;  %v6523_v38 = vadd.f32 %v9010_v39, %v14479_v61 }
 0x8d3   : > { %7009 = vmatmul.mubr.bf16.gmra.mrb[144].mxu0 %v14534_v29 }
 0x8d4   : > { %v6681_v49 = vmul.f32 0.01, %v6617_v20  ;;  %v6620_v35 = vadd.f32 %v14489_v23, %v6523_v38  ;;  %7016 = vmatprep.mubr.bf16.mxu0 %v14447_v26  ;;  %vm6665_vm11 = vcmp.gt.f32.partialorder %v6617_v20, 0.0  ;;  %v9904_v26 = vld [vmem:[#allocation3 + $0x538] sm:$0xff]   ;;  %v9905_v23 = vld [vmem:[#allocation3 + $0x4c0] sm:$0xff]  }
 0x8d5   : > { %9517 = vmatprep.subr.bf16.mxu0 %v9904_v26  ;;  %9119 = vmatprep.subr.bf16.mxu1 %v9905_v23 }
 0x8d6   : > { %v6682_v5 = vmul.f32 0.01, %v6620_v35  ;;  %vm6666_vm12 = vcmp.gt.f32.partialorder %v6620_v35, 0.0  ;;  %v6697_v55 = vsel %vm6665_vm11, %v6617_v20, %v6681_v49  ;;  %9518 = vmatpush3.bf16.msra.mxu0 %v9904_v26  ;;  %9120 = vmatpush3.bf16.msra.mxu1 %v9906_v50 }
 0x8d7   : > { %9121 = vmatprep.subr.bf16.mxu1 %v9907_v27 }
 0x8d8   : > { %v6698_v32 = vsel %vm6666_vm12, %v6620_v35, %v6682_v5 }
 0x8d9   : > { %v14541_v48 = vpack.c.bf16 %v6698_v32, %v6697_v55 }
 0x8da   : > { %9122 = vmatpush3.bf16.msra.mxu1 %v9908_v36 }
 0x8db   : > { %7017 = vmatmul.mubr.bf16.gmra.mrb[148].mxu0 %v14541_v48  ;;  %9123 = vmatprep.subr.bf16.mxu1 %v9909_v58 }
 0x8dc   : > { %7024 = vmatprep.mubr.bf16.mxu0 %v14459_v18  ;;  %v9913_v18 = vld [vmem:[#allocation3 + $0x4e0] sm:$0xff]  }
 0x8de   : > { %9124 = vmatpush3.bf16.msra.mxu1 %v9910_v17  ;;  %v14576_v17 = vld [vmem:[%s14893_s5 + $0x5] ss:$0 sm:$0xff] }
 0x8df   : > { %9125 = vmatprep.subr.bf16.mxu1 %v9911_v1 }
 0x8e2   : > { %9126 = vmatpush3.bf16.msra.mxu1 %v9912_v16 }
 0x8e3   : > { %9127 = vmatprep.subr.bf16.mxu1 %v9913_v18 }
 0x8e6   : > { %9128 = vmatpush3.bf16.msra.mxu1 %v9914_v45 }
 0x8e7   : > { %9129 = vmatprep.subr.bf16.mxu1 %v9915_v30 }
 0x8ea   : > { %9130 = vmatpush3.bf16.msra.mxu1 %v9916_v40 }
 0x8eb   : > { %9131 = vmatprep.subr.bf16.mxu1 %v9917_v59 }
 0x8ee   : > { %9132 = vmatpush3.bf16.msra.mxu1 %v9918_v14 }
 0x8ef   : > { %9133 = vmatprep.subr.bf16.mxu1 %v9919_v43 }
 0x8f2   : > { %9134 = vmatpush3.bf16.msra.mxu1 %v9920_v54 }
 0x8f3   : > { %9535 = vmatprep.subr.bf16.mxu1 %v14548_v7 }
 0x948   : > { %v9011_v2 = vpop.f32.mrb[120].mxu1 }
 0x949   : > { %v9012_v33 = vpop.f32.mrb[121].mxu1 }
 0x94a   : > { %v9013_v57 = vadd.f32 %v9012_v33, %v9011_v2  ;;  %v9014_v6 = vpop.f32.mrb[122].mxu1 }
 0x94b   : > { %v9015_v56 = vpop.f32.mrb[123].mxu1 }
 0x94c   : > { %v6528_v63 = vadd.f32 %v9013_v57, %v14479_v61  ;;  %v9016_v12 = vadd.f32 %v9015_v56, %v9014_v6 }
 0x94e   : > { %v6625_v31 = vadd.f32 %v14499_v37, %v6528_v63  ;;  %v6531_v47 = vadd.f32 %v9016_v12, %v14479_v61 }
 0x950   : > { %v6683_v9 = vmul.f32 0.01, %v6625_v31  ;;  %v6628_v41 = vadd.f32 %v14505_v15, %v6531_v47  ;;  %v9017_v19 = vpop.f32.mrb[124].mxu1  ;;  %vm6667_vm13 = vcmp.gt.f32.partialorder %v6625_v31, 0.0 }
 0x951   : > { %v9018_v4 = vpop.f32.mrb[125].mxu1 }
 0x952   : > { %v6684_v21 = vmul.f32 0.01, %v6628_v41  ;;  %v9019_v39 = vadd.f32 %v9018_v4, %v9017_v19  ;;  %v9020_v8 = vpop.f32.mrb[126].mxu1  ;;  %vm6668_vm14 = vcmp.gt.f32.partialorder %v6628_v41, 0.0  ;;  %v6699_v42 = vsel %vm6667_vm13, %v6625_v31, %v6683_v9 }
 0x953   : > { %v9021_v46 = vpop.f32.mrb[127].mxu1 }
 0x954   : > { %v6536_v20 = vadd.f32 %v9019_v39, %v14479_v61  ;;  %v9022_v38 = vadd.f32 %v9021_v46, %v9020_v8  ;;  %v6700_v49 = vsel %vm6668_vm14, %v6628_v41, %v6684_v21 }
 0x955   : > { %v14556_v35 = vpack.c.bf16 %v6700_v49, %v6699_v42 }
 0x956   : > { %v6633_v37 = vadd.f32 %v14495_v34, %v6536_v20  ;;  %v6539_v5 = vadd.f32 %v9022_v38, %v14479_v61 }
 0x957   : > { %7025 = vmatmul.mubr.bf16.gmra.mrb[152].mxu0 %v14556_v35 }
 0x958   : > { %v6685_v15 = vmul.f32 0.01, %v6633_v37  ;;  %v6636_v60 = vadd.f32 %v14501_v24, %v6539_v5  ;;  %7032 = vmatprep.mubr.bf16.mxu0 %v14466_v44  ;;  %v9489_v55 = vpop.f32.mrb[128].mxu1  ;;  %vm6669_vm2 = vcmp.gt.f32.partialorder %v6633_v37, 0.0 }
 0x959   : > { %v7075_v32 = vpop.f32.mrb[129].mxu1 }
 0x95a   : > { %v6686_v52 = vmul.f32 0.01, %v6636_v60  ;;  %v9490_v26 = vpop.f32.mrb[130].mxu1  ;;  %vm6670_vm3 = vcmp.gt.f32.partialorder %v6636_v60, 0.0  ;;  %v6701_v50 = vsel %vm6669_vm2, %v6633_v37, %v6685_v15 }
 0x95b   : > { %v7078_v23 = vpop.f32.mrb[131].mxu1  ;;  %v9055_v44 = vpop.f32.mrb[128].mxu0 }
 0x95c   : > { %v6702_v27 = vsel %vm6670_vm3, %v6636_v60, %v6686_v52  ;;  %v9056_v1 = vpop.f32.mrb[129].mxu0 }
 0x95d   : > { %v14563_v36 = vpack.c.bf16 %v6702_v27, %v6701_v50  ;;  %v9057_v16 = vadd.f32 %v9056_v1, %v9055_v44  ;;  %v9058_v18 = vpop.f32.mrb[130].mxu0 }
 0x95e   : > { %v9059_v45 = vpop.f32.mrb[131].mxu0 }
 0x95f   : > { %7033 = vmatmul.mubr.bf16.gmra.mrb[156].mxu0 %v14563_v36  ;;  %v6979_v30 = vadd.f32 %v9057_v16, %v14576_v17  ;;  %v9060_v40 = vadd.f32 %v9059_v45, %v9058_v18 }
 0x960   : > { %v14566_v61 = vpop.f32.mrb[132].mxu1  ;;  %9519 = vmatprep.mubr.bf16.mxu0 %v15270_v53 }
 0x961   : > { %v7091_v34 = vpop.f32.mrb[133].mxu1  ;;  %v7076_v14 = vadd.f32 %v7075_v32, %v6979_v30  ;;  %v6982_v43 = vadd.f32 %v9060_v40, %v14576_v17 }
 0x962   : > { %v14569_v24 = vpop.f32.mrb[134].mxu1 }
 0x963   : > { %v14571_v58 = vpop.f32.mrb[135].mxu1  ;;  %v7170_v33 = vmul.f32 0.01, %v7076_v14  ;;  %v7079_v57 = vadd.f32 %v7078_v23, %v6982_v43  ;;  %v9061_v6 = vpop.f32.mrb[132].mxu0  ;;  %vm7154_vm4 = vcmp.gt.f32.partialorder %v7076_v14, 0.0 }
 0x964   : > { %v9062_v63 = vpop.f32.mrb[133].mxu0 }
 0x965   : > { %vm7155_vm6 = vcmp.gt.f32.partialorder %v7079_v57, 0.0  ;;  %v7171_v12 = vmul.f32 0.01, %v7079_v57  ;;  %v9063_v31 = vadd.f32 %v9062_v63, %v9061_v6  ;;  %v9064_v47 = vpop.f32.mrb[134].mxu0  ;;  %v7186_v41 = vsel %vm7154_vm4, %v7076_v14, %v7170_v33 }
 0x966   : > { %v9065_v9 = vpop.f32.mrb[135].mxu0 }
 0x967   : > { %9520 = vmatmul.mubr.bf16.vlgmr.msra.gmra.mrb[160].mxu0 %v15271_v10  ;;  %v7187_v19 = vsel %vm7155_vm6, %v7079_v57, %v7171_v12  ;;  %v6987_v4 = vadd.f32 %v9063_v31, %v14576_v17  ;;  %v9066_v21 = vadd.f32 %v9065_v9, %v9064_v47 }
 0x968   : > { %v14580_v59 = vpop.f32.mrb[136].mxu1  ;;  %9523 = vmatprep.mubr.bf16.mxu0 %v15272_v13  ;;  %v7202_v39 = vpack.c.bf16 %v7187_v19, %v7186_v41 }
 0x969   : > { %v14584_v54 = vpop.f32.mrb[137].mxu1  ;;  %v7084_v46 = vadd.f32 %v9489_v55, %v6987_v4  ;;  %v6990_v20 = vadd.f32 %v9066_v21, %v14576_v17 }
 0x96a   : > { %v14586_v2 = vpop.f32.mrb[138].mxu1  ;;  %7476 = vmatmul.mubr.bf16.vlgmr.msra.gmra.mrb[144].mxu1 %v7202_v39 }
 0x96b   : > { %v14588_v56 = vpop.f32.mrb[139].mxu1  ;;  %v7172_v49 = vmul.f32 0.01, %v7084_v46  ;;  %v7087_v37 = vadd.f32 %v9490_v26, %v6990_v20  ;;  %7483 = vmatprep.mubr.bf16.mxu1 %v14509_v22  ;;  %v9067_v5 = vpop.f32.mrb[136].mxu0  ;;  %9536 = vmatpush3.bf16.msra.mxu1 %v14548_v7  ;;  %vm7156_vm10 = vcmp.gt.f32.partialorder %v7084_v46, 0.0 }
 0x96c   : > { %v9068_v60 = vpop.f32.mrb[137].mxu0 }
 0x96d   : > { %v7173_v32 = vmul.f32 0.01, %v7087_v37  ;;  %vm7157_vm15 = vcmp.gt.f32.partialorder %v7087_v37, 0.0  ;;  %v9069_v55 = vadd.f32 %v9068_v60, %v9067_v5  ;;  %v9070_v52 = vpop.f32.mrb[138].mxu0  ;;  %v7188_v50 = vsel %vm7156_vm10, %v7084_v46, %v7172_v49 }
 0x96e   : > { %v9071_v23 = vpop.f32.mrb[139].mxu0 }
 0x96f   : > { %9524 = vmatmul.mubr.bf16.gmra.mrb[164].mxu0 %v15273_v11  ;;  %v7189_v27 = vsel %vm7157_vm15, %v7087_v37, %v7173_v32  ;;  %v6995_v44 = vadd.f32 %v9069_v55, %v14576_v17  ;;  %v9072_v1 = vadd.f32 %v9071_v23, %v9070_v52 }
 0x970   : > { %v14592_v8 = vpop.f32.mrb[140].mxu1  ;;  %9527 = vmatprep.mubr.bf16.mxu0 %v15274_v25  ;;  %v14606_v22 = vpack.c.bf16 %v7189_v27, %v7188_v50 }
 0x971   : > { %v14596_v38 = vpop.f32.mrb[141].mxu1  ;;  %v7092_v7 = vadd.f32 %v7091_v34, %v6995_v44  ;;  %v6998_v26 = vadd.f32 %v9072_v1, %v14576_v17 }
 0x972   : > { %v14598_v42 = vpop.f32.mrb[142].mxu1  ;;  %7484 = vmatmul.mubr.bf16.gmra.mrb[148].mxu1 %v14606_v22 }
 0x973   : > { %v14602_v15 = vpop.f32.mrb[143].mxu1  ;;  %7491 = vmatprep.mubr.bf16.mxu1 %v14518_v0  ;;  %v7174_v16 = vmul.f32 0.01, %v7092_v7  ;;  %v7095_v18 = vadd.f32 %v14571_v58, %v6998_v26  ;;  %v9073_v45 = vpop.f32.mrb[140].mxu0  ;;  %vm7158_vm5 = vcmp.gt.f32.partialorder %v7092_v7, 0.0 }
 0x974   : > { %v9074_v30 = vpop.f32.mrb[141].mxu0 }
 0x975   : > { %v7175_v40 = vmul.f32 0.01, %v7095_v18  ;;  %v9075_v14 = vadd.f32 %v9074_v30, %v9073_v45  ;;  %v9076_v43 = vpop.f32.mrb[142].mxu0  ;;  %vm7159_vm7 = vcmp.gt.f32.partialorder %v7095_v18, 0.0  ;;  %v7190_v6 = vsel %vm7158_vm5, %v7092_v7, %v7174_v16  ;;  %v9925_v30 = vld [vmem:[%s14894_s6 + $0xa0] sm:$0xff]  }
 0x976   : > { %v9077_v33 = vpop.f32.mrb[143].mxu0 }
 0x977   : > { %9528 = vmatmul.mubr.bf16.gmra.mrb[168].mxu0 %v13563_v3  ;;  %v7003_v57 = vadd.f32 %v9075_v14, %v14576_v17  ;;  %v9078_v34 = vadd.f32 %v9077_v33, %v9076_v43  ;;  %v7191_v63 = vsel %vm7159_vm7, %v7095_v18, %v7175_v40 }
 0x978   : > { %9531 = vmatprep.mubr.bf16.mxu0 %v13944_v62  ;;  %v14615_v12 = vpack.c.bf16 %v7191_v63, %v7190_v6  ;;  %v9929_v6 = vld [vmem:[%s14894_s6 + $0x40] sm:$0xff]  }
 0x979   : > { %v7100_v0 = vadd.f32 %v14566_v61, %v7003_v57  ;;  %v7006_v58 = vadd.f32 %v9078_v34, %v14576_v17  ;;  %v9930_v63 = vld [vmem:[%s14894_s6] sm:$0xff]   ;;  %9199 = vmatprep.subr.bf16.mxu0 %v9929_v6 }
 0x97a   : > { %7492 = vmatmul.mubr.bf16.gmra.mrb[152].mxu1 %v14615_v12  ;;  %9200 = vmatpush3.bf16.msra.mxu0 %v9930_v63 }
 0x97b   : > { %v7176_v31 = vmul.f32 0.01, %v7100_v0  ;;  %v7103_v47 = vadd.f32 %v14569_v24, %v7006_v58  ;;  %7499 = vmatprep.mubr.bf16.mxu1 %v14525_v51  ;;  %vm7160_vm1 = vcmp.gt.f32.partialorder %v7100_v0, 0.0  ;;  %v9922_v24 = vld [vmem:[%s14894_s6 + $0x88] sm:$0xff]   ;;  %v9933_v58 = vld [vmem:[%s14894_s6 + $0x50] sm:$0xff]  }
 0x97c   : > { %9537 = vmatprep.subr.bf16.mxu1 %v9922_v24 }
 0x97d   : > { %v7177_v9 = vmul.f32 0.01, %v7103_v47  ;;  %vm7161_vm0 = vcmp.gt.f32.partialorder %v7103_v47, 0.0  ;;  %v7192_v41 = vsel %vm7160_vm1, %v7100_v0, %v7176_v31  ;;  %9538 = vmatpush3.bf16.msra.mxu1 %v9922_v24  ;;  %v9932_v0 = vld [vmem:[%s14894_s6 + $0x8] sm:$0xff]   ;;  %v9934_v31 = vld [vmem:[%s14894_s6 + $0x10] sm:$0xff]   ;;  %v9943_v24 = vld [vmem:[%s14894_s6 + $0x78] sm:$0xff]  }
 0x97f   : > { %9532 = vmatmul.mubr.bf16.gmra.mrb[172].mxu0 %v14026_v28  ;;  %v7193_v19 = vsel %vm7161_vm0, %v7103_v47, %v7177_v9  ;;  %v9935_v47 = vld [vmem:[%s14894_s6 + $0x58] sm:$0xff]  }
 0x980   : > { %7972 = vmatprep.mubr.bf16.mxu0 %v7202_v39  ;;  %v14622_v4 = vpack.c.bf16 %v7193_v19, %v7192_v41  ;;  %v9936_v9 = vld [vmem:[%s14894_s6 + $0x18] sm:$0xff]   ;;  %v9937_v41 = vld [vmem:[%s14894_s6 + $0x60] sm:$0xff]  }
 0x981   : > { %v9938_v19 = vld [vmem:[%s14894_s6 + $0x20] sm:$0xff]  }
 0x982   : > { %7500 = vmatmul.mubr.bf16.gmra.mrb[156].mxu1 %v14622_v4 }
 0x983   : > { %7507 = vmatprep.mubr.bf16.mxu1 %v14534_v29  ;;  %v9923_v29 = vld [vmem:[%s14894_s6 + $0x90] sm:$0xff]  }
 0x984   : > { %9539 = vmatprep.subr.bf16.mxu1 %v9923_v29 }
 0x985   : > { %9540 = vmatpush3.bf16.msra.mxu1 %v9923_v29 }
 0x9a6   : > { %v9079_v61 = vpop.f32.mrb[144].mxu0 }
 0x9a7   : > { %v9080_v21 = vpop.f32.mrb[145].mxu0 }
 0x9a8   : > { %v9081_v39 = vadd.f32 %v9080_v21, %v9079_v61  ;;  %v9082_v46 = vpop.f32.mrb[146].mxu0  ;;  %v9939_v61 = vld [vmem:[%s14894_s6 + $0x68] sm:$0xff]  }
 0x9a9   : > { %v9083_v51 = vpop.f32.mrb[147].mxu0  ;;  %v9940_v21 = vld [vmem:[%s14894_s6 + $0x28] sm:$0xff]  }
 0x9aa   : > { %v7011_v20 = vadd.f32 %v9081_v39, %v14576_v17  ;;  %v9084_v49 = vadd.f32 %v9083_v51, %v9082_v46  ;;  %v9941_v39 = vld [vmem:[%s14894_s6 + $0x70] sm:$0xff]   ;;  %v9944_v51 = vld [vmem:[%s14894_s6 + $0x38] sm:$0xff]  }
 0x9ab   : > { %v9942_v46 = vld [vmem:[%s14894_s6 + $0x30] sm:$0xff]  }
 0x9ac   : > { %v7108_v37 = vadd.f32 %v14584_v54, %v7011_v20  ;;  %v7014_v5 = vadd.f32 %v9084_v49, %v14576_v17  ;;  %v9924_v54 = vld [vmem:[%s14894_s6 + $0x98] sm:$0xff]  }
 0x9ad   : > { %9541 = vmatprep.subr.bf16.mxu1 %v9924_v54 }
 0x9ae   : > { %v7178_v60 = vmul.f32 0.01, %v7108_v37  ;;  %v7111_v32 = vadd.f32 %v14588_v56, %v7014_v5  ;;  %v9085_v55 = vpop.f32.mrb[148].mxu0  ;;  %vm7162_vm8 = vcmp.gt.f32.partialorder %v7108_v37, 0.0  ;;  %9542 = vmatpush3.bf16.msra.mxu1 %v9924_v54 }
 0x9af   : > { %v9086_v52 = vpop.f32.mrb[149].mxu0  ;;  %9543 = vmatprep.subr.bf16.mxu1 %v9925_v30 }
 0x9b0   : > { %v7179_v23 = vmul.f32 0.01, %v7111_v32  ;;  %v9087_v50 = vadd.f32 %v9086_v52, %v9085_v55  ;;  %v9088_v27 = vpop.f32.mrb[150].mxu0  ;;  %vm7163_vm9 = vcmp.gt.f32.partialorder %v7111_v32, 0.0  ;;  %v7194_v26 = vsel %vm7162_vm8, %v7108_v37, %v7178_v60 }
 0x9b1   : > { %v9089_v44 = vpop.f32.mrb[151].mxu0 }
 0x9b2   : > { %v7019_v1 = vadd.f32 %v9087_v50, %v14576_v17  ;;  %v9090_v7 = vadd.f32 %v9089_v44, %v9088_v27  ;;  %v7195_v16 = vsel %vm7163_vm9, %v7111_v32, %v7179_v23  ;;  %9544 = vmatpush3.bf16.msra.mxu1 %v9925_v30 }
 0x9b3   : > { %v14640_v56 = vpack.c.bf16 %v7195_v16, %v7194_v26 }
 0x9b4   : > { %v7116_v18 = vadd.f32 %v14580_v59, %v7019_v1  ;;  %v7022_v45 = vadd.f32 %v9090_v7, %v14576_v17  ;;  %v9926_v59 = vld [vmem:[%s14894_s6 + $0xa8] sm:$0xff]  }
 0x9b5   : > { %7508 = vmatmul.mubr.bf16.gmra.mrb[160].mxu1 %v14640_v56  ;;  %9545 = vmatprep.subr.bf16.mxu1 %v9926_v59 }
 0x9b6   : > { %v7180_v40 = vmul.f32 0.01, %v7116_v18  ;;  %v7119_v14 = vadd.f32 %v14586_v2, %v7022_v45  ;;  %7515 = vmatprep.mubr.bf16.mxu1 %v14541_v48  ;;  %vm7164_vm11 = vcmp.gt.f32.partialorder %v7116_v18, 0.0  ;;  %9546 = vmatpush3.bf16.msra.mxu1 %v9926_v59  ;;  %v9927_v2 = vld [vmem:[%s14894_s6 + $0xb0] sm:$0xff]   ;;  %v9928_v48 = vld [vmem:[%s14894_s6 + $0xb8] sm:$0xff]  }
 0x9b7   : > { %9547 = vmatprep.subr.bf16.mxu1 %v9927_v2 }
 0x9b8   : > { %v7181_v43 = vmul.f32 0.01, %v7119_v14  ;;  %vm7165_vm12 = vcmp.gt.f32.partialorder %v7119_v14, 0.0  ;;  %v7196_v33 = vsel %vm7164_vm11, %v7116_v18, %v7180_v40 }
 0x9ba   : > { %v7197_v57 = vsel %vm7165_vm12, %v7119_v14, %v7181_v43  ;;  %9548 = vmatpush3.bf16.msra.mxu1 %v9927_v2 }
 0x9bb   : > { %v14653_v34 = vpack.c.bf16 %v7197_v57, %v7196_v33  ;;  %9549 = vmatprep.subr.bf16.mxu1 %v9928_v48 }
 0x9bd   : > { %7516 = vmatmul.mubr.bf16.gmra.mrb[164].mxu1 %v14653_v34 }
 0x9be   : > { %7523 = vmatprep.mubr.bf16.mxu1 %v14556_v35  ;;  %9550 = vmatpush3.bf16.msra.mxu1 %v9928_v48  ;;  %v9931_v35 = vld [vmem:[%s14894_s6 + $0x48] sm:$0xff]  }
 0x9bf   : > { %9201 = vmatprep.subr.bf16.mxu0 %v9931_v35 }
 0x9c0   : > { %9202 = vmatpush3.bf16.msra.mxu0 %v9932_v0 }
 0x9c1   : > { %9203 = vmatprep.subr.bf16.mxu0 %v9933_v58  ;;  %v14736_v58 = vld [vmem:[%s14893_s5 + $0x6] ss:$0 sm:$0xff] }
 0x9c4   : > { %9204 = vmatpush3.bf16.msra.mxu0 %v9934_v31 }
 0x9c5   : > { %9205 = vmatprep.subr.bf16.mxu0 %v9935_v47 }
 0x9c8   : > { %9206 = vmatpush3.bf16.msra.mxu0 %v9936_v9 }
 0x9c9   : > { %9207 = vmatprep.subr.bf16.mxu0 %v9937_v41 }
 0x9cc   : > { %9208 = vmatpush3.bf16.msra.mxu0 %v9938_v19 }
 0x9cd   : > { %9209 = vmatprep.subr.bf16.mxu0 %v9939_v61 }
 0x9d0   : > { %9210 = vmatpush3.bf16.msra.mxu0 %v9940_v21 }
 0x9d1   : > { %9211 = vmatprep.subr.bf16.mxu0 %v9941_v39 }
 0x9d4   : > { %9212 = vmatpush3.bf16.msra.mxu0 %v9942_v46 }
 0x9d5   : > { %9213 = vmatprep.subr.bf16.mxu0 %v9943_v24 }
 0x9d8   : > { %9214 = vmatpush3.bf16.msra.mxu0 %v9944_v51 }
 0xa2a   : > { %v9091_v20 = vpop.f32.mrb[152].mxu0 }
 0xa2b   : > { %v9092_v49 = vpop.f32.mrb[153].mxu0 }
 0xa2c   : > { %v9093_v37 = vadd.f32 %v9092_v49, %v9091_v20  ;;  %v9094_v5 = vpop.f32.mrb[154].mxu0 }
 0xa2d   : > { %v9095_v29 = vpop.f32.mrb[155].mxu0 }
 0xa2e   : > { %v7027_v60 = vadd.f32 %v9093_v37, %v14576_v17  ;;  %v9096_v32 = vadd.f32 %v9095_v29, %v9094_v5 }
 0xa30   : > { %v7124_v55 = vadd.f32 %v14596_v38, %v7027_v60  ;;  %v7030_v52 = vadd.f32 %v9096_v32, %v14576_v17 }
 0xa32   : > { %v7182_v23 = vmul.f32 0.01, %v7124_v55  ;;  %v7127_v50 = vadd.f32 %v14602_v15, %v7030_v52  ;;  %v9097_v27 = vpop.f32.mrb[156].mxu0  ;;  %vm7166_vm13 = vcmp.gt.f32.partialorder %v7124_v55, 0.0 }
 0xa33   : > { %v9098_v54 = vpop.f32.mrb[157].mxu0 }
 0xa34   : > { %v7183_v44 = vmul.f32 0.01, %v7127_v50  ;;  %v9099_v1 = vadd.f32 %v9098_v54, %v9097_v27  ;;  %v9100_v7 = vpop.f32.mrb[158].mxu0  ;;  %vm7167_vm14 = vcmp.gt.f32.partialorder %v7127_v50, 0.0  ;;  %v7198_v45 = vsel %vm7166_vm13, %v7124_v55, %v7182_v23 }
 0xa35   : > { %v9101_v26 = vpop.f32.mrb[159].mxu0 }
 0xa36   : > { %v7035_v16 = vadd.f32 %v9099_v1, %v14576_v17  ;;  %v9102_v18 = vadd.f32 %v9101_v26, %v9100_v7  ;;  %v7199_v30 = vsel %vm7167_vm14, %v7127_v50, %v7183_v44 }
 0xa37   : > { %v14716_v40 = vpack.c.bf16 %v7199_v30, %v7198_v45 }
 0xa38   : > { %v7132_v38 = vadd.f32 %v14592_v8, %v7035_v16  ;;  %v7038_v14 = vadd.f32 %v9102_v18, %v14576_v17 }
 0xa39   : > { %7524 = vmatmul.mubr.bf16.gmra.mrb[168].mxu1 %v14716_v40 }
 0xa3a   : > { %v7184_v15 = vmul.f32 0.01, %v7132_v38  ;;  %v7135_v43 = vadd.f32 %v14598_v42, %v7038_v14  ;;  %7531 = vmatprep.mubr.bf16.mxu1 %v14563_v36  ;;  %v9521_v59 = vpop.f32.mrb[160].mxu0  ;;  %vm7168_vm2 = vcmp.gt.f32.partialorder %v7132_v38, 0.0 }
 0xa3b   : > { %v7574_v33 = vpop.f32.mrb[161].mxu0 }
 0xa3c   : > { %v7185_v57 = vmul.f32 0.01, %v7135_v43  ;;  %v9522_v2 = vpop.f32.mrb[162].mxu0  ;;  %vm7169_vm3 = vcmp.gt.f32.partialorder %v7135_v43, 0.0  ;;  %v7200_v6 = vsel %vm7168_vm2, %v7132_v38, %v7184_v15 }
 0xa3d   : > { %v7577_v48 = vpop.f32.mrb[163].mxu0  ;;  %v9135_v36 = vpop.f32.mrb[144].mxu1 }
 0xa3e   : > { %v7201_v63 = vsel %vm7169_vm3, %v7135_v43, %v7185_v57  ;;  %v9136_v31 = vpop.f32.mrb[145].mxu1 }
 0xa3f   : > { %v14723_v35 = vpack.c.bf16 %v7201_v63, %v7200_v6  ;;  %v9137_v47 = vadd.f32 %v9136_v31, %v9135_v36  ;;  %v9138_v9 = vpop.f32.mrb[146].mxu1 }
 0xa40   : > { %v9139_v41 = vpop.f32.mrb[147].mxu1 }
 0xa41   : > { %7532 = vmatmul.mubr.bf16.gmra.mrb[172].mxu1 %v14723_v35  ;;  %v7478_v19 = vadd.f32 %v9137_v47, %v14736_v58  ;;  %v9140_v61 = vadd.f32 %v9139_v41, %v9138_v9 }
 0xa42   : > { %v14726_v17 = vpop.f32.mrb[164].mxu0  ;;  %9551 = vmatprep.mubr.bf16.mxu1 %v15270_v53 }
 0xa43   : > { %v7590_v8 = vpop.f32.mrb[165].mxu0  ;;  %v7575_v21 = vadd.f32 %v7574_v33, %v7478_v19  ;;  %v7481_v39 = vadd.f32 %v9140_v61, %v14736_v58 }
 0xa44   : > { %v14729_v42 = vpop.f32.mrb[166].mxu0 }
 0xa45   : > { %v14731_v0 = vpop.f32.mrb[167].mxu0  ;;  %v7669_v51 = vmul.f32 0.01, %v7575_v21  ;;  %v7578_v20 = vadd.f32 %v7577_v48, %v7481_v39  ;;  %v9141_v49 = vpop.f32.mrb[148].mxu1  ;;  %vm7653_vm4 = vcmp.gt.f32.partialorder %v7575_v21, 0.0 }
 0xa46   : > { %v9142_v5 = vpop.f32.mrb[149].mxu1 }
 0xa47   : > { %vm7654_vm6 = vcmp.gt.f32.partialorder %v7578_v20, 0.0  ;;  %v9143_v29 = vadd.f32 %v9142_v5, %v9141_v49  ;;  %v9144_v60 = vpop.f32.mrb[150].mxu1 }
 0xa48   : > { %v9145_v32 = vpop.f32.mrb[151].mxu1 }
 0xa49   : > { %9552 = vmatmul.mubr.bf16.vlgmr.msra.gmra.mrb[176].mxu1 %v15271_v10  ;;  %v7670_v10 = vmul.f32 0.01, %v7578_v20  ;;  %v7486_v52 = vadd.f32 %v9143_v29, %v14736_v58  ;;  %v9146_v23 = vadd.f32 %v9145_v32, %v9144_v60 }
 0xa4a   : > { %v14740_v53 = vpop.f32.mrb[168].mxu0  ;;  %9555 = vmatprep.mubr.bf16.mxu1 %v15272_v13  ;;  %v7685_v13 = vsel %vm7653_vm4, %v7575_v21, %v7669_v51  ;;  %vm8182_vm4 = vcmask 7168  }
 0xa4b   : > { %v14744_v46 = vpop.f32.mrb[169].mxu0  ;;  %v7686_v55 = vsel %vm7654_vm6, %v7578_v20, %v7670_v10  ;;  %v7583_v54 = vadd.f32 %v9521_v59, %v7486_v52  ;;  %v7489_v44 = vadd.f32 %v9146_v23, %v14736_v58 }
 0xa4c   : > { %v14746_v24 = vpop.f32.mrb[170].mxu0  ;;  %v7701_v50 = vpack.c.bf16 %v7686_v55, %v7685_v13 }
 0xa4d   : > { %v14748_v37 = vpop.f32.mrb[171].mxu0  ;;  %v7671_v26 = vmul.f32 0.01, %v7583_v54  ;;  %v7586_v16 = vadd.f32 %v9522_v2, %v7489_v44  ;;  %v9147_v18 = vpop.f32.mrb[152].mxu1  ;;  %vm7655_vm10 = vcmp.gt.f32.partialorder %v7583_v54, 0.0 }
 0xa4e   : > { %7973 = vmatmul.mubr.bf16.vlgmr.msra.gmra.mrb[176].mxu0 %v7701_v50 }
 0xa4f   : > { %7980 = vmatprep.mubr.bf16.mxu0 %v14606_v22  ;;  %v7672_v30 = vmul.f32 0.01, %v7586_v16  ;;  %vm7656_vm15 = vcmp.gt.f32.partialorder %v7586_v16, 0.0  ;;  %v7687_v15 = vsel %vm7655_vm10, %v7583_v54, %v7671_v26 }
 0xa51   : > { %9556 = vmatmul.mubr.bf16.gmra.mrb[180].mxu1 %v15273_v11  ;;  %v9148_v11 = vpop.f32.mrb[153].mxu1  ;;  %v7688_v43 = vsel %vm7656_vm15, %v7586_v16, %v7672_v30 }
 0xa52   : > { %v14752_v27 = vpop.f32.mrb[172].mxu0  ;;  %9559 = vmatprep.mubr.bf16.mxu1 %v15274_v25  ;;  %v9149_v25 = vadd.f32 %v9148_v11, %v9147_v18  ;;  %v9150_v38 = vpop.f32.mrb[154].mxu1  ;;  %v7702_v57 = vpack.c.bf16 %v7688_v43, %v7687_v15 }
 0xa53   : > { %v14756_v1 = vpop.f32.mrb[173].mxu0  ;;  %v9151_v14 = vpop.f32.mrb[155].mxu1 }
 0xa54   : > { %v14758_v7 = vpop.f32.mrb[174].mxu0  ;;  %v7494_v59 = vadd.f32 %v9149_v25, %v14736_v58  ;;  %v9152_v33 = vadd.f32 %v9151_v14, %v9150_v38 }
 0xa55   : > { %v14761_v45 = vpop.f32.mrb[175].mxu0  ;;  %v9153_v63 = vpop.f32.mrb[156].mxu1 }
 0xa56   : > { %v7591_v22 = vadd.f32 %v7590_v8, %v7494_v59  ;;  %v7497_v2 = vadd.f32 %v9152_v33, %v14736_v58  ;;  %7981 = vmatmul.mubr.bf16.gmra.mrb[180].mxu0 %v7702_v57  ;;  %v9154_v36 = vpop.f32.mrb[157].mxu1 }
 0xa57   : > { %7988 = vmatprep.mubr.bf16.mxu0 %v14615_v12  ;;  %v9155_v47 = vadd.f32 %v9154_v36, %v9153_v63  ;;  %v9156_v9 = vpop.f32.mrb[158].mxu1 }
 0xa58   : > { %v7673_v48 = vmul.f32 0.01, %v7591_v22  ;;  %v7594_v6 = vadd.f32 %v14731_v0, %v7497_v2  ;;  %vm7657_vm5 = vcmp.gt.f32.partialorder %v7591_v22, 0.0 }
 0xa59   : > { %9560 = vmatmul.mubr.bf16.gmra.mrb[184].mxu1 %v13563_v3  ;;  %v9157_v3 = vpop.f32.mrb[159].mxu1  ;;  %v7502_v41 = vadd.f32 %v9155_v47, %v14736_v58 }
 0xa5a   : > { %9563 = vmatprep.mubr.bf16.mxu1 %v13944_v62  ;;  %v7674_v31 = vmul.f32 0.01, %v7594_v6  ;;  %vm7658_vm7 = vcmp.gt.f32.partialorder %v7594_v6, 0.0  ;;  %v9158_v62 = vadd.f32 %v9157_v3, %v9156_v9  ;;  %v7689_v8 = vsel %vm7657_vm5, %v7591_v22, %v7673_v48 }
 0xa5b   : > { %v7599_v12 = vadd.f32 %v14726_v17, %v7502_v41 }
 0xa5c   : > { %v7690_v19 = vsel %vm7658_vm7, %v7594_v6, %v7674_v31  ;;  %v7505_v0 = vadd.f32 %v9158_v62, %v14736_v58 }
 0xa5d   : > { %v7703_v61 = vpack.c.bf16 %v7690_v19, %v7689_v8  ;;  %v7675_v21 = vmul.f32 0.01, %v7599_v12  ;;  %vm7659_vm1 = vcmp.gt.f32.partialorder %v7599_v12, 0.0 }
 0xa5e   : > { %v7602_v39 = vadd.f32 %v14729_v42, %v7505_v0 }
 0xa5f   : > { %7989 = vmatmul.mubr.bf16.gmra.mrb[184].mxu0 %v7703_v61  ;;  %v7691_v20 = vsel %vm7659_vm1, %v7599_v12, %v7675_v21 }
 0xa60   : > { %7996 = vmatprep.mubr.bf16.mxu0 %v14622_v4  ;;  %v7676_v51 = vmul.f32 0.01, %v7602_v39  ;;  %vm7660_vm0 = vcmp.gt.f32.partialorder %v7602_v39, 0.0 }
 0xa61   : > { %9564 = vmatmul.mubr.bf16.gmra.mrb[188].mxu1 %v14026_v28 }
 0xa62   : > { %v7692_v49 = vsel %vm7660_vm0, %v7602_v39, %v7676_v51 }
 0xa63   : > { %v7704_v5 = vpack.c.bf16 %v7692_v49, %v7691_v20 }
 0xa67   : > { %7997 = vmatmul.mubr.bf16.gmra.mrb[188].mxu0 %v7704_v5 }
 0xa68   : > { %8004 = vmatprep.mubr.bf16.mxu0 %v14640_v56 }
 0xa88   : > { %v9159_v28 = vpop.f32.mrb[160].mxu1 }
 0xa89   : > { %v9160_v10 = vpop.f32.mrb[161].mxu1 }
 0xa8a   : > { %v9161_v17 = vadd.f32 %v9160_v10, %v9159_v28  ;;  %v9162_v29 = vpop.f32.mrb[162].mxu1 }
 0xa8b   : > { %v9163_v60 = vpop.f32.mrb[163].mxu1 }
 0xa8c   : > { %v7510_v32 = vadd.f32 %v9161_v17, %v14736_v58  ;;  %v9164_v13 = vadd.f32 %v9163_v60, %v9162_v29 }
 0xa8e   : > { %v7607_v42 = vadd.f32 %v14744_v46, %v7510_v32  ;;  %v7513_v4 = vadd.f32 %v9164_v13, %v14736_v58 }
 0xa90   : > { %v7677_v55 = vmul.f32 0.01, %v7607_v42  ;;  %v7610_v52 = vadd.f32 %v14748_v37, %v7513_v4  ;;  %v9165_v23 = vpop.f32.mrb[164].mxu1  ;;  %vm7661_vm8 = vcmp.gt.f32.partialorder %v7607_v42, 0.0 }
 0xa91   : > { %v9166_v50 = vpop.f32.mrb[165].mxu1 }
 0xa92   : > { %v7678_v54 = vmul.f32 0.01, %v7610_v52  ;;  %v9167_v56 = vadd.f32 %v9166_v50, %v9165_v23  ;;  %v9168_v44 = vpop.f32.mrb[166].mxu1  ;;  %vm7662_vm9 = vcmp.gt.f32.partialorder %v7610_v52, 0.0  ;;  %v7693_v11 = vsel %vm7661_vm8, %v7607_v42, %v7677_v55 }
 0xa93   : > { %v9169_v26 = vpop.f32.mrb[167].mxu1 }
 0xa94   : > { %v7518_v16 = vadd.f32 %v9167_v56, %v14736_v58  ;;  %v9170_v18 = vadd.f32 %v9169_v26, %v9168_v44  ;;  %v7694_v30 = vsel %vm7662_vm9, %v7610_v52, %v7678_v54 }
 0xa95   : > { %v7705_v25 = vpack.c.bf16 %v7694_v30, %v7693_v11 }
 0xa96   : > { %v7615_v46 = vadd.f32 %v14740_v53, %v7518_v16  ;;  %v7521_v38 = vadd.f32 %v9170_v18, %v14736_v58 }
 0xa97   : > { %8005 = vmatmul.mubr.bf16.gmra.mrb[192].mxu0 %v7705_v25 }
 0xa98   : > { %v7679_v37 = vmul.f32 0.01, %v7615_v46  ;;  %v7618_v14 = vadd.f32 %v14746_v24, %v7521_v38  ;;  %8012 = vmatprep.mubr.bf16.mxu0 %v14653_v34  ;;  %vm7663_vm11 = vcmp.gt.f32.partialorder %v7615_v46, 0.0 }
 0xa9a   : > { %v7680_v15 = vmul.f32 0.01, %v7618_v14  ;;  %vm7664_vm12 = vcmp.gt.f32.partialorder %v7618_v14, 0.0  ;;  %v7695_v43 = vsel %vm7663_vm11, %v7615_v46, %v7679_v37 }
 0xa9c   : > { %v7696_v59 = vsel %vm7664_vm12, %v7618_v14, %v7680_v15 }
 0xa9d   : > { %v7706_v33 = vpack.c.bf16 %v7696_v59, %v7695_v43 }
 0xa9f   : > { %8013 = vmatmul.mubr.bf16.gmra.mrb[196].mxu0 %v7706_v33 }
 0xaa0   : > { %8020 = vmatprep.mubr.bf16.mxu0 %v14716_v40 }
 0xb0c   : > { %v9171_v57 = vpop.f32.mrb[168].mxu1 }
 0xb0d   : > { %v9172_v22 = vpop.f32.mrb[169].mxu1 }
 0xb0e   : > { %v9173_v53 = vadd.f32 %v9172_v22, %v9171_v57  ;;  %v9174_v2 = vpop.f32.mrb[170].mxu1 }
 0xb0f   : > { %v9175_v48 = vpop.f32.mrb[171].mxu1 }
 0xb10   : > { %v7526_v6 = vadd.f32 %v9173_v53, %v14736_v58  ;;  %v9176_v63 = vadd.f32 %v9175_v48, %v9174_v2 }
 0xb12   : > { %v7623_v24 = vadd.f32 %v14756_v1, %v7526_v6  ;;  %v7529_v34 = vadd.f32 %v9176_v63, %v14736_v58 }
 0xb14   : > { %v7681_v36 = vmul.f32 0.01, %v7623_v24  ;;  %v7626_v31 = vadd.f32 %v14761_v45, %v7529_v34  ;;  %v9177_v47 = vpop.f32.mrb[172].mxu1  ;;  %vm7665_vm13 = vcmp.gt.f32.partialorder %v7623_v24, 0.0 }
 0xb15   : > { %v9178_v9 = vpop.f32.mrb[173].mxu1 }
 0xb16   : > { %v7682_v3 = vmul.f32 0.01, %v7626_v31  ;;  %v9179_v40 = vadd.f32 %v9178_v9, %v9177_v47  ;;  %v9180_v41 = vpop.f32.mrb[174].mxu1  ;;  %vm7666_vm14 = vcmp.gt.f32.partialorder %v7626_v31, 0.0  ;;  %v7697_v61 = vsel %vm7665_vm13, %v7623_v24, %v7681_v36 }
 0xb17   : > { %v9181_v62 = vpop.f32.mrb[175].mxu1 }
 0xb18   : > { %v7534_v8 = vadd.f32 %v9179_v40, %v14736_v58  ;;  %v9182_v19 = vadd.f32 %v9181_v62, %v9180_v41  ;;  %v7698_v12 = vsel %vm7666_vm14, %v7626_v31, %v7682_v3 }
 0xb19   : > { %v7707_v0 = vpack.c.bf16 %v7698_v12, %v7697_v61 }
 0xb1a   : > { %v7631_v1 = vadd.f32 %v14752_v27, %v7534_v8  ;;  %v7537_v21 = vadd.f32 %v9182_v19, %v14736_v58 }
 0xb1b   : > { %8021 = vmatmul.mubr.bf16.gmra.mrb[200].mxu0 %v7707_v0 }
 0xb1c   : > { %v7683_v45 = vmul.f32 0.01, %v7631_v1  ;;  %v7634_v39 = vadd.f32 %v14758_v7, %v7537_v21  ;;  %8028 = vmatprep.mubr.bf16.mxu0 %v14723_v35  ;;  %v9553_v51 = vpop.f32.mrb[176].mxu1  ;;  %vm7667_vm2 = vcmp.gt.f32.partialorder %v7631_v1, 0.0  ;;  %v14802_v35 = vld [vmem:[%s14895_s7] ss:$0 sm:$0xff] }
 0xb1d   : > { %v8071_v20 = vpop.f32.mrb[177].mxu1 }
 0xb1e   : > { %v7684_v49 = vmul.f32 0.01, %v7634_v39  ;;  %v9554_v5 = vpop.f32.mrb[178].mxu1  ;;  %vm7668_vm3 = vcmp.gt.f32.partialorder %v7634_v39, 0.0  ;;  %v7699_v10 = vsel %vm7667_vm2, %v7631_v1, %v7683_v45 }
 0xb1f   : > { %v8074_v28 = vpop.f32.mrb[179].mxu1 }
 0xb20   : > { %v7700_v17 = vsel %vm7668_vm3, %v7634_v39, %v7684_v49 }
 0xb21   : > { %v7708_v29 = vpack.c.bf16 %v7700_v17, %v7699_v10  ;;  %v9215_v32 = vpop.f32.mrb[176].mxu0 }
 0xb22   : > { %v9216_v13 = vpop.f32.mrb[177].mxu0 }
 0xb23   : > { %8029 = vmatmul.mubr.bf16.gmra.mrb[204].mxu0 %v7708_v29  ;;  %v9217_v42 = vadd.f32 %v9216_v13, %v9215_v32  ;;  %v9218_v4 = vpop.f32.mrb[178].mxu0 }
 0xb24   : > { %v14795_v27 = vpop.f32.mrb[180].mxu1  ;;  %v9219_v55 = vpop.f32.mrb[179].mxu0 }
 0xb25   : > { %v8087_v58 = vpop.f32.mrb[181].mxu1  ;;  %v7975_v52 = vadd.f32 %v9217_v42, %v14802_v35  ;;  %v9220_v23 = vadd.f32 %v9219_v55, %v9218_v4 }
 0xb26   : > { %v14797_v60 = vpop.f32.mrb[182].mxu1 }
 0xb27   : > { %v8090_v7 = vpop.f32.mrb[183].mxu1  ;;  %v8072_v54 = vadd.f32 %v8071_v20, %v7975_v52  ;;  %v7978_v56 = vadd.f32 %v9220_v23, %v14802_v35 }
 0xb29   : > { %10073 = vtanh.f32 %v8072_v54  ;;  %v8075_v16 = vadd.f32 %v8074_v28, %v7978_v56  ;;  %v9221_v18 = vpop.f32.mrb[180].mxu0 }
 0xb2a   : > { %v9222_v30 = vpop.f32.mrb[181].mxu0 }
 0xb2b   : > { %10075 = vtanh.f32 %v8075_v16  ;;  %v9223_v25 = vadd.f32 %v9222_v30, %v9221_v18  ;;  %v9224_v46 = vpop.f32.mrb[182].mxu0 }
 0xb2c   : > { %v14805_v50 = vpop.f32.mrb[184].mxu1  ;;  %v9225_v38 = vpop.f32.mrb[183].mxu0 }
 0xb2d   : > { %v14808_v44 = vpop.f32.mrb[185].mxu1  ;;  %v7983_v37 = vadd.f32 %v9223_v25, %v14802_v35  ;;  %v9226_v14 = vadd.f32 %v9225_v38, %v9224_v46 }
 0xb2e   : > { %v14810_v26 = vpop.f32.mrb[186].mxu1 }
 0xb2f   : > { %v14812_v11 = vpop.f32.mrb[187].mxu1  ;;  %v8080_v43 = vadd.f32 %v9553_v51, %v7983_v37  ;;  %v7986_v59 = vadd.f32 %v9226_v14, %v14802_v35 }
 0xb31   : > { %10077 = vtanh.f32 %v8080_v43  ;;  %v8083_v22 = vadd.f32 %v9554_v5, %v7986_v59 }
 0xb32   : > { %v9227_v53 = vpop.f32.mrb[184].mxu0 }
 0xb33   : > { %v9228_v48 = vpop.f32.mrb[185].mxu0  ;;  %v10074_v6 = vpop.eup %10073  ;;  %10079 = vtanh.f32 %v8083_v22 }
 0xb34   : > { %v14815_v15 = vpop.f32.mrb[188].mxu1  ;;  %v9229_v63 = vadd.f32 %v9228_v48, %v9227_v53  ;;  %v9230_v24 = vpop.f32.mrb[186].mxu0  ;;  %v8150_v34 = vadd.f32 1.0, %v10074_v6 }
 0xb35   : > { %v14818_v33 = vpop.f32.mrb[189].mxu1  ;;  %v9231_v36 = vpop.f32.mrb[187].mxu0 }
 0xb36   : > { %v14820_v57 = vpop.f32.mrb[190].mxu1  ;;  %v10076_v31 = vpop.eup %10075  ;;  %v7991_v47 = vadd.f32 %v9229_v63, %v14802_v35  ;;  %v9232_v9 = vadd.f32 %v9231_v36, %v9230_v24  ;;  %v8166_v3 = vmul.f32 0.5, %v8150_v34 }
 0xb37   : > { %v14822_v2 = vpop.f32.mrb[191].mxu1  ;;  %v8151_v40 = vadd.f32 1.0, %v10076_v31 }
 0xb38   : > { %v8088_v41 = vadd.f32 %v8087_v58, %v7991_v47  ;;  %v7994_v62 = vadd.f32 %v9232_v9, %v14802_v35  ;;  %8183 = vst.msk [vmem:[%s14829_s18] sm:$0xff] %vm8182_vm4, %v8166_v3 }
 0xb39   : > { %v8167_v8 = vmul.f32 0.5, %v8151_v40 }
 0xb3a   : > { %10081 = vtanh.f32 %v8088_v41  ;;  %v8091_v19 = vadd.f32 %v8090_v7, %v7994_v62  ;;  %v9233_v61 = vpop.f32.mrb[188].mxu0 }
 0xb3b   : > { %8184 = vst.msk [vmem:[%s14829_s18 + $0x8] sm:$0xff] %vm8182_vm4, %v8167_v8  ;;  %v9234_v12 = vpop.f32.mrb[189].mxu0  ;;  %v10078_v0 = vpop.eup %10077 }
 0xb3c   : > { %10083 = vtanh.f32 %v8091_v19  ;;  %v9235_v1 = vadd.f32 %v9234_v12, %v9233_v61  ;;  %v9236_v21 = vpop.f32.mrb[190].mxu0  ;;  %v8152_v45 = vadd.f32 1.0, %v10078_v0 }
 0xb3d   : > { %v9237_v39 = vpop.f32.mrb[191].mxu0  ;;  %v10080_v51 = vpop.eup %10079 }
 0xb3e   : > { %v7999_v20 = vadd.f32 %v9235_v1, %v14802_v35  ;;  %v9238_v49 = vadd.f32 %v9237_v39, %v9236_v21  ;;  %v8168_v5 = vmul.f32 0.5, %v8152_v45  ;;  %v8153_v28 = vadd.f32 1.0, %v10080_v51 }
 0xb40   : > { %v8096_v10 = vadd.f32 %v14795_v27, %v7999_v20  ;;  %v8002_v17 = vadd.f32 %v9238_v49, %v14802_v35  ;;  %8185 = vst.msk [vmem:[%s14829_s18 + $0x10] sm:$0xff] %vm8182_vm4, %v8168_v5  ;;  %v8169_v29 = vmul.f32 0.5, %v8153_v28 }
 0xb42   : > { %10085 = vtanh.f32 %v8096_v10  ;;  %v8099_v58 = vadd.f32 %v14797_v60, %v8002_v17  ;;  %8186 = vst.msk [vmem:[%s14829_s18 + $0x18] sm:$0xff] %vm8182_vm4, %v8169_v29 }
 0xb44   : > { %v10082_v32 = vpop.eup %10081  ;;  %10087 = vtanh.f32 %v8099_v58 }
 0xb45   : > { %v8154_v7 = vadd.f32 1.0, %v10082_v32 }
 0xb46   : > { %v10084_v13 = vpop.eup %10083 }
 0xb47   : > { %v8170_v42 = vmul.f32 0.5, %v8154_v7  ;;  %v8155_v4 = vadd.f32 1.0, %v10084_v13 }
 0xb49   : > { %8187 = vst.msk [vmem:[%s14829_s18 + $0x20] sm:$0xff] %vm8182_vm4, %v8170_v42  ;;  %v8171_v27 = vmul.f32 0.5, %v8155_v4 }
 0xb4b   : > { %8188 = vst.msk [vmem:[%s14829_s18 + $0x28] sm:$0xff] %vm8182_vm4, %v8171_v27 }
 0xb4c   : > { %v10086_v55 = vpop.eup %10085 }
 0xb4d   : > { %v8156_v52 = vadd.f32 1.0, %v10086_v55 }
 0xb4e   : > { %v10088_v23 = vpop.eup %10087 }
 0xb4f   : > { %v8172_v54 = vmul.f32 0.5, %v8156_v52  ;;  %v8157_v60 = vadd.f32 1.0, %v10088_v23 }
 0xb51   : > { %8189 = vst.msk [vmem:[%s14829_s18 + $0x30] sm:$0xff] %vm8182_vm4, %v8172_v54  ;;  %v8173_v56 = vmul.f32 0.5, %v8157_v60 }
 0xb53   : > { %8190 = vst.msk [vmem:[%s14829_s18 + $0x38] sm:$0xff] %vm8182_vm4, %v8173_v56 }
 0xb6a   : > { %v9239_v16 = vpop.f32.mrb[192].mxu0 }
 0xb6b   : > { %v9240_v18 = vpop.f32.mrb[193].mxu0 }
 0xb6c   : > { %v9241_v30 = vadd.f32 %v9240_v18, %v9239_v16  ;;  %v9242_v25 = vpop.f32.mrb[194].mxu0 }
 0xb6d   : > { %v9243_v46 = vpop.f32.mrb[195].mxu0 }
 0xb6e   : > { %v8007_v38 = vadd.f32 %v9241_v30, %v14802_v35  ;;  %v9244_v37 = vadd.f32 %v9243_v46, %v9242_v25 }
 0xb70   : > { %v8104_v14 = vadd.f32 %v14808_v44, %v8007_v38  ;;  %v8010_v43 = vadd.f32 %v9244_v37, %v14802_v35 }
 0xb72   : > { %10089 = vtanh.f32 %v8104_v14  ;;  %v8107_v59 = vadd.f32 %v14812_v11, %v8010_v43  ;;  %v9245_v22 = vpop.f32.mrb[196].mxu0 }
 0xb73   : > { %v9246_v53 = vpop.f32.mrb[197].mxu0 }
 0xb74   : > { %10091 = vtanh.f32 %v8107_v59  ;;  %v9247_v48 = vadd.f32 %v9246_v53, %v9245_v22  ;;  %v9248_v6 = vpop.f32.mrb[198].mxu0 }
 0xb75   : > { %v9249_v63 = vpop.f32.mrb[199].mxu0 }
 0xb76   : > { %v8015_v24 = vadd.f32 %v9247_v48, %v14802_v35  ;;  %v9250_v34 = vadd.f32 %v9249_v63, %v9248_v6 }
 0xb78   : > { %v8112_v36 = vadd.f32 %v14805_v50, %v8015_v24  ;;  %v8018_v44 = vadd.f32 %v9250_v34, %v14802_v35 }
 0xb7a   : > { %10093 = vtanh.f32 %v8112_v36  ;;  %v8115_v31 = vadd.f32 %v14810_v26, %v8018_v44 }
 0xb7c   : > { %v10090_v11 = vpop.eup %10089  ;;  %10095 = vtanh.f32 %v8115_v31 }
 0xb7d   : > { %v8158_v47 = vadd.f32 1.0, %v10090_v11 }
 0xb7e   : > { %v10092_v9 = vpop.eup %10091 }
 0xb7f   : > { %v8174_v3 = vmul.f32 0.5, %v8158_v47  ;;  %v8159_v40 = vadd.f32 1.0, %v10092_v9 }
 0xb81   : > { %8191 = vst.msk [vmem:[%s14829_s18 + $0x40] sm:$0xff] %vm8182_vm4, %v8174_v3  ;;  %v8175_v41 = vmul.f32 0.5, %v8159_v40 }
 0xb83   : > { %8192 = vst.msk [vmem:[%s14829_s18 + $0x48] sm:$0xff] %vm8182_vm4, %v8175_v41 }
 0xb84   : > { %v10094_v62 = vpop.eup %10093 }
 0xb85   : > { %v8160_v50 = vadd.f32 1.0, %v10094_v62 }
 0xb86   : > { %v10096_v8 = vpop.eup %10095 }
 0xb87   : > { %v8176_v19 = vmul.f32 0.5, %v8160_v50  ;;  %v8161_v61 = vadd.f32 1.0, %v10096_v8 }
 0xb89   : > { %8193 = vst.msk [vmem:[%s14829_s18 + $0x50] sm:$0xff] %vm8182_vm4, %v8176_v19  ;;  %v8177_v26 = vmul.f32 0.5, %v8161_v61 }
 0xb8b   : > { %8194 = vst.msk [vmem:[%s14829_s18 + $0x58] sm:$0xff] %vm8182_vm4, %v8177_v26 }
 0xbee   : > { %v9251_v12 = vpop.f32.mrb[200].mxu0 }
 0xbef   : > { %v9252_v0 = vpop.f32.mrb[201].mxu0 }
 0xbf0   : > { %v9253_v1 = vadd.f32 %v9252_v0, %v9251_v12  ;;  %v9254_v21 = vpop.f32.mrb[202].mxu0 }
 0xbf1   : > { %v9255_v45 = vpop.f32.mrb[203].mxu0 }
 0xbf2   : > { %v8023_v39 = vadd.f32 %v9253_v1, %v14802_v35  ;;  %v9256_v51 = vadd.f32 %v9255_v45, %v9254_v21 }
 0xbf4   : > { %v8120_v20 = vadd.f32 %v14818_v33, %v8023_v39  ;;  %v8026_v49 = vadd.f32 %v9256_v51, %v14802_v35 }
 0xbf6   : > { %10097 = vtanh.f32 %v8120_v20  ;;  %v8123_v5 = vadd.f32 %v14822_v2, %v8026_v49  ;;  %v9257_v28 = vpop.f32.mrb[204].mxu0 }
 0xbf7   : > { %v9258_v10 = vpop.f32.mrb[205].mxu0 }
 0xbf8   : > { %10099 = vtanh.f32 %v8123_v5  ;;  %v9259_v17 = vadd.f32 %v9258_v10, %v9257_v28  ;;  %v9260_v29 = vpop.f32.mrb[206].mxu0 }
 0xbf9   : > { %v9261_v58 = vpop.f32.mrb[207].mxu0 }
 0xbfa   : > { %v8031_v32 = vadd.f32 %v9259_v17, %v14802_v35  ;;  %v9262_v7 = vadd.f32 %v9261_v58, %v9260_v29 }
 0xbfc   : > { %v8128_v13 = vadd.f32 %v14815_v15, %v8031_v32  ;;  %v8034_v33 = vadd.f32 %v9262_v7, %v14802_v35 }
 0xbfe   : > { %10101 = vtanh.f32 %v8128_v13  ;;  %v8131_v42 = vadd.f32 %v14820_v57, %v8034_v33 }
 0xc00   : > { %v10098_v2 = vpop.eup %10097  ;;  %10103 = vtanh.f32 %v8131_v42 }
 0xc01   : > { %v8162_v4 = vadd.f32 1.0, %v10098_v2 }
 0xc02   : > { %v10100_v27 = vpop.eup %10099 }
 0xc03   : > { %v8178_v55 = vmul.f32 0.5, %v8162_v4  ;;  %v8163_v52 = vadd.f32 1.0, %v10100_v27 }
 0xc05   : > { %8195 = vst.msk [vmem:[%s14829_s18 + $0x60] sm:$0xff] %vm8182_vm4, %v8178_v55  ;;  %v8179_v23 = vmul.f32 0.5, %v8163_v52 }
 0xc07   : > { %8196 = vst.msk [vmem:[%s14829_s18 + $0x68] sm:$0xff] %vm8182_vm4, %v8179_v23 }
 0xc08   : > { %v10102_v54 = vpop.eup %10101 }
 0xc09   : > { %v8164_v15 = vadd.f32 1.0, %v10102_v54 }
 0xc0a   : > { %v10104_v60 = vpop.eup %10103 }
 0xc0b   : > { %v8180_v35 = vmul.f32 0.5, %v8164_v15  ;;  %v8165_v56 = vadd.f32 1.0, %v10104_v60 }
 0xc0d   : > { %8197 = vst.msk [vmem:[%s14829_s18 + $0x70] sm:$0xff] %vm8182_vm4, %v8180_v35  ;;  %v8181_v57 = vmul.f32 0.5, %v8165_v56 }
 0xc0f   : > { %8198 = vst.msk [vmem:[%s14829_s18 + $0x78] sm:$0xff] %vm8182_vm4, %v8181_v57 }
 0xc10 PF: > { %s19_s27 = sadd.s32 1, %s10143_s27  }
 0xc11   : > { %p16_p3 = scmp.ge.s32.totalorder %s19_s27, 4  }
 0xc13   :  { %18 = sbr.rel (!%p16_p3) target bundleno = 1 (0x1), region = 99 }
 0xc1a   :  { %8221 = vsyncpa [#allocation4], 1 }
 0xc1b   :  { %8223 = vsyncpa [#allocation4 + $0x1], 1 }

</bundles_post_ra>
